<compile_context>
chip_gen: v7x
topology: tpu7x:2x2x1
jax: 0.10.0
libtpu: 0.0.40
codegen_flags: <defaults>
</compile_context>

<pallas_src>
import numpy as np

import jax
import jax.numpy as jnp
from jax.experimental import pallas as pl
from jax.experimental.pallas import tpu as pltpu

nclasses = 20
BN_EPS = 1e-5


# ---------------------------------------------------------------------------
# Kernel 1: fused conv('same') + BatchNorm(eval) + maxpool(2) + ReLU
# ---------------------------------------------------------------------------
def _conv_bn_pool_relu_kernel(p_ref, w_ref, b_ref, o_ref):
    # p_ref: (4, tM, K) bf16 im2col patches, one slab per 2x2 pool position
    # w_ref: (K, Cout)  bf16 conv weights with the BN scale already folded in
    # b_ref: (1, Cout)  f32 folded BN/conv bias
    # o_ref: (tM, Cout) bf16 output tile
    w = w_ref[...]
    acc = jnp.dot(p_ref[0], w, preferred_element_type=jnp.float32)
    for p in range(1, 4):  # static unroll: running max over pool positions
        acc = jnp.maximum(
            acc, jnp.dot(p_ref[p], w, preferred_element_type=jnp.float32))
    # bias is constant across pool positions -> add once, fuse the ReLU
    o_ref[...] = jnp.maximum(acc + b_ref[...], 0.0).astype(o_ref.dtype)


def conv_bn_pool_relu(x_nhwc, w, conv_b, gamma, beta, mean, var):
    """F.relu(F.max_pool2d(BN(conv(x)), 2)) with 'same' padding, via Pallas."""
    B, H, W, Cin = x_nhwc.shape
    kh, kw, _, Cout = w.shape          # kernel size is static (from the shape)
    Ho, Wo = H // 2, W // 2
    K = kh * kw * Cin
    M = B * Ho * Wo

    # PyTorch padding='same': left/top = total//2, right/bottom = rest.
    pt = (kh - 1) // 2
    pleft = (kw - 1) // 2
    xp = jnp.pad(x_nhwc, ((0, 0), (pt, kh - 1 - pt),
                          (pleft, kw - 1 - pleft), (0, 0)))

    # im2col per 2x2 pool-window position (strided slices, flatten (kh,kw,Cin))
    pos = []
    for ph in range(2):
        for pq in range(2):
            cols = []
            for i in range(kh):
                for j in range(kw):
                    cols.append(
                        xp[:, ph + i: ph + i + 2 * (Ho - 1) + 1: 2,
                              pq + j: pq + j + 2 * (Wo - 1) + 1: 2, :])
            pos.append(jnp.concatenate(cols, axis=-1).reshape(M, K))
    patches = jnp.stack(pos, axis=0).astype(jnp.bfloat16)      # (4, M, K)

    # Fold BN (eval mode) into the conv: scale goes into the weights (so the
    # pool max is taken on already-scaled values -> sign-safe), bias is added
    # once after the max.
    scale = (gamma / jnp.sqrt(var + BN_EPS)).astype(jnp.float32)
    bias = (beta + (conv_b - mean) * scale).reshape(1, Cout).astype(jnp.float32)
    w2d = (w * scale).reshape(K, Cout).astype(jnp.bfloat16)

    # Tile M (rows) on a parallel grid axis; pad M up to a tile multiple.
    tM = M if M < 512 else 512
    gm = pl.cdiv(M, tM)
    Mpad = gm * tM
    if Mpad != M:
        patches = jnp.pad(patches, ((0, 0), (0, Mpad - M), (0, 0)))

    cost = pl.CostEstimate(
        flops=2 * 4 * Mpad * K * Cout,
        transcendentals=0,
        bytes_accessed=(patches.size * 2 + K * Cout * 2
                        + Mpad * Cout * 2 + Cout * 4))

    out = pl.pallas_call(
        _conv_bn_pool_relu_kernel,
        out_shape=jax.ShapeDtypeStruct((Mpad, Cout), jnp.bfloat16),
        grid_spec=pltpu.PrefetchScalarGridSpec(
            num_scalar_prefetch=0,
            grid=(gm,),
            in_specs=[
                pl.BlockSpec((4, tM, K), lambda m: (0, m, 0)),
                pl.BlockSpec((K, Cout), lambda m: (0, 0)),   # VMEM-resident
                pl.BlockSpec((1, Cout), lambda m: (0, 0)),   # VMEM-resident
            ],
            out_specs=pl.BlockSpec((tM, Cout), lambda m: (m, 0)),
        ),
        compiler_params=pltpu.CompilerParams(
            dimension_semantics=("parallel",)),
        cost_estimate=cost,
    )(patches, w2d, bias)

    return out[:M].reshape(B, Ho, Wo, Cout)


# ---------------------------------------------------------------------------
# Kernel 2: fc1 -> relu -> fc2 -> relu -> dropout(p=0.5) -> fc3
# ---------------------------------------------------------------------------
def _mlp_kernel(x_ref, w1_ref, b1_ref, w2_ref, b2_ref, w3_ref, b3_ref,
                mask_ref, o_ref):
    h = jnp.dot(x_ref[...], w1_ref[...],
                preferred_element_type=jnp.float32) + b1_ref[...]
    h = jnp.maximum(h, 0.0)
    h = jnp.dot(h.astype(jnp.bfloat16), w2_ref[...],
                preferred_element_type=jnp.float32) + b2_ref[...]
    h = jnp.maximum(h, 0.0)
    # F.dropout(x, p=0.5) defaults to training=True in the reference module.
    # mask_ref holds {0, 2} = keep/(1-p) precomputed from a jax PRNG key.
    # TODO(synk): not bit-identical to torch's RNG stream.
    h = h * mask_ref[...]
    o_ref[...] = jnp.dot(h.astype(jnp.bfloat16), w3_ref[...],
                         preferred_element_type=jnp.float32) + b3_ref[...]


def mlp_head(x, fc_params, drop_mask):
    B = x.shape[0]
    w1, b1, w2, b2, w3, b3 = fc_params
    vmem = pl.BlockSpec(memory_space=pltpu.MemorySpace.VMEM)
    return pl.pallas_call(
        _mlp_kernel,
        out_shape=jax.ShapeDtypeStruct((B, nclasses), jnp.float32),
        in_specs=[vmem] * 8,
        out_specs=vmem,
    )(x.astype(jnp.bfloat16),
      w1.astype(jnp.bfloat16), b1.reshape(1, -1).astype(jnp.float32),
      w2.astype(jnp.bfloat16), b2.reshape(1, -1).astype(jnp.float32),
      w3.astype(jnp.bfloat16), b3.reshape(1, -1).astype(jnp.float32),
      drop_mask.astype(jnp.float32))


# ---------------------------------------------------------------------------
# Parameter init (deterministic, synthetic) and full forward pass
# ---------------------------------------------------------------------------
_CONV_CFG = [(3, 16, 5), (16, 32, 5), (32, 64, 3), (64, 128, 3), (128, 256, 2)]
_FC_CFG = [(1024, 256), (256, 128), (128, nclasses)]


def init_params(key):
    conv_params = []
    for (cin, cout, k) in _CONV_CFG:
        key, kw_, kb_, kg_, kbe_, km_, kv_ = jax.random.split(key, 7)
        fan_in = k * k * cin
        w = jax.random.normal(kw_, (k, k, cin, cout), jnp.float32) / jnp.sqrt(float(fan_in))
        b = jax.random.normal(kb_, (cout,), jnp.float32) * 0.05
        gamma = jax.random.uniform(kg_, (cout,), jnp.float32, 0.5, 1.5)
        beta = jax.random.normal(kbe_, (cout,), jnp.float32) * 0.1
        mean = jax.random.normal(km_, (cout,), jnp.float32) * 0.1
        var = jax.random.uniform(kv_, (cout,), jnp.float32, 0.5, 1.5)
        conv_params.append((w, b, gamma, beta, mean, var))  # k comes from w.shape

    fc_params = []
    for (fin, fout) in _FC_CFG:
        key, kw_, kb_ = jax.random.split(key, 3)
        w = jax.random.normal(kw_, (fin, fout), jnp.float32) / jnp.sqrt(float(fin))
        b = jax.random.normal(kb_, (fout,), jnp.float32) * 0.05
        fc_params += [w, b]
    return conv_params, tuple(fc_params)


@jax.jit
def net_forward(x_nchw, conv_params, fc_params, drop_mask):
    x = jnp.transpose(x_nchw, (0, 2, 3, 1)).astype(jnp.bfloat16)  # NCHW -> NHWC
    for (w, b, g, be, m, v) in conv_params:
        x = conv_bn_pool_relu(x, w, b, g, be, m, v)
    B, Ho, Wo, C = x.shape
    feat = x.reshape(B, Ho * Wo * C)           # flatten in (h, w, c) order
    # PyTorch's x.view(-1, 1024) flattens an NCHW tensor in (c, h, w) order;
    # fold the layout difference into a one-time permutation of fc1's rows
    # instead of transposing the activation.
    perm = np.arange(C * Ho * Wo).reshape(C, Ho, Wo).transpose(1, 2, 0).reshape(-1)
    w1, b1, w2, b2, w3, b3 = fc_params
    fc = (w1[perm], b1, w2, b2, w3, b3)
    return mlp_head(feat, fc, drop_mask)


if __name__ == "__main__":
    key = jax.random.PRNGKey(0)
    pkey, xkey, dkey = jax.random.split(key, 3)
    conv_params, fc_params = init_params(pkey)

    # Input must be 64x64 so that the flatten yields 1024 features (256*2*2).
    x = jax.random.normal(xkey, (2, 3, 64, 64), jnp.float32)   # NCHW, like torch

    # Dropout keep-mask (p=0.5, scaled by 1/(1-p)) for the fc2 activations.
    keep = jax.random.bernoulli(dkey, 0.5, (2, 128))
    drop_mask = keep.astype(jnp.float32) * 2.0

    out = net_forward(x, conv_params, fc_params, drop_mask)
    out = jax.block_until_ready(out)
    assert out.shape == (2, nclasses) and out.dtype == jnp.float32
    assert bool(jnp.all(jnp.isfinite(out)))
    print("KERNEL_OK")
</pallas_src>

<mosaic_0001>
module attributes {stable_mosaic.version = 11 : i64} {
  func.func @_conv_bn_pool_relu_kernel(%arg0: i32, %arg1: memref<4x512x75xbf16, #tpu.memory_space<vmem>>, %arg2: memref<75x16xbf16, #tpu.memory_space<vmem>>, %arg3: memref<1x16xf32, #tpu.memory_space<vmem>>, %arg4: memref<512x16xbf16, #tpu.memory_space<vmem>>) attributes {dimension_semantics = [#tpu.dimension_semantics<parallel>], iteration_bounds = array<i64: 4>, scalar_prefetch = 0 : i64, scratch_operands = 0 : i64, tpu.core_type = #tpu.core_type<tc>, window_params = [{transform_indices = @transform_0, window_bounds = array<i64: 4, 512, 75>}, {pipeline_mode = #tpu.pipeline_mode<synchronous>, transform_indices = @transform_1, window_bounds = array<i64: 75, 16>}, {pipeline_mode = #tpu.pipeline_mode<synchronous>, transform_indices = @transform_2, window_bounds = array<i64: 1, 16>}, {transform_indices = @transform_3, window_bounds = array<i64: 512, 16>}]} {
    %c0 = arith.constant 0 : index
    %c0_0 = arith.constant 0 : index
    %0 = vector.load %arg2[%c0, %c0_0] : memref<75x16xbf16, #tpu.memory_space<vmem>>, vector<75x16xbf16>
    %c0_1 = arith.constant 0 : index
    %c0_2 = arith.constant 0 : index
    %c0_3 = arith.constant 0 : index
    %1 = vector.load %arg1[%c0_1, %c0_2, %c0_3] : memref<4x512x75xbf16, #tpu.memory_space<vmem>>, vector<1x512x75xbf16>
    %2 = vector.shape_cast %1 : vector<1x512x75xbf16> to vector<512x75xbf16>
    %cst = arith.constant dense<0.000000e+00> : vector<512x16xf32>
    %3 = tpu.matmul %2, %0, %cst {dimension_numbers = #tpu.dot_dimension_numbers<[1], [0], [0], [1], [0, 0, 1, 1], [], []>} : vector<512x75xbf16>, vector<75x16xbf16>, vector<512x16xf32> -> vector<512x16xf32>
    %c1 = arith.constant 1 : index
    %c0_4 = arith.constant 0 : index
    %c0_5 = arith.constant 0 : index
    %4 = vector.load %arg1[%c1, %c0_4, %c0_5] : memref<4x512x75xbf16, #tpu.memory_space<vmem>>, vector<1x512x75xbf16>
    %5 = vector.shape_cast %4 : vector<1x512x75xbf16> to vector<512x75xbf16>
    %cst_6 = arith.constant dense<0.000000e+00> : vector<512x16xf32>
    %6 = tpu.matmul %5, %0, %cst_6 {dimension_numbers = #tpu.dot_dimension_numbers<[1], [0], [0], [1], [0, 0, 1, 1], [], []>} : vector<512x75xbf16>, vector<75x16xbf16>, vector<512x16xf32> -> vector<512x16xf32>
    %7 = arith.maximumf %3, %6 : vector<512x16xf32>
    %c2 = arith.constant 2 : index
    %c0_7 = arith.constant 0 : index
    %c0_8 = arith.constant 0 : index
    %8 = vector.load %arg1[%c2, %c0_7, %c0_8] : memref<4x512x75xbf16, #tpu.memory_space<vmem>>, vector<1x512x75xbf16>
    %9 = vector.shape_cast %8 : vector<1x512x75xbf16> to vector<512x75xbf16>
    %cst_9 = arith.constant dense<0.000000e+00> : vector<512x16xf32>
    %10 = tpu.matmul %9, %0, %cst_9 {dimension_numbers = #tpu.dot_dimension_numbers<[1], [0], [0], [1], [0, 0, 1, 1], [], []>} : vector<512x75xbf16>, vector<75x16xbf16>, vector<512x16xf32> -> vector<512x16xf32>
    %11 = arith.maximumf %7, %10 : vector<512x16xf32>
    %c3 = arith.constant 3 : index
    %c0_10 = arith.constant 0 : index
    %c0_11 = arith.constant 0 : index
    %12 = vector.load %arg1[%c3, %c0_10, %c0_11] : memref<4x512x75xbf16, #tpu.memory_space<vmem>>, vector<1x512x75xbf16>
    %13 = vector.shape_cast %12 : vector<1x512x75xbf16> to vector<512x75xbf16>
    %cst_12 = arith.constant dense<0.000000e+00> : vector<512x16xf32>
    %14 = tpu.matmul %13, %0, %cst_12 {dimension_numbers = #tpu.dot_dimension_numbers<[1], [0], [0], [1], [0, 0, 1, 1], [], []>} : vector<512x75xbf16>, vector<75x16xbf16>, vector<512x16xf32> -> vector<512x16xf32>
    %15 = arith.maximumf %11, %14 : vector<512x16xf32>
    %c0_13 = arith.constant 0 : index
    %c0_14 = arith.constant 0 : index
    %16 = vector.load %arg3[%c0_13, %c0_14] : memref<1x16xf32, #tpu.memory_space<vmem>>, vector<1x16xf32>
    %17 = vector.broadcast %16 : vector<1x16xf32> to vector<512x16xf32>
    %18 = arith.addf %15, %17 : vector<512x16xf32>
    %cst_15 = arith.constant 0.000000e+00 : f32
    %19 = vector.broadcast %cst_15 : f32 to vector<512x16xf32>
    %20 = arith.maximumf %18, %19 : vector<512x16xf32>
    %21 = arith.truncf %20 : vector<512x16xf32> to vector<512x16xbf16>
    %c0_16 = arith.constant 0 : index
    %c0_17 = arith.constant 0 : index
    %22 = vector.load %arg4[%c0_16, %c0_17] : memref<512x16xbf16, #tpu.memory_space<vmem>>, vector<512x16xbf16>
    tpu.vector_store %arg4[%c0_16, %c0_17], %21 {strides = array<i32>} : memref<512x16xbf16, #tpu.memory_space<vmem>>, vector<512x16xbf16>,
    return
  }
  func.func @transform_0(%arg0: i32) -> (i32, i32, i32) {
    %c0_i32 = arith.constant 0 : i32
    %c0_i32_0 = arith.constant 0 : i32
    %c0_i32_1 = arith.constant 0 : i32
    return %c0_i32, %arg0, %c0_i32_0 : i32, i32, i32
  }
  func.func @transform_1(%arg0: i32) -> (i32, i32) {
    %c0_i32 = arith.constant 0 : i32
    %c0_i32_0 = arith.constant 0 : i32
    %c0_i32_1 = arith.constant 0 : i32
    return %c0_i32, %c0_i32_0 : i32, i32
  }
  func.func @transform_2(%arg0: i32) -> (i32, i32) {
    %c0_i32 = arith.constant 0 : i32
    %c0_i32_0 = arith.constant 0 : i32
    %c0_i32_1 = arith.constant 0 : i32
    return %c0_i32, %c0_i32_0 : i32, i32
  }
  func.func @transform_3(%arg0: i32) -> (i32, i32) {
    %c0_i32 = arith.constant 0 : i32
    %c0_i32_0 = arith.constant 0 : i32
    return %arg0, %c0_i32 : i32, i32
  }
}

module attributes {stable_mosaic.version = 11 : i64} {
  func.func @_conv_bn_pool_relu_kernel(%arg0: i32, %arg1: memref<4x512x400xbf16, #tpu.memory_space<vmem>>, %arg2: memref<400x32xbf16, #tpu.memory_space<vmem>>, %arg3: memref<1x32xf32, #tpu.memory_space<vmem>>, %arg4: memref<512x32xbf16, #tpu.memory_space<vmem>>) attributes {dimension_semantics = [#tpu.dimension_semantics<parallel>], iteration_bounds = array<i64: 1>, scalar_prefetch = 0 : i64, scratch_operands = 0 : i64, tpu.core_type = #tpu.core_type<tc>, window_params = [{transform_indices = @transform_0, window_bounds = array<i64: 4, 512, 400>}, {pipeline_mode = #tpu.pipeline_mode<synchronous>, transform_indices = @transform_1, window_bounds = array<i64: 400, 32>}, {pipeline_mode = #tpu.pipeline_mode<synchronous>, transform_indices = @transform_2, window_bounds = array<i64: 1, 32>}, {transform_indices = @transform_3, window_bounds = array<i64: 512, 32>}]} {
    %c0 = arith.constant 0 : index
    %c0_0 = arith.constant 0 : index
    %0 = vector.load %arg2[%c0, %c0_0] : memref<400x32xbf16, #tpu.memory_space<vmem>>, vector<400x32xbf16>
    %c0_1 = arith.constant 0 : index
    %c0_2 = arith.constant 0 : index
    %c0_3 = arith.constant 0 : index
    %1 = vector.load %arg1[%c0_1, %c0_2, %c0_3] : memref<4x512x400xbf16, #tpu.memory_space<vmem>>, vector<1x512x400xbf16>
    %2 = vector.shape_cast %1 : vector<1x512x400xbf16> to vector<512x400xbf16>
    %cst = arith.constant dense<0.000000e+00> : vector<512x32xf32>
    %3 = tpu.matmul %2, %0, %cst {dimension_numbers = #tpu.dot_dimension_numbers<[1], [0], [0], [1], [0, 0, 1, 1], [], []>} : vector<512x400xbf16>, vector<400x32xbf16>, vector<512x32xf32> -> vector<512x32xf32>
    %c1 = arith.constant 1 : index
    %c0_4 = arith.constant 0 : index
    %c0_5 = arith.constant 0 : index
    %4 = vector.load %arg1[%c1, %c0_4, %c0_5] : memref<4x512x400xbf16, #tpu.memory_space<vmem>>, vector<1x512x400xbf16>
    %5 = vector.shape_cast %4 : vector<1x512x400xbf16> to vector<512x400xbf16>
    %cst_6 = arith.constant dense<0.000000e+00> : vector<512x32xf32>
    %6 = tpu.matmul %5, %0, %cst_6 {dimension_numbers = #tpu.dot_dimension_numbers<[1], [0], [0], [1], [0, 0, 1, 1], [], []>} : vector<512x400xbf16>, vector<400x32xbf16>, vector<512x32xf32> -> vector<512x32xf32>
    %7 = arith.maximumf %3, %6 : vector<512x32xf32>
    %c2 = arith.constant 2 : index
    %c0_7 = arith.constant 0 : index
    %c0_8 = arith.constant 0 : index
    %8 = vector.load %arg1[%c2, %c0_7, %c0_8] : memref<4x512x400xbf16, #tpu.memory_space<vmem>>, vector<1x512x400xbf16>
    %9 = vector.shape_cast %8 : vector<1x512x400xbf16> to vector<512x400xbf16>
    %cst_9 = arith.constant dense<0.000000e+00> : vector<512x32xf32>
    %10 = tpu.matmul %9, %0, %cst_9 {dimension_numbers = #tpu.dot_dimension_numbers<[1], [0], [0], [1], [0, 0, 1, 1], [], []>} : vector<512x400xbf16>, vector<400x32xbf16>, vector<512x32xf32> -> vector<512x32xf32>
    %11 = arith.maximumf %7, %10 : vector<512x32xf32>
    %c3 = arith.constant 3 : index
    %c0_10 = arith.constant 0 : index
    %c0_11 = arith.constant 0 : index
    %12 = vector.load %arg1[%c3, %c0_10, %c0_11] : memref<4x512x400xbf16, #tpu.memory_space<vmem>>, vector<1x512x400xbf16>
    %13 = vector.shape_cast %12 : vector<1x512x400xbf16> to vector<512x400xbf16>
    %cst_12 = arith.constant dense<0.000000e+00> : vector<512x32xf32>
    %14 = tpu.matmul %13, %0, %cst_12 {dimension_numbers = #tpu.dot_dimension_numbers<[1], [0], [0], [1], [0, 0, 1, 1], [], []>} : vector<512x400xbf16>, vector<400x32xbf16>, vector<512x32xf32> -> vector<512x32xf32>
    %15 = arith.maximumf %11, %14 : vector<512x32xf32>
    %c0_13 = arith.constant 0 : index
    %c0_14 = arith.constant 0 : index
    %16 = vector.load %arg3[%c0_13, %c0_14] : memref<1x32xf32, #tpu.memory_space<vmem>>, vector<1x32xf32>
    %17 = vector.broadcast %16 : vector<1x32xf32> to vector<512x32xf32>
    %18 = arith.addf %15, %17 : vector<512x32xf32>
    %cst_15 = arith.constant 0.000000e+00 : f32
    %19 = vector.broadcast %cst_15 : f32 to vector<512x32xf32>
    %20 = arith.maximumf %18, %19 : vector<512x32xf32>
    %21 = arith.truncf %20 : vector<512x32xf32> to vector<512x32xbf16>
    %c0_16 = arith.constant 0 : index
    %c0_17 = arith.constant 0 : index
    %22 = vector.load %arg4[%c0_16, %c0_17] : memref<512x32xbf16, #tpu.memory_space<vmem>>, vector<512x32xbf16>
    tpu.vector_store %arg4[%c0_16, %c0_17], %21 {strides = array<i32>} : memref<512x32xbf16, #tpu.memory_space<vmem>>, vector<512x32xbf16>,
    return
  }
  func.func @transform_0(%arg0: i32) -> (i32, i32, i32) {
    %c0_i32 = arith.constant 0 : i32
    %c0_i32_0 = arith.constant 0 : i32
    %c0_i32_1 = arith.constant 0 : i32
    return %c0_i32, %arg0, %c0_i32_0 : i32, i32, i32
  }
  func.func @transform_1(%arg0: i32) -> (i32, i32) {
    %c0_i32 = arith.constant 0 : i32
    %c0_i32_0 = arith.constant 0 : i32
    %c0_i32_1 = arith.constant 0 : i32
    return %c0_i32, %c0_i32_0 : i32, i32
  }
  func.func @transform_2(%arg0: i32) -> (i32, i32) {
    %c0_i32 = arith.constant 0 : i32
    %c0_i32_0 = arith.constant 0 : i32
    %c0_i32_1 = arith.constant 0 : i32
    return %c0_i32, %c0_i32_0 : i32, i32
  }
  func.func @transform_3(%arg0: i32) -> (i32, i32) {
    %c0_i32 = arith.constant 0 : i32
    %c0_i32_0 = arith.constant 0 : i32
    return %arg0, %c0_i32 : i32, i32
  }
}

module attributes {stable_mosaic.version = 11 : i64} {
  func.func @_conv_bn_pool_relu_kernel(%arg0: i32, %arg1: memref<4x128x288xbf16, #tpu.memory_space<vmem>>, %arg2: memref<288x64xbf16, #tpu.memory_space<vmem>>, %arg3: memref<1x64xf32, #tpu.memory_space<vmem>>, %arg4: memref<128x64xbf16, #tpu.memory_space<vmem>>) attributes {dimension_semantics = [#tpu.dimension_semantics<parallel>], iteration_bounds = array<i64: 1>, scalar_prefetch = 0 : i64, scratch_operands = 0 : i64, tpu.core_type = #tpu.core_type<tc>, window_params = [{transform_indices = @transform_0, window_bounds = array<i64: 4, 128, 288>}, {pipeline_mode = #tpu.pipeline_mode<synchronous>, transform_indices = @transform_1, window_bounds = array<i64: 288, 64>}, {pipeline_mode = #tpu.pipeline_mode<synchronous>, transform_indices = @transform_2, window_bounds = array<i64: 1, 64>}, {transform_indices = @transform_3, window_bounds = array<i64: 128, 64>}]} {
    %c0 = arith.constant 0 : index
    %c0_0 = arith.constant 0 : index
    %0 = vector.load %arg2[%c0, %c0_0] : memref<288x64xbf16, #tpu.memory_space<vmem>>, vector<288x64xbf16>
    %c0_1 = arith.constant 0 : index
    %c0_2 = arith.constant 0 : index
    %c0_3 = arith.constant 0 : index
    %1 = vector.load %arg1[%c0_1, %c0_2, %c0_3] : memref<4x128x288xbf16, #tpu.memory_space<vmem>>, vector<1x128x288xbf16>
    %2 = vector.shape_cast %1 : vector<1x128x288xbf16> to vector<128x288xbf16>
    %cst = arith.constant dense<0.000000e+00> : vector<128x64xf32>
    %3 = tpu.matmul %2, %0, %cst {dimension_numbers = #tpu.dot_dimension_numbers<[1], [0], [0], [1], [0, 0, 1, 1], [], []>} : vector<128x288xbf16>, vector<288x64xbf16>, vector<128x64xf32> -> vector<128x64xf32>
    %c1 = arith.constant 1 : index
    %c0_4 = arith.constant 0 : index
    %c0_5 = arith.constant 0 : index
    %4 = vector.load %arg1[%c1, %c0_4, %c0_5] : memref<4x128x288xbf16, #tpu.memory_space<vmem>>, vector<1x128x288xbf16>
    %5 = vector.shape_cast %4 : vector<1x128x288xbf16> to vector<128x288xbf16>
    %cst_6 = arith.constant dense<0.000000e+00> : vector<128x64xf32>
    %6 = tpu.matmul %5, %0, %cst_6 {dimension_numbers = #tpu.dot_dimension_numbers<[1], [0], [0], [1], [0, 0, 1, 1], [], []>} : vector<128x288xbf16>, vector<288x64xbf16>, vector<128x64xf32> -> vector<128x64xf32>
    %7 = arith.maximumf %3, %6 : vector<128x64xf32>
    %c2 = arith.constant 2 : index
    %c0_7 = arith.constant 0 : index
    %c0_8 = arith.constant 0 : index
    %8 = vector.load %arg1[%c2, %c0_7, %c0_8] : memref<4x128x288xbf16, #tpu.memory_space<vmem>>, vector<1x128x288xbf16>
    %9 = vector.shape_cast %8 : vector<1x128x288xbf16> to vector<128x288xbf16>
    %cst_9 = arith.constant dense<0.000000e+00> : vector<128x64xf32>
    %10 = tpu.matmul %9, %0, %cst_9 {dimension_numbers = #tpu.dot_dimension_numbers<[1], [0], [0], [1], [0, 0, 1, 1], [], []>} : vector<128x288xbf16>, vector<288x64xbf16>, vector<128x64xf32> -> vector<128x64xf32>
    %11 = arith.maximumf %7, %10 : vector<128x64xf32>
    %c3 = arith.constant 3 : index
    %c0_10 = arith.constant 0 : index
    %c0_11 = arith.constant 0 : index
    %12 = vector.load %arg1[%c3, %c0_10, %c0_11] : memref<4x128x288xbf16, #tpu.memory_space<vmem>>, vector<1x128x288xbf16>
    %13 = vector.shape_cast %12 : vector<1x128x288xbf16> to vector<128x288xbf16>
    %cst_12 = arith.constant dense<0.000000e+00> : vector<128x64xf32>
    %14 = tpu.matmul %13, %0, %cst_12 {dimension_numbers = #tpu.dot_dimension_numbers<[1], [0], [0], [1], [0, 0, 1, 1], [], []>} : vector<128x288xbf16>, vector<288x64xbf16>, vector<128x64xf32> -> vector<128x64xf32>
    %15 = arith.maximumf %11, %14 : vector<128x64xf32>
    %c0_13 = arith.constant 0 : index
    %c0_14 = arith.constant 0 : index
    %16 = vector.load %arg3[%c0_13, %c0_14] : memref<1x64xf32, #tpu.memory_space<vmem>>, vector<1x64xf32>
    %17 = vector.broadcast %16 : vector<1x64xf32> to vector<128x64xf32>
    %18 = arith.addf %15, %17 : vector<128x64xf32>
    %cst_15 = arith.constant 0.000000e+00 : f32
    %19 = vector.broadcast %cst_15 : f32 to vector<128x64xf32>
    %20 = arith.maximumf %18, %19 : vector<128x64xf32>
    %21 = arith.truncf %20 : vector<128x64xf32> to vector<128x64xbf16>
    %c0_16 = arith.constant 0 : index
    %c0_17 = arith.constant 0 : index
    %22 = vector.load %arg4[%c0_16, %c0_17] : memref<128x64xbf16, #tpu.memory_space<vmem>>, vector<128x64xbf16>
    tpu.vector_store %arg4[%c0_16, %c0_17], %21 {strides = array<i32>} : memref<128x64xbf16, #tpu.memory_space<vmem>>, vector<128x64xbf16>,
    return
  }
  func.func @transform_0(%arg0: i32) -> (i32, i32, i32) {
    %c0_i32 = arith.constant 0 : i32
    %c0_i32_0 = arith.constant 0 : i32
    %c0_i32_1 = arith.constant 0 : i32
    return %c0_i32, %arg0, %c0_i32_0 : i32, i32, i32
  }
  func.func @transform_1(%arg0: i32) -> (i32, i32) {
    %c0_i32 = arith.constant 0 : i32
    %c0_i32_0 = arith.constant 0 : i32
    %c0_i32_1 = arith.constant 0 : i32
    return %c0_i32, %c0_i32_0 : i32, i32
  }
  func.func @transform_2(%arg0: i32) -> (i32, i32) {
    %c0_i32 = arith.constant 0 : i32
    %c0_i32_0 = arith.constant 0 : i32
    %c0_i32_1 = arith.constant 0 : i32
    return %c0_i32, %c0_i32_0 : i32, i32
  }
  func.func @transform_3(%arg0: i32) -> (i32, i32) {
    %c0_i32 = arith.constant 0 : i32
    %c0_i32_0 = arith.constant 0 : i32
    return %arg0, %c0_i32 : i32, i32
  }
}

module attributes {stable_mosaic.version = 11 : i64} {
  func.func @_conv_bn_pool_relu_kernel(%arg0: i32, %arg1: memref<4x32x576xbf16, #tpu.memory_space<vmem>>, %arg2: memref<576x128xbf16, #tpu.memory_space<vmem>>, %arg3: memref<1x128xf32, #tpu.memory_space<vmem>>, %arg4: memref<32x128xbf16, #tpu.memory_space<vmem>>) attributes {dimension_semantics = [#tpu.dimension_semantics<parallel>], iteration_bounds = array<i64: 1>, scalar_prefetch = 0 : i64, scratch_operands = 0 : i64, tpu.core_type = #tpu.core_type<tc>, window_params = [{transform_indices = @transform_0, window_bounds = array<i64: 4, 32, 576>}, {pipeline_mode = #tpu.pipeline_mode<synchronous>, transform_indices = @transform_1, window_bounds = array<i64: 576, 128>}, {pipeline_mode = #tpu.pipeline_mode<synchronous>, transform_indices = @transform_2, window_bounds = array<i64: 1, 128>}, {transform_indices = @transform_3, window_bounds = array<i64: 32, 128>}]} {
    %c0 = arith.constant 0 : index
    %c0_0 = arith.constant 0 : index
    %0 = vector.load %arg2[%c0, %c0_0] : memref<576x128xbf16, #tpu.memory_space<vmem>>, vector<576x128xbf16>
    %c0_1 = arith.constant 0 : index
    %c0_2 = arith.constant 0 : index
    %c0_3 = arith.constant 0 : index
    %1 = vector.load %arg1[%c0_1, %c0_2, %c0_3] : memref<4x32x576xbf16, #tpu.memory_space<vmem>>, vector<1x32x576xbf16>
    %2 = vector.shape_cast %1 : vector<1x32x576xbf16> to vector<32x576xbf16>
    %cst = arith.constant dense<0.000000e+00> : vector<32x128xf32>
    %3 = tpu.matmul %2, %0, %cst {dimension_numbers = #tpu.dot_dimension_numbers<[1], [0], [0], [1], [0, 0, 1, 1], [], []>} : vector<32x576xbf16>, vector<576x128xbf16>, vector<32x128xf32> -> vector<32x128xf32>
    %c1 = arith.constant 1 : index
    %c0_4 = arith.constant 0 : index
    %c0_5 = arith.constant 0 : index
    %4 = vector.load %arg1[%c1, %c0_4, %c0_5] : memref<4x32x576xbf16, #tpu.memory_space<vmem>>, vector<1x32x576xbf16>
    %5 = vector.shape_cast %4 : vector<1x32x576xbf16> to vector<32x576xbf16>
    %cst_6 = arith.constant dense<0.000000e+00> : vector<32x128xf32>
    %6 = tpu.matmul %5, %0, %cst_6 {dimension_numbers = #tpu.dot_dimension_numbers<[1], [0], [0], [1], [0, 0, 1, 1], [], []>} : vector<32x576xbf16>, vector<576x128xbf16>, vector<32x128xf32> -> vector<32x128xf32>
    %7 = arith.maximumf %3, %6 : vector<32x128xf32>
    %c2 = arith.constant 2 : index
    %c0_7 = arith.constant 0 : index
    %c0_8 = arith.constant 0 : index
    %8 = vector.load %arg1[%c2, %c0_7, %c0_8] : memref<4x32x576xbf16, #tpu.memory_space<vmem>>, vector<1x32x576xbf16>
    %9 = vector.shape_cast %8 : vector<1x32x576xbf16> to vector<32x576xbf16>
    %cst_9 = arith.constant dense<0.000000e+00> : vector<32x128xf32>
    %10 = tpu.matmul %9, %0, %cst_9 {dimension_numbers = #tpu.dot_dimension_numbers<[1], [0], [0], [1], [0, 0, 1, 1], [], []>} : vector<32x576xbf16>, vector<576x128xbf16>, vector<32x128xf32> -> vector<32x128xf32>
    %11 = arith.maximumf %7, %10 : vector<32x128xf32>
    %c3 = arith.constant 3 : index
    %c0_10 = arith.constant 0 : index
    %c0_11 = arith.constant 0 : index
    %12 = vector.load %arg1[%c3, %c0_10, %c0_11] : memref<4x32x576xbf16, #tpu.memory_space<vmem>>, vector<1x32x576xbf16>
    %13 = vector.shape_cast %12 : vector<1x32x576xbf16> to vector<32x576xbf16>
    %cst_12 = arith.constant dense<0.000000e+00> : vector<32x128xf32>
    %14 = tpu.matmul %13, %0, %cst_12 {dimension_numbers = #tpu.dot_dimension_numbers<[1], [0], [0], [1], [0, 0, 1, 1], [], []>} : vector<32x576xbf16>, vector<576x128xbf16>, vector<32x128xf32> -> vector<32x128xf32>
    %15 = arith.maximumf %11, %14 : vector<32x128xf32>
    %c0_13 = arith.constant 0 : index
    %c0_14 = arith.constant 0 : index
    %16 = vector.load %arg3[%c0_13, %c0_14] : memref<1x128xf32, #tpu.memory_space<vmem>>, vector<1x128xf32>
    %17 = vector.broadcast %16 : vector<1x128xf32> to vector<32x128xf32>
    %18 = arith.addf %15, %17 : vector<32x128xf32>
    %cst_15 = arith.constant 0.000000e+00 : f32
    %19 = vector.broadcast %cst_15 : f32 to vector<32x128xf32>
    %20 = arith.maximumf %18, %19 : vector<32x128xf32>
    %21 = arith.truncf %20 : vector<32x128xf32> to vector<32x128xbf16>
    %c0_16 = arith.constant 0 : index
    %c0_17 = arith.constant 0 : index
    %22 = vector.load %arg4[%c0_16, %c0_17] : memref<32x128xbf16, #tpu.memory_space<vmem>>, vector<32x128xbf16>
    tpu.vector_store %arg4[%c0_16, %c0_17], %21 {strides = array<i32>} : memref<32x128xbf16, #tpu.memory_space<vmem>>, vector<32x128xbf16>,
    return
  }
  func.func @transform_0(%arg0: i32) -> (i32, i32, i32) {
    %c0_i32 = arith.constant 0 : i32
    %c0_i32_0 = arith.constant 0 : i32
    %c0_i32_1 = arith.constant 0 : i32
    return %c0_i32, %arg0, %c0_i32_0 : i32, i32, i32
  }
  func.func @transform_1(%arg0: i32) -> (i32, i32) {
    %c0_i32 = arith.constant 0 : i32
    %c0_i32_0 = arith.constant 0 : i32
    %c0_i32_1 = arith.constant 0 : i32
    return %c0_i32, %c0_i32_0 : i32, i32
  }
  func.func @transform_2(%arg0: i32) -> (i32, i32) {
    %c0_i32 = arith.constant 0 : i32
    %c0_i32_0 = arith.constant 0 : i32
    %c0_i32_1 = arith.constant 0 : i32
    return %c0_i32, %c0_i32_0 : i32, i32
  }
  func.func @transform_3(%arg0: i32) -> (i32, i32) {
    %c0_i32 = arith.constant 0 : i32
    %c0_i32_0 = arith.constant 0 : i32
    return %arg0, %c0_i32 : i32, i32
  }
}

module attributes {stable_mosaic.version = 11 : i64} {
  func.func @_conv_bn_pool_relu_kernel(%arg0: i32, %arg1: memref<4x8x512xbf16, #tpu.memory_space<vmem>>, %arg2: memref<512x256xbf16, #tpu.memory_space<vmem>>, %arg3: memref<1x256xf32, #tpu.memory_space<vmem>>, %arg4: memref<8x256xbf16, #tpu.memory_space<vmem>>) attributes {dimension_semantics = [#tpu.dimension_semantics<parallel>], iteration_bounds = array<i64: 1>, scalar_prefetch = 0 : i64, scratch_operands = 0 : i64, tpu.core_type = #tpu.core_type<tc>, window_params = [{transform_indices = @transform_0, window_bounds = array<i64: 4, 8, 512>}, {pipeline_mode = #tpu.pipeline_mode<synchronous>, transform_indices = @transform_1, window_bounds = array<i64: 512, 256>}, {pipeline_mode = #tpu.pipeline_mode<synchronous>, transform_indices = @transform_2, window_bounds = array<i64: 1, 256>}, {transform_indices = @transform_3, window_bounds = array<i64: 8, 256>}]} {
    %c0 = arith.constant 0 : index
    %c0_0 = arith.constant 0 : index
    %0 = vector.load %arg2[%c0, %c0_0] : memref<512x256xbf16, #tpu.memory_space<vmem>>, vector<512x256xbf16>
    %c0_1 = arith.constant 0 : index
    %c0_2 = arith.constant 0 : index
    %c0_3 = arith.constant 0 : index
    %1 = vector.load %arg1[%c0_1, %c0_2, %c0_3] : memref<4x8x512xbf16, #tpu.memory_space<vmem>>, vector<1x8x512xbf16>
    %2 = vector.shape_cast %1 : vector<1x8x512xbf16> to vector<8x512xbf16>
    %cst = arith.constant dense<0.000000e+00> : vector<8x256xf32>
    %3 = tpu.matmul %2, %0, %cst {dimension_numbers = #tpu.dot_dimension_numbers<[1], [0], [0], [1], [0, 0, 1, 1], [], []>} : vector<8x512xbf16>, vector<512x256xbf16>, vector<8x256xf32> -> vector<8x256xf32>
    %c1 = arith.constant 1 : index
    %c0_4 = arith.constant 0 : index
    %c0_5 = arith.constant 0 : index
    %4 = vector.load %arg1[%c1, %c0_4, %c0_5] : memref<4x8x512xbf16, #tpu.memory_space<vmem>>, vector<1x8x512xbf16>
    %5 = vector.shape_cast %4 : vector<1x8x512xbf16> to vector<8x512xbf16>
    %cst_6 = arith.constant dense<0.000000e+00> : vector<8x256xf32>
    %6 = tpu.matmul %5, %0, %cst_6 {dimension_numbers = #tpu.dot_dimension_numbers<[1], [0], [0], [1], [0, 0, 1, 1], [], []>} : vector<8x512xbf16>, vector<512x256xbf16>, vector<8x256xf32> -> vector<8x256xf32>
    %7 = arith.maximumf %3, %6 : vector<8x256xf32>
    %c2 = arith.constant 2 : index
    %c0_7 = arith.constant 0 : index
    %c0_8 = arith.constant 0 : index
    %8 = vector.load %arg1[%c2, %c0_7, %c0_8] : memref<4x8x512xbf16, #tpu.memory_space<vmem>>, vector<1x8x512xbf16>
    %9 = vector.shape_cast %8 : vector<1x8x512xbf16> to vector<8x512xbf16>
    %cst_9 = arith.constant dense<0.000000e+00> : vector<8x256xf32>
    %10 = tpu.matmul %9, %0, %cst_9 {dimension_numbers = #tpu.dot_dimension_numbers<[1], [0], [0], [1], [0, 0, 1, 1], [], []>} : vector<8x512xbf16>, vector<512x256xbf16>, vector<8x256xf32> -> vector<8x256xf32>
    %11 = arith.maximumf %7, %10 : vector<8x256xf32>
    %c3 = arith.constant 3 : index
    %c0_10 = arith.constant 0 : index
    %c0_11 = arith.constant 0 : index
    %12 = vector.load %arg1[%c3, %c0_10, %c0_11] : memref<4x8x512xbf16, #tpu.memory_space<vmem>>, vector<1x8x512xbf16>
    %13 = vector.shape_cast %12 : vector<1x8x512xbf16> to vector<8x512xbf16>
    %cst_12 = arith.constant dense<0.000000e+00> : vector<8x256xf32>
    %14 = tpu.matmul %13, %0, %cst_12 {dimension_numbers = #tpu.dot_dimension_numbers<[1], [0], [0], [1], [0, 0, 1, 1], [], []>} : vector<8x512xbf16>, vector<512x256xbf16>, vector<8x256xf32> -> vector<8x256xf32>
    %15 = arith.maximumf %11, %14 : vector<8x256xf32>
    %c0_13 = arith.constant 0 : index
    %c0_14 = arith.constant 0 : index
    %16 = vector.load %arg3[%c0_13, %c0_14] : memref<1x256xf32, #tpu.memory_space<vmem>>, vector<1x256xf32>
    %17 = vector.broadcast %16 : vector<1x256xf32> to vector<8x256xf32>
    %18 = arith.addf %15, %17 : vector<8x256xf32>
    %cst_15 = arith.constant 0.000000e+00 : f32
    %19 = vector.broadcast %cst_15 : f32 to vector<8x256xf32>
    %20 = arith.maximumf %18, %19 : vector<8x256xf32>
    %21 = arith.truncf %20 : vector<8x256xf32> to vector<8x256xbf16>
    %c0_16 = arith.constant 0 : index
    %c0_17 = arith.constant 0 : index
    %22 = vector.load %arg4[%c0_16, %c0_17] : memref<8x256xbf16, #tpu.memory_space<vmem>>, vector<8x256xbf16>
    tpu.vector_store %arg4[%c0_16, %c0_17], %21 {strides = array<i32>} : memref<8x256xbf16, #tpu.memory_space<vmem>>, vector<8x256xbf16>,
    return
  }
  func.func @transform_0(%arg0: i32) -> (i32, i32, i32) {
    %c0_i32 = arith.constant 0 : i32
    %c0_i32_0 = arith.constant 0 : i32
    %c0_i32_1 = arith.constant 0 : i32
    return %c0_i32, %arg0, %c0_i32_0 : i32, i32, i32
  }
  func.func @transform_1(%arg0: i32) -> (i32, i32) {
    %c0_i32 = arith.constant 0 : i32
    %c0_i32_0 = arith.constant 0 : i32
    %c0_i32_1 = arith.constant 0 : i32
    return %c0_i32, %c0_i32_0 : i32, i32
  }
  func.func @transform_2(%arg0: i32) -> (i32, i32) {
    %c0_i32 = arith.constant 0 : i32
    %c0_i32_0 = arith.constant 0 : i32
    %c0_i32_1 = arith.constant 0 : i32
    return %c0_i32, %c0_i32_0 : i32, i32
  }
  func.func @transform_3(%arg0: i32) -> (i32, i32) {
    %c0_i32 = arith.constant 0 : i32
    %c0_i32_0 = arith.constant 0 : i32
    return %arg0, %c0_i32 : i32, i32
  }
}

module attributes {stable_mosaic.version = 11 : i64} {
  func.func @_mlp_kernel(%arg0: memref<2x1024xbf16, #tpu.memory_space<vmem>>, %arg1: memref<1024x256xbf16, #tpu.memory_space<vmem>>, %arg2: memref<1x256xf32, #tpu.memory_space<vmem>>, %arg3: memref<256x128xbf16, #tpu.memory_space<vmem>>, %arg4: memref<1x128xf32, #tpu.memory_space<vmem>>, %arg5: memref<128x20xbf16, #tpu.memory_space<vmem>>, %arg6: memref<1x20xf32, #tpu.memory_space<vmem>>, %arg7: memref<2x128xf32, #tpu.memory_space<vmem>>, %arg8: memref<2x20xf32, #tpu.memory_space<vmem>>) attributes {dimension_semantics = [], scalar_prefetch = 0 : i64, scratch_operands = 0 : i64, tpu.core_type = #tpu.core_type<tc>} {
    %c0 = arith.constant 0 : index
    %c0_0 = arith.constant 0 : index
    %0 = vector.load %arg0[%c0, %c0_0] : memref<2x1024xbf16, #tpu.memory_space<vmem>>, vector<2x1024xbf16>
    %c0_1 = arith.constant 0 : index
    %c0_2 = arith.constant 0 : index
    %1 = vector.load %arg1[%c0_1, %c0_2] : memref<1024x256xbf16, #tpu.memory_space<vmem>>, vector<1024x256xbf16>
    %cst = arith.constant dense<0.000000e+00> : vector<2x256xf32>
    %2 = tpu.matmul %0, %1, %cst {dimension_numbers = #tpu.dot_dimension_numbers<[1], [0], [0], [1], [0, 0, 1, 1], [], []>} : vector<2x1024xbf16>, vector<1024x256xbf16>, vector<2x256xf32> -> vector<2x256xf32>
    %c0_3 = arith.constant 0 : index
    %c0_4 = arith.constant 0 : index
    %3 = vector.load %arg2[%c0_3, %c0_4] : memref<1x256xf32, #tpu.memory_space<vmem>>, vector<1x256xf32>
    %4 = vector.broadcast %3 : vector<1x256xf32> to vector<2x256xf32>
    %5 = arith.addf %2, %4 : vector<2x256xf32>
    %cst_5 = arith.constant 0.000000e+00 : f32
    %6 = vector.broadcast %cst_5 : f32 to vector<2x256xf32>
    %7 = arith.maximumf %5, %6 : vector<2x256xf32>
    %8 = arith.truncf %7 : vector<2x256xf32> to vector<2x256xbf16>
    %c0_6 = arith.constant 0 : index
    %c0_7 = arith.constant 0 : index
    %9 = vector.load %arg3[%c0_6, %c0_7] : memref<256x128xbf16, #tpu.memory_space<vmem>>, vector<256x128xbf16>
    %cst_8 = arith.constant dense<0.000000e+00> : vector<2x128xf32>
    %10 = tpu.matmul %8, %9, %cst_8 {dimension_numbers = #tpu.dot_dimension_numbers<[1], [0], [0], [1], [0, 0, 1, 1], [], []>} : vector<2x256xbf16>, vector<256x128xbf16>, vector<2x128xf32> -> vector<2x128xf32>
    %c0_9 = arith.constant 0 : index
    %c0_10 = arith.constant 0 : index
    %11 = vector.load %arg4[%c0_9, %c0_10] : memref<1x128xf32, #tpu.memory_space<vmem>>, vector<1x128xf32>
    %12 = vector.broadcast %11 : vector<1x128xf32> to vector<2x128xf32>
    %13 = arith.addf %10, %12 : vector<2x128xf32>
    %cst_11 = arith.constant 0.000000e+00 : f32
    %14 = vector.broadcast %cst_11 : f32 to vector<2x128xf32>
    %15 = arith.maximumf %13, %14 : vector<2x128xf32>
    %c0_12 = arith.constant 0 : index
    %c0_13 = arith.constant 0 : index
    %16 = vector.load %arg7[%c0_12, %c0_13] : memref<2x128xf32, #tpu.memory_space<vmem>>, vector<2x128xf32>
    %17 = arith.mulf %15, %16 : vector<2x128xf32>
    %18 = arith.truncf %17 : vector<2x128xf32> to vector<2x128xbf16>
    %c0_14 = arith.constant 0 : index
    %c0_15 = arith.constant 0 : index
    %19 = vector.load %arg5[%c0_14, %c0_15] : memref<128x20xbf16, #tpu.memory_space<vmem>>, vector<128x20xbf16>
    %cst_16 = arith.constant dense<0.000000e+00> : vector<2x20xf32>
    %20 = tpu.matmul %18, %19, %cst_16 {dimension_numbers = #tpu.dot_dimension_numbers<[1], [0], [0], [1], [0, 0, 1, 1], [], []>} : vector<2x128xbf16>, vector<128x20xbf16>, vector<2x20xf32> -> vector<2x20xf32>
    %c0_17 = arith.constant 0 : index
    %c0_18 = arith.constant 0 : index
    %21 = vector.load %arg6[%c0_17, %c0_18] : memref<1x20xf32, #tpu.memory_space<vmem>>, vector<1x20xf32>
    %22 = vector.broadcast %21 : vector<1x20xf32> to vector<2x20xf32>
    %23 = arith.addf %20, %22 : vector<2x20xf32>
    %c0_19 = arith.constant 0 : index
    %c0_20 = arith.constant 0 : index
    %24 = vector.load %arg8[%c0_19, %c0_20] : memref<2x20xf32, #tpu.memory_space<vmem>>, vector<2x20xf32>
    tpu.vector_store %arg8[%c0_19, %c0_20], %23 {strides = array<i32>} : memref<2x20xf32, #tpu.memory_space<vmem>>, vector<2x20xf32>,
    return
  }
}

</mosaic_0001>

<bundles_post_ra>
// kernel: net_forward.6
= control target key start
LH: loop header
LB: loop body
LE: loop exit
PB: predicated region body
PF: predicated region fallthrough
CT: control target
= control target key end

     0   :  { %s5675_s12 = smov 0   ;;  %s5677_s13 = smov 0   ;;  %s7035_s0 = inlined_call_operand.vmem [shape: bf16[4,2048,75], index: 0, kind: input, shape index: {}]   ;;  %s7036_s1 = inlined_call_operand.vmem [shape: bf16[75,16], index: 1, kind: input, shape index: {}]   ;;  %s7037_s2 = inlined_call_operand.vmem [shape: f32[1,16], index: 2, kind: input, shape index: {}]   ;;  %s7038_s3 = inlined_call_operand.vmem [shape: bf16[2048,16], index: 3, kind: output, shape index: {}]  }
   0x1   :  { %s5679_s14 = smov 0  }
   0x2 LB: > { %s4432_s15 = sadd.s32 4294967295, %s5652_s14   ;;  %s5692_s16 = sadd.s32 1, %s5652_s14   ;;  %s5652_s14 = sphi %s5679_s14, %s7348_s14   ;;  %s5648_s13 = sphi %s5677_s13, %s7347_s13   ;;  %s5644_s12 = sphi %s5675_s12, %s7346_s12  }
   0x3   : > { %s17_s17 = ssub.s32 %s5652_s14, %s5692_s16  ;;  %s20_s18 = sadd.s32 1, %s5648_s13 }
   0x4   : > { %p18_p0 = scmp.eq.s32.totalorder %s17_s17, 0  ;;  %p27_p1 = scmp.ne.s32.totalorder %s5648_s13, %s5644_s12 }
   0x5   : > { %p28_p2 = scmp.eq.s32.totalorder %s5652_s14, 0  ;;  %p4435_p4 = scmp.ge.s32.totalorder %s5652_s14, 4 }
   0x6   : > { %s5701_s19 = scalar_select %p18_p0, %s5648_s13, %s20_s18  }
   0x7   : > { %p29_p3 = por %p28_p2, %p27_p1  ;;  %127 = sbr.rel (%p4435_p4) target bundleno = 82 (0x52), region = 24 }
   0xe   : > { %130 = sbr.rel (!%p29_p3) target bundleno = 82 (0x52), region = 28  ;;  %s132_s20 = sand.u32 (%p29_p3), 1, %s5648_s13  }
   0xf   : > { %s4963_s21 = sshll.u32 (%p29_p3), %s5652_s14, 8  ;;  %s4436_s22 = sshll.u32 (%p29_p3), %s132_s20, 10 }
  0x10   : > { %s5709_s25 = scalar_lea.vmem (%p29_p3), %s7035_s0, %s4963_s21  ;;  %s5714_s26 = scalar_lea.vmem (%p29_p3), [#allocation2], %s4436_s22 }
  0x11   : > { %v153_v0 = vld [vmem:[%s5709_s25] sm:$0xff] (%p29_p3)   ;;  %v157_v1 = vld [vmem:[%s5709_s25 + $0x8] sm:$0xff] (%p29_p3)   ;;  %v161_v2 = vld [vmem:[%s5709_s25 + $0x10] sm:$0xff] (%p29_p3)  }
  0x12   : > { %154 = vst [vmem:[%s5714_s26] sm:$0xff] (%p29_p3), %v153_v0   ;;  %158 = vst [vmem:[%s5714_s26 + $0x8] sm:$0xff] (%p29_p3), %v157_v1   ;;  %v165_v3 = vld [vmem:[%s5709_s25 + $0x18] sm:$0xff] (%p29_p3)   ;;  %v169_v4 = vld [vmem:[%s5709_s25 + $0x20] sm:$0xff] (%p29_p3)  }
  0x13   : > { %162 = vst [vmem:[%s5714_s26 + $0x10] sm:$0xff] (%p29_p3), %v161_v2   ;;  %v173_v5 = vld [vmem:[%s5709_s25 + $0x28] sm:$0xff] (%p29_p3)   ;;  %166 = vst [vmem:[%s5714_s26 + $0x18] sm:$0xff] (%p29_p3), %v165_v3   ;;  %v177_v6 = vld [vmem:[%s5709_s25 + $0x30] sm:$0xff] (%p29_p3)  }
  0x14   : > { %170 = vst [vmem:[%s5714_s26 + $0x20] sm:$0xff] (%p29_p3), %v169_v4   ;;  %174 = vst [vmem:[%s5714_s26 + $0x28] sm:$0xff] (%p29_p3), %v173_v5   ;;  %v181_v7 = vld [vmem:[%s5709_s25 + $0x38] sm:$0xff] (%p29_p3)   ;;  %v185_v8 = vld [vmem:[%s5709_s25 + $0x40] sm:$0xff] (%p29_p3)  }
  0x15   : > { %178 = vst [vmem:[%s5714_s26 + $0x30] sm:$0xff] %v177_v6   ;;  %182 = vst [vmem:[%s5714_s26 + $0x38] sm:$0xff] %v181_v7   ;;  %v189_v9 = vld [vmem:[%s5709_s25 + $0x48] sm:$0xff]   ;;  %v193_v10 = vld [vmem:[%s5709_s25 + $0x50] sm:$0xff]  }
  0x16   : > { %186 = vst [vmem:[%s5714_s26 + $0x40] sm:$0xff] %v185_v8   ;;  %v197_v11 = vld [vmem:[%s5709_s25 + $0x58] sm:$0xff]   ;;  %190 = vst [vmem:[%s5714_s26 + $0x48] sm:$0xff] %v189_v9   ;;  %v201_v12 = vld [vmem:[%s5709_s25 + $0x60] sm:$0xff]  }
  0x17   : > { %194 = vst [vmem:[%s5714_s26 + $0x50] sm:$0xff] %v193_v10   ;;  %198 = vst [vmem:[%s5714_s26 + $0x58] sm:$0xff] %v197_v11   ;;  %v205_v13 = vld [vmem:[%s5709_s25 + $0x68] sm:$0xff]   ;;  %v209_v14 = vld [vmem:[%s5709_s25 + $0x70] sm:$0xff]  }
  0x18   : > { %202 = vst [vmem:[%s5714_s26 + $0x60] sm:$0xff] %v201_v12   ;;  %206 = vst [vmem:[%s5714_s26 + $0x68] sm:$0xff] %v205_v13   ;;  %v213_v15 = vld [vmem:[%s5709_s25 + $0x78] sm:$0xff]   ;;  %v217_v16 = vld [vmem:[%s5709_s25 + $0x80] sm:$0xff]  }
  0x19   : > { %210 = vst [vmem:[%s5714_s26 + $0x70] sm:$0xff] %v209_v14   ;;  %v221_v17 = vld [vmem:[%s5709_s25 + $0x88] sm:$0xff]   ;;  %214 = vst [vmem:[%s5714_s26 + $0x78] sm:$0xff] %v213_v15   ;;  %v225_v18 = vld [vmem:[%s5709_s25 + $0x90] sm:$0xff]  }
  0x1a   : > { %218 = vst [vmem:[%s5714_s26 + $0x80] sm:$0xff] %v217_v16   ;;  %222 = vst [vmem:[%s5714_s26 + $0x88] sm:$0xff] %v221_v17   ;;  %v229_v19 = vld [vmem:[%s5709_s25 + $0x98] sm:$0xff]   ;;  %v233_v20 = vld [vmem:[%s5709_s25 + $0xa0] sm:$0xff]  }
  0x1b   : > { %226 = vst [vmem:[%s5714_s26 + $0x90] sm:$0xff] %v225_v18   ;;  %230 = vst [vmem:[%s5714_s26 + $0x98] sm:$0xff] %v229_v19   ;;  %v237_v21 = vld [vmem:[%s5709_s25 + $0xa8] sm:$0xff]   ;;  %v241_v22 = vld [vmem:[%s5709_s25 + $0xb0] sm:$0xff]  }
  0x1c   : > { %234 = vst [vmem:[%s5714_s26 + $0xa0] sm:$0xff] %v233_v20   ;;  %v245_v23 = vld [vmem:[%s5709_s25 + $0xb8] sm:$0xff]   ;;  %238 = vst [vmem:[%s5714_s26 + $0xa8] sm:$0xff] %v237_v21   ;;  %v249_v24 = vld [vmem:[%s5709_s25 + $0xc0] sm:$0xff]  }
  0x1d   : > { %242 = vst [vmem:[%s5714_s26 + $0xb0] sm:$0xff] %v241_v22   ;;  %246 = vst [vmem:[%s5714_s26 + $0xb8] sm:$0xff] %v245_v23   ;;  %v253_v25 = vld [vmem:[%s5709_s25 + $0xc8] sm:$0xff]   ;;  %v257_v26 = vld [vmem:[%s5709_s25 + $0xd0] sm:$0xff]  }
  0x1e   : > { %250 = vst [vmem:[%s5714_s26 + $0xc0] sm:$0xff] %v249_v24   ;;  %254 = vst [vmem:[%s5714_s26 + $0xc8] sm:$0xff] %v253_v25   ;;  %v261_v27 = vld [vmem:[%s5709_s25 + $0xd8] sm:$0xff]   ;;  %v265_v28 = vld [vmem:[%s5709_s25 + $0xe0] sm:$0xff]  }
  0x1f   : > { %258 = vst [vmem:[%s5714_s26 + $0xd0] sm:$0xff] %v257_v26   ;;  %v269_v29 = vld [vmem:[%s5709_s25 + $0xe8] sm:$0xff]   ;;  %262 = vst [vmem:[%s5714_s26 + $0xd8] sm:$0xff] %v261_v27   ;;  %v273_v30 = vld [vmem:[%s5709_s25 + $0xf0] sm:$0xff]  }
  0x20   : > { %266 = vst [vmem:[%s5714_s26 + $0xe0] sm:$0xff] %v265_v28   ;;  %270 = vst [vmem:[%s5714_s26 + $0xe8] sm:$0xff] %v269_v29   ;;  %v277_v31 = vld [vmem:[%s5709_s25 + $0xf8] sm:$0xff]   ;;  %v281_v32 = vld [vmem:[%s5709_s25 + $0x400] sm:$0xff]  }
  0x21   : > { %274 = vst [vmem:[%s5714_s26 + $0xf0] sm:$0xff] %v273_v30   ;;  %278 = vst [vmem:[%s5714_s26 + $0xf8] sm:$0xff] %v277_v31   ;;  %v285_v33 = vld [vmem:[%s5709_s25 + $0x408] sm:$0xff]   ;;  %v289_v34 = vld [vmem:[%s5709_s25 + $0x410] sm:$0xff]  }
  0x22   : > { %282 = vst [vmem:[%s5714_s26 + $0x100] sm:$0xff] %v281_v32   ;;  %v293_v35 = vld [vmem:[%s5709_s25 + $0x418] sm:$0xff]   ;;  %286 = vst [vmem:[%s5714_s26 + $0x108] sm:$0xff] %v285_v33   ;;  %v297_v36 = vld [vmem:[%s5709_s25 + $0x420] sm:$0xff]  }
  0x23   : > { %290 = vst [vmem:[%s5714_s26 + $0x110] sm:$0xff] %v289_v34   ;;  %294 = vst [vmem:[%s5714_s26 + $0x118] sm:$0xff] %v293_v35   ;;  %v301_v37 = vld [vmem:[%s5709_s25 + $0x428] sm:$0xff]   ;;  %v305_v38 = vld [vmem:[%s5709_s25 + $0x430] sm:$0xff]  }
  0x24   : > { %298 = vst [vmem:[%s5714_s26 + $0x120] sm:$0xff] %v297_v36   ;;  %302 = vst [vmem:[%s5714_s26 + $0x128] sm:$0xff] %v301_v37   ;;  %v309_v39 = vld [vmem:[%s5709_s25 + $0x438] sm:$0xff]   ;;  %v313_v40 = vld [vmem:[%s5709_s25 + $0x440] sm:$0xff]  }
  0x25   : > { %306 = vst [vmem:[%s5714_s26 + $0x130] sm:$0xff] %v305_v38   ;;  %v317_v41 = vld [vmem:[%s5709_s25 + $0x448] sm:$0xff]   ;;  %310 = vst [vmem:[%s5714_s26 + $0x138] sm:$0xff] %v309_v39   ;;  %v321_v42 = vld [vmem:[%s5709_s25 + $0x450] sm:$0xff]  }
  0x26   : > { %314 = vst [vmem:[%s5714_s26 + $0x140] sm:$0xff] %v313_v40   ;;  %318 = vst [vmem:[%s5714_s26 + $0x148] sm:$0xff] %v317_v41   ;;  %v325_v43 = vld [vmem:[%s5709_s25 + $0x458] sm:$0xff]   ;;  %v329_v44 = vld [vmem:[%s5709_s25 + $0x460] sm:$0xff]  }
  0x27   : > { %322 = vst [vmem:[%s5714_s26 + $0x150] sm:$0xff] %v321_v42   ;;  %326 = vst [vmem:[%s5714_s26 + $0x158] sm:$0xff] %v325_v43   ;;  %v333_v45 = vld [vmem:[%s5709_s25 + $0x468] sm:$0xff]   ;;  %v337_v46 = vld [vmem:[%s5709_s25 + $0x470] sm:$0xff]  }
  0x28   : > { %330 = vst [vmem:[%s5714_s26 + $0x160] sm:$0xff] %v329_v44   ;;  %v341_v47 = vld [vmem:[%s5709_s25 + $0x478] sm:$0xff]   ;;  %334 = vst [vmem:[%s5714_s26 + $0x168] sm:$0xff] %v333_v45   ;;  %v345_v48 = vld [vmem:[%s5709_s25 + $0x480] sm:$0xff]  }
  0x29   : > { %338 = vst [vmem:[%s5714_s26 + $0x170] sm:$0xff] %v337_v46   ;;  %342 = vst [vmem:[%s5714_s26 + $0x178] sm:$0xff] %v341_v47   ;;  %v349_v49 = vld [vmem:[%s5709_s25 + $0x488] sm:$0xff]   ;;  %v353_v50 = vld [vmem:[%s5709_s25 + $0x490] sm:$0xff]  }
  0x2a   : > { %346 = vst [vmem:[%s5714_s26 + $0x180] sm:$0xff] %v345_v48   ;;  %350 = vst [vmem:[%s5714_s26 + $0x188] sm:$0xff] %v349_v49   ;;  %v357_v51 = vld [vmem:[%s5709_s25 + $0x498] sm:$0xff]   ;;  %v361_v52 = vld [vmem:[%s5709_s25 + $0x4a0] sm:$0xff]  }
  0x2b   : > { %354 = vst [vmem:[%s5714_s26 + $0x190] sm:$0xff] %v353_v50   ;;  %v365_v53 = vld [vmem:[%s5709_s25 + $0x4a8] sm:$0xff]   ;;  %358 = vst [vmem:[%s5714_s26 + $0x198] sm:$0xff] %v357_v51   ;;  %v369_v54 = vld [vmem:[%s5709_s25 + $0x4b0] sm:$0xff]  }
  0x2c   : > { %362 = vst [vmem:[%s5714_s26 + $0x1a0] sm:$0xff] %v361_v52   ;;  %366 = vst [vmem:[%s5714_s26 + $0x1a8] sm:$0xff] %v365_v53   ;;  %v373_v55 = vld [vmem:[%s5709_s25 + $0x4b8] sm:$0xff]   ;;  %v377_v56 = vld [vmem:[%s5709_s25 + $0x4c0] sm:$0xff]  }
  0x2d   : > { %370 = vst [vmem:[%s5714_s26 + $0x1b0] sm:$0xff] %v369_v54   ;;  %374 = vst [vmem:[%s5714_s26 + $0x1b8] sm:$0xff] %v373_v55   ;;  %v381_v57 = vld [vmem:[%s5709_s25 + $0x4c8] sm:$0xff]   ;;  %v385_v58 = vld [vmem:[%s5709_s25 + $0x4d0] sm:$0xff]  }
  0x2e   : > { %378 = vst [vmem:[%s5714_s26 + $0x1c0] sm:$0xff] %v377_v56   ;;  %v389_v59 = vld [vmem:[%s5709_s25 + $0x4d8] sm:$0xff]   ;;  %382 = vst [vmem:[%s5714_s26 + $0x1c8] sm:$0xff] %v381_v57   ;;  %v393_v60 = vld [vmem:[%s5709_s25 + $0x4e0] sm:$0xff]  }
  0x2f   : > { %386 = vst [vmem:[%s5714_s26 + $0x1d0] sm:$0xff] %v385_v58   ;;  %390 = vst [vmem:[%s5714_s26 + $0x1d8] sm:$0xff] %v389_v59   ;;  %v397_v61 = vld [vmem:[%s5709_s25 + $0x4e8] sm:$0xff]   ;;  %v401_v62 = vld [vmem:[%s5709_s25 + $0x4f0] sm:$0xff]  }
  0x30   : > { %394 = vst [vmem:[%s5714_s26 + $0x1e0] sm:$0xff] %v393_v60   ;;  %398 = vst [vmem:[%s5714_s26 + $0x1e8] sm:$0xff] %v397_v61   ;;  %v405_v63 = vld [vmem:[%s5709_s25 + $0x4f8] sm:$0xff]   ;;  %v409_v0 = vld [vmem:[%s5709_s25 + $0x800] sm:$0xff]  }
  0x31   : > { %402 = vst [vmem:[%s5714_s26 + $0x1f0] sm:$0xff] %v401_v62   ;;  %v413_v1 = vld [vmem:[%s5709_s25 + $0x808] sm:$0xff]   ;;  %406 = vst [vmem:[%s5714_s26 + $0x1f8] sm:$0xff] %v405_v63   ;;  %v417_v2 = vld [vmem:[%s5709_s25 + $0x810] sm:$0xff]  }
  0x32   : > { %410 = vst [vmem:[%s5714_s26 + $0x200] sm:$0xff] %v409_v0   ;;  %414 = vst [vmem:[%s5714_s26 + $0x208] sm:$0xff] %v413_v1   ;;  %v421_v3 = vld [vmem:[%s5709_s25 + $0x818] sm:$0xff]   ;;  %v425_v4 = vld [vmem:[%s5709_s25 + $0x820] sm:$0xff]  }
  0x33   : > { %418 = vst [vmem:[%s5714_s26 + $0x210] sm:$0xff] %v417_v2   ;;  %422 = vst [vmem:[%s5714_s26 + $0x218] sm:$0xff] %v421_v3   ;;  %v429_v5 = vld [vmem:[%s5709_s25 + $0x828] sm:$0xff]   ;;  %v433_v6 = vld [vmem:[%s5709_s25 + $0x830] sm:$0xff]  }
  0x34   : > { %426 = vst [vmem:[%s5714_s26 + $0x220] sm:$0xff] %v425_v4   ;;  %v437_v7 = vld [vmem:[%s5709_s25 + $0x838] sm:$0xff]   ;;  %430 = vst [vmem:[%s5714_s26 + $0x228] sm:$0xff] %v429_v5   ;;  %v441_v8 = vld [vmem:[%s5709_s25 + $0x840] sm:$0xff]  }
  0x35   : > { %434 = vst [vmem:[%s5714_s26 + $0x230] sm:$0xff] %v433_v6   ;;  %438 = vst [vmem:[%s5714_s26 + $0x238] sm:$0xff] %v437_v7   ;;  %v445_v9 = vld [vmem:[%s5709_s25 + $0x848] sm:$0xff]   ;;  %v449_v10 = vld [vmem:[%s5709_s25 + $0x850] sm:$0xff]  }
  0x36   : > { %442 = vst [vmem:[%s5714_s26 + $0x240] sm:$0xff] %v441_v8   ;;  %446 = vst [vmem:[%s5714_s26 + $0x248] sm:$0xff] %v445_v9   ;;  %v453_v11 = vld [vmem:[%s5709_s25 + $0x858] sm:$0xff]   ;;  %v457_v12 = vld [vmem:[%s5709_s25 + $0x860] sm:$0xff]  }
  0x37   : > { %450 = vst [vmem:[%s5714_s26 + $0x250] sm:$0xff] %v449_v10   ;;  %v461_v13 = vld [vmem:[%s5709_s25 + $0x868] sm:$0xff]   ;;  %454 = vst [vmem:[%s5714_s26 + $0x258] sm:$0xff] %v453_v11   ;;  %v465_v14 = vld [vmem:[%s5709_s25 + $0x870] sm:$0xff]  }
  0x38   : > { %458 = vst [vmem:[%s5714_s26 + $0x260] sm:$0xff] %v457_v12   ;;  %462 = vst [vmem:[%s5714_s26 + $0x268] sm:$0xff] %v461_v13   ;;  %v469_v15 = vld [vmem:[%s5709_s25 + $0x878] sm:$0xff]   ;;  %v473_v16 = vld [vmem:[%s5709_s25 + $0x880] sm:$0xff]  }
  0x39   : > { %466 = vst [vmem:[%s5714_s26 + $0x270] sm:$0xff] %v465_v14   ;;  %470 = vst [vmem:[%s5714_s26 + $0x278] sm:$0xff] %v469_v15   ;;  %v477_v17 = vld [vmem:[%s5709_s25 + $0x888] sm:$0xff]   ;;  %v481_v18 = vld [vmem:[%s5709_s25 + $0x890] sm:$0xff]  }
  0x3a   : > { %474 = vst [vmem:[%s5714_s26 + $0x280] sm:$0xff] %v473_v16   ;;  %v485_v19 = vld [vmem:[%s5709_s25 + $0x898] sm:$0xff]   ;;  %478 = vst [vmem:[%s5714_s26 + $0x288] sm:$0xff] %v477_v17   ;;  %v489_v20 = vld [vmem:[%s5709_s25 + $0x8a0] sm:$0xff]  }
  0x3b   : > { %482 = vst [vmem:[%s5714_s26 + $0x290] sm:$0xff] %v481_v18   ;;  %486 = vst [vmem:[%s5714_s26 + $0x298] sm:$0xff] %v485_v19   ;;  %v493_v21 = vld [vmem:[%s5709_s25 + $0x8a8] sm:$0xff]   ;;  %v497_v22 = vld [vmem:[%s5709_s25 + $0x8b0] sm:$0xff]  }
  0x3c   : > { %490 = vst [vmem:[%s5714_s26 + $0x2a0] sm:$0xff] %v489_v20   ;;  %494 = vst [vmem:[%s5714_s26 + $0x2a8] sm:$0xff] %v493_v21   ;;  %v501_v23 = vld [vmem:[%s5709_s25 + $0x8b8] sm:$0xff]   ;;  %v505_v24 = vld [vmem:[%s5709_s25 + $0x8c0] sm:$0xff]  }
  0x3d   : > { %498 = vst [vmem:[%s5714_s26 + $0x2b0] sm:$0xff] %v497_v22   ;;  %v509_v25 = vld [vmem:[%s5709_s25 + $0x8c8] sm:$0xff]   ;;  %502 = vst [vmem:[%s5714_s26 + $0x2b8] sm:$0xff] %v501_v23   ;;  %v513_v26 = vld [vmem:[%s5709_s25 + $0x8d0] sm:$0xff]  }
  0x3e   : > { %506 = vst [vmem:[%s5714_s26 + $0x2c0] sm:$0xff] %v505_v24   ;;  %510 = vst [vmem:[%s5714_s26 + $0x2c8] sm:$0xff] %v509_v25   ;;  %v517_v27 = vld [vmem:[%s5709_s25 + $0x8d8] sm:$0xff]   ;;  %v521_v28 = vld [vmem:[%s5709_s25 + $0x8e0] sm:$0xff]  }
  0x3f   : > { %514 = vst [vmem:[%s5714_s26 + $0x2d0] sm:$0xff] %v513_v26   ;;  %518 = vst [vmem:[%s5714_s26 + $0x2d8] sm:$0xff] %v517_v27   ;;  %v525_v29 = vld [vmem:[%s5709_s25 + $0x8e8] sm:$0xff]   ;;  %v529_v30 = vld [vmem:[%s5709_s25 + $0x8f0] sm:$0xff]  }
  0x40   : > { %522 = vst [vmem:[%s5714_s26 + $0x2e0] sm:$0xff] %v521_v28   ;;  %v533_v31 = vld [vmem:[%s5709_s25 + $0x8f8] sm:$0xff]   ;;  %526 = vst [vmem:[%s5714_s26 + $0x2e8] sm:$0xff] %v525_v29   ;;  %v537_v32 = vld [vmem:[%s5709_s25 + $0xc00] sm:$0xff]  }
  0x41   : > { %530 = vst [vmem:[%s5714_s26 + $0x2f0] sm:$0xff] %v529_v30   ;;  %534 = vst [vmem:[%s5714_s26 + $0x2f8] sm:$0xff] %v533_v31   ;;  %v541_v33 = vld [vmem:[%s5709_s25 + $0xc08] sm:$0xff]   ;;  %v545_v34 = vld [vmem:[%s5709_s25 + $0xc10] sm:$0xff]  }
  0x42   : > { %538 = vst [vmem:[%s5714_s26 + $0x300] sm:$0xff] %v537_v32   ;;  %542 = vst [vmem:[%s5714_s26 + $0x308] sm:$0xff] %v541_v33   ;;  %v549_v35 = vld [vmem:[%s5709_s25 + $0xc18] sm:$0xff]   ;;  %v553_v36 = vld [vmem:[%s5709_s25 + $0xc20] sm:$0xff]  }
  0x43   : > { %546 = vst [vmem:[%s5714_s26 + $0x310] sm:$0xff] %v545_v34   ;;  %v557_v37 = vld [vmem:[%s5709_s25 + $0xc28] sm:$0xff]   ;;  %550 = vst [vmem:[%s5714_s26 + $0x318] sm:$0xff] %v549_v35   ;;  %v561_v38 = vld [vmem:[%s5709_s25 + $0xc30] sm:$0xff]  }
  0x44   : > { %554 = vst [vmem:[%s5714_s26 + $0x320] sm:$0xff] %v553_v36   ;;  %558 = vst [vmem:[%s5714_s26 + $0x328] sm:$0xff] %v557_v37   ;;  %v565_v39 = vld [vmem:[%s5709_s25 + $0xc38] sm:$0xff]   ;;  %v569_v40 = vld [vmem:[%s5709_s25 + $0xc40] sm:$0xff]  }
  0x45   : > { %562 = vst [vmem:[%s5714_s26 + $0x330] sm:$0xff] %v561_v38   ;;  %566 = vst [vmem:[%s5714_s26 + $0x338] sm:$0xff] %v565_v39   ;;  %v573_v41 = vld [vmem:[%s5709_s25 + $0xc48] sm:$0xff]   ;;  %v577_v42 = vld [vmem:[%s5709_s25 + $0xc50] sm:$0xff]  }
  0x46   : > { %570 = vst [vmem:[%s5714_s26 + $0x340] sm:$0xff] %v569_v40   ;;  %v581_v43 = vld [vmem:[%s5709_s25 + $0xc58] sm:$0xff]   ;;  %574 = vst [vmem:[%s5714_s26 + $0x348] sm:$0xff] %v573_v41   ;;  %v585_v44 = vld [vmem:[%s5709_s25 + $0xc60] sm:$0xff]  }
  0x47   : > { %578 = vst [vmem:[%s5714_s26 + $0x350] sm:$0xff] %v577_v42   ;;  %582 = vst [vmem:[%s5714_s26 + $0x358] sm:$0xff] %v581_v43   ;;  %v589_v45 = vld [vmem:[%s5709_s25 + $0xc68] sm:$0xff]   ;;  %v593_v46 = vld [vmem:[%s5709_s25 + $0xc70] sm:$0xff]  }
  0x48   : > { %586 = vst [vmem:[%s5714_s26 + $0x360] sm:$0xff] %v585_v44   ;;  %590 = vst [vmem:[%s5714_s26 + $0x368] sm:$0xff] %v589_v45   ;;  %v597_v47 = vld [vmem:[%s5709_s25 + $0xc78] sm:$0xff]   ;;  %v601_v48 = vld [vmem:[%s5709_s25 + $0xc80] sm:$0xff]  }
  0x49   : > { %594 = vst [vmem:[%s5714_s26 + $0x370] sm:$0xff] %v593_v46   ;;  %v605_v49 = vld [vmem:[%s5709_s25 + $0xc88] sm:$0xff]   ;;  %598 = vst [vmem:[%s5714_s26 + $0x378] sm:$0xff] %v597_v47   ;;  %v609_v50 = vld [vmem:[%s5709_s25 + $0xc90] sm:$0xff]  }
  0x4a   : > { %602 = vst [vmem:[%s5714_s26 + $0x380] sm:$0xff] %v601_v48   ;;  %606 = vst [vmem:[%s5714_s26 + $0x388] sm:$0xff] %v605_v49   ;;  %v613_v51 = vld [vmem:[%s5709_s25 + $0xc98] sm:$0xff]   ;;  %v617_v52 = vld [vmem:[%s5709_s25 + $0xca0] sm:$0xff]  }
  0x4b   : > { %610 = vst [vmem:[%s5714_s26 + $0x390] sm:$0xff] %v609_v50   ;;  %614 = vst [vmem:[%s5714_s26 + $0x398] sm:$0xff] %v613_v51   ;;  %v621_v53 = vld [vmem:[%s5709_s25 + $0xca8] sm:$0xff]   ;;  %v625_v54 = vld [vmem:[%s5709_s25 + $0xcb0] sm:$0xff]  }
  0x4c   : > { %618 = vst [vmem:[%s5714_s26 + $0x3a0] sm:$0xff] %v617_v52   ;;  %v629_v55 = vld [vmem:[%s5709_s25 + $0xcb8] sm:$0xff]   ;;  %622 = vst [vmem:[%s5714_s26 + $0x3a8] sm:$0xff] %v621_v53   ;;  %v633_v56 = vld [vmem:[%s5709_s25 + $0xcc0] sm:$0xff]  }
  0x4d   : > { %626 = vst [vmem:[%s5714_s26 + $0x3b0] sm:$0xff] %v625_v54   ;;  %630 = vst [vmem:[%s5714_s26 + $0x3b8] sm:$0xff] %v629_v55   ;;  %v637_v57 = vld [vmem:[%s5709_s25 + $0xcc8] sm:$0xff]   ;;  %v641_v58 = vld [vmem:[%s5709_s25 + $0xcd0] sm:$0xff]  }
  0x4e   : > { %634 = vst [vmem:[%s5714_s26 + $0x3c0] sm:$0xff] %v633_v56   ;;  %638 = vst [vmem:[%s5714_s26 + $0x3c8] sm:$0xff] %v637_v57   ;;  %v645_v59 = vld [vmem:[%s5709_s25 + $0xcd8] sm:$0xff]   ;;  %v649_v60 = vld [vmem:[%s5709_s25 + $0xce0] sm:$0xff]  }
  0x4f   : > { %642 = vst [vmem:[%s5714_s26 + $0x3d0] sm:$0xff] %v641_v58   ;;  %v653_v61 = vld [vmem:[%s5709_s25 + $0xce8] sm:$0xff]   ;;  %646 = vst [vmem:[%s5714_s26 + $0x3d8] sm:$0xff] %v645_v59   ;;  %v657_v62 = vld [vmem:[%s5709_s25 + $0xcf0] sm:$0xff]  }
  0x50   : > { %650 = vst [vmem:[%s5714_s26 + $0x3e0] sm:$0xff] %v649_v60   ;;  %654 = vst [vmem:[%s5714_s26 + $0x3e8] sm:$0xff] %v653_v61   ;;  %v661_v63 = vld [vmem:[%s5709_s25 + $0xcf8] sm:$0xff]  }
  0x51   : > { %658 = vst [vmem:[%s5714_s26 + $0x3f0] sm:$0xff] %v657_v62   ;;  %662 = vst [vmem:[%s5714_s26 + $0x3f8] sm:$0xff] %v661_v63  }
  0x52 PF: > { %p4439_p5 = scmp.ge.s32.totalorder %s5652_s14, 1  ;;  %p1198_p6 = scmp.lt.s32.totalorder %s5652_s14, 5 }
  0x54   : > { %p1199_p7 = pnand %p4439_p5, %p1198_p6 }
  0x56   : > { %1202 = sbr.rel (%p1199_p7) target bundleno = 588 (0x24c), region = 69 }
  0x5d   : > { %v5497_v0 = vld [vmem:[%s7036_s1] sm:$0xff]   ;;  %v5498_v1 = vld [vmem:[%s7036_s1 + $0x8] sm:$0xff]   ;;  %vm1596_vm0 = vcmask 1044480   ;;  %v5499_v2 = vld [vmem:[%s7036_s1 + $0x10] sm:$0xff]   ;;  %s1205_s6 = sand.u32 1, %s5644_s12   ;;  %vm1597_vm1 = vcmask 1045504  }
  0x5e   : > { %5176 = vmatprep.subr.bf16.mxu0 %v5497_v0  ;;  %5250 = vmatprep.subr.bf16.mxu1 %v5497_v0  ;;  %v5654_v3 = vmov 65535   ;;  %s4440_s7 = sshll.u32 %s1205_s6, 10  ;;  %v5500_v5 = vld [vmem:[%s7036_s1 + $0x18] sm:$0xff]   ;;  %v5501_v6 = vld [vmem:[%s7036_s1 + $0x20] sm:$0x3f]   ;;  %vm1499_vm2 = vcmask 613376  }
  0x5f   : > { %5177 = vmatpush3.bf16.msra.mxu0 %v5497_v0  ;;  %5251 = vmatpush3.bf16.msra.mxu1 %v5497_v0  ;;  %v1598_v4 = vsel %vm1596_vm0, 4294967295, %v5654_v3  ;;  %s5987_s17 = scalar_lea.vmem [#allocation2], %s4440_s7  ;;  %s4441_s12 = sshll.u32 %s4432_s15, 6  ;;  %vm4305_vm3 = vcmask 125952  }
  0x60   : > { %5178 = vmatprep.subr.bf16.mxu0 %v5498_v1  ;;  %5252 = vmatprep.subr.bf16.mxu1 %v5498_v1  ;;  %v5502_v7 = vld [vmem:[%s5987_s17] sm:$0xff]   ;;  %v1599_v8 = vsel %vm1597_vm1, %v1598_v4, 0  ;;  %v5504_v11 = vld [vmem:[%s5987_s17 + $0x8] sm:$0xff]   ;;  %v5506_v13 = vld [vmem:[%s5987_s17 + $0x10] sm:$0xff]   ;;  %p1230_p8 = scmp.lt.s32.totalorder %s4441_s12, 255 }
  0x61   : > { %v5503_v9 = vld [vmem:[%s5987_s17 + $0x100] sm:$0xff]   ;;  %5186 = vmatprep.mubr.msk.bf16.mxu0 %vm1499_vm2, %v5502_v7  ;;  %v1601_v10 = vand.u32 %v5501_v6, %v1599_v8  ;;  %v5505_v12 = vld [vmem:[%s5987_s17 + $0x108] sm:$0xff]   ;;  %v5507_v14 = vld [vmem:[%s5987_s17 + $0x110] sm:$0xff]  }
  0x62   : > { %5260 = vmatprep.mubr.msk.bf16.mxu1 %vm1499_vm2, %v5503_v9  ;;  %v5508_v15 = vld [vmem:[%s5987_s17 + $0x18] sm:$0xff]   ;;  %v5510_v17 = vld [vmem:[%s5987_s17 + $0x20] sm:$0xff]   ;;  %v5512_v19 = vld [vmem:[%s5987_s17 + $0x28] sm:$0xff]   ;;  %s7350_s12 = smov (!%p1230_p8, %s4441_s12), 255 }
  0x63   : > { %5179 = vmatpush3.bf16.msra.mxu0 %v5498_v1  ;;  %5253 = vmatpush3.bf16.msra.mxu1 %v5498_v1  ;;  %v5509_v16 = vld [vmem:[%s5987_s17 + $0x118] sm:$0xff]   ;;  %v5511_v18 = vld [vmem:[%s5987_s17 + $0x120] sm:$0xff]   ;;  %v5513_v20 = vld [vmem:[%s5987_s17 + $0x128] sm:$0xff]   ;;  %s4442_s18 = sshll.u32 %s7350_s12, 2 }
  0x64   : > { %5180 = vmatprep.subr.bf16.mxu0 %v5499_v2  ;;  %5254 = vmatprep.subr.bf16.mxu1 %v5499_v2  ;;  %v5514_v21 = vld [vmem:[%s5987_s17 + $0x30] sm:$0xff]   ;;  %v5516_v23 = vld [vmem:[%s5987_s17 + $0x38] sm:$0xff]   ;;  %v5518_v25 = vld [vmem:[%s5987_s17 + $0x40] sm:$0xff]   ;;  %s6654_s22 = scalar_lea.vmem %s7038_s3, %s4442_s18 }
  0x65   : > { %v5515_v22 = vld [vmem:[%s5987_s17 + $0x130] sm:$0xff]   ;;  %v5517_v24 = vld [vmem:[%s5987_s17 + $0x138] sm:$0xff]   ;;  %v5519_v26 = vld [vmem:[%s5987_s17 + $0x140] sm:$0xff]  }
  0x66   : > { %v5520_v27 = vld [vmem:[%s5987_s17 + $0x48] sm:$0xff]   ;;  %v5522_v29 = vld [vmem:[%s5987_s17 + $0x50] sm:$0xff]   ;;  %v5524_v31 = vld [vmem:[%s5987_s17 + $0x58] sm:$0xff]  }
  0x67   : > { %5181 = vmatpush3.bf16.msra.mxu0 %v5499_v2  ;;  %5255 = vmatpush3.bf16.msra.mxu1 %v5499_v2  ;;  %v5521_v28 = vld [vmem:[%s5987_s17 + $0x148] sm:$0xff]   ;;  %v5523_v30 = vld [vmem:[%s5987_s17 + $0x150] sm:$0xff]   ;;  %v5525_v32 = vld [vmem:[%s5987_s17 + $0x158] sm:$0xff]  }
  0x68   : > { %5182 = vmatprep.subr.bf16.mxu0 %v5500_v5  ;;  %5256 = vmatprep.subr.bf16.mxu1 %v5500_v5  ;;  %v5526_v33 = vld [vmem:[%s5987_s17 + $0x60] sm:$0xff]   ;;  %v5528_v35 = vld [vmem:[%s5987_s17 + $0x68] sm:$0xff]   ;;  %v5530_v37 = vld [vmem:[%s5987_s17 + $0x70] sm:$0xff]  }
  0x69   : > { %v5527_v34 = vld [vmem:[%s5987_s17 + $0x160] sm:$0xff]   ;;  %v5529_v36 = vld [vmem:[%s5987_s17 + $0x168] sm:$0xff]   ;;  %v5531_v38 = vld [vmem:[%s5987_s17 + $0x170] sm:$0xff]  }
  0x6a   : > { %v5532_v39 = vld [vmem:[%s5987_s17 + $0x78] sm:$0xff]   ;;  %v5534_v41 = vld [vmem:[%s5987_s17 + $0x80] sm:$0xff]   ;;  %v5536_v43 = vld [vmem:[%s5987_s17 + $0x88] sm:$0xff]  }
  0x6b   : > { %5183 = vmatpush3.bf16.msra.mxu0 %v5500_v5  ;;  %5257 = vmatpush3.bf16.msra.mxu1 %v5500_v5  ;;  %v5533_v40 = vld [vmem:[%s5987_s17 + $0x178] sm:$0xff]   ;;  %v5535_v42 = vld [vmem:[%s5987_s17 + $0x180] sm:$0xff]   ;;  %v5537_v44 = vld [vmem:[%s5987_s17 + $0x188] sm:$0xff]  }
  0x6c   : > { %5184 = vmatprep.subr.bf16.mxu0 %v1601_v10  ;;  %5258 = vmatprep.subr.bf16.mxu1 %v1601_v10  ;;  %v5538_v45 = vld [vmem:[%s5987_s17 + $0x90] sm:$0xff]   ;;  %v5540_v47 = vld [vmem:[%s5987_s17 + $0x98] sm:$0xff]   ;;  %v5542_v49 = vld [vmem:[%s5987_s17 + $0xa0] sm:$0xff]  }
  0x6d   : > { %v5539_v46 = vld [vmem:[%s5987_s17 + $0x190] sm:$0xff]   ;;  %v5541_v48 = vld [vmem:[%s5987_s17 + $0x198] sm:$0xff]   ;;  %v5543_v50 = vld [vmem:[%s5987_s17 + $0x1a0] sm:$0xff]  }
  0x6e   : > { %v5544_v51 = vld [vmem:[%s5987_s17 + $0xa8] sm:$0xff]   ;;  %v5546_v53 = vld [vmem:[%s5987_s17 + $0xb0] sm:$0xff]   ;;  %v5548_v55 = vld [vmem:[%s5987_s17 + $0xb8] sm:$0xff]  }
  0x6f   : > { %5185 = vmatpush3.bf16.msra.mxu0 %v1601_v10  ;;  %5259 = vmatpush3.bf16.msra.mxu1 %v1601_v10  ;;  %v5545_v52 = vld [vmem:[%s5987_s17 + $0x1a8] sm:$0xff]   ;;  %v5547_v54 = vld [vmem:[%s5987_s17 + $0x1b0] sm:$0xff]   ;;  %v5549_v56 = vld [vmem:[%s5987_s17 + $0x1b8] sm:$0xff]  }
  0x70   : > { %5324 = vmatprep.subr.bf16.mxu0 %v5497_v0  ;;  %5398 = vmatprep.subr.bf16.mxu1 %v5497_v0  ;;  %v5550_v57 = vld [vmem:[%s5987_s17 + $0xc0] sm:$0xff]   ;;  %v5552_v59 = vld [vmem:[%s5987_s17 + $0xc8] sm:$0xff]   ;;  %v5554_v61 = vld [vmem:[%s5987_s17 + $0xd0] sm:$0xff]  }
  0x71   : > { %v5551_v58 = vld [vmem:[%s5987_s17 + $0x1c0] sm:$0xff]   ;;  %v5553_v60 = vld [vmem:[%s5987_s17 + $0x1c8] sm:$0xff]   ;;  %v5555_v62 = vld [vmem:[%s5987_s17 + $0x1d0] sm:$0xff]  }
  0x72   : > { %5187 = vmatmul.mubr.msk.bf16.vlgmr.msra.gmra.mrb[0].mxu0 %vm1499_vm2, %v5504_v11  ;;  %5261 = vmatmul.mubr.msk.bf16.vlgmr.msra.gmra.mrb[0].mxu1 %vm1499_vm2, %v5505_v12  ;;  %v5556_v63 = vld [vmem:[%s5987_s17 + $0xd8] sm:$0xff]   ;;  %v5560_v3 = vld [vmem:[%s5987_s17 + $0xe8] sm:$0xff]   ;;  %v5563_v6 = vld [vmem:[%s5987_s17 + $0x1f0] sm:$0xff]  }
  0x73   : > { %5325 = vmatpush3.bf16.msra.mxu0 %v5497_v0  ;;  %5399 = vmatpush3.bf16.msra.mxu1 %v5497_v0  ;;  %v5557_v0 = vld [vmem:[%s5987_s17 + $0x1d8] sm:$0xff]   ;;  %v5561_v4 = vld [vmem:[%s5987_s17 + $0x1e8] sm:$0xff]   ;;  %v5566_v9 = vld [vmem:[%s5987_s17 + $0x200] sm:$0xff]  }
  0x74   : > { %5190 = vmatprep.mubr.msk.bf16.mxu0 %vm1499_vm2, %v5506_v13  ;;  %5264 = vmatprep.mubr.msk.bf16.mxu1 %vm1499_vm2, %v5507_v14  ;;  %v5564_v7 = vld [vmem:[%s5987_s17 + $0xf8] sm:$0xff]   ;;  %v5568_v11 = vld [vmem:[%s5987_s17 + $0x208] sm:$0xff]   ;;  %v5570_v13 = vld [vmem:[%s5987_s17 + $0x210] sm:$0xff]  }
  0x75   : > { %5326 = vmatprep.subr.bf16.mxu0 %v5498_v1  ;;  %5400 = vmatprep.subr.bf16.mxu1 %v5498_v1  ;;  %v5565_v8 = vld [vmem:[%s5987_s17 + $0x1f8] sm:$0xff]   ;;  %v5569_v12 = vld [vmem:[%s5987_s17 + $0x308] sm:$0xff]   ;;  %v5571_v14 = vld [vmem:[%s5987_s17 + $0x310] sm:$0xff]  }
  0x77   : > { %5327 = vmatpush3.bf16.msra.mxu0 %v5498_v1  ;;  %5401 = vmatpush3.bf16.msra.mxu1 %v5498_v1  ;;  %v5558_v1 = vld [vmem:[%s5987_s17 + $0xe0] sm:$0xff]  }
  0x78   : > { %5328 = vmatprep.subr.bf16.mxu0 %v5499_v2  ;;  %5402 = vmatprep.subr.bf16.mxu1 %v5499_v2 }
  0x7a   : > { %5191 = vmatmul.mubr.msk.bf16.gmra.mrb[4].mxu0 %vm1499_vm2, %v5508_v15  ;;  %5265 = vmatmul.mubr.msk.bf16.gmra.mrb[4].mxu1 %vm1499_vm2, %v5509_v16  ;;  %v5572_v15 = vld [vmem:[%s5987_s17 + $0x218] sm:$0xff]  }
  0x7b   : > { %5194 = vmatprep.mubr.msk.bf16.mxu0 %vm1499_vm2, %v5510_v17  ;;  %5268 = vmatprep.mubr.msk.bf16.mxu1 %vm1499_vm2, %v5511_v18  ;;  %v5573_v16 = vld [vmem:[%s5987_s17 + $0x318] sm:$0xff]   ;;  %v5574_v17 = vld [vmem:[%s5987_s17 + $0x220] sm:$0xff]  }
  0x7c   : > { %5329 = vmatpush3.bf16.msra.mxu0 %v5499_v2  ;;  %5403 = vmatpush3.bf16.msra.mxu1 %v5499_v2  ;;  %v5559_v2 = vld [vmem:[%s5987_s17 + $0x1e0] sm:$0xff]  }
  0x7d   : > { %5330 = vmatprep.subr.bf16.mxu0 %v5500_v5  ;;  %5404 = vmatprep.subr.bf16.mxu1 %v5500_v5  ;;  %v5575_v18 = vld [vmem:[%s5987_s17 + $0x320] sm:$0xff]  }
  0x80   : > { %5331 = vmatpush3.bf16.msra.mxu0 %v5500_v5  ;;  %5405 = vmatpush3.bf16.msra.mxu1 %v5500_v5  ;;  %v5562_v5 = vld [vmem:[%s5987_s17 + $0xf0] sm:$0xff]  }
  0x81   : > { %5332 = vmatprep.subr.bf16.mxu0 %v1601_v10  ;;  %5406 = vmatprep.subr.bf16.mxu1 %v1601_v10 }
  0x82   : > { %5195 = vmatmul.mubr.msk.bf16.gmra.mrb[8].mxu0 %vm1499_vm2, %v5512_v19  ;;  %5269 = vmatmul.mubr.msk.bf16.gmra.mrb[8].mxu1 %vm1499_vm2, %v5513_v20  ;;  %v5576_v19 = vld [vmem:[%s5987_s17 + $0x228] sm:$0xff]  }
  0x83   : > { %5198 = vmatprep.mubr.msk.bf16.mxu0 %vm1499_vm2, %v5514_v21  ;;  %5272 = vmatprep.mubr.msk.bf16.mxu1 %vm1499_vm2, %v5515_v22  ;;  %v5577_v20 = vld [vmem:[%s5987_s17 + $0x328] sm:$0xff]   ;;  %v5578_v21 = vld [vmem:[%s5987_s17 + $0x230] sm:$0xff]  }
  0x84   : > { %5333 = vmatpush3.bf16.msra.mxu0 %v1601_v10  ;;  %5407 = vmatpush3.bf16.msra.mxu1 %v1601_v10  ;;  %v5567_v10 = vld [vmem:[%s5987_s17 + $0x300] sm:$0xff]   ;;  %v5579_v22 = vld [vmem:[%s5987_s17 + $0x330] sm:$0xff]  }
  0x8a   : > { %5199 = vmatmul.mubr.msk.bf16.gmra.mrb[12].mxu0 %vm1499_vm2, %v5516_v23  ;;  %5273 = vmatmul.mubr.msk.bf16.gmra.mrb[12].mxu1 %vm1499_vm2, %v5517_v24  ;;  %v5580_v23 = vld [vmem:[%s5987_s17 + $0x238] sm:$0xff]  }
  0x8b   : > { %5202 = vmatprep.mubr.msk.bf16.mxu0 %vm1499_vm2, %v5518_v25  ;;  %5276 = vmatprep.mubr.msk.bf16.mxu1 %vm1499_vm2, %v5519_v26  ;;  %v5581_v24 = vld [vmem:[%s5987_s17 + $0x338] sm:$0xff]   ;;  %v5582_v25 = vld [vmem:[%s5987_s17 + $0x240] sm:$0xff]  }
  0x8c   : > { %v5583_v26 = vld [vmem:[%s5987_s17 + $0x340] sm:$0xff]  }
  0x92   : > { %5203 = vmatmul.mubr.msk.bf16.gmra.mrb[16].mxu0 %vm1499_vm2, %v5520_v27  ;;  %5277 = vmatmul.mubr.msk.bf16.gmra.mrb[16].mxu1 %vm1499_vm2, %v5521_v28  ;;  %v5584_v27 = vld [vmem:[%s5987_s17 + $0x248] sm:$0xff]  }
  0x93   : > { %5206 = vmatprep.mubr.msk.bf16.mxu0 %vm1499_vm2, %v5522_v29  ;;  %5280 = vmatprep.mubr.msk.bf16.mxu1 %vm1499_vm2, %v5523_v30  ;;  %v5585_v28 = vld [vmem:[%s5987_s17 + $0x348] sm:$0xff]   ;;  %v5586_v29 = vld [vmem:[%s5987_s17 + $0x250] sm:$0xff]  }
  0x94   : > { %v5587_v30 = vld [vmem:[%s5987_s17 + $0x350] sm:$0xff]  }
  0x9a   : > { %5207 = vmatmul.mubr.msk.bf16.gmra.mrb[20].mxu0 %vm1499_vm2, %v5524_v31  ;;  %5281 = vmatmul.mubr.msk.bf16.gmra.mrb[20].mxu1 %vm1499_vm2, %v5525_v32  ;;  %v5588_v31 = vld [vmem:[%s5987_s17 + $0x258] sm:$0xff]  }
  0x9b   : > { %5210 = vmatprep.mubr.msk.bf16.mxu0 %vm1499_vm2, %v5526_v33  ;;  %5284 = vmatprep.mubr.msk.bf16.mxu1 %vm1499_vm2, %v5527_v34  ;;  %v5589_v32 = vld [vmem:[%s5987_s17 + $0x358] sm:$0xff]   ;;  %v5590_v33 = vld [vmem:[%s5987_s17 + $0x260] sm:$0xff]  }
  0x9c   : > { %v5591_v34 = vld [vmem:[%s5987_s17 + $0x360] sm:$0xff]  }
  0xa2   : > { %5211 = vmatmul.mubr.msk.bf16.gmra.mrb[24].mxu0 %vm1499_vm2, %v5528_v35  ;;  %5285 = vmatmul.mubr.msk.bf16.gmra.mrb[24].mxu1 %vm1499_vm2, %v5529_v36  ;;  %v5592_v35 = vld [vmem:[%s5987_s17 + $0x268] sm:$0xff]  }
  0xa3   : > { %5214 = vmatprep.mubr.msk.bf16.mxu0 %vm1499_vm2, %v5530_v37  ;;  %5288 = vmatprep.mubr.msk.bf16.mxu1 %vm1499_vm2, %v5531_v38  ;;  %v5593_v36 = vld [vmem:[%s5987_s17 + $0x368] sm:$0xff]   ;;  %v5594_v37 = vld [vmem:[%s5987_s17 + $0x270] sm:$0xff]  }
  0xa4   : > { %v5595_v38 = vld [vmem:[%s5987_s17 + $0x370] sm:$0xff]  }
  0xaa   : > { %5215 = vmatmul.mubr.msk.bf16.gmra.mrb[28].mxu0 %vm1499_vm2, %v5532_v39  ;;  %5289 = vmatmul.mubr.msk.bf16.gmra.mrb[28].mxu1 %vm1499_vm2, %v5533_v40  ;;  %v5596_v39 = vld [vmem:[%s5987_s17 + $0x278] sm:$0xff]  }
  0xab   : > { %5218 = vmatprep.mubr.msk.bf16.mxu0 %vm1499_vm2, %v5534_v41  ;;  %5292 = vmatprep.mubr.msk.bf16.mxu1 %vm1499_vm2, %v5535_v42  ;;  %v5597_v40 = vld [vmem:[%s5987_s17 + $0x378] sm:$0xff]   ;;  %v5598_v41 = vld [vmem:[%s5987_s17 + $0x280] sm:$0xff]  }
  0xac   : > { %v5599_v42 = vld [vmem:[%s5987_s17 + $0x380] sm:$0xff]  }
  0xb2   : > { %5219 = vmatmul.mubr.msk.bf16.gmra.mrb[32].mxu0 %vm1499_vm2, %v5536_v43  ;;  %5293 = vmatmul.mubr.msk.bf16.gmra.mrb[32].mxu1 %vm1499_vm2, %v5537_v44  ;;  %v5600_v43 = vld [vmem:[%s5987_s17 + $0x288] sm:$0xff]  }
  0xb3   : > { %5222 = vmatprep.mubr.msk.bf16.mxu0 %vm1499_vm2, %v5538_v45  ;;  %5296 = vmatprep.mubr.msk.bf16.mxu1 %vm1499_vm2, %v5539_v46  ;;  %v5601_v44 = vld [vmem:[%s5987_s17 + $0x388] sm:$0xff]   ;;  %v5602_v45 = vld [vmem:[%s5987_s17 + $0x290] sm:$0xff]  }
  0xb4   : > { %v5603_v46 = vld [vmem:[%s5987_s17 + $0x390] sm:$0xff]  }
  0xba   : > { %5223 = vmatmul.mubr.msk.bf16.gmra.mrb[36].mxu0 %vm1499_vm2, %v5540_v47  ;;  %5297 = vmatmul.mubr.msk.bf16.gmra.mrb[36].mxu1 %vm1499_vm2, %v5541_v48  ;;  %v5604_v47 = vld [vmem:[%s5987_s17 + $0x298] sm:$0xff]  }
  0xbb   : > { %5226 = vmatprep.mubr.msk.bf16.mxu0 %vm1499_vm2, %v5542_v49  ;;  %5300 = vmatprep.mubr.msk.bf16.mxu1 %vm1499_vm2, %v5543_v50  ;;  %v5605_v48 = vld [vmem:[%s5987_s17 + $0x398] sm:$0xff]   ;;  %v5606_v49 = vld [vmem:[%s5987_s17 + $0x2a0] sm:$0xff]  }
  0xbc   : > { %v5607_v50 = vld [vmem:[%s5987_s17 + $0x3a0] sm:$0xff]  }
  0xc2   : > { %5227 = vmatmul.mubr.msk.bf16.gmra.mrb[40].mxu0 %vm1499_vm2, %v5544_v51  ;;  %5301 = vmatmul.mubr.msk.bf16.gmra.mrb[40].mxu1 %vm1499_vm2, %v5545_v52  ;;  %v5608_v51 = vld [vmem:[%s5987_s17 + $0x2a8] sm:$0xff]  }
  0xc3   : > { %5230 = vmatprep.mubr.msk.bf16.mxu0 %vm1499_vm2, %v5546_v53  ;;  %5304 = vmatprep.mubr.msk.bf16.mxu1 %vm1499_vm2, %v5547_v54  ;;  %v5609_v52 = vld [vmem:[%s5987_s17 + $0x3a8] sm:$0xff]   ;;  %v5610_v53 = vld [vmem:[%s5987_s17 + $0x2b0] sm:$0xff]  }
  0xc4   : > { %v5611_v54 = vld [vmem:[%s5987_s17 + $0x3b0] sm:$0xff]  }
  0xca   : > { %5231 = vmatmul.mubr.msk.bf16.gmra.mrb[44].mxu0 %vm1499_vm2, %v5548_v55  ;;  %5305 = vmatmul.mubr.msk.bf16.gmra.mrb[44].mxu1 %vm1499_vm2, %v5549_v56 }
  0xcb   : > { %5234 = vmatprep.mubr.msk.bf16.mxu0 %vm1499_vm2, %v5550_v57  ;;  %5308 = vmatprep.mubr.msk.bf16.mxu1 %vm1499_vm2, %v5551_v58 }
  0xd2   : > { %5235 = vmatmul.mubr.msk.bf16.gmra.mrb[48].mxu0 %vm1499_vm2, %v5552_v59  ;;  %5309 = vmatmul.mubr.msk.bf16.gmra.mrb[48].mxu1 %vm1499_vm2, %v5553_v60  ;;  %v5612_v60 = vld [vmem:[%s5987_s17 + $0x2b8] sm:$0xff]  }
  0xd3   : > { %5238 = vmatprep.mubr.msk.bf16.mxu0 %vm1499_vm2, %v5554_v61  ;;  %5312 = vmatprep.mubr.msk.bf16.mxu1 %vm1499_vm2, %v5555_v62  ;;  %v5613_v61 = vld [vmem:[%s5987_s17 + $0x3b8] sm:$0xff]  }
  0xda   : > { %5239 = vmatmul.mubr.msk.bf16.gmra.mrb[52].mxu0 %vm1499_vm2, %v5556_v63  ;;  %5313 = vmatmul.mubr.msk.bf16.gmra.mrb[52].mxu1 %vm1499_vm2, %v5557_v0 }
  0xdb   : > { %5242 = vmatprep.mubr.msk.bf16.mxu0 %vm1499_vm2, %v5558_v1  ;;  %5316 = vmatprep.mubr.msk.bf16.mxu1 %vm1499_vm2, %v5559_v2  ;;  %v5614_v1 = vld [vmem:[%s5987_s17 + $0x2c0] sm:$0xff]  }
  0xdc   : > { %v5615_v2 = vld [vmem:[%s5987_s17 + $0x3c0] sm:$0xff]  }
  0xe2   : > { %5243 = vmatmul.mubr.msk.bf16.gmra.mrb[56].mxu0 %vm1499_vm2, %v5560_v3  ;;  %5317 = vmatmul.mubr.msk.bf16.gmra.mrb[56].mxu1 %vm1499_vm2, %v5561_v4 }
  0xe3   : > { %5246 = vmatprep.mubr.msk.bf16.mxu0 %vm1499_vm2, %v5562_v5  ;;  %5320 = vmatprep.mubr.msk.bf16.mxu1 %vm1499_vm2, %v5563_v6 }
  0xea   : > { %5247 = vmatmul.mubr.msk.bf16.gmra.mrb[60].mxu0 %vm1499_vm2, %v5564_v7  ;;  %5321 = vmatmul.mubr.msk.bf16.gmra.mrb[60].mxu1 %vm1499_vm2, %v5565_v8 }
  0xeb   : > { %5334 = vmatprep.mubr.msk.bf16.mxu0 %vm1499_vm2, %v5566_v9  ;;  %5408 = vmatprep.mubr.msk.bf16.mxu1 %vm1499_vm2, %v5567_v10 }
  0xf2   : > { %5335 = vmatmul.mubr.msk.bf16.vlgmr.msra.gmra.mrb[64].mxu0 %vm1499_vm2, %v5568_v11  ;;  %5409 = vmatmul.mubr.msk.bf16.vlgmr.msra.gmra.mrb[64].mxu1 %vm1499_vm2, %v5569_v12  ;;  %v5616_v12 = vld [vmem:[%s5987_s17 + $0x2c8] sm:$0xff]  }
  0xf3   : > { %5338 = vmatprep.mubr.msk.bf16.mxu0 %vm1499_vm2, %v5570_v13  ;;  %5412 = vmatprep.mubr.msk.bf16.mxu1 %vm1499_vm2, %v5571_v14  ;;  %v5617_v13 = vld [vmem:[%s5987_s17 + $0x3c8] sm:$0xff]  }
  0xfa   : > { %5339 = vmatmul.mubr.msk.bf16.gmra.mrb[68].mxu0 %vm1499_vm2, %v5572_v15  ;;  %5413 = vmatmul.mubr.msk.bf16.gmra.mrb[68].mxu1 %vm1499_vm2, %v5573_v16 }
  0xfb   : > { %5342 = vmatprep.mubr.msk.bf16.mxu0 %vm1499_vm2, %v5574_v17  ;;  %5416 = vmatprep.mubr.msk.bf16.mxu1 %vm1499_vm2, %v5575_v18  ;;  %v5618_v17 = vld [vmem:[%s5987_s17 + $0x2d0] sm:$0xff]  }
  0xfc   : > { %v5619_v18 = vld [vmem:[%s5987_s17 + $0x3d0] sm:$0xff]  }
 0x102   : > { %5343 = vmatmul.mubr.msk.bf16.gmra.mrb[72].mxu0 %vm1499_vm2, %v5576_v19  ;;  %5417 = vmatmul.mubr.msk.bf16.gmra.mrb[72].mxu1 %vm1499_vm2, %v5577_v20 }
 0x103   : > { %5346 = vmatprep.mubr.msk.bf16.mxu0 %vm1499_vm2, %v5578_v21  ;;  %5420 = vmatprep.mubr.msk.bf16.mxu1 %vm1499_vm2, %v5579_v22 }
 0x10a   : > { %5347 = vmatmul.mubr.msk.bf16.gmra.mrb[76].mxu0 %vm1499_vm2, %v5580_v23  ;;  %5421 = vmatmul.mubr.msk.bf16.gmra.mrb[76].mxu1 %vm1499_vm2, %v5581_v24 }
 0x10b   : > { %5350 = vmatprep.mubr.msk.bf16.mxu0 %vm1499_vm2, %v5582_v25  ;;  %5424 = vmatprep.mubr.msk.bf16.mxu1 %vm1499_vm2, %v5583_v26 }
 0x112   : > { %5351 = vmatmul.mubr.msk.bf16.gmra.mrb[80].mxu0 %vm1499_vm2, %v5584_v27  ;;  %5425 = vmatmul.mubr.msk.bf16.gmra.mrb[80].mxu1 %vm1499_vm2, %v5585_v28  ;;  %v5620_v28 = vld [vmem:[%s5987_s17 + $0x2d8] sm:$0xff]  }
 0x113   : > { %5354 = vmatprep.mubr.msk.bf16.mxu0 %vm1499_vm2, %v5586_v29  ;;  %5428 = vmatprep.mubr.msk.bf16.mxu1 %vm1499_vm2, %v5587_v30  ;;  %v5621_v29 = vld [vmem:[%s5987_s17 + $0x3d8] sm:$0xff]  }
 0x11a   : > { %5355 = vmatmul.mubr.msk.bf16.gmra.mrb[84].mxu0 %vm1499_vm2, %v5588_v31  ;;  %5429 = vmatmul.mubr.msk.bf16.gmra.mrb[84].mxu1 %vm1499_vm2, %v5589_v32 }
 0x11b   : > { %5358 = vmatprep.mubr.msk.bf16.mxu0 %vm1499_vm2, %v5590_v33  ;;  %5432 = vmatprep.mubr.msk.bf16.mxu1 %vm1499_vm2, %v5591_v34  ;;  %v5622_v33 = vld [vmem:[%s5987_s17 + $0x2e0] sm:$0xff]  }
 0x11c   : > { %v5623_v34 = vld [vmem:[%s5987_s17 + $0x3e0] sm:$0xff]  }
 0x122   : > { %5359 = vmatmul.mubr.msk.bf16.gmra.mrb[88].mxu0 %vm1499_vm2, %v5592_v35  ;;  %5433 = vmatmul.mubr.msk.bf16.gmra.mrb[88].mxu1 %vm1499_vm2, %v5593_v36 }
 0x123   : > { %5362 = vmatprep.mubr.msk.bf16.mxu0 %vm1499_vm2, %v5594_v37  ;;  %5436 = vmatprep.mubr.msk.bf16.mxu1 %vm1499_vm2, %v5595_v38 }
 0x12a   : > { %5363 = vmatmul.mubr.msk.bf16.gmra.mrb[92].mxu0 %vm1499_vm2, %v5596_v39  ;;  %5437 = vmatmul.mubr.msk.bf16.gmra.mrb[92].mxu1 %vm1499_vm2, %v5597_v40 }
 0x12b   : > { %5366 = vmatprep.mubr.msk.bf16.mxu0 %vm1499_vm2, %v5598_v41  ;;  %5440 = vmatprep.mubr.msk.bf16.mxu1 %vm1499_vm2, %v5599_v42 }
 0x132   : > { %5367 = vmatmul.mubr.msk.bf16.gmra.mrb[96].mxu0 %vm1499_vm2, %v5600_v43  ;;  %5441 = vmatmul.mubr.msk.bf16.gmra.mrb[96].mxu1 %vm1499_vm2, %v5601_v44  ;;  %v5624_v44 = vld [vmem:[%s5987_s17 + $0x2e8] sm:$0xff]  }
 0x133   : > { %5370 = vmatprep.mubr.msk.bf16.mxu0 %vm1499_vm2, %v5602_v45  ;;  %5444 = vmatprep.mubr.msk.bf16.mxu1 %vm1499_vm2, %v5603_v46  ;;  %v5625_v45 = vld [vmem:[%s5987_s17 + $0x3e8] sm:$0xff]  }
 0x13a   : > { %5371 = vmatmul.mubr.msk.bf16.gmra.mrb[100].mxu0 %vm1499_vm2, %v5604_v47  ;;  %5445 = vmatmul.mubr.msk.bf16.gmra.mrb[100].mxu1 %vm1499_vm2, %v5605_v48 }
 0x13b   : > { %5374 = vmatprep.mubr.msk.bf16.mxu0 %vm1499_vm2, %v5606_v49  ;;  %5448 = vmatprep.mubr.msk.bf16.mxu1 %vm1499_vm2, %v5607_v50  ;;  %v5626_v49 = vld [vmem:[%s5987_s17 + $0x2f0] sm:$0xff]  }
 0x13c   : > { %v5627_v50 = vld [vmem:[%s5987_s17 + $0x3f0] sm:$0xff]  }
 0x142   : > { %5375 = vmatmul.mubr.msk.bf16.gmra.mrb[104].mxu0 %vm1499_vm2, %v5608_v51  ;;  %5449 = vmatmul.mubr.msk.bf16.gmra.mrb[104].mxu1 %vm1499_vm2, %v5609_v52 }
 0x143   : > { %5378 = vmatprep.mubr.msk.bf16.mxu0 %vm1499_vm2, %v5610_v53  ;;  %5452 = vmatprep.mubr.msk.bf16.mxu1 %vm1499_vm2, %v5611_v54 }
 0x145   : > { %v6209_v55 = vpop.f32.mrb[0].mxu0  ;;  %v6211_v56 = vpop.f32.mrb[0].mxu1 }
 0x146   : > { %v6215_v58 = vpop.f32.mrb[1].mxu0  ;;  %v6217_v59 = vpop.f32.mrb[1].mxu1 }
 0x147   : > { %v6223_v63 = vpop.f32.mrb[2].mxu0  ;;  %v6225_v0 = vpop.f32.mrb[2].mxu1 }
 0x148   : > { %v6231_v4 = vpop.f32.mrb[3].mxu0  ;;  %v6233_v5 = vpop.f32.mrb[3].mxu1 }
 0x14a   : > { %5379 = vmatmul.mubr.msk.bf16.gmra.mrb[108].mxu0 %vm1499_vm2, %v5612_v60  ;;  %5453 = vmatmul.mubr.msk.bf16.gmra.mrb[108].mxu1 %vm1499_vm2, %v5613_v61 }
 0x14b   : > { %5382 = vmatprep.mubr.msk.bf16.mxu0 %vm1499_vm2, %v5614_v1  ;;  %5456 = vmatprep.mubr.msk.bf16.mxu1 %vm1499_vm2, %v5615_v2 }
 0x14d   : > { %v6241_v7 = vpop.f32.mrb[4].mxu0  ;;  %v6243_v8 = vpop.f32.mrb[4].mxu1 }
 0x14e   : > { %v6247_v10 = vpop.f32.mrb[5].mxu0  ;;  %v6249_v11 = vpop.f32.mrb[5].mxu1 }
 0x14f   : > { %v6255_v15 = vpop.f32.mrb[6].mxu0  ;;  %v6257_v16 = vpop.f32.mrb[6].mxu1 }
 0x150   : > { %v6263_v20 = vpop.f32.mrb[7].mxu0  ;;  %v6265_v21 = vpop.f32.mrb[7].mxu1 }
 0x152   : > { %5383 = vmatmul.mubr.msk.bf16.gmra.mrb[112].mxu0 %vm1499_vm2, %v5616_v12  ;;  %5457 = vmatmul.mubr.msk.bf16.gmra.mrb[112].mxu1 %vm1499_vm2, %v5617_v13  ;;  %v5628_v13 = vld [vmem:[%s5987_s17 + $0x2f8] sm:$0xff]  }
 0x153   : > { %5386 = vmatprep.mubr.msk.bf16.mxu0 %vm1499_vm2, %v5618_v17  ;;  %5460 = vmatprep.mubr.msk.bf16.mxu1 %vm1499_vm2, %v5619_v18  ;;  %v5629_v17 = vld [vmem:[%s5987_s17 + $0x3f8] sm:$0xff]   ;;  %v6637_v18 = vld [vmem:[%s7037_s2] ss:$0 sm:$0xff] }
 0x155   : > { %v6273_v23 = vpop.f32.mrb[8].mxu0  ;;  %v6275_v24 = vpop.f32.mrb[8].mxu1 }
 0x156   : > { %v6279_v26 = vpop.f32.mrb[9].mxu0  ;;  %v6281_v27 = vpop.f32.mrb[9].mxu1 }
 0x157   : > { %v6287_v31 = vpop.f32.mrb[10].mxu0  ;;  %v6289_v32 = vpop.f32.mrb[10].mxu1 }
 0x158   : > { %v6295_v36 = vpop.f32.mrb[11].mxu0  ;;  %v6297_v37 = vpop.f32.mrb[11].mxu1 }
 0x15a   : > { %5387 = vmatmul.mubr.msk.bf16.gmra.mrb[116].mxu0 %vm1499_vm2, %v5620_v28  ;;  %5461 = vmatmul.mubr.msk.bf16.gmra.mrb[116].mxu1 %vm1499_vm2, %v5621_v29 }
 0x15b   : > { %5390 = vmatprep.mubr.msk.bf16.mxu0 %vm1499_vm2, %v5622_v33  ;;  %5464 = vmatprep.mubr.msk.bf16.mxu1 %vm1499_vm2, %v5623_v34 }
 0x15d   : > { %v6305_v39 = vpop.f32.mrb[12].mxu0  ;;  %v6307_v40 = vpop.f32.mrb[12].mxu1 }
 0x15e   : > { %v6311_v42 = vpop.f32.mrb[13].mxu0  ;;  %v6313_v43 = vpop.f32.mrb[13].mxu1 }
 0x15f   : > { %v6319_v47 = vpop.f32.mrb[14].mxu0  ;;  %v6321_v48 = vpop.f32.mrb[14].mxu1 }
 0x160   : > { %v6327_v52 = vpop.f32.mrb[15].mxu0  ;;  %v6329_v53 = vpop.f32.mrb[15].mxu1 }
 0x162   : > { %5391 = vmatmul.mubr.msk.bf16.gmra.mrb[120].mxu0 %vm1499_vm2, %v5624_v44  ;;  %5465 = vmatmul.mubr.msk.bf16.gmra.mrb[120].mxu1 %vm1499_vm2, %v5625_v45 }
 0x163   : > { %5394 = vmatprep.mubr.msk.bf16.mxu0 %vm1499_vm2, %v5626_v49  ;;  %5468 = vmatprep.mubr.msk.bf16.mxu1 %vm1499_vm2, %v5627_v50 }
 0x165   : > { %v6337_v60 = vpop.f32.mrb[16].mxu0  ;;  %v6339_v61 = vpop.f32.mrb[16].mxu1 }
 0x166   : > { %v6343_v2 = vpop.f32.mrb[17].mxu0  ;;  %v6345_v12 = vpop.f32.mrb[17].mxu1 }
 0x167   : > { %v6351_v28 = vpop.f32.mrb[18].mxu0  ;;  %v6353_v29 = vpop.f32.mrb[18].mxu1 }
 0x168   : > { %v6357_v34 = vpop.f32.mrb[19].mxu0  ;;  %v6359_v44 = vpop.f32.mrb[19].mxu1 }
 0x16a   : > { %5395 = vmatmul.mubr.msk.bf16.gmra.mrb[124].mxu0 %vm1499_vm2, %v5628_v13  ;;  %5469 = vmatmul.mubr.msk.bf16.gmra.mrb[124].mxu1 %vm1499_vm2, %v5629_v17  ;;  %v7201_v13 = vmax.f32 %v6209_v55, %v6211_v56 }
 0x16d   : > { %v6365_v49 = vpop.f32.mrb[20].mxu0  ;;  %v6367_v50 = vpop.f32.mrb[20].mxu1 }
 0x16e   : > { %v6371_v1 = vpop.f32.mrb[21].mxu0  ;;  %v6373_v33 = vpop.f32.mrb[21].mxu1 }
 0x16f   : > { %v6377_v51 = vpop.f32.mrb[22].mxu0  ;;  %v6379_v45 = vpop.f32.mrb[22].mxu1 }
 0x170   : > { %v6383_v17 = vpop.f32.mrb[23].mxu0  ;;  %v6385_v46 = vpop.f32.mrb[23].mxu1 }
 0x171   : > { %7120 = vst [vmem:[#allocation3_spill] sm:$0xff] %v6385_v46 }
 0x175   : > { %v6389_v41 = vpop.f32.mrb[24].mxu0  ;;  %v6391_v38 = vpop.f32.mrb[24].mxu1 }
 0x176   : > { %7121 = vst [vmem:[#allocation4_spill] sm:$0xff] %v6389_v41  ;;  %7122 = vst [vmem:[#allocation5_spill] sm:$0xff] %v6391_v38  ;;  %v6395_v35 = vpop.f32.mrb[25].mxu0  ;;  %v6397_v30 = vpop.f32.mrb[25].mxu1 }
 0x177   : > { %7123 = vst [vmem:[#allocation6_spill] sm:$0xff] %v6395_v35  ;;  %7124 = vst [vmem:[#allocation7_spill] sm:$0xff] %v6397_v30  ;;  %v6401_v25 = vpop.f32.mrb[26].mxu0  ;;  %v6403_v22 = vpop.f32.mrb[26].mxu1  ;;  %v7203_v30 = vmax.f32 %v6223_v63, %v6225_v0  ;;  %v7204_v35 = vmax.f32 %v6231_v4, %v6233_v5 }
 0x178   : > { %7125 = vst [vmem:[#allocation8_spill] sm:$0xff] %v6401_v25  ;;  %7126 = vst [vmem:[#allocation9_spill] sm:$0xff] %v6403_v22  ;;  %v6407_v19 = vpop.f32.mrb[27].mxu0  ;;  %v6409_v14 = vpop.f32.mrb[27].mxu1 }
 0x179   : > { %7127 = vst [vmem:[#allocation10_spill] sm:$0xff] %v6407_v19  ;;  %7128 = vst [vmem:[#allocation11_spill] sm:$0xff] %v6409_v14 }
 0x17d   : > { %v6413_v9 = vpop.f32.mrb[28].mxu0  ;;  %v6415_v6 = vpop.f32.mrb[28].mxu1 }
 0x17e   : > { %7129 = vst [vmem:[#allocation12_spill] sm:$0xff] %v6413_v9  ;;  %7130 = vst [vmem:[#allocation13_spill] sm:$0xff] %v6415_v6  ;;  %v6419_v3 = vpop.f32.mrb[29].mxu0  ;;  %v6421_v62 = vpop.f32.mrb[29].mxu1 }
 0x17f   : > { %7131 = vst [vmem:[#allocation14_spill] sm:$0xff] %v6419_v3  ;;  %7132 = vst [vmem:[#allocation15_spill] sm:$0xff] %v6421_v62  ;;  %v6425_v57 = vpop.f32.mrb[30].mxu0  ;;  %v6427_v22 = vpop.f32.mrb[30].mxu1 }
 0x180   : > { %7133 = vst [vmem:[#allocation16_spill] sm:$0xff] %v6425_v57  ;;  %7134 = vst [vmem:[#allocation17_spill] sm:$0xff] %v6427_v22  ;;  %v6431_v14 = vpop.f32.mrb[31].mxu0  ;;  %v6433_v19 = vpop.f32.mrb[31].mxu1 }
 0x181   : > { %7135 = vst [vmem:[#allocation18_spill] sm:$0xff] %v6431_v14  ;;  %7136 = vst [vmem:[#allocation19_spill] sm:$0xff] %v6433_v19 }
 0x185   : > { %v6437_v6 = vpop.f32.mrb[32].mxu0  ;;  %v6439_v9 = vpop.f32.mrb[32].mxu1 }
 0x186   : > { %7137 = vst [vmem:[#allocation20_spill] sm:$0xff] %v6437_v6  ;;  %7138 = vst [vmem:[#allocation21_spill] sm:$0xff] %v6439_v9  ;;  %v6443_v62 = vpop.f32.mrb[33].mxu0  ;;  %v6445_v3 = vpop.f32.mrb[33].mxu1 }
 0x187   : > { %7139 = vst [vmem:[#allocation22_spill] sm:$0xff] %v6443_v62  ;;  %7140 = vst [vmem:[#allocation23_spill] sm:$0xff] %v6445_v3  ;;  %v6449_v22 = vpop.f32.mrb[34].mxu0  ;;  %v6451_v57 = vpop.f32.mrb[34].mxu1 }
 0x188   : > { %7141 = vst [vmem:[#allocation24_spill] sm:$0xff] %v6449_v22  ;;  %7142 = vst [vmem:[#allocation25_spill] sm:$0xff] %v6451_v57  ;;  %v6455_v19 = vpop.f32.mrb[35].mxu0  ;;  %v6457_v14 = vpop.f32.mrb[35].mxu1 }
 0x189   : > { %7143 = vst [vmem:[#allocation26_spill] sm:$0xff] %v6455_v19  ;;  %7144 = vst [vmem:[#allocation27_spill] sm:$0xff] %v6457_v14 }
 0x18d   : > { %v6461_v9 = vpop.f32.mrb[36].mxu0  ;;  %v6463_v6 = vpop.f32.mrb[36].mxu1 }
 0x18e   : > { %7145 = vst [vmem:[#allocation28_spill] sm:$0xff] %v6461_v9  ;;  %7146 = vst [vmem:[#allocation29_spill] sm:$0xff] %v6463_v6  ;;  %v6467_v3 = vpop.f32.mrb[37].mxu0  ;;  %v6469_v62 = vpop.f32.mrb[37].mxu1 }
 0x18f   : > { %7147 = vst [vmem:[#allocation30_spill] sm:$0xff] %v6467_v3  ;;  %7148 = vst [vmem:[#allocation31_spill] sm:$0xff] %v6469_v62  ;;  %v6473_v57 = vpop.f32.mrb[38].mxu0  ;;  %v6475_v22 = vpop.f32.mrb[38].mxu1 }
 0x190   : > { %7149 = vst [vmem:[#allocation32_spill] sm:$0xff] %v6473_v57  ;;  %7150 = vst [vmem:[#allocation33_spill] sm:$0xff] %v6475_v22  ;;  %v6479_v14 = vpop.f32.mrb[39].mxu0  ;;  %v6481_v19 = vpop.f32.mrb[39].mxu1 }
 0x191   : > { %7151 = vst [vmem:[#allocation34_spill] sm:$0xff] %v6479_v14  ;;  %7152 = vst [vmem:[#allocation35_spill] sm:$0xff] %v6481_v19 }
 0x195   : > { %v6485_v6 = vpop.f32.mrb[40].mxu0  ;;  %v6487_v9 = vpop.f32.mrb[40].mxu1 }
 0x196   : > { %7153 = vst [vmem:[#allocation36_spill] sm:$0xff] %v6485_v6  ;;  %7154 = vst [vmem:[#allocation37_spill] sm:$0xff] %v6487_v9  ;;  %v6491_v62 = vpop.f32.mrb[41].mxu0  ;;  %v6493_v3 = vpop.f32.mrb[41].mxu1 }
 0x197   : > { %7155 = vst [vmem:[#allocation38_spill] sm:$0xff] %v6491_v62  ;;  %7156 = vst [vmem:[#allocation39_spill] sm:$0xff] %v6493_v3  ;;  %v6497_v22 = vpop.f32.mrb[42].mxu0  ;;  %v6499_v57 = vpop.f32.mrb[42].mxu1 }
 0x198   : > { %7157 = vst [vmem:[#allocation40_spill] sm:$0xff] %v6497_v22  ;;  %7158 = vst [vmem:[#allocation41_spill] sm:$0xff] %v6499_v57  ;;  %v6503_v19 = vpop.f32.mrb[43].mxu0  ;;  %v6505_v14 = vpop.f32.mrb[43].mxu1 }
 0x199   : > { %7159 = vst [vmem:[#allocation42_spill] sm:$0xff] %v6503_v19  ;;  %7160 = vst [vmem:[#allocation43_spill] sm:$0xff] %v6505_v14 }
 0x19d   : > { %v6509_v9 = vpop.f32.mrb[44].mxu0  ;;  %v6511_v6 = vpop.f32.mrb[44].mxu1 }
 0x19e   : > { %7161 = vst [vmem:[#allocation44_spill] sm:$0xff] %v6509_v9  ;;  %7162 = vst [vmem:[#allocation45_spill] sm:$0xff] %v6511_v6  ;;  %v6515_v3 = vpop.f32.mrb[45].mxu0  ;;  %v6517_v62 = vpop.f32.mrb[45].mxu1 }
 0x19f   : > { %7163 = vst [vmem:[#allocation46_spill] sm:$0xff] %v6515_v3  ;;  %7164 = vst [vmem:[#allocation47_spill] sm:$0xff] %v6517_v62  ;;  %v6521_v57 = vpop.f32.mrb[46].mxu0  ;;  %v6523_v22 = vpop.f32.mrb[46].mxu1 }
 0x1a0   : > { %7165 = vst [vmem:[#allocation48_spill] sm:$0xff] %v6521_v57  ;;  %7166 = vst [vmem:[#allocation49_spill] sm:$0xff] %v6523_v22  ;;  %v6527_v14 = vpop.f32.mrb[47].mxu0  ;;  %v6529_v19 = vpop.f32.mrb[47].mxu1 }
 0x1a1   : > { %7167 = vst [vmem:[#allocation50_spill] sm:$0xff] %v6527_v14  ;;  %7168 = vst [vmem:[#allocation51_spill] sm:$0xff] %v6529_v19 }
 0x1a5   : > { %v6533_v6 = vpop.f32.mrb[48].mxu0  ;;  %v6535_v9 = vpop.f32.mrb[48].mxu1 }
 0x1a6   : > { %7169 = vst [vmem:[#allocation52_spill] sm:$0xff] %v6533_v6  ;;  %7170 = vst [vmem:[#allocation53_spill] sm:$0xff] %v6535_v9  ;;  %v6539_v62 = vpop.f32.mrb[49].mxu0  ;;  %v6541_v3 = vpop.f32.mrb[49].mxu1 }
 0x1a7   : > { %7171 = vst [vmem:[#allocation54_spill] sm:$0xff] %v6539_v62  ;;  %7172 = vst [vmem:[#allocation55_spill] sm:$0xff] %v6541_v3  ;;  %v6545_v22 = vpop.f32.mrb[50].mxu0  ;;  %v6547_v57 = vpop.f32.mrb[50].mxu1 }
 0x1a8   : > { %7173 = vst [vmem:[#allocation56_spill] sm:$0xff] %v6545_v22  ;;  %7174 = vst [vmem:[#allocation57_spill] sm:$0xff] %v6547_v57  ;;  %v6551_v19 = vpop.f32.mrb[51].mxu0  ;;  %v6553_v14 = vpop.f32.mrb[51].mxu1 }
 0x1a9   : > { %7175 = vst [vmem:[#allocation58_spill] sm:$0xff] %v6551_v19  ;;  %7176 = vst [vmem:[#allocation59_spill] sm:$0xff] %v6553_v14 }
 0x1ad   : > { %v6557_v9 = vpop.f32.mrb[52].mxu0  ;;  %v6559_v6 = vpop.f32.mrb[52].mxu1 }
 0x1ae   : > { %7177 = vst [vmem:[#allocation60_spill] sm:$0xff] %v6557_v9  ;;  %7178 = vst [vmem:[#allocation61_spill] sm:$0xff] %v6559_v6  ;;  %v6563_v3 = vpop.f32.mrb[53].mxu0  ;;  %v6565_v62 = vpop.f32.mrb[53].mxu1 }
 0x1af   : > { %7179 = vst [vmem:[#allocation62_spill] sm:$0xff] %v6563_v3  ;;  %7180 = vst [vmem:[#allocation63_spill] sm:$0xff] %v6565_v62  ;;  %v6569_v57 = vpop.f32.mrb[54].mxu0  ;;  %v6571_v22 = vpop.f32.mrb[54].mxu1 }
 0x1b0   : > { %7181 = vst [vmem:[#allocation64_spill] sm:$0xff] %v6569_v57  ;;  %7182 = vst [vmem:[#allocation65_spill] sm:$0xff] %v6571_v22  ;;  %v6575_v14 = vpop.f32.mrb[55].mxu0  ;;  %v6577_v19 = vpop.f32.mrb[55].mxu1 }
 0x1b1   : > { %7183 = vst [vmem:[#allocation66_spill] sm:$0xff] %v6575_v14  ;;  %7184 = vst [vmem:[#allocation67_spill] sm:$0xff] %v6577_v19 }
 0x1b5   : > { %v6581_v6 = vpop.f32.mrb[56].mxu0  ;;  %v6583_v9 = vpop.f32.mrb[56].mxu1 }
 0x1b6   : > { %7185 = vst [vmem:[#allocation68_spill] sm:$0xff] %v6581_v6  ;;  %7186 = vst [vmem:[#allocation69_spill] sm:$0xff] %v6583_v9  ;;  %v6587_v62 = vpop.f32.mrb[57].mxu0  ;;  %v6589_v3 = vpop.f32.mrb[57].mxu1 }
 0x1b7   : > { %7187 = vst [vmem:[#allocation70_spill] sm:$0xff] %v6587_v62  ;;  %7188 = vst [vmem:[#allocation71_spill] sm:$0xff] %v6589_v3  ;;  %v6593_v22 = vpop.f32.mrb[58].mxu0  ;;  %v6595_v57 = vpop.f32.mrb[58].mxu1 }
 0x1b8   : > { %7189 = vst [vmem:[#allocation72_spill] sm:$0xff] %v6593_v22  ;;  %7190 = vst [vmem:[#allocation73_spill] sm:$0xff] %v6595_v57  ;;  %v6599_v19 = vpop.f32.mrb[59].mxu0  ;;  %v6601_v14 = vpop.f32.mrb[59].mxu1 }
 0x1b9   : > { %7191 = vst [vmem:[#allocation74_spill] sm:$0xff] %v6599_v19  ;;  %7192 = vst [vmem:[#allocation75_spill] sm:$0xff] %v6601_v14 }
 0x1bd   : > { %v6605_v9 = vpop.f32.mrb[60].mxu0  ;;  %v6607_v6 = vpop.f32.mrb[60].mxu1 }
 0x1be   : > { %7193 = vst [vmem:[#allocation76_spill] sm:$0xff] %v6605_v9  ;;  %7194 = vst [vmem:[#allocation77_spill] sm:$0xff] %v6607_v6  ;;  %v6611_v3 = vpop.f32.mrb[61].mxu0  ;;  %v6613_v62 = vpop.f32.mrb[61].mxu1 }
 0x1bf   : > { %7195 = vst [vmem:[#allocation78_spill] sm:$0xff] %v6611_v3  ;;  %7196 = vst [vmem:[#allocation79_spill] sm:$0xff] %v6613_v62  ;;  %v6617_v57 = vpop.f32.mrb[62].mxu0  ;;  %v6619_v22 = vpop.f32.mrb[62].mxu1 }
 0x1c0   : > { %7197 = vst [vmem:[#allocation80_spill] sm:$0xff] %v6617_v57  ;;  %7198 = vst [vmem:[#allocation81_spill] sm:$0xff] %v6619_v22  ;;  %v6625_v14 = vpop.f32.mrb[63].mxu0  ;;  %v6627_v19 = vpop.f32.mrb[63].mxu1  ;;  %v7202_v22 = vmax.f32 %v6215_v58, %v6217_v59 }
 0x1c1   : > { %7199 = vst [vmem:[#allocation82_spill] sm:$0xff] %v6625_v14  ;;  %7200 = vst [vmem:[#allocation83_spill] sm:$0xff] %v6627_v19 }
 0x1c5   : > { %v5336_v6 = vpop.f32.mrb[64].mxu0  ;;  %v5410_v9 = vpop.f32.mrb[64].mxu1 }
 0x1c6   : > { %v3178_v62 = vmax.f32 %v7201_v13, %v5336_v6  ;;  %v2921_v3 = vpop.f32.mrb[65].mxu0  ;;  %v3595_v25 = vpop.f32.mrb[65].mxu1 }
 0x1c7   : > { %v3176_v57 = vmax.f32 %v7202_v22, %v2921_v3  ;;  %v5337_v54 = vpop.f32.mrb[66].mxu0  ;;  %v5411_v19 = vpop.f32.mrb[66].mxu1 }
 0x1c8   : > { %v3852_v14 = vmax.f32 %v3178_v62, %v5410_v9  ;;  %v3179_v55 = vmax.f32 %v7203_v30, %v5337_v54  ;;  %v2924_v56 = vpop.f32.mrb[67].mxu0  ;;  %v3598_v6 = vpop.f32.mrb[67].mxu1 }
 0x1c9   : > { %v3850_v13 = vmax.f32 %v3176_v57, %v3595_v25  ;;  %v3177_v38 = vmax.f32 %v7204_v35, %v2924_v56 }
 0x1ca   : > { %v3923_v41 = vadd.f32 %v6637_v18, %v3852_v14  ;;  %v3853_v46 = vmax.f32 %v3179_v55, %v5411_v19  ;;  %v7205_v14 = vmax.f32 %v6241_v7, %v6243_v8  ;;  %v7207_v7 = vmax.f32 %v6255_v15, %v6257_v16 }
 0x1cb   : > { %v3921_v58 = vadd.f32 %v6637_v18, %v3850_v13  ;;  %v3851_v59 = vmax.f32 %v3177_v38, %v3598_v6  ;;  %v7206_v38 = vmax.f32 %v6247_v10, %v6249_v11  ;;  %v7208_v10 = vmax.f32 %v6263_v20, %v6265_v21 }
 0x1cc   : > { %v3987_v3 = vmax.f32 %v3923_v41, 0.0  ;;  %v3924_v62 = vadd.f32 %v6637_v18, %v3853_v46 }
 0x1cd   : > { %v3985_v57 = vmax.f32 %v3921_v58, 0.0  ;;  %v3922_v63 = vadd.f32 %v6637_v18, %v3851_v59  ;;  %v5340_v0 = vpop.f32.mrb[68].mxu0  ;;  %v5414_v4 = vpop.f32.mrb[68].mxu1 }
 0x1ce   : > { %v4966_v5 = vpack.c.bf16 %v3987_v3, %v3987_v3  ;;  %v3988_v9 = vmax.f32 %v3924_v62, 0.0  ;;  %v3182_v19 = vmax.f32 %v7205_v14, %v5340_v0  ;;  %v2937_v22 = vpop.f32.mrb[69].mxu0  ;;  %v3611_v25 = vpop.f32.mrb[69].mxu1  ;;  %v7209_v14 = vmax.f32 %v6273_v23, %v6275_v24 }
 0x1cf   : > { %v4964_v30 = vpack.c.bf16 %v3985_v57, %v3985_v57  ;;  %v3986_v35 = vmax.f32 %v3922_v63, 0.0  ;;  %v3180_v41 = vmax.f32 %v7206_v38, %v2937_v22  ;;  %v5341_v46 = vpop.f32.mrb[70].mxu0  ;;  %v5415_v54 = vpop.f32.mrb[70].mxu1  ;;  %v7210_v38 = vmax.f32 %v6279_v26, %v6281_v27 }
 0x1d0   : > { %4308 = vst.msk [vmem:[%s6654_s22 + $0x8] sm:$0xf] %vm4305_vm3, %v4966_v5  ;;  %v4967_v55 = vpack.c.bf16 %v3988_v9, %v3988_v9  ;;  %v3856_v56 = vmax.f32 %v3182_v19, %v5414_v4  ;;  %v3183_v8 = vmax.f32 %v7207_v7, %v5341_v46  ;;  %v2940_v6 = vpop.f32.mrb[71].mxu0  ;;  %v3614_v13 = vpop.f32.mrb[71].mxu1  ;;  %v7211_v23 = vmax.f32 %v6287_v31, %v6289_v32 }
 0x1d1   : > { %4306 = vst.msk [vmem:[%s6654_s22] sm:$0xf] %vm4305_vm3, %v4964_v30  ;;  %v4965_v58 = vpack.c.bf16 %v3986_v35, %v3986_v35  ;;  %v3854_v59 = vmax.f32 %v3180_v41, %v3611_v25  ;;  %v3181_v11 = vmax.f32 %v7208_v10, %v2940_v6  ;;  %v7212_v26 = vmax.f32 %v6295_v36, %v6297_v37 }
 0x1d2   : > { %4309 = vst.msk [vmem:[%s6654_s22 + $0xc] sm:$0xf] %vm4305_vm3, %v4967_v55  ;;  %v3927_v3 = vadd.f32 %v6637_v18, %v3856_v56  ;;  %v3857_v62 = vmax.f32 %v3183_v8, %v5415_v54 }
 0x1d3   : > { %4307 = vst.msk [vmem:[%s6654_s22 + $0x4] sm:$0xf] %vm4305_vm3, %v4965_v58  ;;  %v3925_v15 = vadd.f32 %v6637_v18, %v3854_v59  ;;  %v3855_v16 = vmax.f32 %v3181_v11, %v3614_v13 }
 0x1d4   : > { %v3991_v57 = vmax.f32 %v3927_v3, 0.0  ;;  %v3928_v63 = vadd.f32 %v6637_v18, %v3857_v62 }
 0x1d5   : > { %v3989_v0 = vmax.f32 %v3925_v15, 0.0  ;;  %v3926_v4 = vadd.f32 %v6637_v18, %v3855_v16  ;;  %v5344_v5 = vpop.f32.mrb[72].mxu0  ;;  %v5418_v20 = vpop.f32.mrb[72].mxu1 }
 0x1d6   : > { %v4970_v21 = vpack.c.bf16 %v3991_v57, %v3991_v57  ;;  %v3992_v9 = vmax.f32 %v3928_v63, 0.0  ;;  %v3186_v19 = vmax.f32 %v7209_v14, %v5344_v5  ;;  %v2953_v22 = vpop.f32.mrb[73].mxu0  ;;  %v3627_v25 = vpop.f32.mrb[73].mxu1  ;;  %v7213_v57 = vmax.f32 %v6305_v39, %v6307_v40 }
 0x1d7   : > { %v4968_v30 = vpack.c.bf16 %v3989_v0, %v3989_v0  ;;  %v3990_v35 = vmax.f32 %v3926_v4, 0.0  ;;  %v3184_v41 = vmax.f32 %v7210_v38, %v2953_v22  ;;  %v5345_v46 = vpop.f32.mrb[74].mxu0  ;;  %v5419_v54 = vpop.f32.mrb[74].mxu1  ;;  %v7215_v39 = vmax.f32 %v6319_v47, %v6321_v48 }
 0x1d8   : > { %4312 = vst.msk [vmem:[%s6654_s22 + $0x18] sm:$0xf] %vm4305_vm3, %v4970_v21  ;;  %v4971_v55 = vpack.c.bf16 %v3992_v9, %v3992_v9  ;;  %v3860_v56 = vmax.f32 %v3186_v19, %v5418_v20  ;;  %v3187_v24 = vmax.f32 %v7211_v23, %v5345_v46  ;;  %v2956_v7 = vpop.f32.mrb[75].mxu0  ;;  %v3630_v8 = vpop.f32.mrb[75].mxu1  ;;  %v7214_v21 = vmax.f32 %v6311_v42, %v6313_v43 }
 0x1d9   : > { %4310 = vst.msk [vmem:[%s6654_s22 + $0x10] sm:$0xf] %vm4305_vm3, %v4968_v30  ;;  %v4969_v6 = vpack.c.bf16 %v3990_v35, %v3990_v35  ;;  %v3858_v13 = vmax.f32 %v3184_v41, %v3627_v25  ;;  %v3185_v27 = vmax.f32 %v7212_v26, %v2956_v7  ;;  %v7216_v42 = vmax.f32 %v6327_v52, %v6329_v53 }
 0x1da   : > { %4313 = vst.msk [vmem:[%s6654_s22 + $0x1c] sm:$0xf] %vm4305_vm3, %v4971_v55  ;;  %v3931_v58 = vadd.f32 %v6637_v18, %v3860_v56  ;;  %v3861_v59 = vmax.f32 %v3187_v24, %v5419_v54 }
 0x1db   : > { %4311 = vst.msk [vmem:[%s6654_s22 + $0x14] sm:$0xf] %vm4305_vm3, %v4969_v6  ;;  %v3929_v31 = vadd.f32 %v6637_v18, %v3858_v13  ;;  %v3859_v32 = vmax.f32 %v3185_v27, %v3630_v8  ;;  %v7217_v6 = vmax.f32 %v6337_v60, %v6339_v61  ;;  %v7219_v60 = vmax.f32 %v6351_v28, %v6353_v29 }
 0x1dc   : > { %v3995_v10 = vmax.f32 %v3931_v58, 0.0  ;;  %v3932_v11 = vadd.f32 %v6637_v18, %v3861_v59 }
 0x1dd   : > { %v3993_v3 = vmax.f32 %v3929_v31, 0.0  ;;  %v3930_v62 = vadd.f32 %v6637_v18, %v3859_v32  ;;  %v5348_v15 = vpop.f32.mrb[76].mxu0  ;;  %v5422_v36 = vpop.f32.mrb[76].mxu1  ;;  %v7218_v31 = vmax.f32 %v6343_v2, %v6345_v12  ;;  %v7220_v2 = vmax.f32 %v6357_v34, %v6359_v44 }
 0x1de   : > { %v4974_v37 = vpack.c.bf16 %v3995_v10, %v3995_v10  ;;  %v3996_v16 = vmax.f32 %v3932_v11, 0.0  ;;  %v3190_v63 = vmax.f32 %v7213_v57, %v5348_v15  ;;  %v2969_v0 = vpop.f32.mrb[77].mxu0  ;;  %v3643_v4 = vpop.f32.mrb[77].mxu1 }
 0x1df   : > { %v4972_v5 = vpack.c.bf16 %v3993_v3, %v3993_v3  ;;  %v3994_v20 = vmax.f32 %v3930_v62, 0.0  ;;  %v3188_v9 = vmax.f32 %v7214_v21, %v2969_v0  ;;  %v5349_v14 = vpop.f32.mrb[78].mxu0  ;;  %v5423_v19 = vpop.f32.mrb[78].mxu1 }
 0x1e0   : > { %4316 = vst.msk [vmem:[%s6654_s22 + $0x28] sm:$0xf] %vm4305_vm3, %v4974_v37  ;;  %v4975_v22 = vpack.c.bf16 %v3996_v16, %v3996_v16  ;;  %v3864_v25 = vmax.f32 %v3190_v63, %v5422_v36  ;;  %v3191_v40 = vmax.f32 %v7215_v39, %v5349_v14  ;;  %v2972_v30 = vpop.f32.mrb[79].mxu0  ;;  %v3646_v35 = vpop.f32.mrb[79].mxu1  ;;  %v7221_v14 = vmax.f32 %v6365_v49, %v6367_v50 }
 0x1e1   : > { %4314 = vst.msk [vmem:[%s6654_s22 + $0x20] sm:$0xf] %vm4305_vm3, %v4972_v5  ;;  %v4973_v38 = vpack.c.bf16 %v3994_v20, %v3994_v20  ;;  %v3862_v41 = vmax.f32 %v3188_v9, %v3643_v4  ;;  %v3189_v43 = vmax.f32 %v7216_v42, %v2972_v30  ;;  %v7222_v30 = vmax.f32 %v6371_v1, %v6373_v33  ;;  %v7224_v1 = vld [vmem:[#allocation3_spill] sm:$0xff] }
 0x1e2   : > { %4317 = vst.msk [vmem:[%s6654_s22 + $0x2c] sm:$0xf] %vm4305_vm3, %v4975_v22  ;;  %v3935_v46 = vadd.f32 %v6637_v18, %v3864_v25  ;;  %v3865_v54 = vmax.f32 %v3191_v40, %v5423_v19  ;;  %v7223_v49 = vmax.f32 %v6377_v51, %v6379_v45  ;;  %v7225_v33 = vmax.f32 %v6383_v17, %v7224_v1  ;;  %v7241_v1 = vld [vmem:[#allocation14_spill] sm:$0xff] }
 0x1e3   : > { %4315 = vst.msk [vmem:[%s6654_s22 + $0x24] sm:$0xf] %vm4305_vm3, %v4973_v38  ;;  %v3933_v47 = vadd.f32 %v6637_v18, %v3862_v41  ;;  %v3863_v48 = vmax.f32 %v3189_v43, %v3646_v35 }
 0x1e4   : > { %v3999_v55 = vmax.f32 %v3935_v46, 0.0  ;;  %v3936_v56 = vadd.f32 %v6637_v18, %v3865_v54 }
 0x1e5   : > { %v3997_v23 = vmax.f32 %v3933_v47, 0.0  ;;  %v3934_v24 = vadd.f32 %v6637_v18, %v3863_v48  ;;  %v5352_v7 = vpop.f32.mrb[80].mxu0  ;;  %v5426_v52 = vpop.f32.mrb[80].mxu1 }
 0x1e6   : > { %v4978_v53 = vpack.c.bf16 %v3999_v55, %v3999_v55  ;;  %v4000_v8 = vmax.f32 %v3936_v56, 0.0  ;;  %v3194_v13 = vmax.f32 %v7217_v6, %v5352_v7  ;;  %v2985_v26 = vpop.f32.mrb[81].mxu0  ;;  %v3659_v27 = vpop.f32.mrb[81].mxu1 }
 0x1e7   : > { %v4976_v58 = vpack.c.bf16 %v3997_v23, %v3997_v23  ;;  %v3998_v59 = vmax.f32 %v3934_v24, 0.0  ;;  %v3192_v32 = vmax.f32 %v7218_v31, %v2985_v26  ;;  %v5353_v10 = vpop.f32.mrb[82].mxu0  ;;  %v5427_v11 = vpop.f32.mrb[82].mxu1  ;;  %v7226_v26 = vld [vmem:[#allocation4_spill] sm:$0xff] }
 0x1e8   : > { %4320 = vst.msk [vmem:[%s6654_s22 + $0x38] sm:$0xf] %vm4305_vm3, %v4978_v53  ;;  %v4979_v3 = vpack.c.bf16 %v4000_v8, %v4000_v8  ;;  %v3868_v62 = vmax.f32 %v3194_v13, %v5426_v52  ;;  %v3195_v61 = vmax.f32 %v7219_v60, %v5353_v10  ;;  %v2988_v15 = vpop.f32.mrb[83].mxu0  ;;  %v3662_v36 = vpop.f32.mrb[83].mxu1 }
 0x1e9   : > { %4318 = vst.msk [vmem:[%s6654_s22 + $0x30] sm:$0xf] %vm4305_vm3, %v4976_v58  ;;  %v4977_v37 = vpack.c.bf16 %v3998_v59, %v3998_v59  ;;  %v3866_v16 = vmax.f32 %v3192_v32, %v3659_v27  ;;  %v3193_v12 = vmax.f32 %v7220_v2, %v2988_v15  ;;  %v7227_v27 = vld [vmem:[#allocation5_spill] sm:$0xff]  ;;  %v7232_v2 = vld [vmem:[#allocation8_spill] sm:$0xff] }
 0x1ea   : > { %4321 = vst.msk [vmem:[%s6654_s22 + $0x3c] sm:$0xf] %vm4305_vm3, %v4979_v3  ;;  %v3939_v57 = vadd.f32 %v6637_v18, %v3868_v62  ;;  %v3869_v63 = vmax.f32 %v3195_v61, %v5427_v11  ;;  %v7228_v58 = vmax.f32 %v7226_v26, %v7227_v27  ;;  %v7229_v3 = vld [vmem:[#allocation6_spill] sm:$0xff]  ;;  %v7230_v62 = vld [vmem:[#allocation7_spill] sm:$0xff] }
 0x1eb   : > { %4319 = vst.msk [vmem:[%s6654_s22 + $0x34] sm:$0xf] %vm4305_vm3, %v4977_v37  ;;  %v3937_v28 = vadd.f32 %v6637_v18, %v3866_v16  ;;  %v3867_v29 = vmax.f32 %v3193_v12, %v3662_v36  ;;  %v7231_v60 = vmax.f32 %v7229_v3, %v7230_v62  ;;  %v7233_v12 = vld [vmem:[#allocation9_spill] sm:$0xff]  ;;  %v7247_v27 = vld [vmem:[#allocation18_spill] sm:$0xff] }
 0x1ec   : > { %v4003_v0 = vmax.f32 %v3939_v57, 0.0  ;;  %v3940_v4 = vadd.f32 %v6637_v18, %v3869_v63  ;;  %v7234_v57 = vmax.f32 %v7232_v2, %v7233_v12  ;;  %v7250_v12 = vld [vmem:[#allocation20_spill] sm:$0xff] }
 0x1ed   : > { %v4001_v5 = vmax.f32 %v3937_v28, 0.0  ;;  %v3938_v20 = vadd.f32 %v6637_v18, %v3867_v29  ;;  %v5356_v21 = vpop.f32.mrb[84].mxu0  ;;  %v5430_v34 = vpop.f32.mrb[84].mxu1 }
 0x1ee   : > { %v4982_v44 = vpack.c.bf16 %v4003_v0, %v4003_v0  ;;  %v4004_v9 = vmax.f32 %v3940_v4, 0.0  ;;  %v3198_v19 = vmax.f32 %v7221_v14, %v5356_v21  ;;  %v3001_v22 = vpop.f32.mrb[85].mxu0  ;;  %v3675_v25 = vpop.f32.mrb[85].mxu1 }
 0x1ef   : > { %v4980_v39 = vpack.c.bf16 %v4001_v5, %v4001_v5  ;;  %v4002_v40 = vmax.f32 %v3938_v20, 0.0  ;;  %v3196_v35 = vmax.f32 %v7222_v30, %v3001_v22  ;;  %v5357_v38 = vpop.f32.mrb[86].mxu0  ;;  %v5431_v41 = vpop.f32.mrb[86].mxu1  ;;  %v7235_v5 = vld [vmem:[#allocation10_spill] sm:$0xff]  ;;  %v7236_v20 = vld [vmem:[#allocation11_spill] sm:$0xff] }
 0x1f0   : > { %4324 = vst.msk [vmem:[%s6654_s22 + $0x48] sm:$0xf] %vm4305_vm3, %v4982_v44  ;;  %v4983_v42 = vpack.c.bf16 %v4004_v9, %v4004_v9  ;;  %v3872_v43 = vmax.f32 %v3198_v19, %v5430_v34  ;;  %v3199_v50 = vmax.f32 %v7223_v49, %v5357_v38  ;;  %v3004_v46 = vpop.f32.mrb[87].mxu0  ;;  %v3678_v54 = vpop.f32.mrb[87].mxu1  ;;  %v7237_v21 = vmax.f32 %v7235_v5, %v7236_v20  ;;  %v7253_v20 = vld [vmem:[#allocation22_spill] sm:$0xff] }
 0x1f1   : > { %4322 = vst.msk [vmem:[%s6654_s22 + $0x40] sm:$0xf] %vm4305_vm3, %v4980_v39  ;;  %v4981_v47 = vpack.c.bf16 %v4002_v40, %v4002_v40  ;;  %v3870_v48 = vmax.f32 %v3196_v35, %v3675_v25  ;;  %v3197_v55 = vmax.f32 %v7225_v33, %v3004_v46  ;;  %v7242_v33 = vld [vmem:[#allocation15_spill] sm:$0xff] }
 0x1f2   : > { %4325 = vst.msk [vmem:[%s6654_s22 + $0x4c] sm:$0xf] %vm4305_vm3, %v4983_v42  ;;  %v3943_v56 = vadd.f32 %v6637_v18, %v3872_v43  ;;  %v3873_v23 = vmax.f32 %v3199_v50, %v5431_v41  ;;  %v7238_v42 = vld [vmem:[#allocation12_spill] sm:$0xff]  ;;  %v7239_v43 = vld [vmem:[#allocation13_spill] sm:$0xff] }
 0x1f3   : > { %4323 = vst.msk [vmem:[%s6654_s22 + $0x44] sm:$0xf] %vm4305_vm3, %v4981_v47  ;;  %v3941_v51 = vadd.f32 %v6637_v18, %v3870_v48  ;;  %v3871_v45 = vmax.f32 %v3197_v55, %v3678_v54  ;;  %v7240_v49 = vmax.f32 %v7238_v42, %v7239_v43  ;;  %v7243_v55 = vmax.f32 %v7241_v1, %v7242_v33  ;;  %v7259_v43 = vld [vmem:[#allocation26_spill] sm:$0xff] }
 0x1f4   : > { %v4007_v24 = vmax.f32 %v3943_v56, 0.0  ;;  %v3944_v7 = vadd.f32 %v6637_v18, %v3873_v23 }
 0x1f5   : > { %v4005_v52 = vmax.f32 %v3941_v51, 0.0  ;;  %v3942_v53 = vadd.f32 %v6637_v18, %v3871_v45  ;;  %v5360_v8 = vpop.f32.mrb[88].mxu0  ;;  %v5434_v17 = vpop.f32.mrb[88].mxu1 }
 0x1f6   : > { %v4986_v6 = vpack.c.bf16 %v4007_v24, %v4007_v24  ;;  %v4008_v13 = vmax.f32 %v3944_v7, 0.0  ;;  %v3202_v59 = vmax.f32 %v7228_v58, %v5360_v8  ;;  %v3017_v31 = vpop.f32.mrb[89].mxu0  ;;  %v3691_v32 = vpop.f32.mrb[89].mxu1  ;;  %v7244_v7 = vld [vmem:[#allocation16_spill] sm:$0xff]  ;;  %v7248_v58 = vld [vmem:[#allocation19_spill] sm:$0xff] }
 0x1f7   : > { %v4984_v10 = vpack.c.bf16 %v4005_v52, %v4005_v52  ;;  %v4006_v11 = vmax.f32 %v3942_v53, 0.0  ;;  %v3200_v61 = vmax.f32 %v7231_v60, %v3017_v31  ;;  %v5361_v15 = vpop.f32.mrb[90].mxu0  ;;  %v5435_v36 = vpop.f32.mrb[90].mxu1  ;;  %v7245_v52 = vld [vmem:[#allocation17_spill] sm:$0xff] }
 0x1f8   : > { %4328 = vst.msk [vmem:[%s6654_s22 + $0x58] sm:$0xf] %vm4305_vm3, %v4986_v6  ;;  %v4987_v37 = vpack.c.bf16 %v4008_v13, %v4008_v13  ;;  %v3876_v16 = vmax.f32 %v3202_v59, %v5434_v17  ;;  %v3203_v63 = vmax.f32 %v7234_v57, %v5361_v15  ;;  %v3020_v28 = vpop.f32.mrb[91].mxu0  ;;  %v3694_v29 = vpop.f32.mrb[91].mxu1  ;;  %v7246_v53 = vmax.f32 %v7244_v7, %v7245_v52  ;;  %v7251_v57 = vld [vmem:[#allocation21_spill] sm:$0xff]  ;;  %v7262_v52 = vld [vmem:[#allocation28_spill] sm:$0xff] }
 0x1f9   : > { %4326 = vst.msk [vmem:[%s6654_s22 + $0x50] sm:$0xf] %vm4305_vm3, %v4984_v10  ;;  %v4985_v0 = vpack.c.bf16 %v4006_v11, %v4006_v11  ;;  %v3874_v4 = vmax.f32 %v3200_v61, %v3691_v32  ;;  %v3201_v34 = vmax.f32 %v7237_v21, %v3020_v28  ;;  %v7249_v59 = vmax.f32 %v7247_v27, %v7248_v58  ;;  %v7254_v21 = vld [vmem:[#allocation23_spill] sm:$0xff]  ;;  %v7265_v58 = vld [vmem:[#allocation30_spill] sm:$0xff] }
 0x1fa   : > { %4329 = vst.msk [vmem:[%s6654_s22 + $0x5c] sm:$0xf] %vm4305_vm3, %v4987_v37  ;;  %v3947_v44 = vadd.f32 %v6637_v18, %v3876_v16  ;;  %v3877_v9 = vmax.f32 %v3203_v63, %v5435_v36  ;;  %v7252_v63 = vmax.f32 %v7250_v12, %v7251_v57  ;;  %v7271_v57 = vld [vmem:[#allocation34_spill] sm:$0xff] }
 0x1fb   : > { %4327 = vst.msk [vmem:[%s6654_s22 + $0x54] sm:$0xf] %vm4305_vm3, %v4985_v0  ;;  %v3945_v14 = vadd.f32 %v6637_v18, %v3874_v4  ;;  %v3875_v19 = vmax.f32 %v3201_v34, %v3694_v29  ;;  %v7255_v34 = vmax.f32 %v7253_v20, %v7254_v21 }
 0x1fc   : > { %v4011_v22 = vmax.f32 %v3947_v44, 0.0  ;;  %v3948_v25 = vadd.f32 %v6637_v18, %v3877_v9 }
 0x1fd   : > { %v4009_v39 = vmax.f32 %v3945_v14, 0.0  ;;  %v3946_v40 = vadd.f32 %v6637_v18, %v3875_v19  ;;  %v5364_v30 = vpop.f32.mrb[92].mxu0  ;;  %v5438_v35 = vpop.f32.mrb[92].mxu1 }
 0x1fe   : > { %v4990_v38 = vpack.c.bf16 %v4011_v22, %v4011_v22  ;;  %v4012_v41 = vmax.f32 %v3948_v25, 0.0  ;;  %v3206_v50 = vmax.f32 %v7240_v49, %v5364_v30  ;;  %v3033_v46 = vpop.f32.mrb[93].mxu0  ;;  %v3707_v54 = vpop.f32.mrb[93].mxu1  ;;  %v7256_v25 = vld [vmem:[#allocation24_spill] sm:$0xff]  ;;  %v7260_v49 = vld [vmem:[#allocation27_spill] sm:$0xff] }
 0x1ff   : > { %v4988_v47 = vpack.c.bf16 %v4009_v39, %v4009_v39  ;;  %v4010_v48 = vmax.f32 %v3946_v40, 0.0  ;;  %v3204_v56 = vmax.f32 %v7243_v55, %v3033_v46  ;;  %v5365_v23 = vpop.f32.mrb[94].mxu0  ;;  %v5439_v51 = vpop.f32.mrb[94].mxu1  ;;  %v7257_v39 = vld [vmem:[#allocation25_spill] sm:$0xff] }
 0x200   : > { %4332 = vst.msk [vmem:[%s6654_s22 + $0x68] sm:$0xf] %vm4305_vm3, %v4990_v38  ;;  %v4991_v45 = vpack.c.bf16 %v4012_v41, %v4012_v41  ;;  %v3880_v24 = vmax.f32 %v3206_v50, %v5438_v35  ;;  %v3207_v8 = vmax.f32 %v7246_v53, %v5365_v23  ;;  %v3036_v17 = vpop.f32.mrb[95].mxu0  ;;  %v3710_v6 = vpop.f32.mrb[95].mxu1  ;;  %v7258_v40 = vmax.f32 %v7256_v25, %v7257_v39  ;;  %v7263_v53 = vld [vmem:[#allocation29_spill] sm:$0xff]  ;;  %v7274_v39 = vld [vmem:[#allocation36_spill] sm:$0xff] }
 0x201   : > { %4330 = vst.msk [vmem:[%s6654_s22 + $0x60] sm:$0xf] %vm4305_vm3, %v4988_v47  ;;  %v4989_v13 = vpack.c.bf16 %v4010_v48, %v4010_v48  ;;  %v3878_v26 = vmax.f32 %v3204_v56, %v3707_v54  ;;  %v3205_v31 = vmax.f32 %v7249_v59, %v3036_v17  ;;  %v7261_v50 = vmax.f32 %v7259_v43, %v7260_v49  ;;  %v7266_v59 = vld [vmem:[#allocation31_spill] sm:$0xff]  ;;  %v7277_v49 = vld [vmem:[#allocation38_spill] sm:$0xff] }
 0x202   : > { %4333 = vst.msk [vmem:[%s6654_s22 + $0x6c] sm:$0xf] %vm4305_vm3, %v4991_v45  ;;  %v3951_v32 = vadd.f32 %v6637_v18, %v3880_v24  ;;  %v3881_v10 = vmax.f32 %v3207_v8, %v5439_v51  ;;  %v7264_v8 = vmax.f32 %v7262_v52, %v7263_v53  ;;  %v7283_v53 = vld [vmem:[#allocation42_spill] sm:$0xff] }
 0x203   : > { %4331 = vst.msk [vmem:[%s6654_s22 + $0x64] sm:$0xf] %vm4305_vm3, %v4989_v13  ;;  %v3949_v11 = vadd.f32 %v6637_v18, %v3878_v26  ;;  %v3879_v3 = vmax.f32 %v3205_v31, %v3710_v6  ;;  %v7267_v31 = vmax.f32 %v7265_v58, %v7266_v59 }
 0x204   : > { %v4015_v62 = vmax.f32 %v3951_v32, 0.0  ;;  %v3952_v60 = vadd.f32 %v6637_v18, %v3881_v10 }
 0x205   : > { %v4013_v61 = vmax.f32 %v3949_v11, 0.0  ;;  %v3950_v15 = vadd.f32 %v6637_v18, %v3879_v3  ;;  %v5368_v36 = vpop.f32.mrb[96].mxu0  ;;  %v5442_v37 = vpop.f32.mrb[96].mxu1 }
 0x206   : > { %v4994_v16 = vpack.c.bf16 %v4015_v62, %v4015_v62  ;;  %v4016_v2 = vmax.f32 %v3952_v60, 0.0  ;;  %v3210_v28 = vmax.f32 %v7252_v63, %v5368_v36  ;;  %v3049_v29 = vpop.f32.mrb[97].mxu0  ;;  %v3723_v0 = vpop.f32.mrb[97].mxu1  ;;  %v7268_v60 = vld [vmem:[#allocation32_spill] sm:$0xff]  ;;  %v7272_v63 = vld [vmem:[#allocation35_spill] sm:$0xff] }
 0x207   : > { %v4992_v4 = vpack.c.bf16 %v4013_v61, %v4013_v61  ;;  %v4014_v5 = vmax.f32 %v3950_v15, 0.0  ;;  %v3208_v44 = vmax.f32 %v7255_v34, %v3049_v29  ;;  %v5369_v9 = vpop.f32.mrb[98].mxu0  ;;  %v5443_v14 = vpop.f32.mrb[98].mxu1  ;;  %v7269_v61 = vld [vmem:[#allocation33_spill] sm:$0xff] }
 0x208   : > { %4336 = vst.msk [vmem:[%s6654_s22 + $0x78] sm:$0xf] %vm4305_vm3, %v4994_v16  ;;  %v4995_v19 = vpack.c.bf16 %v4016_v2, %v4016_v2  ;;  %v3884_v22 = vmax.f32 %v3210_v28, %v5442_v37  ;;  %v3211_v30 = vmax.f32 %v7258_v40, %v5369_v9  ;;  %v3052_v35 = vpop.f32.mrb[99].mxu0  ;;  %v3726_v38 = vpop.f32.mrb[99].mxu1  ;;  %v7270_v15 = vmax.f32 %v7268_v60, %v7269_v61  ;;  %v7275_v40 = vld [vmem:[#allocation37_spill] sm:$0xff]  ;;  %v7286_v61 = vld [vmem:[#allocation44_spill] sm:$0xff] }
 0x209   : > { %4334 = vst.msk [vmem:[%s6654_s22 + $0x70] sm:$0xf] %vm4305_vm3, %v4992_v4  ;;  %v4993_v41 = vpack.c.bf16 %v4014_v5, %v4014_v5  ;;  %v3882_v42 = vmax.f32 %v3208_v44, %v3723_v0  ;;  %v3209_v46 = vmax.f32 %v7261_v50, %v3052_v35  ;;  %v7273_v28 = vmax.f32 %v7271_v57, %v7272_v63  ;;  %v7278_v50 = vld [vmem:[#allocation39_spill] sm:$0xff]  ;;  %v7289_v63 = vld [vmem:[#allocation46_spill] sm:$0xff] }
 0x20a   : > { %4337 = vst.msk [vmem:[%s6654_s22 + $0x7c] sm:$0xf] %vm4305_vm3, %v4995_v19  ;;  %v3955_v54 = vadd.f32 %v6637_v18, %v3884_v22  ;;  %v3885_v47 = vmax.f32 %v3211_v30, %v5443_v14  ;;  %v7276_v30 = vmax.f32 %v7274_v39, %v7275_v40  ;;  %v7295_v40 = vld [vmem:[#allocation50_spill] sm:$0xff] }
 0x20b   : > { %4335 = vst.msk [vmem:[%s6654_s22 + $0x74] sm:$0xf] %vm4305_vm3, %v4993_v41  ;;  %v3953_v48 = vadd.f32 %v6637_v18, %v3882_v42  ;;  %v3883_v1 = vmax.f32 %v3209_v46, %v3726_v38  ;;  %v7279_v46 = vmax.f32 %v7277_v49, %v7278_v50 }
 0x20c   : > { %v4019_v33 = vmax.f32 %v3955_v54, 0.0  ;;  %v3956_v55 = vadd.f32 %v6637_v18, %v3885_v47 }
 0x20d   : > { %v4017_v56 = vmax.f32 %v3953_v48, 0.0  ;;  %v3954_v23 = vadd.f32 %v6637_v18, %v3883_v1  ;;  %v5372_v51 = vpop.f32.mrb[100].mxu0  ;;  %v5446_v45 = vpop.f32.mrb[100].mxu1 }
 0x20e   : > { %v4998_v24 = vpack.c.bf16 %v4019_v33, %v4019_v33  ;;  %v4020_v7 = vmax.f32 %v3956_v55, 0.0  ;;  %v3214_v17 = vmax.f32 %v7264_v8, %v5372_v51  ;;  %v3065_v6 = vpop.f32.mrb[101].mxu0  ;;  %v3739_v13 = vpop.f32.mrb[101].mxu1  ;;  %v7280_v55 = vld [vmem:[#allocation40_spill] sm:$0xff]  ;;  %v7284_v8 = vld [vmem:[#allocation43_spill] sm:$0xff] }
 0x20f   : > { %v4996_v26 = vpack.c.bf16 %v4017_v56, %v4017_v56  ;;  %v4018_v27 = vmax.f32 %v3954_v23, 0.0  ;;  %v3212_v32 = vmax.f32 %v7267_v31, %v3065_v6  ;;  %v5373_v10 = vpop.f32.mrb[102].mxu0  ;;  %v5447_v11 = vpop.f32.mrb[102].mxu1  ;;  %v7281_v56 = vld [vmem:[#allocation41_spill] sm:$0xff] }
 0x210   : > { %4340 = vst.msk [vmem:[%s6654_s22 + $0x88] sm:$0xf] %vm4305_vm3, %v4998_v24  ;;  %v4999_v3 = vpack.c.bf16 %v4020_v7, %v4020_v7  ;;  %v3888_v62 = vmax.f32 %v3214_v17, %v5446_v45  ;;  %v3215_v36 = vmax.f32 %v7270_v15, %v5373_v10  ;;  %v3068_v37 = vpop.f32.mrb[103].mxu0  ;;  %v3742_v16 = vpop.f32.mrb[103].mxu1  ;;  %v7282_v23 = vmax.f32 %v7280_v55, %v7281_v56  ;;  %v7287_v15 = vld [vmem:[#allocation45_spill] sm:$0xff]  ;;  %v7298_v56 = vld [vmem:[#allocation52_spill] sm:$0xff] }
 0x211   : > { %4338 = vst.msk [vmem:[%s6654_s22 + $0x80] sm:$0xf] %vm4305_vm3, %v4996_v26  ;;  %v4997_v2 = vpack.c.bf16 %v4018_v27, %v4018_v27  ;;  %v3886_v12 = vmax.f32 %v3212_v32, %v3739_v13  ;;  %v3213_v29 = vmax.f32 %v7273_v28, %v3068_v37  ;;  %v7285_v17 = vmax.f32 %v7283_v53, %v7284_v8  ;;  %v7290_v28 = vld [vmem:[#allocation47_spill] sm:$0xff]  ;;  %v7301_v8 = vld [vmem:[#allocation54_spill] sm:$0xff] }
 0x212   : > { %4341 = vst.msk [vmem:[%s6654_s22 + $0x8c] sm:$0xf] %vm4305_vm3, %v4999_v3  ;;  %v3959_v0 = vadd.f32 %v6637_v18, %v3888_v62  ;;  %v3889_v4 = vmax.f32 %v3215_v36, %v5447_v11  ;;  %v7288_v36 = vmax.f32 %v7286_v61, %v7287_v15  ;;  %v7307_v15 = vld [vmem:[#allocation58_spill] sm:$0xff] }
 0x213   : > { %4339 = vst.msk [vmem:[%s6654_s22 + $0x84] sm:$0xf] %vm4305_vm3, %v4997_v2  ;;  %v3957_v5 = vadd.f32 %v6637_v18, %v3886_v12  ;;  %v3887_v20 = vmax.f32 %v3213_v29, %v3742_v16  ;;  %v7291_v29 = vmax.f32 %v7289_v63, %v7290_v28 }
 0x214   : > { %v4023_v21 = vmax.f32 %v3959_v0, 0.0  ;;  %v3960_v34 = vadd.f32 %v6637_v18, %v3889_v4 }
 0x215   : > { %v4021_v44 = vmax.f32 %v3957_v5, 0.0  ;;  %v3958_v9 = vadd.f32 %v6637_v18, %v3887_v20  ;;  %v5376_v14 = vpop.f32.mrb[104].mxu0  ;;  %v5450_v19 = vpop.f32.mrb[104].mxu1 }
 0x216   : > { %v5002_v22 = vpack.c.bf16 %v4023_v21, %v4023_v21  ;;  %v4024_v25 = vmax.f32 %v3960_v34, 0.0  ;;  %v3218_v35 = vmax.f32 %v7276_v30, %v5376_v14  ;;  %v3081_v38 = vpop.f32.mrb[105].mxu0  ;;  %v3755_v41 = vpop.f32.mrb[105].mxu1  ;;  %v7292_v34 = vld [vmem:[#allocation48_spill] sm:$0xff]  ;;  %v7296_v30 = vld [vmem:[#allocation51_spill] sm:$0xff] }
 0x217   : > { %v5000_v42 = vpack.c.bf16 %v4021_v44, %v4021_v44  ;;  %v4022_v43 = vmax.f32 %v3958_v9, 0.0  ;;  %v3216_v54 = vmax.f32 %v7279_v46, %v3081_v38  ;;  %v5377_v47 = vpop.f32.mrb[106].mxu0  ;;  %v5451_v48 = vpop.f32.mrb[106].mxu1  ;;  %v7293_v44 = vld [vmem:[#allocation49_spill] sm:$0xff] }
 0x218   : > { %4344 = vst.msk [vmem:[%s6654_s22 + $0x98] sm:$0xf] %vm4305_vm3, %v5002_v22  ;;  %v5003_v1 = vpack.c.bf16 %v4024_v25, %v4024_v25  ;;  %v3892_v33 = vmax.f32 %v3218_v35, %v5450_v19  ;;  %v3219_v51 = vmax.f32 %v7282_v23, %v5377_v47  ;;  %v3084_v45 = vpop.f32.mrb[107].mxu0  ;;  %v3758_v24 = vpop.f32.mrb[107].mxu1  ;;  %v7294_v9 = vmax.f32 %v7292_v34, %v7293_v44  ;;  %v7299_v23 = vld [vmem:[#allocation53_spill] sm:$0xff]  ;;  %v7310_v44 = vld [vmem:[#allocation60_spill] sm:$0xff] }
 0x219   : > { %4342 = vst.msk [vmem:[%s6654_s22 + $0x90] sm:$0xf] %vm4305_vm3, %v5000_v42  ;;  %v5001_v7 = vpack.c.bf16 %v4022_v43, %v4022_v43  ;;  %v3890_v52 = vmax.f32 %v3216_v54, %v3755_v41  ;;  %v3217_v6 = vmax.f32 %v7285_v17, %v3084_v45  ;;  %v7297_v35 = vmax.f32 %v7295_v40, %v7296_v30  ;;  %v7302_v17 = vld [vmem:[#allocation55_spill] sm:$0xff]  ;;  %v7313_v30 = vld [vmem:[#allocation62_spill] sm:$0xff] }
 0x21a   : > { %4345 = vst.msk [vmem:[%s6654_s22 + $0x9c] sm:$0xf] %vm4305_vm3, %v5003_v1  ;;  %v3963_v13 = vadd.f32 %v6637_v18, %v3892_v33  ;;  %v3893_v26 = vmax.f32 %v3219_v51, %v5451_v48  ;;  %v7300_v51 = vmax.f32 %v7298_v56, %v7299_v23  ;;  %v7319_v23 = vld [vmem:[#allocation66_spill] sm:$0xff] }
 0x21b   : > { %4343 = vst.msk [vmem:[%s6654_s22 + $0x94] sm:$0xf] %vm4305_vm3, %v5001_v7  ;;  %v3961_v27 = vadd.f32 %v6637_v18, %v3890_v52  ;;  %v3891_v58 = vmax.f32 %v3217_v6, %v3758_v24  ;;  %v7303_v6 = vmax.f32 %v7301_v8, %v7302_v17 }
 0x21c   : > { %v4027_v59 = vmax.f32 %v3963_v13, 0.0  ;;  %v3964_v31 = vadd.f32 %v6637_v18, %v3893_v26 }
 0x21d   : > { %v4025_v32 = vmax.f32 %v3961_v27, 0.0  ;;  %v3962_v10 = vadd.f32 %v6637_v18, %v3891_v58  ;;  %v5380_v11 = vpop.f32.mrb[108].mxu0  ;;  %v5454_v3 = vpop.f32.mrb[108].mxu1 }
 0x21e   : > { %v5006_v62 = vpack.c.bf16 %v4027_v59, %v4027_v59  ;;  %v4028_v60 = vmax.f32 %v3964_v31, 0.0  ;;  %v3222_v37 = vmax.f32 %v7288_v36, %v5380_v11  ;;  %v3097_v16 = vpop.f32.mrb[109].mxu0  ;;  %v3771_v2 = vpop.f32.mrb[109].mxu1  ;;  %v7304_v31 = vld [vmem:[#allocation56_spill] sm:$0xff]  ;;  %v7308_v36 = vld [vmem:[#allocation59_spill] sm:$0xff] }
 0x21f   : > { %v5004_v12 = vpack.c.bf16 %v4025_v32, %v4025_v32  ;;  %v4026_v57 = vmax.f32 %v3962_v10, 0.0  ;;  %v3220_v0 = vmax.f32 %v7291_v29, %v3097_v16  ;;  %v5381_v4 = vpop.f32.mrb[110].mxu0  ;;  %v5455_v5 = vpop.f32.mrb[110].mxu1  ;;  %v7305_v32 = vld [vmem:[#allocation57_spill] sm:$0xff] }
 0x220   : > { %4348 = vst.msk [vmem:[%s6654_s22 + $0xa8] sm:$0xf] %vm4305_vm3, %v5006_v62  ;;  %v5007_v20 = vpack.c.bf16 %v4028_v60, %v4028_v60  ;;  %v3896_v21 = vmax.f32 %v3222_v37, %v5454_v3  ;;  %v3223_v14 = vmax.f32 %v7294_v9, %v5381_v4  ;;  %v3100_v19 = vpop.f32.mrb[111].mxu0  ;;  %v3774_v22 = vpop.f32.mrb[111].mxu1  ;;  %v7306_v10 = vmax.f32 %v7304_v31, %v7305_v32  ;;  %v7311_v9 = vld [vmem:[#allocation61_spill] sm:$0xff]  ;;  %v7322_v32 = vld [vmem:[#allocation68_spill] sm:$0xff] }
 0x221   : > { %4346 = vst.msk [vmem:[%s6654_s22 + $0xa0] sm:$0xf] %vm4305_vm3, %v5004_v12  ;;  %v5005_v25 = vpack.c.bf16 %v4026_v57, %v4026_v57  ;;  %v3894_v39 = vmax.f32 %v3220_v0, %v3771_v2  ;;  %v3221_v38 = vmax.f32 %v7297_v35, %v3100_v19  ;;  %v7309_v37 = vmax.f32 %v7307_v15, %v7308_v36  ;;  %v7314_v35 = vld [vmem:[#allocation63_spill] sm:$0xff]  ;;  %v7325_v36 = vld [vmem:[#allocation70_spill] sm:$0xff] }
 0x222   : > { %4349 = vst.msk [vmem:[%s6654_s22 + $0xac] sm:$0xf] %vm4305_vm3, %v5007_v20  ;;  %v3967_v41 = vadd.f32 %v6637_v18, %v3896_v21  ;;  %v3897_v42 = vmax.f32 %v3223_v14, %v5455_v5  ;;  %v7312_v14 = vmax.f32 %v7310_v44, %v7311_v9  ;;  %v7331_v9 = vld [vmem:[#allocation74_spill] sm:$0xff] }
 0x223   : > { %4347 = vst.msk [vmem:[%s6654_s22 + $0xa4] sm:$0xf] %vm4305_vm3, %v5005_v25  ;;  %v3965_v43 = vadd.f32 %v6637_v18, %v3894_v39  ;;  %v3895_v49 = vmax.f32 %v3221_v38, %v3774_v22  ;;  %v7315_v38 = vmax.f32 %v7313_v30, %v7314_v35 }
 0x224   : > { %v4031_v50 = vmax.f32 %v3967_v41, 0.0  ;;  %v3968_v46 = vadd.f32 %v6637_v18, %v3897_v42 }
 0x225   : > { %v4029_v54 = vmax.f32 %v3965_v43, 0.0  ;;  %v3966_v47 = vadd.f32 %v6637_v18, %v3895_v49  ;;  %v5384_v48 = vpop.f32.mrb[112].mxu0  ;;  %v5458_v1 = vpop.f32.mrb[112].mxu1 }
 0x226   : > { %v5010_v33 = vpack.c.bf16 %v4031_v50, %v4031_v50  ;;  %v4032_v55 = vmax.f32 %v3968_v46, 0.0  ;;  %v3226_v45 = vmax.f32 %v7300_v51, %v5384_v48  ;;  %v3113_v24 = vpop.f32.mrb[113].mxu0  ;;  %v3787_v7 = vpop.f32.mrb[113].mxu1  ;;  %v7316_v46 = vld [vmem:[#allocation64_spill] sm:$0xff]  ;;  %v7320_v51 = vld [vmem:[#allocation67_spill] sm:$0xff] }
 0x227   : > { %v5008_v52 = vpack.c.bf16 %v4029_v54, %v4029_v54  ;;  %v4030_v53 = vmax.f32 %v3966_v47, 0.0  ;;  %v3224_v13 = vmax.f32 %v7303_v6, %v3113_v24  ;;  %v5385_v26 = vpop.f32.mrb[114].mxu0  ;;  %v5459_v27 = vpop.f32.mrb[114].mxu1  ;;  %v7317_v54 = vld [vmem:[#allocation65_spill] sm:$0xff] }
 0x228   : > { %4352 = vst.msk [vmem:[%s6654_s22 + $0xb8] sm:$0xf] %vm4305_vm3, %v5010_v33  ;;  %v5011_v58 = vpack.c.bf16 %v4032_v55, %v4032_v55  ;;  %v3900_v59 = vmax.f32 %v3226_v45, %v5458_v1  ;;  %v3227_v11 = vmax.f32 %v7306_v10, %v5385_v26  ;;  %v3116_v3 = vpop.f32.mrb[115].mxu0  ;;  %v3790_v62 = vpop.f32.mrb[115].mxu1  ;;  %v7318_v47 = vmax.f32 %v7316_v46, %v7317_v54  ;;  %v7323_v10 = vld [vmem:[#allocation69_spill] sm:$0xff]  ;;  %v7334_v54 = vld [vmem:[#allocation76_spill] sm:$0xff] }
 0x229   : > { %4350 = vst.msk [vmem:[%s6654_s22 + $0xb0] sm:$0xf] %vm4305_vm3, %v5008_v52  ;;  %v5009_v60 = vpack.c.bf16 %v4030_v53, %v4030_v53  ;;  %v3898_v61 = vmax.f32 %v3224_v13, %v3787_v7  ;;  %v3225_v16 = vmax.f32 %v7309_v37, %v3116_v3  ;;  %v7321_v45 = vmax.f32 %v7319_v23, %v7320_v51  ;;  %v7326_v37 = vld [vmem:[#allocation71_spill] sm:$0xff]  ;;  %v7337_v51 = vld [vmem:[#allocation78_spill] sm:$0xff] }
 0x22a   : > { %4353 = vst.msk [vmem:[%s6654_s22 + $0xbc] sm:$0xf] %vm4305_vm3, %v5011_v58  ;;  %v3971_v2 = vadd.f32 %v6637_v18, %v3900_v59  ;;  %v3901_v12 = vmax.f32 %v3227_v11, %v5459_v27  ;;  %v7324_v11 = vmax.f32 %v7322_v32, %v7323_v10  ;;  %v7343_v10 = vld [vmem:[#allocation82_spill] sm:$0xff] }
 0x22b   : > { %4351 = vst.msk [vmem:[%s6654_s22 + $0xb4] sm:$0xf] %vm4305_vm3, %v5009_v60  ;;  %v3969_v57 = vadd.f32 %v6637_v18, %v3898_v61  ;;  %v3899_v63 = vmax.f32 %v3225_v16, %v3790_v62  ;;  %v7327_v16 = vmax.f32 %v7325_v36, %v7326_v37 }
 0x22c   : > { %v4035_v28 = vmax.f32 %v3971_v2, 0.0  ;;  %v3972_v29 = vadd.f32 %v6637_v18, %v3901_v12 }
 0x22d   : > { %v4033_v0 = vmax.f32 %v3969_v57, 0.0  ;;  %v3970_v4 = vadd.f32 %v6637_v18, %v3899_v63  ;;  %v5388_v5 = vpop.f32.mrb[116].mxu0  ;;  %v5462_v20 = vpop.f32.mrb[116].mxu1 }
 0x22e   : > { %v5014_v21 = vpack.c.bf16 %v4035_v28, %v4035_v28  ;;  %v4036_v34 = vmax.f32 %v3972_v29, 0.0  ;;  %v3230_v19 = vmax.f32 %v7312_v14, %v5388_v5  ;;  %v3129_v22 = vpop.f32.mrb[117].mxu0  ;;  %v3803_v25 = vpop.f32.mrb[117].mxu1  ;;  %v7328_v29 = vld [vmem:[#allocation72_spill] sm:$0xff]  ;;  %v7332_v14 = vld [vmem:[#allocation75_spill] sm:$0xff] }
 0x22f   : > { %v5012_v39 = vpack.c.bf16 %v4033_v0, %v4033_v0  ;;  %v4034_v40 = vmax.f32 %v3970_v4, 0.0  ;;  %v3228_v41 = vmax.f32 %v7315_v38, %v3129_v22  ;;  %v5389_v42 = vpop.f32.mrb[118].mxu0  ;;  %v5463_v43 = vpop.f32.mrb[118].mxu1  ;;  %v7329_v0 = vld [vmem:[#allocation73_spill] sm:$0xff] }
 0x230   : > { %4356 = vst.msk [vmem:[%s6654_s22 + $0xc8] sm:$0xf] %vm4305_vm3, %v5014_v21  ;;  %v5015_v49 = vpack.c.bf16 %v4036_v34, %v4036_v34  ;;  %v3904_v50 = vmax.f32 %v3230_v19, %v5462_v20  ;;  %v3231_v48 = vmax.f32 %v7318_v47, %v5389_v42  ;;  %v3132_v1 = vpop.f32.mrb[119].mxu0  ;;  %v3806_v33 = vpop.f32.mrb[119].mxu1  ;;  %v7330_v4 = vmax.f32 %v7328_v29, %v7329_v0  ;;  %v7335_v47 = vld [vmem:[#allocation77_spill] sm:$0xff] }
 0x231   : > { %4354 = vst.msk [vmem:[%s6654_s22 + $0xc0] sm:$0xf] %vm4305_vm3, %v5012_v39  ;;  %v5013_v55 = vpack.c.bf16 %v4034_v40, %v4034_v40  ;;  %v3902_v56 = vmax.f32 %v3228_v41, %v3803_v25  ;;  %v3229_v24 = vmax.f32 %v7321_v45, %v3132_v1  ;;  %v7333_v19 = vmax.f32 %v7331_v9, %v7332_v14  ;;  %v7338_v45 = vld [vmem:[#allocation79_spill] sm:$0xff] }
 0x232   : > { %4357 = vst.msk [vmem:[%s6654_s22 + $0xcc] sm:$0xf] %vm4305_vm3, %v5015_v49  ;;  %v3975_v7 = vadd.f32 %v6637_v18, %v3904_v50  ;;  %v3905_v52 = vmax.f32 %v3231_v48, %v5463_v43  ;;  %v7336_v48 = vmax.f32 %v7334_v54, %v7335_v47 }
 0x233   : > { %4355 = vst.msk [vmem:[%s6654_s22 + $0xc4] sm:$0xf] %vm4305_vm3, %v5013_v55  ;;  %v3973_v53 = vadd.f32 %v6637_v18, %v3902_v56  ;;  %v3903_v8 = vmax.f32 %v3229_v24, %v3806_v33  ;;  %v7339_v24 = vmax.f32 %v7337_v51, %v7338_v45 }
 0x234   : > { %v4039_v17 = vmax.f32 %v3975_v7, 0.0  ;;  %v3976_v6 = vadd.f32 %v6637_v18, %v3905_v52 }
 0x235   : > { %v4037_v13 = vmax.f32 %v3973_v53, 0.0  ;;  %v3974_v26 = vadd.f32 %v6637_v18, %v3903_v8  ;;  %v5392_v27 = vpop.f32.mrb[120].mxu0  ;;  %v5466_v58 = vpop.f32.mrb[120].mxu1 }
 0x236   : > { %v5018_v59 = vpack.c.bf16 %v4039_v17, %v4039_v17  ;;  %v4040_v31 = vmax.f32 %v3976_v6, 0.0  ;;  %v3234_v3 = vmax.f32 %v7324_v11, %v5392_v27  ;;  %v3145_v62 = vpop.f32.mrb[121].mxu0  ;;  %v3819_v60 = vpop.f32.mrb[121].mxu1  ;;  %v7340_v6 = vld [vmem:[#allocation80_spill] sm:$0xff]  ;;  %v7344_v11 = vld [vmem:[#allocation83_spill] sm:$0xff] }
 0x237   : > { %v5016_v61 = vpack.c.bf16 %v4037_v13, %v4037_v13  ;;  %v4038_v15 = vmax.f32 %v3974_v26, 0.0  ;;  %v3232_v2 = vmax.f32 %v7327_v16, %v3145_v62  ;;  %v5393_v12 = vpop.f32.mrb[122].mxu0  ;;  %v5467_v57 = vpop.f32.mrb[122].mxu1  ;;  %v7341_v13 = vld [vmem:[#allocation81_spill] sm:$0xff] }
 0x238   : > { %4360 = vst.msk [vmem:[%s6654_s22 + $0xd8] sm:$0xf] %vm4305_vm3, %v5018_v59  ;;  %v5019_v63 = vpack.c.bf16 %v4040_v31, %v4040_v31  ;;  %v3908_v28 = vmax.f32 %v3234_v3, %v5466_v58  ;;  %v3235_v5 = vmax.f32 %v7330_v4, %v5393_v12  ;;  %v3148_v20 = vpop.f32.mrb[123].mxu0  ;;  %v3822_v21 = vpop.f32.mrb[123].mxu1  ;;  %v7342_v26 = vmax.f32 %v7340_v6, %v7341_v13 }
 0x239   : > { %4358 = vst.msk [vmem:[%s6654_s22 + $0xd0] sm:$0xf] %vm4305_vm3, %v5016_v61  ;;  %v5017_v34 = vpack.c.bf16 %v4038_v15, %v4038_v15  ;;  %v3906_v44 = vmax.f32 %v3232_v2, %v3819_v60  ;;  %v3233_v22 = vmax.f32 %v7333_v19, %v3148_v20  ;;  %v7345_v3 = vmax.f32 %v7343_v10, %v7344_v11 }
 0x23a   : > { %4361 = vst.msk [vmem:[%s6654_s22 + $0xdc] sm:$0xf] %vm4305_vm3, %v5019_v63  ;;  %v3979_v25 = vadd.f32 %v6637_v18, %v3908_v28  ;;  %v3909_v39 = vmax.f32 %v3235_v5, %v5467_v57 }
 0x23b   : > { %4359 = vst.msk [vmem:[%s6654_s22 + $0xd4] sm:$0xf] %vm4305_vm3, %v5017_v34  ;;  %v3977_v40 = vadd.f32 %v6637_v18, %v3906_v44  ;;  %v3907_v30 = vmax.f32 %v3233_v22, %v3822_v21 }
 0x23c   : > { %v4043_v35 = vmax.f32 %v3979_v25, 0.0  ;;  %v3980_v38 = vadd.f32 %v6637_v18, %v3909_v39 }
 0x23d   : > { %v4041_v41 = vmax.f32 %v3977_v40, 0.0  ;;  %v3978_v42 = vadd.f32 %v6637_v18, %v3907_v30  ;;  %v5396_v43 = vpop.f32.mrb[124].mxu0  ;;  %v5470_v49 = vpop.f32.mrb[124].mxu1 }
 0x23e   : > { %v5022_v50 = vpack.c.bf16 %v4043_v35, %v4043_v35  ;;  %v4044_v46 = vmax.f32 %v3980_v38, 0.0  ;;  %v3238_v1 = vmax.f32 %v7336_v48, %v5396_v43  ;;  %v3161_v33 = vpop.f32.mrb[125].mxu0  ;;  %v3835_v55 = vpop.f32.mrb[125].mxu1 }
 0x23f   : > { %v5020_v56 = vpack.c.bf16 %v4041_v41, %v4041_v41  ;;  %v4042_v23 = vmax.f32 %v3978_v42, 0.0  ;;  %v3236_v7 = vmax.f32 %v7339_v24, %v3161_v33  ;;  %v5397_v52 = vpop.f32.mrb[126].mxu0  ;;  %v5471_v53 = vpop.f32.mrb[126].mxu1 }
 0x240   : > { %4364 = vst.msk [vmem:[%s6654_s22 + $0xe8] sm:$0xf] %vm4305_vm3, %v5022_v50  ;;  %v5023_v8 = vpack.c.bf16 %v4044_v46, %v4044_v46  ;;  %v3912_v17 = vmax.f32 %v3238_v1, %v5470_v49  ;;  %v3239_v27 = vmax.f32 %v7342_v26, %v5397_v52  ;;  %v3164_v58 = vpop.f32.mrb[127].mxu0  ;;  %v3838_v59 = vpop.f32.mrb[127].mxu1 }
 0x241   : > { %4362 = vst.msk [vmem:[%s6654_s22 + $0xe0] sm:$0xf] %vm4305_vm3, %v5020_v56  ;;  %v5021_v31 = vpack.c.bf16 %v4042_v23, %v4042_v23  ;;  %v3910_v32 = vmax.f32 %v3236_v7, %v3835_v55  ;;  %v3237_v62 = vmax.f32 %v7345_v3, %v3164_v58 }
 0x242   : > { %4365 = vst.msk [vmem:[%s6654_s22 + $0xec] sm:$0xf] %vm4305_vm3, %v5023_v8  ;;  %v3983_v60 = vadd.f32 %v6637_v18, %v3912_v17  ;;  %v3913_v61 = vmax.f32 %v3239_v27, %v5471_v53 }
 0x243   : > { %4363 = vst.msk [vmem:[%s6654_s22 + $0xe4] sm:$0xf] %vm4305_vm3, %v5021_v31  ;;  %v3981_v15 = vadd.f32 %v6637_v18, %v3910_v32  ;;  %v3911_v36 = vmax.f32 %v3237_v62, %v3838_v59 }
 0x244   : > { %v4047_v37 = vmax.f32 %v3983_v60, 0.0  ;;  %v3984_v16 = vadd.f32 %v6637_v18, %v3913_v61 }
 0x245   : > { %v4045_v2 = vmax.f32 %v3981_v15, 0.0  ;;  %v3982_v12 = vadd.f32 %v6637_v18, %v3911_v36 }
 0x246   : > { %v5026_v57 = vpack.c.bf16 %v4047_v37, %v4047_v37  ;;  %v4048_v63 = vmax.f32 %v3984_v16, 0.0 }
 0x247   : > { %v5024_v28 = vpack.c.bf16 %v4045_v2, %v4045_v2  ;;  %v4046_v29 = vmax.f32 %v3982_v12, 0.0 }
 0x248   : > { %4368 = vst.msk [vmem:[%s6654_s22 + $0xf8] sm:$0xf] %vm4305_vm3, %v5026_v57  ;;  %v5027_v0 = vpack.c.bf16 %v4048_v63, %v4048_v63 }
 0x249   : > { %4366 = vst.msk [vmem:[%s6654_s22 + $0xf0] sm:$0xf] %vm4305_vm3, %v5024_v28  ;;  %v5025_v4 = vpack.c.bf16 %v4046_v29, %v4046_v29 }
 0x24a   : > { %4369 = vst.msk [vmem:[%s6654_s22 + $0xfc] sm:$0xf] %vm4305_vm3, %v5027_v0 }
 0x24b   : > { %4367 = vst.msk [vmem:[%s6654_s22 + $0xf4] sm:$0xf] %vm4305_vm3, %v5025_v4 }
 0x24c PF: > { %p10_p9 = scmp.ge.s32.totalorder %s5692_s16, 6   ;;  %s7346_s12 = smov %s5648_s13 }
 0x24d   : > { %s7347_s13 = smov %s5701_s19  ;;  %s7348_s14 = smov %s5692_s16 }
 0x24e   :  { %12 = sbr.rel (!%p10_p9) target bundleno = 2 (0x2), region = 111 }

// kernel: net_forward.7
= control target key start
LH: loop header
LB: loop body
LE: loop exit
PB: predicated region body
PF: predicated region fallthrough
CT: control target
= control target key end

     0   :  { %v9021_v0 = vmov 0   ;;  %vm951_vm0 = vcmask 130048   ;;  %vm6442_vm1 = vcmask 257024   ;;  %s11862_s1 = inlined_call_operand.vmem [shape: bf16[400,32], index: 1, kind: input, shape index: {}]   ;;  %s11863_s0 = inlined_call_operand.vmem [shape: bf16[4,512,400], index: 0, kind: input, shape index: {}]   ;;  %s11864_s2 = inlined_call_operand.vmem [shape: f32[1,32], index: 2, kind: input, shape index: {}]   ;;  %s11865_s3 = inlined_call_operand.vmem [shape: bf16[512,32], index: 3, kind: output, shape index: {}]  }
   0x1   :  { %1048 = vmatprep.subr.bf16.mxu0 %v9021_v0  ;;  %2459 = vmatprep.subr.bf16.mxu1 %v9021_v0  ;;  %v8202_v1 = vld [vmem:[%s11862_s1] sm:$0xff]   ;;  %v8203_v2 = vld [vmem:[%s11862_s1 + $0x8] sm:$0xff]   ;;  %v8204_v3 = vld [vmem:[%s11862_s1 + $0x10] sm:$0xff]  }
   0x2   :  { %1049 = vmatpush1.bf16.msra.mxu0 %v8202_v1  ;;  %2460 = vmatpush1.bf16.msra.mxu1 %v8202_v1  ;;  %v8205_v4 = vld [vmem:[%s11862_s1 + $0x18] sm:$0xff]   ;;  %v8206_v5 = vld [vmem:[%s11862_s1 + $0x20] sm:$0xff]   ;;  %v8207_v7 = vld [vmem:[%s11862_s1 + $0x28] sm:$0xff]  }
   0x3   :  { %1050 = vmatprep.subr.bf16.mxu0 %v9021_v0  ;;  %2461 = vmatprep.subr.bf16.mxu1 %v9021_v0  ;;  %v8220_v6 = vld [vmem:[%s11863_s0 + $0x4] ss:$16 sps:$4 sm:$0xff]   ;;  %v8209_v10 = vld [vmem:[%s11862_s1 + $0x38] sm:$0xff]   ;;  %v8211_v12 = vld [vmem:[%s11862_s1 + $0x48] sm:$0xff]  }
   0x4   :  { %v8223_v8 = vld [vmem:[%s11863_s0 + $0x404] ss:$16 sps:$4 sm:$0xff]   ;;  %1080 = vmatprep.mubr.bf16.mxu0 %v8220_v6  ;;  %v8213_v14 = vld [vmem:[%s11862_s1 + $0x58] sm:$0xff]   ;;  %v8215_v16 = vld [vmem:[%s11862_s1 + $0x68] sm:$0xff]  }
   0x5   :  { %2491 = vmatprep.mubr.bf16.mxu1 %v8223_v8  ;;  %v8208_v9 = vld [vmem:[%s11862_s1 + $0x30] sm:$0xff]   ;;  %v8210_v11 = vld [vmem:[%s11862_s1 + $0x40] sm:$0xff]   ;;  %v8217_v18 = vld [vmem:[%s11862_s1 + $0x78] sm:$0xff]  }
   0x6   :  { %1051 = vmatpush1.bf16.msra.mxu0 %v8203_v2  ;;  %2462 = vmatpush1.bf16.msra.mxu1 %v8203_v2  ;;  %v8212_v13 = vld [vmem:[%s11862_s1 + $0x50] sm:$0xff]   ;;  %v8214_v15 = vld [vmem:[%s11862_s1 + $0x60] sm:$0xff]   ;;  %v8243_v24 = vld [vmem:[%s11862_s1 + $0x88] sm:$0xff]  }
   0x7   :  { %1052 = vmatprep.subr.bf16.mxu0 %v9021_v0  ;;  %2463 = vmatprep.subr.bf16.mxu1 %v9021_v0  ;;  %v8216_v17 = vld [vmem:[%s11862_s1 + $0x70] sm:$0xff]   ;;  %v8224_v21 = vld [vmem:[%s11862_s1 + $0x80] sm:$0xff]   ;;  %v8289_v30 = vld [vmem:[%s11862_s1 + $0x98] sm:$0xff]  }
   0x8   :  { %v8218_v19 = vld [vmem:[%s11863_s0] ss:$16 sps:$4 sm:$0xff]   ;;  %v8225_v22 = vld [vmem:[%s11863_s0 + $0x24] ss:$16 sps:$4 sm:$0xff]   ;;  %v8336_v36 = vld [vmem:[%s11862_s1 + $0xa8] sm:$0xff]  }
   0x9   :  { %v8221_v20 = vld [vmem:[%s11863_s0 + $0x400] ss:$16 sps:$4 sm:$0xff]   ;;  %v8227_v23 = vld [vmem:[%s11863_s0 + $0x424] ss:$16 sps:$4 sm:$0xff]  }
   0xa   :  { %1053 = vmatpush1.bf16.msra.mxu0 %v8204_v3  ;;  %2464 = vmatpush1.bf16.msra.mxu1 %v8204_v3  ;;  %v8229_v25 = vld [vmem:[%s11863_s0 + $0x20] ss:$16 sps:$4 sm:$0xff]   ;;  %v8231_v27 = vld [vmem:[%s11863_s0 + $0x44] ss:$16 sps:$4 sm:$0xff]   ;;  %v8381_v3 = vld [vmem:[%s11862_s1 + $0xb8] sm:$0xff]  }
   0xb   :  { %1054 = vmatprep.subr.bf16.mxu0 %v9021_v0  ;;  %2465 = vmatprep.subr.bf16.mxu1 %v9021_v0  ;;  %v8230_v26 = vld [vmem:[%s11863_s0 + $0x420] ss:$16 sps:$4 sm:$0xff]   ;;  %v8233_v28 = vld [vmem:[%s11863_s0 + $0x444] ss:$16 sps:$4 sm:$0xff]  }
   0xc   :  { %v8268_v29 = vld [vmem:[%s11862_s1 + $0x90] sm:$0xff]   ;;  %v8312_v35 = vld [vmem:[%s11862_s1 + $0xa0] sm:$0xff]  }
   0xd   :  { %v8235_v31 = vld [vmem:[%s11863_s0 + $0x40] ss:$16 sps:$4 sm:$0xff]   ;;  %v8237_v33 = vld [vmem:[%s11863_s0 + $0x64] ss:$16 sps:$4 sm:$0xff]  }
   0xe   :  { %1055 = vmatpush1.bf16.msra.mxu0 %v8205_v4  ;;  %2466 = vmatpush1.bf16.msra.mxu1 %v8205_v4  ;;  %v8236_v32 = vld [vmem:[%s11863_s0 + $0x440] ss:$16 sps:$4 sm:$0xff]   ;;  %v8239_v34 = vld [vmem:[%s11863_s0 + $0x464] ss:$16 sps:$4 sm:$0xff]  }
   0xf   :  { %1056 = vmatprep.subr.bf16.mxu0 %v9021_v0  ;;  %2467 = vmatprep.subr.bf16.mxu1 %v9021_v0  ;;  %v8241_v37 = vld [vmem:[%s11863_s0 + $0x60] ss:$16 sps:$4 sm:$0xff]   ;;  %v8244_v39 = vld [vmem:[%s11863_s0 + $0x84] ss:$16 sps:$4 sm:$0xff]  }
  0x10   :  { %v8242_v38 = vld [vmem:[%s11863_s0 + $0x460] ss:$16 sps:$4 sm:$0xff]   ;;  %v8246_v40 = vld [vmem:[%s11863_s0 + $0x484] ss:$16 sps:$4 sm:$0xff]  }
  0x11   :  { %v8248_v41 = vld [vmem:[%s11863_s0 + $0x80] ss:$16 sps:$4 sm:$0xff]   ;;  %v8250_v43 = vld [vmem:[%s11863_s0 + $0xa4] ss:$16 sps:$4 sm:$0xff]  }
  0x12   :  { %1057 = vmatpush1.bf16.msra.mxu0 %v8206_v5  ;;  %2468 = vmatpush1.bf16.msra.mxu1 %v8206_v5  ;;  %v8249_v42 = vld [vmem:[%s11863_s0 + $0x480] ss:$16 sps:$4 sm:$0xff]   ;;  %v8252_v44 = vld [vmem:[%s11863_s0 + $0x4a4] ss:$16 sps:$4 sm:$0xff]  }
  0x13   :  { %1058 = vmatprep.subr.bf16.mxu0 %v9021_v0  ;;  %2469 = vmatprep.subr.bf16.mxu1 %v9021_v0  ;;  %v8254_v45 = vld [vmem:[%s11863_s0 + $0xa0] ss:$16 sps:$4 sm:$0xff]   ;;  %v8256_v47 = vld [vmem:[%s11863_s0 + $0xc4] ss:$16 sps:$4 sm:$0xff]  }
  0x14   :  { %v8255_v46 = vld [vmem:[%s11863_s0 + $0x4a0] ss:$16 sps:$4 sm:$0xff]   ;;  %v8258_v48 = vld [vmem:[%s11863_s0 + $0x4c4] ss:$16 sps:$4 sm:$0xff]  }
  0x15   :  { %v8356_v49 = vld [vmem:[%s11862_s1 + $0xb0] sm:$0xff]  }
  0x16   :  { %1059 = vmatpush1.bf16.msra.mxu0 %v8207_v7  ;;  %2470 = vmatpush1.bf16.msra.mxu1 %v8207_v7  ;;  %v8260_v50 = vld [vmem:[%s11863_s0 + $0xc0] ss:$16 sps:$4 sm:$0xff]   ;;  %v8262_v52 = vld [vmem:[%s11863_s0 + $0xe4] ss:$16 sps:$4 sm:$0xff]  }
  0x17   :  { %1060 = vmatprep.subr.bf16.mxu0 %v9021_v0  ;;  %2471 = vmatprep.subr.bf16.mxu1 %v9021_v0  ;;  %v8261_v51 = vld [vmem:[%s11863_s0 + $0x4c0] ss:$16 sps:$4 sm:$0xff]   ;;  %v8264_v53 = vld [vmem:[%s11863_s0 + $0x4e4] ss:$16 sps:$4 sm:$0xff]  }
  0x18   :  { %v8266_v54 = vld [vmem:[%s11863_s0 + $0xe0] ss:$16 sps:$4 sm:$0xff]   ;;  %v8269_v56 = vld [vmem:[%s11863_s0 + $0x104] ss:$16 sps:$4 sm:$0xff]  }
  0x19   :  { %v8267_v55 = vld [vmem:[%s11863_s0 + $0x4e0] ss:$16 sps:$4 sm:$0xff]   ;;  %v8271_v57 = vld [vmem:[%s11863_s0 + $0x504] ss:$16 sps:$4 sm:$0xff]  }
  0x1a   :  { %1061 = vmatpush1.bf16.msra.mxu0 %v8208_v9  ;;  %2472 = vmatpush1.bf16.msra.mxu1 %v8208_v9  ;;  %v8273_v58 = vld [vmem:[%s11863_s0 + $0x100] ss:$16 sps:$4 sm:$0xff]   ;;  %v8275_v60 = vld [vmem:[%s11863_s0 + $0x124] ss:$16 sps:$4 sm:$0xff]  }
  0x1b   :  { %1062 = vmatprep.subr.bf16.mxu0 %v9021_v0  ;;  %2473 = vmatprep.subr.bf16.mxu1 %v9021_v0  ;;  %v8274_v59 = vld [vmem:[%s11863_s0 + $0x500] ss:$16 sps:$4 sm:$0xff]   ;;  %v8277_v61 = vld [vmem:[%s11863_s0 + $0x524] ss:$16 sps:$4 sm:$0xff]  }
  0x1c   :  { %v8279_v62 = vld [vmem:[%s11863_s0 + $0x120] ss:$16 sps:$4 sm:$0xff]   ;;  %v8281_v1 = vld [vmem:[%s11863_s0 + $0x144] ss:$16 sps:$4 sm:$0xff]  }
  0x1d   :  { %v8280_v63 = vld [vmem:[%s11863_s0 + $0x520] ss:$16 sps:$4 sm:$0xff]   ;;  %v8283_v2 = vld [vmem:[%s11863_s0 + $0x544] ss:$16 sps:$4 sm:$0xff]  }
  0x1e   :  { %1063 = vmatpush1.bf16.msra.mxu0 %v8209_v10  ;;  %2474 = vmatpush1.bf16.msra.mxu1 %v8209_v10  ;;  %v8285_v4 = vld [vmem:[%s11863_s0 + $0x140] ss:$16 sps:$4 sm:$0xff]   ;;  %v8287_v6 = vld [vmem:[%s11863_s0 + $0x164] ss:$16 sps:$4 sm:$0xff]  }
  0x1f   :  { %1064 = vmatprep.subr.bf16.mxu0 %v9021_v0  ;;  %2475 = vmatprep.subr.bf16.mxu1 %v9021_v0  ;;  %v8286_v5 = vld [vmem:[%s11863_s0 + $0x540] ss:$16 sps:$4 sm:$0xff]   ;;  %v8290_v7 = vld [vmem:[%s11863_s0 + $0x564] ss:$16 sps:$4 sm:$0xff]  }
  0x20   :  { %v8292_v8 = vld [vmem:[%s11863_s0 + $0x160] ss:$16 sps:$4 sm:$0xff]   ;;  %v8294_v10 = vld [vmem:[%s11863_s0 + $0x184] ss:$16 sps:$4 sm:$0xff]  }
  0x21   :  { %v8293_v9 = vld [vmem:[%s11863_s0 + $0x560] ss:$16 sps:$4 sm:$0xff]  }
  0x22   :  { %1065 = vmatpush1.bf16.msra.mxu0 %v8210_v11  ;;  %2476 = vmatpush1.bf16.msra.mxu1 %v8210_v11  ;;  %v8296_v11 = vld [vmem:[%s11863_s0 + $0x584] ss:$16 sps:$4 sm:$0xff]  }
  0x23   :  { %1066 = vmatprep.subr.bf16.mxu0 %v9021_v0  ;;  %2477 = vmatprep.subr.bf16.mxu1 %v9021_v0 }
  0x26   :  { %1067 = vmatpush1.bf16.msra.mxu0 %v8211_v12  ;;  %2478 = vmatpush1.bf16.msra.mxu1 %v8211_v12  ;;  %v8298_v12 = vld [vmem:[%s11863_s0 + $0x180] ss:$16 sps:$4 sm:$0xff]  }
  0x27   :  { %1068 = vmatprep.subr.bf16.mxu0 %v9021_v0  ;;  %2479 = vmatprep.subr.bf16.mxu1 %v9021_v0 }
  0x2a   :  { %1069 = vmatpush1.bf16.msra.mxu0 %v8212_v13  ;;  %2480 = vmatpush1.bf16.msra.mxu1 %v8212_v13  ;;  %v8299_v13 = vld [vmem:[%s11863_s0 + $0x580] ss:$16 sps:$4 sm:$0xff]  }
  0x2b   :  { %1070 = vmatprep.subr.bf16.mxu0 %v9021_v0  ;;  %2481 = vmatprep.subr.bf16.mxu1 %v9021_v0 }
  0x2e   :  { %1071 = vmatpush1.bf16.msra.mxu0 %v8213_v14  ;;  %2482 = vmatpush1.bf16.msra.mxu1 %v8213_v14  ;;  %v8300_v14 = vld [vmem:[%s11863_s0 + $0x1a4] ss:$16 sps:$4 sm:$0xff]  }
  0x2f   :  { %1072 = vmatprep.subr.bf16.mxu0 %v9021_v0  ;;  %2483 = vmatprep.subr.bf16.mxu1 %v9021_v0 }
  0x32   :  { %1073 = vmatpush1.bf16.msra.mxu0 %v8214_v15  ;;  %2484 = vmatpush1.bf16.msra.mxu1 %v8214_v15  ;;  %v8302_v15 = vld [vmem:[%s11863_s0 + $0x5a4] ss:$16 sps:$4 sm:$0xff]  }
  0x33   :  { %1074 = vmatprep.subr.bf16.mxu0 %v9021_v0  ;;  %2485 = vmatprep.subr.bf16.mxu1 %v9021_v0 }
  0x36   :  { %1075 = vmatpush1.bf16.msra.mxu0 %v8215_v16  ;;  %2486 = vmatpush1.bf16.msra.mxu1 %v8215_v16  ;;  %v8400_v16 = vld [vmem:[%s11862_s1 + $0xc0] sm:$0xff]  }
  0x37   :  { %1076 = vmatprep.subr.bf16.mxu0 %v9021_v0  ;;  %2487 = vmatprep.subr.bf16.mxu1 %v9021_v0 }
  0x3a   :  { %1077 = vmatpush1.bf16.msra.mxu0 %v8216_v17  ;;  %2488 = vmatpush1.bf16.msra.mxu1 %v8216_v17  ;;  %v8304_v17 = vld [vmem:[%s11863_s0 + $0x1a0] ss:$16 sps:$4 sm:$0xff]  }
  0x3b   :  { %1078 = vmatprep.subr.bf16.mxu0 %v9021_v0  ;;  %2489 = vmatprep.subr.bf16.mxu1 %v9021_v0 }
  0x3e   :  { %1079 = vmatpush1.bf16.msra.mxu0 %v8217_v18  ;;  %2490 = vmatpush1.bf16.msra.mxu1 %v8217_v18  ;;  %v8305_v18 = vld [vmem:[%s11863_s0 + $0x5a0] ss:$16 sps:$4 sm:$0xff]  }
  0x3f   :  { %1337 = vmatprep.subr.bf16.mxu0 %v9021_v0  ;;  %2748 = vmatprep.subr.bf16.mxu1 %v9021_v0 }
  0x41   :  { %1081 = vmatmul.mubr.bf16.vlgmr.msra.gmra.mrb[0].mxu0 %v8218_v19  ;;  %2492 = vmatmul.mubr.bf16.vlgmr.msra.gmra.mrb[0].mxu1 %v8221_v20  ;;  %v8306_v19 = vld [vmem:[%s11863_s0 + $0x1c4] ss:$16 sps:$4 sm:$0xff]  }
  0x42   :  { %1338 = vmatpush1.bf16.msra.mxu0 %v8224_v21  ;;  %2749 = vmatpush1.bf16.msra.mxu1 %v8224_v21  ;;  %v8308_v20 = vld [vmem:[%s11863_s0 + $0x5c4] ss:$16 sps:$4 sm:$0xff]   ;;  %v8310_v21 = vld [vmem:[%s11863_s0 + $0x1c0] ss:$16 sps:$4 sm:$0xff]  }
  0x43   :  { %1088 = vmatprep.mubr.bf16.mxu0 %v8225_v22  ;;  %2499 = vmatprep.mubr.bf16.mxu1 %v8227_v23  ;;  %v8311_v22 = vld [vmem:[%s11863_s0 + $0x5c0] ss:$16 sps:$4 sm:$0xff]   ;;  %v8313_v23 = vld [vmem:[%s11863_s0 + $0x1e4] ss:$16 sps:$4 sm:$0xff]  }
  0x44   :  { %1339 = vmatprep.subr.bf16.mxu0 %v9021_v0  ;;  %2750 = vmatprep.subr.bf16.mxu1 %v9021_v0 }
  0x46   :  { %1340 = vmatpush1.bf16.msra.mxu0 %v8243_v24  ;;  %2751 = vmatpush1.bf16.msra.mxu1 %v8243_v24  ;;  %v8315_v24 = vld [vmem:[%s11863_s0 + $0x5e4] ss:$16 sps:$4 sm:$0xff]  }
  0x47   :  { %1341 = vmatprep.subr.bf16.mxu0 %v9021_v0  ;;  %2752 = vmatprep.subr.bf16.mxu1 %v9021_v0 }
  0x49   :  { %1089 = vmatmul.mubr.bf16.gmra.mrb[4].mxu0 %v8229_v25  ;;  %2500 = vmatmul.mubr.bf16.gmra.mrb[4].mxu1 %v8230_v26  ;;  %v8317_v25 = vld [vmem:[%s11863_s0 + $0x1e0] ss:$16 sps:$4 sm:$0xff]  }
  0x4a   :  { %1096 = vmatprep.mubr.bf16.mxu0 %v8231_v27  ;;  %2507 = vmatprep.mubr.bf16.mxu1 %v8233_v28  ;;  %v8318_v26 = vld [vmem:[%s11863_s0 + $0x5e0] ss:$16 sps:$4 sm:$0xff]   ;;  %v8319_v27 = vld [vmem:[%s11863_s0 + $0x204] ss:$16 sps:$4 sm:$0xff]  }
  0x4b   :  { %1342 = vmatpush1.bf16.msra.mxu0 %v8268_v29  ;;  %2753 = vmatpush1.bf16.msra.mxu1 %v8268_v29  ;;  %v8321_v28 = vld [vmem:[%s11863_s0 + $0x604] ss:$16 sps:$4 sm:$0xff]   ;;  %v8323_v29 = vld [vmem:[%s11863_s0 + $0x200] ss:$16 sps:$4 sm:$0xff]  }
  0x4c   :  { %1343 = vmatprep.subr.bf16.mxu0 %v9021_v0  ;;  %2754 = vmatprep.subr.bf16.mxu1 %v9021_v0 }
  0x4f   :  { %1344 = vmatpush1.bf16.msra.mxu0 %v8289_v30  ;;  %2755 = vmatpush1.bf16.msra.mxu1 %v8289_v30  ;;  %v8324_v30 = vld [vmem:[%s11863_s0 + $0x600] ss:$16 sps:$4 sm:$0xff]  }
  0x50   :  { %1345 = vmatprep.subr.bf16.mxu0 %v9021_v0  ;;  %2756 = vmatprep.subr.bf16.mxu1 %v9021_v0 }
  0x51   :  { %1097 = vmatmul.mubr.bf16.gmra.mrb[8].mxu0 %v8235_v31  ;;  %2508 = vmatmul.mubr.bf16.gmra.mrb[8].mxu1 %v8236_v32  ;;  %v8325_v31 = vld [vmem:[%s11863_s0 + $0x224] ss:$16 sps:$4 sm:$0xff]  }
  0x52   :  { %1104 = vmatprep.mubr.bf16.mxu0 %v8237_v33  ;;  %2515 = vmatprep.mubr.bf16.mxu1 %v8239_v34  ;;  %v8327_v32 = vld [vmem:[%s11863_s0 + $0x624] ss:$16 sps:$4 sm:$0xff]   ;;  %v8329_v33 = vld [vmem:[%s11863_s0 + $0x220] ss:$16 sps:$4 sm:$0xff]  }
  0x53   :  { %1346 = vmatpush1.bf16.msra.mxu0 %v8312_v35  ;;  %2757 = vmatpush1.bf16.msra.mxu1 %v8312_v35  ;;  %v8330_v34 = vld [vmem:[%s11863_s0 + $0x620] ss:$16 sps:$4 sm:$0xff]   ;;  %v8331_v35 = vld [vmem:[%s11863_s0 + $0x244] ss:$16 sps:$4 sm:$0xff]  }
  0x54   :  { %1347 = vmatprep.subr.bf16.mxu0 %v9021_v0  ;;  %2758 = vmatprep.subr.bf16.mxu1 %v9021_v0 }
  0x57   :  { %1348 = vmatpush1.bf16.msra.mxu0 %v8336_v36  ;;  %2759 = vmatpush1.bf16.msra.mxu1 %v8336_v36  ;;  %v8333_v36 = vld [vmem:[%s11863_s0 + $0x644] ss:$16 sps:$4 sm:$0xff]  }
  0x58   :  { %1349 = vmatprep.subr.bf16.mxu0 %v9021_v0  ;;  %2760 = vmatprep.subr.bf16.mxu1 %v9021_v0 }
  0x59   :  { %1105 = vmatmul.mubr.bf16.gmra.mrb[12].mxu0 %v8241_v37  ;;  %2516 = vmatmul.mubr.bf16.gmra.mrb[12].mxu1 %v8242_v38  ;;  %v8335_v37 = vld [vmem:[%s11863_s0 + $0x240] ss:$16 sps:$4 sm:$0xff]  }
  0x5a   :  { %1112 = vmatprep.mubr.bf16.mxu0 %v8244_v39  ;;  %2523 = vmatprep.mubr.bf16.mxu1 %v8246_v40  ;;  %v8337_v38 = vld [vmem:[%s11863_s0 + $0x640] ss:$16 sps:$4 sm:$0xff]   ;;  %v8338_v39 = vld [vmem:[%s11863_s0 + $0x264] ss:$16 sps:$4 sm:$0xff]  }
  0x5b   :  { %1350 = vmatpush1.bf16.msra.mxu0 %v8356_v49  ;;  %2761 = vmatpush1.bf16.msra.mxu1 %v8356_v49  ;;  %v8340_v40 = vld [vmem:[%s11863_s0 + $0x664] ss:$16 sps:$4 sm:$0xff]   ;;  %v8354_v49 = vld [vmem:[%s11863_s0 + $0x2a0] ss:$16 sps:$4 sm:$0xff]  }
  0x5c   :  { %1351 = vmatprep.subr.bf16.mxu0 %v9021_v0  ;;  %2762 = vmatprep.subr.bf16.mxu1 %v9021_v0 }
  0x5f   :  { %1352 = vmatpush1.bf16.msra.mxu0 %v8381_v3  ;;  %2763 = vmatpush1.bf16.msra.mxu1 %v8381_v3  ;;  %v8380_v3 = vld [vmem:[%s11863_s0 + $0x720] ss:$16 sps:$4 sm:$0xff]  }
  0x60   :  { %1353 = vmatprep.subr.bf16.mxu0 %v9021_v0  ;;  %2764 = vmatprep.subr.bf16.mxu1 %v9021_v0 }
  0x61   :  { %1113 = vmatmul.mubr.bf16.gmra.mrb[16].mxu0 %v8248_v41  ;;  %2524 = vmatmul.mubr.bf16.gmra.mrb[16].mxu1 %v8249_v42  ;;  %v8342_v41 = vld [vmem:[%s11863_s0 + $0x260] ss:$16 sps:$4 sm:$0xff]  }
  0x62   :  { %1120 = vmatprep.mubr.bf16.mxu0 %v8250_v43  ;;  %2531 = vmatprep.mubr.bf16.mxu1 %v8252_v44  ;;  %v8343_v42 = vld [vmem:[%s11863_s0 + $0x660] ss:$16 sps:$4 sm:$0xff]   ;;  %v8344_v43 = vld [vmem:[%s11863_s0 + $0x284] ss:$16 sps:$4 sm:$0xff]  }
  0x63   :  { %1354 = vmatpush1.bf16.msra.mxu0 %v8400_v16  ;;  %2765 = vmatpush1.bf16.msra.mxu1 %v8400_v16  ;;  %v8346_v44 = vld [vmem:[%s11863_s0 + $0x684] ss:$16 sps:$4 sm:$0xff]  }
  0x64   :  { %3934 = vmatprep.subr.bf16.mxu0 %v9021_v0  ;;  %5409 = vmatprep.subr.bf16.mxu1 %v9021_v0  ;;  %v8401_v16 = vld [vmem:[%s11863_s0 + $0x3a4] ss:$16 sps:$4 sm:$0xff]  }
  0x69   :  { %1121 = vmatmul.mubr.bf16.gmra.mrb[20].mxu0 %v8254_v45  ;;  %2532 = vmatmul.mubr.bf16.gmra.mrb[20].mxu1 %v8255_v46  ;;  %v8348_v45 = vld [vmem:[%s11863_s0 + $0x280] ss:$16 sps:$4 sm:$0xff]  }
  0x6a   :  { %1128 = vmatprep.mubr.bf16.mxu0 %v8256_v47  ;;  %2539 = vmatprep.mubr.bf16.mxu1 %v8258_v48  ;;  %v8349_v46 = vld [vmem:[%s11863_s0 + $0x680] ss:$16 sps:$4 sm:$0xff]   ;;  %v8350_v47 = vld [vmem:[%s11863_s0 + $0x2a4] ss:$16 sps:$4 sm:$0xff]  }
  0x6b   :  { %v8352_v48 = vld [vmem:[%s11863_s0 + $0x6a4] ss:$16 sps:$4 sm:$0xff]  }
  0x71   :  { %1129 = vmatmul.mubr.bf16.gmra.mrb[24].mxu0 %v8260_v50  ;;  %2540 = vmatmul.mubr.bf16.gmra.mrb[24].mxu1 %v8261_v51  ;;  %v8355_v50 = vld [vmem:[%s11863_s0 + $0x6a0] ss:$16 sps:$4 sm:$0xff]   ;;  %v8357_v51 = vld [vmem:[%s11863_s0 + $0x2c4] ss:$16 sps:$4 sm:$0xff]  }
  0x72   :  { %1136 = vmatprep.mubr.bf16.mxu0 %v8262_v52  ;;  %2547 = vmatprep.mubr.bf16.mxu1 %v8264_v53  ;;  %v8359_v52 = vld [vmem:[%s11863_s0 + $0x6c4] ss:$16 sps:$4 sm:$0xff]   ;;  %v8361_v53 = vld [vmem:[%s11863_s0 + $0x2c0] ss:$16 sps:$4 sm:$0xff]  }
  0x79   :  { %1137 = vmatmul.mubr.bf16.gmra.mrb[28].mxu0 %v8266_v54  ;;  %2548 = vmatmul.mubr.bf16.gmra.mrb[28].mxu1 %v8267_v55  ;;  %v8362_v54 = vld [vmem:[%s11863_s0 + $0x6c0] ss:$16 sps:$4 sm:$0xff]   ;;  %v8363_v55 = vld [vmem:[%s11863_s0 + $0x2e4] ss:$16 sps:$4 sm:$0xff]  }
  0x7a   :  { %1144 = vmatprep.mubr.bf16.mxu0 %v8269_v56  ;;  %2555 = vmatprep.mubr.bf16.mxu1 %v8271_v57  ;;  %v8365_v56 = vld [vmem:[%s11863_s0 + $0x6e4] ss:$16 sps:$4 sm:$0xff]   ;;  %v8367_v57 = vld [vmem:[%s11863_s0 + $0x2e0] ss:$16 sps:$4 sm:$0xff]  }
  0x81   :  { %1145 = vmatmul.mubr.bf16.gmra.mrb[32].mxu0 %v8273_v58  ;;  %2556 = vmatmul.mubr.bf16.gmra.mrb[32].mxu1 %v8274_v59  ;;  %v8368_v58 = vld [vmem:[%s11863_s0 + $0x6e0] ss:$16 sps:$4 sm:$0xff]   ;;  %v8369_v59 = vld [vmem:[%s11863_s0 + $0x304] ss:$16 sps:$4 sm:$0xff]  }
  0x82   :  { %1152 = vmatprep.mubr.bf16.mxu0 %v8275_v60  ;;  %2563 = vmatprep.mubr.bf16.mxu1 %v8277_v61  ;;  %v8371_v60 = vld [vmem:[%s11863_s0 + $0x704] ss:$16 sps:$4 sm:$0xff]   ;;  %v8373_v61 = vld [vmem:[%s11863_s0 + $0x300] ss:$16 sps:$4 sm:$0xff]  }
  0x89   :  { %1153 = vmatmul.mubr.bf16.gmra.mrb[36].mxu0 %v8279_v62  ;;  %2564 = vmatmul.mubr.bf16.gmra.mrb[36].mxu1 %v8280_v63  ;;  %v8374_v62 = vld [vmem:[%s11863_s0 + $0x700] ss:$16 sps:$4 sm:$0xff]   ;;  %v8375_v63 = vld [vmem:[%s11863_s0 + $0x324] ss:$16 sps:$4 sm:$0xff]  }
  0x8a   :  { %1160 = vmatprep.mubr.bf16.mxu0 %v8281_v1  ;;  %2571 = vmatprep.mubr.bf16.mxu1 %v8283_v2  ;;  %v8377_v1 = vld [vmem:[%s11863_s0 + $0x724] ss:$16 sps:$4 sm:$0xff]   ;;  %v8379_v2 = vld [vmem:[%s11863_s0 + $0x320] ss:$16 sps:$4 sm:$0xff]  }
  0x91   :  { %1161 = vmatmul.mubr.bf16.gmra.mrb[40].mxu0 %v8285_v4  ;;  %2572 = vmatmul.mubr.bf16.gmra.mrb[40].mxu1 %v8286_v5  ;;  %v8382_v4 = vld [vmem:[%s11863_s0 + $0x344] ss:$16 sps:$4 sm:$0xff]  }
  0x92   :  { %1168 = vmatprep.mubr.bf16.mxu0 %v8287_v6  ;;  %2579 = vmatprep.mubr.bf16.mxu1 %v8290_v7  ;;  %v8384_v5 = vld [vmem:[%s11863_s0 + $0x744] ss:$16 sps:$4 sm:$0xff]   ;;  %v8386_v6 = vld [vmem:[%s11863_s0 + $0x340] ss:$16 sps:$4 sm:$0xff]  }
  0x93   :  { %v8387_v7 = vld [vmem:[%s11863_s0 + $0x740] ss:$16 sps:$4 sm:$0xff]  }
  0x99   :  { %1169 = vmatmul.mubr.bf16.gmra.mrb[44].mxu0 %v8292_v8  ;;  %2580 = vmatmul.mubr.bf16.gmra.mrb[44].mxu1 %v8293_v9  ;;  %v8388_v8 = vld [vmem:[%s11863_s0 + $0x364] ss:$16 sps:$4 sm:$0xff]  }
  0x9a   :  { %1176 = vmatprep.mubr.bf16.mxu0 %v8294_v10  ;;  %2587 = vmatprep.mubr.bf16.mxu1 %v8296_v11  ;;  %v8390_v9 = vld [vmem:[%s11863_s0 + $0x764] ss:$16 sps:$4 sm:$0xff]   ;;  %v8392_v10 = vld [vmem:[%s11863_s0 + $0x360] ss:$16 sps:$4 sm:$0xff]  }
  0x9b   :  { %v8393_v11 = vld [vmem:[%s11863_s0 + $0x760] ss:$16 sps:$4 sm:$0xff]  }
  0xa1   :  { %1177 = vmatmul.mubr.bf16.gmra.mrb[48].mxu0 %v8298_v12  ;;  %2588 = vmatmul.mubr.bf16.gmra.mrb[48].mxu1 %v8299_v13  ;;  %v8394_v12 = vld [vmem:[%s11863_s0 + $0x384] ss:$16 sps:$4 sm:$0xff]  }
  0xa2   :  { %1184 = vmatprep.mubr.bf16.mxu0 %v8300_v14  ;;  %2595 = vmatprep.mubr.bf16.mxu1 %v8302_v15  ;;  %v8396_v13 = vld [vmem:[%s11863_s0 + $0x784] ss:$16 sps:$4 sm:$0xff]   ;;  %v8398_v14 = vld [vmem:[%s11863_s0 + $0x380] ss:$16 sps:$4 sm:$0xff]  }
  0xa3   :  { %v8399_v15 = vld [vmem:[%s11863_s0 + $0x780] ss:$16 sps:$4 sm:$0xff]  }
  0xa9   :  { %1185 = vmatmul.mubr.bf16.gmra.mrb[52].mxu0 %v8304_v17  ;;  %2596 = vmatmul.mubr.bf16.gmra.mrb[52].mxu1 %v8305_v18  ;;  %v8403_v17 = vld [vmem:[%s11863_s0 + $0x7a4] ss:$16 sps:$4 sm:$0xff]   ;;  %v8405_v18 = vld [vmem:[%s11863_s0 + $0x3a0] ss:$16 sps:$4 sm:$0xff]  }
  0xaa   :  { %1192 = vmatprep.mubr.bf16.mxu0 %v8306_v19  ;;  %2603 = vmatprep.mubr.bf16.mxu1 %v8308_v20  ;;  %v8406_v19 = vld [vmem:[%s11863_s0 + $0x7a0] ss:$16 sps:$4 sm:$0xff]   ;;  %v8407_v20 = vld [vmem:[%s11863_s0 + $0x3c4] ss:$16 sps:$4 sm:$0xff]  }
  0xb1   :  { %1193 = vmatmul.mubr.bf16.gmra.mrb[56].mxu0 %v8310_v21  ;;  %2604 = vmatmul.mubr.bf16.gmra.mrb[56].mxu1 %v8311_v22  ;;  %v8409_v21 = vld [vmem:[%s11863_s0 + $0x7c4] ss:$16 sps:$4 sm:$0xff]   ;;  %v8411_v22 = vld [vmem:[%s11863_s0 + $0x3c0] ss:$16 sps:$4 sm:$0xff]  }
  0xb2   :  { %1200 = vmatprep.mubr.bf16.mxu0 %v8313_v23  ;;  %2611 = vmatprep.mubr.bf16.mxu1 %v8315_v24  ;;  %v8412_v23 = vld [vmem:[%s11863_s0 + $0x7c0] ss:$16 sps:$4 sm:$0xff]   ;;  %v8413_v24 = vld [vmem:[%s11863_s0 + $0x3e4] ss:$16 sps:$4 sm:$0xff]  }
  0xb9   :  { %1201 = vmatmul.mubr.bf16.gmra.mrb[60].mxu0 %v8317_v25  ;;  %2612 = vmatmul.mubr.bf16.gmra.mrb[60].mxu1 %v8318_v26  ;;  %v8415_v25 = vld [vmem:[%s11863_s0 + $0x7e4] ss:$16 sps:$4 sm:$0xff]   ;;  %v8417_v26 = vld [vmem:[%s11863_s0 + $0x3e0] ss:$16 sps:$4 sm:$0xff]  }
  0xba   :  { %1208 = vmatprep.mubr.bf16.mxu0 %v8319_v27  ;;  %2619 = vmatprep.mubr.bf16.mxu1 %v8321_v28  ;;  %v8418_v27 = vld [vmem:[%s11863_s0 + $0x7e0] ss:$16 sps:$4 sm:$0xff]   ;;  %v8421_v28 = vld [vmem:[%s11863_s0 + $0xc] ss:$16 sps:$4 sm:$0xff]  }
  0xc1   :  { %1209 = vmatmul.mubr.bf16.gmra.mrb[64].mxu0 %v8323_v29  ;;  %2620 = vmatmul.mubr.bf16.gmra.mrb[64].mxu1 %v8324_v30  ;;  %v8424_v29 = vld [vmem:[%s11863_s0 + $0x40c] ss:$16 sps:$4 sm:$0xff]   ;;  %v8419_v30 = vld [vmem:[%s11863_s0 + $0x8] ss:$16 sps:$4 sm:$0xff]  }
  0xc2   :  { %1216 = vmatprep.mubr.bf16.mxu0 %v8325_v31  ;;  %2627 = vmatprep.mubr.bf16.mxu1 %v8327_v32  ;;  %v8422_v31 = vld [vmem:[%s11863_s0 + $0x408] ss:$16 sps:$4 sm:$0xff]   ;;  %v8425_v32 = vld [vmem:[%s11863_s0 + $0x2c] ss:$16 sps:$4 sm:$0xff]  }
  0xc9   :  { %1217 = vmatmul.mubr.bf16.gmra.mrb[68].mxu0 %v8329_v33  ;;  %2628 = vmatmul.mubr.bf16.gmra.mrb[68].mxu1 %v8330_v34  ;;  %v8427_v33 = vld [vmem:[%s11863_s0 + $0x42c] ss:$16 sps:$4 sm:$0xff]   ;;  %v8995_v34 = vld [vmem:[%s11862_s1] sm:$0xff]  }
  0xca   :  { %1224 = vmatprep.mubr.bf16.mxu0 %v8331_v35  ;;  %2635 = vmatprep.mubr.bf16.mxu1 %v8333_v36  ;;  %v8429_v35 = vld [vmem:[%s11863_s0 + $0x28] ss:$16 sps:$4 sm:$0xff]  }
  0xcb   :  { %v8430_v36 = vld [vmem:[%s11863_s0 + $0x428] ss:$16 sps:$4 sm:$0xff]  }
  0xd1   :  { %1225 = vmatmul.mubr.bf16.gmra.mrb[72].mxu0 %v8335_v37  ;;  %2636 = vmatmul.mubr.bf16.gmra.mrb[72].mxu1 %v8337_v38  ;;  %v8431_v37 = vld [vmem:[%s11863_s0 + $0x4c] ss:$16 sps:$4 sm:$0xff]  }
  0xd2   :  { %1232 = vmatprep.mubr.bf16.mxu0 %v8338_v39  ;;  %2643 = vmatprep.mubr.bf16.mxu1 %v8340_v40  ;;  %v8433_v38 = vld [vmem:[%s11863_s0 + $0x44c] ss:$16 sps:$4 sm:$0xff]   ;;  %v8997_v40 = vld [vmem:[%s11862_s1 + $0x10] sm:$0xff]  }
  0xd3   :  { %v8996_v39 = vld [vmem:[%s11862_s1 + $0x8] sm:$0xff]  }
  0xd9   :  { %1233 = vmatmul.mubr.bf16.gmra.mrb[76].mxu0 %v8342_v41  ;;  %2644 = vmatmul.mubr.bf16.gmra.mrb[76].mxu1 %v8343_v42  ;;  %v8435_v41 = vld [vmem:[%s11863_s0 + $0x48] ss:$16 sps:$4 sm:$0xff]  }
  0xda   :  { %1240 = vmatprep.mubr.bf16.mxu0 %v8344_v43  ;;  %2651 = vmatprep.mubr.bf16.mxu1 %v8346_v44  ;;  %v8436_v42 = vld [vmem:[%s11863_s0 + $0x448] ss:$16 sps:$4 sm:$0xff]   ;;  %v8437_v43 = vld [vmem:[%s11863_s0 + $0x6c] ss:$16 sps:$4 sm:$0xff]  }
  0xdb   :  { %v8439_v44 = vld [vmem:[%s11863_s0 + $0x46c] ss:$16 sps:$4 sm:$0xff]  }
  0xe1   :  { %1241 = vmatmul.mubr.bf16.gmra.mrb[80].mxu0 %v8348_v45  ;;  %2652 = vmatmul.mubr.bf16.gmra.mrb[80].mxu1 %v8349_v46  ;;  %v8998_v45 = vld [vmem:[%s11862_s1 + $0x18] sm:$0xff]   ;;  %v8999_v46 = vld [vmem:[%s11862_s1 + $0x20] sm:$0xff]  }
  0xe2   :  { %1248 = vmatprep.mubr.bf16.mxu0 %v8350_v47  ;;  %2659 = vmatprep.mubr.bf16.mxu1 %v8352_v48  ;;  %v8441_v47 = vld [vmem:[%s11863_s0 + $0x68] ss:$16 sps:$4 sm:$0xff]  }
  0xe3   :  { %v8442_v48 = vld [vmem:[%s11863_s0 + $0x468] ss:$16 sps:$4 sm:$0xff]  }
  0xe9   :  { %1249 = vmatmul.mubr.bf16.gmra.mrb[84].mxu0 %v8354_v49  ;;  %2660 = vmatmul.mubr.bf16.gmra.mrb[84].mxu1 %v8355_v50  ;;  %v8443_v49 = vld [vmem:[%s11863_s0 + $0x8c] ss:$16 sps:$4 sm:$0xff]  }
  0xea   :  { %1256 = vmatprep.mubr.bf16.mxu0 %v8357_v51  ;;  %2667 = vmatprep.mubr.bf16.mxu1 %v8359_v52  ;;  %v8445_v50 = vld [vmem:[%s11863_s0 + $0x48c] ss:$16 sps:$4 sm:$0xff]   ;;  %v9001_v52 = vld [vmem:[%s11862_s1 + $0x30] sm:$0xff]  }
  0xeb   :  { %v9000_v51 = vld [vmem:[%s11862_s1 + $0x28] sm:$0xff]  }
  0xf1   :  { %1257 = vmatmul.mubr.bf16.gmra.mrb[88].mxu0 %v8361_v53  ;;  %2668 = vmatmul.mubr.bf16.gmra.mrb[88].mxu1 %v8362_v54  ;;  %v8447_v53 = vld [vmem:[%s11863_s0 + $0x88] ss:$16 sps:$4 sm:$0xff]  }
  0xf2   :  { %1264 = vmatprep.mubr.bf16.mxu0 %v8363_v55  ;;  %2675 = vmatprep.mubr.bf16.mxu1 %v8365_v56  ;;  %v8448_v54 = vld [vmem:[%s11863_s0 + $0x488] ss:$16 sps:$4 sm:$0xff]   ;;  %v8449_v55 = vld [vmem:[%s11863_s0 + $0xac] ss:$16 sps:$4 sm:$0xff]  }
  0xf3   :  { %v8451_v56 = vld [vmem:[%s11863_s0 + $0x4ac] ss:$16 sps:$4 sm:$0xff]  }
  0xf9   :  { %1265 = vmatmul.mubr.bf16.gmra.mrb[92].mxu0 %v8367_v57  ;;  %2676 = vmatmul.mubr.bf16.gmra.mrb[92].mxu1 %v8368_v58  ;;  %v9002_v57 = vld [vmem:[%s11862_s1 + $0x38] sm:$0xff]   ;;  %v9003_v58 = vld [vmem:[%s11862_s1 + $0x40] sm:$0xff]  }
  0xfa   :  { %1272 = vmatprep.mubr.bf16.mxu0 %v8369_v59  ;;  %2683 = vmatprep.mubr.bf16.mxu1 %v8371_v60  ;;  %v8453_v59 = vld [vmem:[%s11863_s0 + $0xa8] ss:$16 sps:$4 sm:$0xff]  }
  0xfb   :  { %v8454_v60 = vld [vmem:[%s11863_s0 + $0x4a8] ss:$16 sps:$4 sm:$0xff]  }
 0x101   :  { %1273 = vmatmul.mubr.bf16.gmra.mrb[96].mxu0 %v8373_v61  ;;  %2684 = vmatmul.mubr.bf16.gmra.mrb[96].mxu1 %v8374_v62  ;;  %v8455_v61 = vld [vmem:[%s11863_s0 + $0xcc] ss:$16 sps:$4 sm:$0xff]  }
 0x102   :  { %1280 = vmatprep.mubr.bf16.mxu0 %v8375_v63  ;;  %2691 = vmatprep.mubr.bf16.mxu1 %v8377_v1  ;;  %v8457_v62 = vld [vmem:[%s11863_s0 + $0x4cc] ss:$16 sps:$4 sm:$0xff]   ;;  %v9005_v1 = vld [vmem:[%s11862_s1 + $0x50] sm:$0xff]  }
 0x103   :  { %v9004_v63 = vld [vmem:[%s11862_s1 + $0x48] sm:$0xff]  }
 0x109   :  { %1281 = vmatmul.mubr.bf16.gmra.mrb[100].mxu0 %v8379_v2  ;;  %2692 = vmatmul.mubr.bf16.gmra.mrb[100].mxu1 %v8380_v3  ;;  %v8459_v2 = vld [vmem:[%s11863_s0 + $0xc8] ss:$16 sps:$4 sm:$0xff]  }
 0x10a   :  { %1288 = vmatprep.mubr.bf16.mxu0 %v8382_v4  ;;  %2699 = vmatprep.mubr.bf16.mxu1 %v8384_v5  ;;  %v8460_v3 = vld [vmem:[%s11863_s0 + $0x4c8] ss:$16 sps:$4 sm:$0xff]   ;;  %v8461_v4 = vld [vmem:[%s11863_s0 + $0xec] ss:$16 sps:$4 sm:$0xff]  }
 0x10b   :  { %v8463_v5 = vld [vmem:[%s11863_s0 + $0x4ec] ss:$16 sps:$4 sm:$0xff]  }
 0x111   :  { %1289 = vmatmul.mubr.bf16.gmra.mrb[104].mxu0 %v8386_v6  ;;  %2700 = vmatmul.mubr.bf16.gmra.mrb[104].mxu1 %v8387_v7  ;;  %v9006_v6 = vld [vmem:[%s11862_s1 + $0x58] sm:$0xff]   ;;  %v9007_v7 = vld [vmem:[%s11862_s1 + $0x60] sm:$0xff]  }
 0x112   :  { %1296 = vmatprep.mubr.bf16.mxu0 %v8388_v8  ;;  %2707 = vmatprep.mubr.bf16.mxu1 %v8390_v9  ;;  %v8465_v8 = vld [vmem:[%s11863_s0 + $0xe8] ss:$16 sps:$4 sm:$0xff]  }
 0x113   :  { %v8466_v9 = vld [vmem:[%s11863_s0 + $0x4e8] ss:$16 sps:$4 sm:$0xff]  }
 0x119   :  { %1297 = vmatmul.mubr.bf16.gmra.mrb[108].mxu0 %v8392_v10  ;;  %2708 = vmatmul.mubr.bf16.gmra.mrb[108].mxu1 %v8393_v11  ;;  %v8467_v10 = vld [vmem:[%s11863_s0 + $0x10c] ss:$16 sps:$4 sm:$0xff]  }
 0x11a   :  { %1304 = vmatprep.mubr.bf16.mxu0 %v8394_v12  ;;  %2715 = vmatprep.mubr.bf16.mxu1 %v8396_v13  ;;  %v8469_v11 = vld [vmem:[%s11863_s0 + $0x50c] ss:$16 sps:$4 sm:$0xff]   ;;  %v9009_v13 = vld [vmem:[%s11862_s1 + $0x70] sm:$0xff]  }
 0x11b   :  { %v9008_v12 = vld [vmem:[%s11862_s1 + $0x68] sm:$0xff]  }
 0x121   :  { %1305 = vmatmul.mubr.bf16.gmra.mrb[112].mxu0 %v8398_v14  ;;  %2716 = vmatmul.mubr.bf16.gmra.mrb[112].mxu1 %v8399_v15  ;;  %v8471_v14 = vld [vmem:[%s11863_s0 + $0x108] ss:$16 sps:$4 sm:$0xff]  }
 0x122   :  { %1312 = vmatprep.mubr.bf16.mxu0 %v8401_v16  ;;  %2723 = vmatprep.mubr.bf16.mxu1 %v8403_v17  ;;  %v8472_v15 = vld [vmem:[%s11863_s0 + $0x508] ss:$16 sps:$4 sm:$0xff]   ;;  %v8473_v16 = vld [vmem:[%s11863_s0 + $0x12c] ss:$16 sps:$4 sm:$0xff]  }
 0x123   :  { %v8475_v17 = vld [vmem:[%s11863_s0 + $0x52c] ss:$16 sps:$4 sm:$0xff]  }
 0x129   :  { %1313 = vmatmul.mubr.bf16.gmra.mrb[116].mxu0 %v8405_v18  ;;  %2724 = vmatmul.mubr.bf16.gmra.mrb[116].mxu1 %v8406_v19  ;;  %v9010_v18 = vld [vmem:[%s11862_s1 + $0x78] sm:$0xff]  }
 0x12a   :  { %1320 = vmatprep.mubr.bf16.mxu0 %v8407_v20  ;;  %2731 = vmatprep.mubr.bf16.mxu1 %v8409_v21  ;;  %v8477_v19 = vld [vmem:[%s11863_s0 + $0x128] ss:$16 sps:$4 sm:$0xff]   ;;  %v8479_v21 = vld [vmem:[%s11863_s0 + $0x14c] ss:$16 sps:$4 sm:$0xff]  }
 0x12b   :  { %v8478_v20 = vld [vmem:[%s11863_s0 + $0x528] ss:$16 sps:$4 sm:$0xff]  }
 0x131   :  { %1321 = vmatmul.mubr.bf16.gmra.mrb[120].mxu0 %v8411_v22  ;;  %2732 = vmatmul.mubr.bf16.gmra.mrb[120].mxu1 %v8412_v23  ;;  %v8481_v22 = vld [vmem:[%s11863_s0 + $0x54c] ss:$16 sps:$4 sm:$0xff]   ;;  %v8483_v23 = vld [vmem:[%s11863_s0 + $0x148] ss:$16 sps:$4 sm:$0xff]  }
 0x132   :  { %1328 = vmatprep.mubr.bf16.mxu0 %v8413_v24  ;;  %2739 = vmatprep.mubr.bf16.mxu1 %v8415_v25  ;;  %v8484_v24 = vld [vmem:[%s11863_s0 + $0x548] ss:$16 sps:$4 sm:$0xff]   ;;  %v8485_v25 = vld [vmem:[%s11863_s0 + $0x16c] ss:$16 sps:$4 sm:$0xff]  }
 0x139   :  { %1329 = vmatmul.mubr.bf16.gmra.mrb[124].mxu0 %v8417_v26  ;;  %2740 = vmatmul.mubr.bf16.gmra.mrb[124].mxu1 %v8418_v27  ;;  %v8487_v26 = vld [vmem:[%s11863_s0 + $0x56c] ss:$16 sps:$4 sm:$0xff]   ;;  %v8489_v27 = vld [vmem:[%s11863_s0 + $0x168] ss:$16 sps:$4 sm:$0xff]  }
 0x13a   :  { %6664 = vmatprep.mubr.msk.bf16.mxu0 %vm951_vm0, %v8421_v28  ;;  %6952 = vmatprep.mubr.msk.bf16.mxu1 %vm951_vm0, %v8424_v29  ;;  %v8490_v28 = vld [vmem:[%s11863_s0 + $0x568] ss:$16 sps:$4 sm:$0xff]   ;;  %v8491_v29 = vld [vmem:[%s11863_s0 + $0x18c] ss:$16 sps:$4 sm:$0xff]  }
 0x141   :  { %1370 = vmatmul.mubr.bf16.vlgmr.msra.gmra.mrb[0].mxu0 %v8419_v30  ;;  %2781 = vmatmul.mubr.bf16.vlgmr.msra.gmra.mrb[0].mxu1 %v8422_v31  ;;  %v8493_v30 = vld [vmem:[%s11863_s0 + $0x58c] ss:$16 sps:$4 sm:$0xff]   ;;  %v8495_v31 = vld [vmem:[%s11863_s0 + $0x188] ss:$16 sps:$4 sm:$0xff]  }
 0x142   :  { %3935 = vmatpush1.bf16.msra.mxu0 %v8995_v34  ;;  %5410 = vmatpush1.bf16.msra.mxu1 %v8995_v34  ;;  %v8499_v34 = vld [vmem:[%s11863_s0 + $0x5ac] ss:$16 sps:$4 sm:$0xff]  }
 0x143   :  { %6665 = vmatprep.mubr.msk.bf16.mxu0 %vm951_vm0, %v8425_v32  ;;  %6953 = vmatprep.mubr.msk.bf16.mxu1 %vm951_vm0, %v8427_v33  ;;  %v8496_v32 = vld [vmem:[%s11863_s0 + $0x588] ss:$16 sps:$4 sm:$0xff]   ;;  %v8497_v33 = vld [vmem:[%s11863_s0 + $0x1ac] ss:$16 sps:$4 sm:$0xff]  }
 0x144   :  { %3936 = vmatprep.subr.bf16.mxu0 %v9021_v0  ;;  %5411 = vmatprep.subr.bf16.mxu1 %v9021_v0 }
 0x146   :  { %3937 = vmatpush1.bf16.msra.mxu0 %v8996_v39  ;;  %5412 = vmatpush1.bf16.msra.mxu1 %v8996_v39  ;;  %v8507_v39 = vld [vmem:[%s11863_s0 + $0x1c8] ss:$16 sps:$4 sm:$0xff]  }
 0x147   :  { %3938 = vmatprep.subr.bf16.mxu0 %v9021_v0  ;;  %5413 = vmatprep.subr.bf16.mxu1 %v9021_v0 }
 0x149   :  { %1378 = vmatmul.mubr.bf16.gmra.mrb[4].mxu0 %v8429_v35  ;;  %2789 = vmatmul.mubr.bf16.gmra.mrb[4].mxu1 %v8430_v36  ;;  %v8501_v35 = vld [vmem:[%s11863_s0 + $0x1a8] ss:$16 sps:$4 sm:$0xff]  }
 0x14a   :  { %6666 = vmatprep.mubr.msk.bf16.mxu0 %vm951_vm0, %v8431_v37  ;;  %6954 = vmatprep.mubr.msk.bf16.mxu1 %vm951_vm0, %v8433_v38  ;;  %v8502_v36 = vld [vmem:[%s11863_s0 + $0x5a8] ss:$16 sps:$4 sm:$0xff]   ;;  %v8503_v37 = vld [vmem:[%s11863_s0 + $0x1cc] ss:$16 sps:$4 sm:$0xff]  }
 0x14b   :  { %3939 = vmatpush1.bf16.msra.mxu0 %v8997_v40  ;;  %5414 = vmatpush1.bf16.msra.mxu1 %v8997_v40  ;;  %v8505_v38 = vld [vmem:[%s11863_s0 + $0x5cc] ss:$16 sps:$4 sm:$0xff]   ;;  %v8508_v40 = vld [vmem:[%s11863_s0 + $0x5c8] ss:$16 sps:$4 sm:$0xff]  }
 0x14c   :  { %3940 = vmatprep.subr.bf16.mxu0 %v9021_v0  ;;  %5415 = vmatprep.subr.bf16.mxu1 %v9021_v0 }
 0x14f   :  { %3941 = vmatpush1.bf16.msra.mxu0 %v8998_v45  ;;  %5416 = vmatpush1.bf16.msra.mxu1 %v8998_v45  ;;  %v8515_v45 = vld [vmem:[%s11863_s0 + $0x20c] ss:$16 sps:$4 sm:$0xff]  }
 0x150   :  { %3942 = vmatprep.subr.bf16.mxu0 %v9021_v0  ;;  %5417 = vmatprep.subr.bf16.mxu1 %v9021_v0 }
 0x151   :  { %1386 = vmatmul.mubr.bf16.gmra.mrb[8].mxu0 %v8435_v41  ;;  %2797 = vmatmul.mubr.bf16.gmra.mrb[8].mxu1 %v8436_v42  ;;  %v8509_v41 = vld [vmem:[%s11863_s0 + $0x1ec] ss:$16 sps:$4 sm:$0xff]  }
 0x152   :  { %6667 = vmatprep.mubr.msk.bf16.mxu0 %vm951_vm0, %v8437_v43  ;;  %6955 = vmatprep.mubr.msk.bf16.mxu1 %vm951_vm0, %v8439_v44  ;;  %v8511_v42 = vld [vmem:[%s11863_s0 + $0x5ec] ss:$16 sps:$4 sm:$0xff]   ;;  %v8513_v43 = vld [vmem:[%s11863_s0 + $0x1e8] ss:$16 sps:$4 sm:$0xff]  }
 0x153   :  { %3943 = vmatpush1.bf16.msra.mxu0 %v8999_v46  ;;  %5418 = vmatpush1.bf16.msra.mxu1 %v8999_v46  ;;  %v8514_v44 = vld [vmem:[%s11863_s0 + $0x5e8] ss:$16 sps:$4 sm:$0xff]   ;;  %v8517_v46 = vld [vmem:[%s11863_s0 + $0x60c] ss:$16 sps:$4 sm:$0xff]  }
 0x154   :  { %3944 = vmatprep.subr.bf16.mxu0 %v9021_v0  ;;  %5419 = vmatprep.subr.bf16.mxu1 %v9021_v0 }
 0x157   :  { %3945 = vmatpush1.bf16.msra.mxu0 %v9000_v51  ;;  %5420 = vmatpush1.bf16.msra.mxu1 %v9000_v51  ;;  %v8525_v51 = vld [vmem:[%s11863_s0 + $0x228] ss:$16 sps:$4 sm:$0xff]  }
 0x158   :  { %3946 = vmatprep.subr.bf16.mxu0 %v9021_v0  ;;  %5421 = vmatprep.subr.bf16.mxu1 %v9021_v0 }
 0x159   :  { %1394 = vmatmul.mubr.bf16.gmra.mrb[12].mxu0 %v8441_v47  ;;  %2805 = vmatmul.mubr.bf16.gmra.mrb[12].mxu1 %v8442_v48  ;;  %v8519_v47 = vld [vmem:[%s11863_s0 + $0x208] ss:$16 sps:$4 sm:$0xff]  }
 0x15a   :  { %6668 = vmatprep.mubr.msk.bf16.mxu0 %vm951_vm0, %v8443_v49  ;;  %6956 = vmatprep.mubr.msk.bf16.mxu1 %vm951_vm0, %v8445_v50  ;;  %v8520_v48 = vld [vmem:[%s11863_s0 + $0x608] ss:$16 sps:$4 sm:$0xff]   ;;  %v8521_v49 = vld [vmem:[%s11863_s0 + $0x22c] ss:$16 sps:$4 sm:$0xff]  }
 0x15b   :  { %3947 = vmatpush1.bf16.msra.mxu0 %v9001_v52  ;;  %5422 = vmatpush1.bf16.msra.mxu1 %v9001_v52  ;;  %v8523_v50 = vld [vmem:[%s11863_s0 + $0x62c] ss:$16 sps:$4 sm:$0xff]   ;;  %v8526_v52 = vld [vmem:[%s11863_s0 + $0x628] ss:$16 sps:$4 sm:$0xff]  }
 0x15c   :  { %3948 = vmatprep.subr.bf16.mxu0 %v9021_v0  ;;  %5423 = vmatprep.subr.bf16.mxu1 %v9021_v0 }
 0x15f   :  { %3949 = vmatpush1.bf16.msra.mxu0 %v9002_v57  ;;  %5424 = vmatpush1.bf16.msra.mxu1 %v9002_v57  ;;  %v8533_v57 = vld [vmem:[%s11863_s0 + $0x26c] ss:$16 sps:$4 sm:$0xff]  }
 0x160   :  { %3950 = vmatprep.subr.bf16.mxu0 %v9021_v0  ;;  %5425 = vmatprep.subr.bf16.mxu1 %v9021_v0 }
 0x161   :  { %1402 = vmatmul.mubr.bf16.gmra.mrb[16].mxu0 %v8447_v53  ;;  %2813 = vmatmul.mubr.bf16.gmra.mrb[16].mxu1 %v8448_v54  ;;  %v8527_v53 = vld [vmem:[%s11863_s0 + $0x24c] ss:$16 sps:$4 sm:$0xff]  }
 0x162   :  { %6669 = vmatprep.mubr.msk.bf16.mxu0 %vm951_vm0, %v8449_v55  ;;  %6957 = vmatprep.mubr.msk.bf16.mxu1 %vm951_vm0, %v8451_v56  ;;  %v8529_v54 = vld [vmem:[%s11863_s0 + $0x64c] ss:$16 sps:$4 sm:$0xff]   ;;  %v8531_v55 = vld [vmem:[%s11863_s0 + $0x248] ss:$16 sps:$4 sm:$0xff]  }
 0x163   :  { %3951 = vmatpush1.bf16.msra.mxu0 %v9003_v58  ;;  %5426 = vmatpush1.bf16.msra.mxu1 %v9003_v58  ;;  %v8532_v56 = vld [vmem:[%s11863_s0 + $0x648] ss:$16 sps:$4 sm:$0xff]   ;;  %v8535_v58 = vld [vmem:[%s11863_s0 + $0x66c] ss:$16 sps:$4 sm:$0xff]  }
 0x164   :  { %3952 = vmatprep.subr.bf16.mxu0 %v9021_v0  ;;  %5427 = vmatprep.subr.bf16.mxu1 %v9021_v0 }
 0x167   :  { %3953 = vmatpush1.bf16.msra.mxu0 %v9004_v63  ;;  %5428 = vmatpush1.bf16.msra.mxu1 %v9004_v63  ;;  %v8543_v63 = vld [vmem:[%s11863_s0 + $0x288] ss:$16 sps:$4 sm:$0xff]  }
 0x168   :  { %3954 = vmatprep.subr.bf16.mxu0 %v9021_v0  ;;  %5429 = vmatprep.subr.bf16.mxu1 %v9021_v0 }
 0x169   :  { %1410 = vmatmul.mubr.bf16.gmra.mrb[20].mxu0 %v8453_v59  ;;  %2821 = vmatmul.mubr.bf16.gmra.mrb[20].mxu1 %v8454_v60  ;;  %v8537_v59 = vld [vmem:[%s11863_s0 + $0x268] ss:$16 sps:$4 sm:$0xff]  }
 0x16a   :  { %6670 = vmatprep.mubr.msk.bf16.mxu0 %vm951_vm0, %v8455_v61  ;;  %6958 = vmatprep.mubr.msk.bf16.mxu1 %vm951_vm0, %v8457_v62  ;;  %v8538_v60 = vld [vmem:[%s11863_s0 + $0x668] ss:$16 sps:$4 sm:$0xff]   ;;  %v8539_v61 = vld [vmem:[%s11863_s0 + $0x28c] ss:$16 sps:$4 sm:$0xff]  }
 0x16b   :  { %3955 = vmatpush1.bf16.msra.mxu0 %v9005_v1  ;;  %5430 = vmatpush1.bf16.msra.mxu1 %v9005_v1  ;;  %v8541_v62 = vld [vmem:[%s11863_s0 + $0x68c] ss:$16 sps:$4 sm:$0xff]   ;;  %v8544_v1 = vld [vmem:[%s11863_s0 + $0x688] ss:$16 sps:$4 sm:$0xff]  }
 0x16c   :  { %3956 = vmatprep.subr.bf16.mxu0 %v9021_v0  ;;  %5431 = vmatprep.subr.bf16.mxu1 %v9021_v0 }
 0x16f   :  { %3957 = vmatpush1.bf16.msra.mxu0 %v9006_v6  ;;  %5432 = vmatpush1.bf16.msra.mxu1 %v9006_v6  ;;  %v8551_v6 = vld [vmem:[%s11863_s0 + $0x2cc] ss:$16 sps:$4 sm:$0xff]  }
 0x170   :  { %3958 = vmatprep.subr.bf16.mxu0 %v9021_v0  ;;  %5433 = vmatprep.subr.bf16.mxu1 %v9021_v0 }
 0x171   :  { %1418 = vmatmul.mubr.bf16.gmra.mrb[24].mxu0 %v8459_v2  ;;  %2829 = vmatmul.mubr.bf16.gmra.mrb[24].mxu1 %v8460_v3  ;;  %v8545_v2 = vld [vmem:[%s11863_s0 + $0x2ac] ss:$16 sps:$4 sm:$0xff]  }
 0x172   :  { %6671 = vmatprep.mubr.msk.bf16.mxu0 %vm951_vm0, %v8461_v4  ;;  %6959 = vmatprep.mubr.msk.bf16.mxu1 %vm951_vm0, %v8463_v5  ;;  %v8547_v3 = vld [vmem:[%s11863_s0 + $0x6ac] ss:$16 sps:$4 sm:$0xff]   ;;  %v8549_v4 = vld [vmem:[%s11863_s0 + $0x2a8] ss:$16 sps:$4 sm:$0xff]  }
 0x173   :  { %3959 = vmatpush1.bf16.msra.mxu0 %v9007_v7  ;;  %5434 = vmatpush1.bf16.msra.mxu1 %v9007_v7  ;;  %v8550_v5 = vld [vmem:[%s11863_s0 + $0x6a8] ss:$16 sps:$4 sm:$0xff]   ;;  %v8553_v7 = vld [vmem:[%s11863_s0 + $0x6cc] ss:$16 sps:$4 sm:$0xff]  }
 0x174   :  { %3960 = vmatprep.subr.bf16.mxu0 %v9021_v0  ;;  %5435 = vmatprep.subr.bf16.mxu1 %v9021_v0 }
 0x177   :  { %3961 = vmatpush1.bf16.msra.mxu0 %v9008_v12  ;;  %5436 = vmatpush1.bf16.msra.mxu1 %v9008_v12  ;;  %v8561_v12 = vld [vmem:[%s11863_s0 + $0x2e8] ss:$16 sps:$4 sm:$0xff]  }
 0x178   :  { %3962 = vmatprep.subr.bf16.mxu0 %v9021_v0  ;;  %5437 = vmatprep.subr.bf16.mxu1 %v9021_v0 }
 0x179   :  { %1426 = vmatmul.mubr.bf16.gmra.mrb[28].mxu0 %v8465_v8  ;;  %2837 = vmatmul.mubr.bf16.gmra.mrb[28].mxu1 %v8466_v9  ;;  %v8555_v8 = vld [vmem:[%s11863_s0 + $0x2c8] ss:$16 sps:$4 sm:$0xff]  }
 0x17a   :  { %6672 = vmatprep.mubr.msk.bf16.mxu0 %vm951_vm0, %v8467_v10  ;;  %6960 = vmatprep.mubr.msk.bf16.mxu1 %vm951_vm0, %v8469_v11  ;;  %v8556_v9 = vld [vmem:[%s11863_s0 + $0x6c8] ss:$16 sps:$4 sm:$0xff]   ;;  %v8557_v10 = vld [vmem:[%s11863_s0 + $0x2ec] ss:$16 sps:$4 sm:$0xff]  }
 0x17b   :  { %3963 = vmatpush1.bf16.msra.mxu0 %v9009_v13  ;;  %5438 = vmatpush1.bf16.msra.mxu1 %v9009_v13  ;;  %v8559_v11 = vld [vmem:[%s11863_s0 + $0x6ec] ss:$16 sps:$4 sm:$0xff]   ;;  %v8562_v13 = vld [vmem:[%s11863_s0 + $0x6e8] ss:$16 sps:$4 sm:$0xff]  }
 0x17c   :  { %3964 = vmatprep.subr.bf16.mxu0 %v9021_v0  ;;  %5439 = vmatprep.subr.bf16.mxu1 %v9021_v0 }
 0x17f   :  { %3965 = vmatpush1.bf16.msra.mxu0 %v9010_v18  ;;  %5440 = vmatpush1.bf16.msra.mxu1 %v9010_v18  ;;  %v8569_v18 = vld [vmem:[%s11863_s0 + $0x32c] ss:$16 sps:$4 sm:$0xff]  }
 0x180   :  { %4223 = vmatprep.subr.bf16.mxu0 %v9021_v0  ;;  %5698 = vmatprep.subr.bf16.mxu1 %v9021_v0 }
 0x181   :  { %1434 = vmatmul.mubr.bf16.gmra.mrb[32].mxu0 %v8471_v14  ;;  %2845 = vmatmul.mubr.bf16.gmra.mrb[32].mxu1 %v8472_v15  ;;  %v8563_v14 = vld [vmem:[%s11863_s0 + $0x30c] ss:$16 sps:$4 sm:$0xff]  }
 0x182   :  { %6673 = vmatprep.mubr.msk.bf16.mxu0 %vm951_vm0, %v8473_v16  ;;  %6961 = vmatprep.mubr.msk.bf16.mxu1 %vm951_vm0, %v8475_v17  ;;  %v8565_v15 = vld [vmem:[%s11863_s0 + $0x70c] ss:$16 sps:$4 sm:$0xff]   ;;  %v8567_v16 = vld [vmem:[%s11863_s0 + $0x308] ss:$16 sps:$4 sm:$0xff]  }
 0x183   :  { %v8568_v17 = vld [vmem:[%s11863_s0 + $0x708] ss:$16 sps:$4 sm:$0xff]  }
 0x189   :  { %1442 = vmatmul.mubr.bf16.gmra.mrb[36].mxu0 %v8477_v19  ;;  %2853 = vmatmul.mubr.bf16.gmra.mrb[36].mxu1 %v8478_v20  ;;  %v8571_v19 = vld [vmem:[%s11863_s0 + $0x72c] ss:$16 sps:$4 sm:$0xff]   ;;  %v8573_v20 = vld [vmem:[%s11863_s0 + $0x328] ss:$16 sps:$4 sm:$0xff]  }
 0x18a   :  { %6674 = vmatprep.mubr.msk.bf16.mxu0 %vm951_vm0, %v8479_v21  ;;  %6962 = vmatprep.mubr.msk.bf16.mxu1 %vm951_vm0, %v8481_v22  ;;  %v8574_v21 = vld [vmem:[%s11863_s0 + $0x728] ss:$16 sps:$4 sm:$0xff]   ;;  %v8575_v22 = vld [vmem:[%s11863_s0 + $0x34c] ss:$16 sps:$4 sm:$0xff]  }
 0x191   :  { %1450 = vmatmul.mubr.bf16.gmra.mrb[40].mxu0 %v8483_v23  ;;  %2861 = vmatmul.mubr.bf16.gmra.mrb[40].mxu1 %v8484_v24  ;;  %v8577_v23 = vld [vmem:[%s11863_s0 + $0x74c] ss:$16 sps:$4 sm:$0xff]   ;;  %v8579_v24 = vld [vmem:[%s11863_s0 + $0x348] ss:$16 sps:$4 sm:$0xff]  }
 0x192   :  { %6675 = vmatprep.mubr.msk.bf16.mxu0 %vm951_vm0, %v8485_v25  ;;  %6963 = vmatprep.mubr.msk.bf16.mxu1 %vm951_vm0, %v8487_v26  ;;  %v8580_v25 = vld [vmem:[%s11863_s0 + $0x748] ss:$16 sps:$4 sm:$0xff]   ;;  %v8581_v26 = vld [vmem:[%s11863_s0 + $0x36c] ss:$16 sps:$4 sm:$0xff]  }
 0x199   :  { %1458 = vmatmul.mubr.bf16.gmra.mrb[44].mxu0 %v8489_v27  ;;  %2869 = vmatmul.mubr.bf16.gmra.mrb[44].mxu1 %v8490_v28  ;;  %v8583_v27 = vld [vmem:[%s11863_s0 + $0x76c] ss:$16 sps:$4 sm:$0xff]  }
 0x19a   :  { %6676 = vmatprep.mubr.msk.bf16.mxu0 %vm951_vm0, %v8491_v29  ;;  %6964 = vmatprep.mubr.msk.bf16.mxu1 %vm951_vm0, %v8493_v30 }
 0x1a1   :  { %1466 = vmatmul.mubr.bf16.gmra.mrb[48].mxu0 %v8495_v31  ;;  %2877 = vmatmul.mubr.bf16.gmra.mrb[48].mxu1 %v8496_v32 }
 0x1a2   :  { %6677 = vmatprep.mubr.msk.bf16.mxu0 %vm951_vm0, %v8497_v33  ;;  %6965 = vmatprep.mubr.msk.bf16.mxu1 %vm951_vm0, %v8499_v34  ;;  %v8585_v33 = vld [vmem:[%s11863_s0 + $0x368] ss:$16 sps:$4 sm:$0xff]  }
 0x1a3   :  { %v8586_v34 = vld [vmem:[%s11863_s0 + $0x768] ss:$16 sps:$4 sm:$0xff]  }
 0x1a9   :  { %1474 = vmatmul.mubr.bf16.gmra.mrb[52].mxu0 %v8501_v35  ;;  %2885 = vmatmul.mubr.bf16.gmra.mrb[52].mxu1 %v8502_v36 }
 0x1aa   :  { %6678 = vmatprep.mubr.msk.bf16.mxu0 %vm951_vm0, %v8503_v37  ;;  %6966 = vmatprep.mubr.msk.bf16.mxu1 %vm951_vm0, %v8505_v38  ;;  %v8587_v37 = vld [vmem:[%s11863_s0 + $0x38c] ss:$16 sps:$4 sm:$0xff]  }
 0x1ab   :  { %v8589_v38 = vld [vmem:[%s11863_s0 + $0x78c] ss:$16 sps:$4 sm:$0xff]  }
 0x1b1   :  { %1482 = vmatmul.mubr.bf16.gmra.mrb[56].mxu0 %v8507_v39  ;;  %2893 = vmatmul.mubr.bf16.gmra.mrb[56].mxu1 %v8508_v40 }
 0x1b2   :  { %6679 = vmatprep.mubr.msk.bf16.mxu0 %vm951_vm0, %v8509_v41  ;;  %6967 = vmatprep.mubr.msk.bf16.mxu1 %vm951_vm0, %v8511_v42 }
 0x1b9   :  { %1490 = vmatmul.mubr.bf16.gmra.mrb[60].mxu0 %v8513_v43  ;;  %2901 = vmatmul.mubr.bf16.gmra.mrb[60].mxu1 %v8514_v44 }
 0x1ba   :  { %6680 = vmatprep.mubr.msk.bf16.mxu0 %vm951_vm0, %v8515_v45  ;;  %6968 = vmatprep.mubr.msk.bf16.mxu1 %vm951_vm0, %v8517_v46 }
 0x1c1   :  { %1498 = vmatmul.mubr.bf16.gmra.mrb[64].mxu0 %v8519_v47  ;;  %2909 = vmatmul.mubr.bf16.gmra.mrb[64].mxu1 %v8520_v48  ;;  %v8591_v47 = vld [vmem:[%s11863_s0 + $0x388] ss:$16 sps:$4 sm:$0xff]  }
 0x1c2   :  { %6681 = vmatprep.mubr.msk.bf16.mxu0 %vm951_vm0, %v8521_v49  ;;  %6969 = vmatprep.mubr.msk.bf16.mxu1 %vm951_vm0, %v8523_v50  ;;  %v8592_v48 = vld [vmem:[%s11863_s0 + $0x788] ss:$16 sps:$4 sm:$0xff]  }
 0x1c9   :  { %1506 = vmatmul.mubr.bf16.gmra.mrb[68].mxu0 %v8525_v51  ;;  %2917 = vmatmul.mubr.bf16.gmra.mrb[68].mxu1 %v8526_v52  ;;  %v8593_v51 = vld [vmem:[%s11863_s0 + $0x3ac] ss:$16 sps:$4 sm:$0xff]  }
 0x1ca   :  { %6682 = vmatprep.mubr.msk.bf16.mxu0 %vm951_vm0, %v8527_v53  ;;  %6970 = vmatprep.mubr.msk.bf16.mxu1 %vm951_vm0, %v8529_v54  ;;  %v8595_v52 = vld [vmem:[%s11863_s0 + $0x7ac] ss:$16 sps:$4 sm:$0xff]   ;;  %v8657_v53 = vld [vmem:[%s11863_s0 + $0x8e0] ss:$16 sps:$4 sm:$0xff]  }
 0x1d1   :  { %1514 = vmatmul.mubr.bf16.gmra.mrb[72].mxu0 %v8531_v55  ;;  %2925 = vmatmul.mubr.bf16.gmra.mrb[72].mxu1 %v8532_v56 }
 0x1d2   :  { %6683 = vmatprep.mubr.msk.bf16.mxu0 %vm951_vm0, %v8533_v57  ;;  %6971 = vmatprep.mubr.msk.bf16.mxu1 %vm951_vm0, %v8535_v58 }
 0x1d9   :  { %1522 = vmatmul.mubr.bf16.gmra.mrb[76].mxu0 %v8537_v59  ;;  %2933 = vmatmul.mubr.bf16.gmra.mrb[76].mxu1 %v8538_v60 }
 0x1da   :  { %6684 = vmatprep.mubr.msk.bf16.mxu0 %vm951_vm0, %v8539_v61  ;;  %6972 = vmatprep.mubr.msk.bf16.mxu1 %vm951_vm0, %v8541_v62  ;;  %v8597_v61 = vld [vmem:[%s11863_s0 + $0x3a8] ss:$16 sps:$4 sm:$0xff]  }
 0x1db   :  { %v8598_v62 = vld [vmem:[%s11863_s0 + $0x7a8] ss:$16 sps:$4 sm:$0xff]  }
 0x1e1   :  { %1530 = vmatmul.mubr.bf16.gmra.mrb[80].mxu0 %v8543_v63  ;;  %2941 = vmatmul.mubr.bf16.gmra.mrb[80].mxu1 %v8544_v1 }
 0x1e2   :  { %6685 = vmatprep.mubr.msk.bf16.mxu0 %vm951_vm0, %v8545_v2  ;;  %6973 = vmatprep.mubr.msk.bf16.mxu1 %vm951_vm0, %v8547_v3  ;;  %v8599_v2 = vld [vmem:[%s11863_s0 + $0x3cc] ss:$16 sps:$4 sm:$0xff]  }
 0x1e3   :  { %v8601_v3 = vld [vmem:[%s11863_s0 + $0x7cc] ss:$16 sps:$4 sm:$0xff]  }
 0x1e9   :  { %1538 = vmatmul.mubr.bf16.gmra.mrb[84].mxu0 %v8549_v4  ;;  %2949 = vmatmul.mubr.bf16.gmra.mrb[84].mxu1 %v8550_v5 }
 0x1ea   :  { %6686 = vmatprep.mubr.msk.bf16.mxu0 %vm951_vm0, %v8551_v6  ;;  %6974 = vmatprep.mubr.msk.bf16.mxu1 %vm951_vm0, %v8553_v7 }
 0x1f1   :  { %1546 = vmatmul.mubr.bf16.gmra.mrb[88].mxu0 %v8555_v8  ;;  %2957 = vmatmul.mubr.bf16.gmra.mrb[88].mxu1 %v8556_v9 }
 0x1f2   :  { %6687 = vmatprep.mubr.msk.bf16.mxu0 %vm951_vm0, %v8557_v10  ;;  %6975 = vmatprep.mubr.msk.bf16.mxu1 %vm951_vm0, %v8559_v11 }
 0x1f9   :  { %1554 = vmatmul.mubr.bf16.gmra.mrb[92].mxu0 %v8561_v12  ;;  %2965 = vmatmul.mubr.bf16.gmra.mrb[92].mxu1 %v8562_v13  ;;  %v8603_v12 = vld [vmem:[%s11863_s0 + $0x3c8] ss:$16 sps:$4 sm:$0xff]  }
 0x1fa   :  { %6688 = vmatprep.mubr.msk.bf16.mxu0 %vm951_vm0, %v8563_v14  ;;  %6976 = vmatprep.mubr.msk.bf16.mxu1 %vm951_vm0, %v8565_v15  ;;  %v8604_v13 = vld [vmem:[%s11863_s0 + $0x7c8] ss:$16 sps:$4 sm:$0xff]  }
 0x201   :  { %1562 = vmatmul.mubr.bf16.gmra.mrb[96].mxu0 %v8567_v16  ;;  %2973 = vmatmul.mubr.bf16.gmra.mrb[96].mxu1 %v8568_v17  ;;  %v8605_v16 = vld [vmem:[%s11863_s0 + $0x3ec] ss:$16 sps:$4 sm:$0xff]  }
 0x202   :  { %6689 = vmatprep.mubr.msk.bf16.mxu0 %vm951_vm0, %v8569_v18  ;;  %6977 = vmatprep.mubr.msk.bf16.mxu1 %vm951_vm0, %v8571_v19  ;;  %v8607_v17 = vld [vmem:[%s11863_s0 + $0x7ec] ss:$16 sps:$4 sm:$0xff]   ;;  %v8651_v18 = vld [vmem:[%s11863_s0 + $0x8c0] ss:$16 sps:$4 sm:$0xff]  }
 0x209   :  { %1570 = vmatmul.mubr.bf16.gmra.mrb[100].mxu0 %v8573_v20  ;;  %2981 = vmatmul.mubr.bf16.gmra.mrb[100].mxu1 %v8574_v21 }
 0x20a   :  { %6690 = vmatprep.mubr.msk.bf16.mxu0 %vm951_vm0, %v8575_v22  ;;  %6978 = vmatprep.mubr.msk.bf16.mxu1 %vm951_vm0, %v8577_v23 }
 0x211   :  { %1578 = vmatmul.mubr.bf16.gmra.mrb[104].mxu0 %v8579_v24  ;;  %2989 = vmatmul.mubr.bf16.gmra.mrb[104].mxu1 %v8580_v25 }
 0x212   :  { %6691 = vmatprep.mubr.msk.bf16.mxu0 %vm951_vm0, %v8581_v26  ;;  %6979 = vmatprep.mubr.msk.bf16.mxu1 %vm951_vm0, %v8583_v27  ;;  %v8609_v26 = vld [vmem:[%s11863_s0 + $0x3e8] ss:$16 sps:$4 sm:$0xff]  }
 0x213   :  { %v8610_v27 = vld [vmem:[%s11863_s0 + $0x7e8] ss:$16 sps:$4 sm:$0xff]  }
 0x214   :  { %v10019_v28 = vpop.f32.mrb[0].mxu0  ;;  %v10021_v29 = vpop.f32.mrb[0].mxu1 }
 0x215   :  { %v1373_v31 = vpop.f32.mrb[1].mxu0  ;;  %v2784_v32 = vpop.f32.mrb[1].mxu1 }
 0x216   :  { %v10031_v35 = vpop.f32.mrb[2].mxu0  ;;  %v10033_v36 = vpop.f32.mrb[2].mxu1 }
 0x217   :  { %v1376_v40 = vpop.f32.mrb[3].mxu0  ;;  %v2787_v41 = vpop.f32.mrb[3].mxu1 }
 0x219   :  { %1586 = vmatmul.mubr.bf16.gmra.mrb[108].mxu0 %v8585_v33  ;;  %2997 = vmatmul.mubr.bf16.gmra.mrb[108].mxu1 %v8586_v34  ;;  %v8613_v33 = vld [vmem:[%s11863_s0 + $0x804] ss:$16 sps:$4 sm:$0xff]  }
 0x21a   :  { %6692 = vmatprep.mubr.msk.bf16.mxu0 %vm951_vm0, %v8587_v37  ;;  %6980 = vmatprep.mubr.msk.bf16.mxu1 %vm951_vm0, %v8589_v38  ;;  %v8616_v34 = vld [vmem:[%s11863_s0 + $0xc04] ss:$16 sps:$4 sm:$0xff]  }
 0x21c   :  { %v10045_v42 = vpop.f32.mrb[4].mxu0  ;;  %v10047_v43 = vpop.f32.mrb[4].mxu1 }
 0x21d   :  { %v1381_v45 = vpop.f32.mrb[5].mxu0  ;;  %v2792_v46 = vpop.f32.mrb[5].mxu1 }
 0x21e   :  { %v10057_v49 = vpop.f32.mrb[6].mxu0  ;;  %v10059_v50 = vpop.f32.mrb[6].mxu1 }
 0x21f   :  { %v1384_v54 = vpop.f32.mrb[7].mxu0  ;;  %v2795_v55 = vpop.f32.mrb[7].mxu1 }
 0x221   :  { %1594 = vmatmul.mubr.bf16.gmra.mrb[112].mxu0 %v8591_v47  ;;  %3005 = vmatmul.mubr.bf16.gmra.mrb[112].mxu1 %v8592_v48 }
 0x222   :  { %6693 = vmatprep.mubr.msk.bf16.mxu0 %vm951_vm0, %v8593_v51  ;;  %6981 = vmatprep.mubr.msk.bf16.mxu1 %vm951_vm0, %v8595_v52  ;;  %v8611_v51 = vld [vmem:[%s11863_s0 + $0x800] ss:$16 sps:$4 sm:$0xff]  }
 0x223   :  { %v8614_v52 = vld [vmem:[%s11863_s0 + $0xc00] ss:$16 sps:$4 sm:$0xff]  }
 0x224   :  { %v10071_v56 = vpop.f32.mrb[8].mxu0  ;;  %v10073_v57 = vpop.f32.mrb[8].mxu1 }
 0x225   :  { %v1389_v59 = vpop.f32.mrb[9].mxu0  ;;  %v2800_v60 = vpop.f32.mrb[9].mxu1 }
 0x226   :  { %v10083_v63 = vpop.f32.mrb[10].mxu0  ;;  %v10085_v1 = vpop.f32.mrb[10].mxu1 }
 0x227   :  { %v1392_v5 = vpop.f32.mrb[11].mxu0  ;;  %v2803_v6 = vpop.f32.mrb[11].mxu1 }
 0x229   :  { %1602 = vmatmul.mubr.bf16.gmra.mrb[116].mxu0 %v8597_v61  ;;  %3013 = vmatmul.mubr.bf16.gmra.mrb[116].mxu1 %v8598_v62  ;;  %v8617_v62 = vld [vmem:[%s11863_s0 + $0x824] ss:$16 sps:$4 sm:$0xff]  }
 0x22a   :  { %6694 = vmatprep.mubr.msk.bf16.mxu0 %vm951_vm0, %v8599_v2  ;;  %6982 = vmatprep.mubr.msk.bf16.mxu1 %vm951_vm0, %v8601_v3  ;;  %v8619_v2 = vld [vmem:[%s11863_s0 + $0xc24] ss:$16 sps:$4 sm:$0xff]  }
 0x22b   :  { %v9011_v3 = vld [vmem:[%s11862_s1 + $0x80] sm:$0xff]  }
 0x22c   :  { %v10097_v7 = vpop.f32.mrb[12].mxu0  ;;  %v10099_v8 = vpop.f32.mrb[12].mxu1 }
 0x22d   :  { %v1397_v10 = vpop.f32.mrb[13].mxu0  ;;  %v2808_v11 = vpop.f32.mrb[13].mxu1 }
 0x22e   :  { %v10109_v14 = vpop.f32.mrb[14].mxu0  ;;  %v10111_v15 = vpop.f32.mrb[14].mxu1 }
 0x22f   :  { %v1400_v19 = vpop.f32.mrb[15].mxu0  ;;  %v2811_v20 = vpop.f32.mrb[15].mxu1 }
 0x230   :  { %v8623_v20 = vld [vmem:[%s11863_s0 + $0x844] ss:$16 sps:$4 sm:$0xff]  }
 0x231   :  { %1610 = vmatmul.mubr.bf16.gmra.mrb[120].mxu0 %v8603_v12  ;;  %3021 = vmatmul.mubr.bf16.gmra.mrb[120].mxu1 %v8604_v13  ;;  %v8621_v13 = vld [vmem:[%s11863_s0 + $0x820] ss:$16 sps:$4 sm:$0xff]  }
 0x232   :  { %6695 = vmatprep.mubr.msk.bf16.mxu0 %vm951_vm0, %v8605_v16  ;;  %6983 = vmatprep.mubr.msk.bf16.mxu1 %vm951_vm0, %v8607_v17  ;;  %v8622_v16 = vld [vmem:[%s11863_s0 + $0xc20] ss:$16 sps:$4 sm:$0xff]  }
 0x234   :  { %v10123_v21 = vpop.f32.mrb[16].mxu0  ;;  %v10125_v22 = vpop.f32.mrb[16].mxu1 }
 0x235   :  { %v1405_v24 = vpop.f32.mrb[17].mxu0  ;;  %v2816_v25 = vpop.f32.mrb[17].mxu1 }
 0x236   :  { %v10135_v31 = vpop.f32.mrb[18].mxu0  ;;  %v10137_v32 = vpop.f32.mrb[18].mxu1  ;;  %v8625_v24 = vld [vmem:[%s11863_s0 + $0xc44] ss:$16 sps:$4 sm:$0xff]   ;;  %v9012_v25 = vld [vmem:[%s11862_s1 + $0x88] sm:$0xff]  }
 0x237   :  { %v1408_v38 = vpop.f32.mrb[19].mxu0  ;;  %v2819_v40 = vpop.f32.mrb[19].mxu1 }
 0x239   :  { %1618 = vmatmul.mubr.bf16.gmra.mrb[124].mxu0 %v8609_v26  ;;  %3029 = vmatmul.mubr.bf16.gmra.mrb[124].mxu1 %v8610_v27 }
 0x23a   :  { %3966 = vmatprep.mubr.bf16.mxu0 %v8613_v33  ;;  %5441 = vmatprep.mubr.bf16.mxu1 %v8616_v34  ;;  %v9013_v34 = vld [vmem:[%s11862_s1 + $0x90] sm:$0xff]  }
 0x23c   :  { %v10147_v41 = vpop.f32.mrb[20].mxu0  ;;  %v10149_v45 = vpop.f32.mrb[20].mxu1 }
 0x23d   :  { %v1413_v47 = vpop.f32.mrb[21].mxu0  ;;  %v2824_v48 = vpop.f32.mrb[21].mxu1 }
 0x23e   :  { %v10159_v54 = vpop.f32.mrb[22].mxu0  ;;  %v10161_v55 = vpop.f32.mrb[22].mxu1 }
 0x23f   :  { %v1416_v60 = vpop.f32.mrb[23].mxu0  ;;  %v2827_v61 = vpop.f32.mrb[23].mxu1 }
 0x240   :  { %v8628_v60 = vld [vmem:[%s11863_s0 + $0xc40] ss:$16 sps:$4 sm:$0xff]  }
 0x241   :  { %3967 = vmatmul.mubr.bf16.vlgmr.msra.gmra.mrb[128].mxu0 %v8611_v51  ;;  %5442 = vmatmul.mubr.bf16.vlgmr.msra.gmra.mrb[128].mxu1 %v8614_v52  ;;  %v8627_v52 = vld [vmem:[%s11863_s0 + $0x840] ss:$16 sps:$4 sm:$0xff]  }
 0x242   :  { %4224 = vmatpush1.bf16.msra.mxu0 %v9011_v3  ;;  %5699 = vmatpush1.bf16.msra.mxu1 %v9011_v3  ;;  %v8631_v3 = vld [vmem:[%s11863_s0 + $0xc64] ss:$16 sps:$4 sm:$0xff]  }
 0x243   :  { %3974 = vmatprep.mubr.bf16.mxu0 %v8617_v62  ;;  %5449 = vmatprep.mubr.bf16.mxu1 %v8619_v2  ;;  %v8629_v2 = vld [vmem:[%s11863_s0 + $0x864] ss:$16 sps:$4 sm:$0xff]  }
 0x244   :  { %v10174_v5 = vpop.f32.mrb[24].mxu0  ;;  %v10176_v6 = vpop.f32.mrb[24].mxu1  ;;  %4225 = vmatprep.subr.bf16.mxu0 %v9021_v0  ;;  %5700 = vmatprep.subr.bf16.mxu1 %v9021_v0 }
 0x245   :  { %v1421_v11 = vpop.f32.mrb[25].mxu0  ;;  %v2832_v12 = vpop.f32.mrb[25].mxu1 }
 0x246   :  { %v10188_v17 = vpop.f32.mrb[26].mxu0  ;;  %v10190_v19 = vpop.f32.mrb[26].mxu1  ;;  %4226 = vmatpush1.bf16.msra.mxu0 %v9012_v25  ;;  %5701 = vmatpush1.bf16.msra.mxu1 %v9012_v25  ;;  %v9018_v11 = vld [vmem:[%s11862_s1 + $0xb8] sm:$0xff]  }
 0x247   :  { %v1424_v27 = vpop.f32.mrb[27].mxu0  ;;  %v2835_v33 = vpop.f32.mrb[27].mxu1  ;;  %4227 = vmatprep.subr.bf16.mxu0 %v9021_v0  ;;  %5702 = vmatprep.subr.bf16.mxu1 %v9021_v0 }
 0x249   :  { %3975 = vmatmul.mubr.bf16.gmra.mrb[132].mxu0 %v8621_v13  ;;  %5450 = vmatmul.mubr.bf16.gmra.mrb[132].mxu1 %v8622_v16  ;;  %v9014_v16 = vld [vmem:[%s11862_s1 + $0x98] sm:$0xff]  }
 0x24a   :  { %3982 = vmatprep.mubr.bf16.mxu0 %v8623_v20  ;;  %5457 = vmatprep.mubr.bf16.mxu1 %v8625_v24  ;;  %v9015_v20 = vld [vmem:[%s11862_s1 + $0xa0] sm:$0xff]  }
 0x24b   :  { %4228 = vmatpush1.bf16.msra.mxu0 %v9013_v34  ;;  %5703 = vmatpush1.bf16.msra.mxu1 %v9013_v34 }
 0x24c   :  { %v10208_v38 = vpop.f32.mrb[28].mxu0  ;;  %v10210_v40 = vpop.f32.mrb[28].mxu1  ;;  %4229 = vmatprep.subr.bf16.mxu0 %v9021_v0  ;;  %5704 = vmatprep.subr.bf16.mxu1 %v9021_v0 }
 0x24d   :  { %v1429_v48 = vpop.f32.mrb[29].mxu0  ;;  %v2840_v51 = vpop.f32.mrb[29].mxu1 }
 0x24e   :  { %v10222_v61 = vpop.f32.mrb[30].mxu0  ;;  %v10224_v62 = vpop.f32.mrb[30].mxu1  ;;  %v8633_v48 = vld [vmem:[%s11863_s0 + $0x860] ss:$16 sps:$4 sm:$0xff]  }
 0x24f   :  { %v1432_v12 = vpop.f32.mrb[31].mxu0  ;;  %v2843_v13 = vpop.f32.mrb[31].mxu1  ;;  %4230 = vmatpush1.bf16.msra.mxu0 %v9014_v16  ;;  %5705 = vmatpush1.bf16.msra.mxu1 %v9014_v16  ;;  %v8634_v51 = vld [vmem:[%s11863_s0 + $0xc60] ss:$16 sps:$4 sm:$0xff]  }
 0x250   :  { %4231 = vmatprep.subr.bf16.mxu0 %v9021_v0  ;;  %5706 = vmatprep.subr.bf16.mxu1 %v9021_v0  ;;  %v8641_v12 = vld [vmem:[%s11863_s0 + $0x8a4] ss:$16 sps:$4 sm:$0xff]  }
 0x251   :  { %3983 = vmatmul.mubr.bf16.gmra.mrb[136].mxu0 %v8627_v52  ;;  %5458 = vmatmul.mubr.bf16.gmra.mrb[136].mxu1 %v8628_v60 }
 0x252   :  { %3990 = vmatprep.mubr.bf16.mxu0 %v8629_v2  ;;  %5465 = vmatprep.mubr.bf16.mxu1 %v8631_v3  ;;  %v8635_v2 = vld [vmem:[%s11863_s0 + $0x884] ss:$16 sps:$4 sm:$0xff]  }
 0x253   :  { %4232 = vmatpush1.bf16.msra.mxu0 %v9015_v20  ;;  %5707 = vmatpush1.bf16.msra.mxu1 %v9015_v20  ;;  %v8637_v3 = vld [vmem:[%s11863_s0 + $0xc84] ss:$16 sps:$4 sm:$0xff]   ;;  %v9016_v20 = vld [vmem:[%s11862_s1 + $0xa8] sm:$0xff]  }
 0x254   :  { %v10242_v24 = vpop.f32.mrb[32].mxu0  ;;  %v10244_v25 = vpop.f32.mrb[32].mxu1  ;;  %4233 = vmatprep.subr.bf16.mxu0 %v9021_v0  ;;  %5708 = vmatprep.subr.bf16.mxu1 %v9021_v0 }
 0x255   :  { %v1437_v33 = vpop.f32.mrb[33].mxu0  ;;  %v2848_v34 = vpop.f32.mrb[33].mxu1 }
 0x256   :  { %v10256_v52 = vpop.f32.mrb[34].mxu0  ;;  %v10258_v60 = vpop.f32.mrb[34].mxu1  ;;  %v9017_v33 = vld [vmem:[%s11862_s1 + $0xb0] sm:$0xff]  }
 0x257   :  { %v1440_v13 = vpop.f32.mrb[35].mxu0  ;;  %v2851_v16 = vpop.f32.mrb[35].mxu1  ;;  %4234 = vmatpush1.bf16.msra.mxu0 %v9016_v20  ;;  %5709 = vmatpush1.bf16.msra.mxu1 %v9016_v20 }
 0x258   :  { %4235 = vmatprep.subr.bf16.mxu0 %v9021_v0  ;;  %5710 = vmatprep.subr.bf16.mxu1 %v9021_v0  ;;  %v8640_v16 = vld [vmem:[%s11863_s0 + $0xc80] ss:$16 sps:$4 sm:$0xff]  }
 0x259   :  { %3991 = vmatmul.mubr.bf16.gmra.mrb[140].mxu0 %v8633_v48  ;;  %5466 = vmatmul.mubr.bf16.gmra.mrb[140].mxu1 %v8634_v51 }
 0x25a   :  { %3998 = vmatprep.mubr.bf16.mxu0 %v8635_v2  ;;  %5473 = vmatprep.mubr.bf16.mxu1 %v8637_v3  ;;  %v8639_v3 = vld [vmem:[%s11863_s0 + $0x880] ss:$16 sps:$4 sm:$0xff]  }
 0x25b   :  { %4236 = vmatpush1.bf16.msra.mxu0 %v9017_v33  ;;  %5711 = vmatpush1.bf16.msra.mxu1 %v9017_v33 }
 0x25c   :  { %v10276_v34 = vpop.f32.mrb[36].mxu0  ;;  %v10278_v13 = vpop.f32.mrb[36].mxu1  ;;  %4237 = vmatprep.subr.bf16.mxu0 %v9021_v0  ;;  %5712 = vmatprep.subr.bf16.mxu1 %v9021_v0 }
 0x25d   :  { %v1445_v51 = vpop.f32.mrb[37].mxu0  ;;  %v2856_v2 = vpop.f32.mrb[37].mxu1 }
 0x25e   :  { %v10290_v20 = vpop.f32.mrb[38].mxu0  ;;  %v10292_v33 = vpop.f32.mrb[38].mxu1  ;;  %v8643_v51 = vld [vmem:[%s11863_s0 + $0xca4] ss:$16 sps:$4 sm:$0xff]  }
 0x25f   :  { %v1448_v48 = vpop.f32.mrb[39].mxu0  ;;  %v2859_v27 = vpop.f32.mrb[39].mxu1  ;;  %4238 = vmatpush1.bf16.msra.mxu0 %v9018_v11  ;;  %5713 = vmatpush1.bf16.msra.mxu1 %v9018_v11  ;;  %v9019_v2 = vld [vmem:[%s11862_s1 + $0xc0] sm:$0xff]  }
 0x260   :  { %4239 = vmatprep.subr.bf16.mxu0 %v9021_v0  ;;  %5714 = vmatprep.subr.bf16.mxu1 %v9021_v0  ;;  %v8645_v0 = vld [vmem:[%s11863_s0 + $0x8a0] ss:$16 sps:$4 sm:$0xff]  }
 0x261   :  { %3999 = vmatmul.mubr.bf16.gmra.mrb[144].mxu0 %v8639_v3  ;;  %5474 = vmatmul.mubr.bf16.gmra.mrb[144].mxu1 %v8640_v16 }
 0x262   :  { %4006 = vmatprep.mubr.bf16.mxu0 %v8641_v12  ;;  %5481 = vmatprep.mubr.bf16.mxu1 %v8643_v51  ;;  %v8646_v12 = vld [vmem:[%s11863_s0 + $0xca0] ss:$16 sps:$4 sm:$0xff]   ;;  %v8647_v51 = vld [vmem:[%s11863_s0 + $0x8c4] ss:$16 sps:$4 sm:$0xff]  }
 0x263   :  { %4240 = vmatpush1.bf16.msra.mxu0 %v9019_v2  ;;  %5715 = vmatpush1.bf16.msra.mxu1 %v9019_v2 }
 0x264   :  { %v10310_v27 = vpop.f32.mrb[40].mxu0  ;;  %v10312_v48 = vpop.f32.mrb[40].mxu1 }
 0x265   :  { %v1453_v47 = vpop.f32.mrb[41].mxu0  ;;  %v2864_v26 = vpop.f32.mrb[41].mxu1 }
 0x266   :  { %v10322_v3 = vpop.f32.mrb[42].mxu0  ;;  %v10324_v16 = vpop.f32.mrb[42].mxu1  ;;  %v8649_v26 = vld [vmem:[%s11863_s0 + $0xcc4] ss:$16 sps:$4 sm:$0xff]  }
 0x267   :  { %v1456_v2 = vpop.f32.mrb[43].mxu0  ;;  %v2867_v11 = vpop.f32.mrb[43].mxu1 }
 0x268   :  { %v8652_v11 = vld [vmem:[%s11863_s0 + $0xcc0] ss:$16 sps:$4 sm:$0xff]  }
 0x269   :  { %4007 = vmatmul.mubr.bf16.gmra.mrb[148].mxu0 %v8645_v0  ;;  %5482 = vmatmul.mubr.bf16.gmra.mrb[148].mxu1 %v8646_v12 }
 0x26a   :  { %4014 = vmatprep.mubr.bf16.mxu0 %v8647_v51  ;;  %5489 = vmatprep.mubr.bf16.mxu1 %v8649_v26  ;;  %v8653_v51 = vld [vmem:[%s11863_s0 + $0x8e4] ss:$16 sps:$4 sm:$0xff]  }
 0x26c   :  { %v10334_v10 = vpop.f32.mrb[44].mxu0  ;;  %v10336_v59 = vpop.f32.mrb[44].mxu1 }
 0x26d   :  { %v1461_v37 = vpop.f32.mrb[45].mxu0  ;;  %v2872_v23 = vpop.f32.mrb[45].mxu1 }
 0x26e   :  { %v10346_v0 = vpop.f32.mrb[46].mxu0  ;;  %v10348_v12 = vpop.f32.mrb[46].mxu1  ;;  %v8655_v23 = vld [vmem:[%s11863_s0 + $0xce4] ss:$16 sps:$4 sm:$0xff]  }
 0x26f   :  { %v1464_v26 = vpop.f32.mrb[47].mxu0  ;;  %v2875_v2 = vpop.f32.mrb[47].mxu1 }
 0x271   :  { %4015 = vmatmul.mubr.bf16.gmra.mrb[152].mxu0 %v8651_v18  ;;  %5490 = vmatmul.mubr.bf16.gmra.mrb[152].mxu1 %v8652_v11  ;;  %v8658_v18 = vld [vmem:[%s11863_s0 + $0xce0] ss:$16 sps:$4 sm:$0xff]  }
 0x272   :  { %4022 = vmatprep.mubr.bf16.mxu0 %v8653_v51  ;;  %5497 = vmatprep.mubr.bf16.mxu1 %v8655_v23  ;;  %v8659_v23 = vld [vmem:[%s11863_s0 + $0x904] ss:$16 sps:$4 sm:$0xff]  }
 0x274   :  { %v10358_v46 = vpop.f32.mrb[48].mxu0  ;;  %v10360_v47 = vpop.f32.mrb[48].mxu1 }
 0x275   :  { %11946 = vst [vmem:[#allocation2_spill] sm:$0xff] %v10358_v46  ;;  %11947 = vst [vmem:[#allocation3_spill] sm:$0xff] %v10360_v47  ;;  %v1469_v4 = vpop.f32.mrb[49].mxu0  ;;  %v2880_v58 = vpop.f32.mrb[49].mxu1  ;;  %v8663_v47 = vld [vmem:[%s11863_s0 + $0x900] ss:$16 sps:$4 sm:$0xff]  }
 0x276   :  { %v10370_v11 = vpop.f32.mrb[50].mxu0  ;;  %v10372_v51 = vpop.f32.mrb[50].mxu1  ;;  %v8661_v58 = vld [vmem:[%s11863_s0 + $0xd04] ss:$16 sps:$4 sm:$0xff]  }
 0x277   :  { %11948 = vst [vmem:[#allocation4_spill] sm:$0xff] %v10370_v11  ;;  %11949 = vst [vmem:[#allocation5_spill] sm:$0xff] %v10372_v51  ;;  %v1472_v26 = vpop.f32.mrb[51].mxu0  ;;  %v2883_v2 = vpop.f32.mrb[51].mxu1  ;;  %v8669_v11 = vld [vmem:[%s11863_s0 + $0x920] ss:$16 sps:$4 sm:$0xff]  }
 0x279   :  { %4023 = vmatmul.mubr.bf16.gmra.mrb[156].mxu0 %v8657_v53  ;;  %5498 = vmatmul.mubr.bf16.gmra.mrb[156].mxu1 %v8658_v18  ;;  %v8664_v53 = vld [vmem:[%s11863_s0 + $0xd00] ss:$16 sps:$4 sm:$0xff]  }
 0x27a   :  { %4030 = vmatprep.mubr.bf16.mxu0 %v8659_v23  ;;  %5505 = vmatprep.mubr.bf16.mxu1 %v8661_v58  ;;  %v8665_v58 = vld [vmem:[%s11863_s0 + $0x924] ss:$16 sps:$4 sm:$0xff]  }
 0x27c   :  { %v10382_v9 = vpop.f32.mrb[52].mxu0  ;;  %v10384_v37 = vpop.f32.mrb[52].mxu1 }
 0x27d   :  { %11950 = vst [vmem:[#allocation6_spill] sm:$0xff] %v10382_v9  ;;  %11951 = vst [vmem:[#allocation7_spill] sm:$0xff] %v10384_v37  ;;  %v1477_v39 = vpop.f32.mrb[53].mxu0  ;;  %v2888_v30 = vpop.f32.mrb[53].mxu1 }
 0x27e   :  { %v10394_v18 = vpop.f32.mrb[54].mxu0  ;;  %v10396_v23 = vpop.f32.mrb[54].mxu1  ;;  %v8667_v30 = vld [vmem:[%s11863_s0 + $0xd24] ss:$16 sps:$4 sm:$0xff]  }
 0x27f   :  { %11952 = vst [vmem:[#allocation8_spill] sm:$0xff] %v10394_v18  ;;  %11953 = vst [vmem:[#allocation9_spill] sm:$0xff] %v10396_v23  ;;  %v1480_v26 = vpop.f32.mrb[55].mxu0  ;;  %v2891_v2 = vpop.f32.mrb[55].mxu1  ;;  %v8675_v18 = vld [vmem:[%s11863_s0 + $0x940] ss:$16 sps:$4 sm:$0xff]  }
 0x281   :  { %4031 = vmatmul.mubr.bf16.gmra.mrb[160].mxu0 %v8663_v47  ;;  %5506 = vmatmul.mubr.bf16.gmra.mrb[160].mxu1 %v8664_v53  ;;  %v8670_v47 = vld [vmem:[%s11863_s0 + $0xd20] ss:$16 sps:$4 sm:$0xff]  }
 0x282   :  { %4038 = vmatprep.mubr.bf16.mxu0 %v8665_v58  ;;  %5513 = vmatprep.mubr.bf16.mxu1 %v8667_v30  ;;  %v8671_v30 = vld [vmem:[%s11863_s0 + $0x944] ss:$16 sps:$4 sm:$0xff]  }
 0x284   :  { %v10406_v44 = vpop.f32.mrb[56].mxu0  ;;  %v10408_v4 = vpop.f32.mrb[56].mxu1 }
 0x285   :  { %11954 = vst [vmem:[#allocation10_spill] sm:$0xff] %v10406_v44  ;;  %11955 = vst [vmem:[#allocation11_spill] sm:$0xff] %v10408_v4  ;;  %v1485_v9 = vpop.f32.mrb[57].mxu0  ;;  %v2896_v51 = vpop.f32.mrb[57].mxu1 }
 0x286   :  { %v10418_v53 = vpop.f32.mrb[58].mxu0  ;;  %v10420_v58 = vpop.f32.mrb[58].mxu1  ;;  %v8673_v9 = vld [vmem:[%s11863_s0 + $0xd44] ss:$16 sps:$4 sm:$0xff]  }
 0x287   :  { %11956 = vst [vmem:[#allocation12_spill] sm:$0xff] %v10418_v53  ;;  %11957 = vst [vmem:[#allocation13_spill] sm:$0xff] %v10420_v58  ;;  %v1488_v26 = vpop.f32.mrb[59].mxu0  ;;  %v2899_v2 = vpop.f32.mrb[59].mxu1  ;;  %v8681_v53 = vld [vmem:[%s11863_s0 + $0x960] ss:$16 sps:$4 sm:$0xff]  }
 0x289   :  { %4039 = vmatmul.mubr.bf16.gmra.mrb[164].mxu0 %v8669_v11  ;;  %5514 = vmatmul.mubr.bf16.gmra.mrb[164].mxu1 %v8670_v47  ;;  %v8676_v11 = vld [vmem:[%s11863_s0 + $0xd40] ss:$16 sps:$4 sm:$0xff]  }
 0x28a   :  { %4046 = vmatprep.mubr.bf16.mxu0 %v8671_v30  ;;  %5521 = vmatprep.mubr.bf16.mxu1 %v8673_v9  ;;  %v8677_v9 = vld [vmem:[%s11863_s0 + $0x964] ss:$16 sps:$4 sm:$0xff]  }
 0x28c   :  { %v10430_v37 = vpop.f32.mrb[60].mxu0  ;;  %v10432_v39 = vpop.f32.mrb[60].mxu1 }
 0x28d   :  { %11958 = vst [vmem:[#allocation14_spill] sm:$0xff] %v10430_v37  ;;  %11959 = vst [vmem:[#allocation15_spill] sm:$0xff] %v10432_v39  ;;  %v1493_v44 = vpop.f32.mrb[61].mxu0  ;;  %v2904_v23 = vpop.f32.mrb[61].mxu1 }
 0x28e   :  { %v10442_v47 = vpop.f32.mrb[62].mxu0  ;;  %v10444_v30 = vpop.f32.mrb[62].mxu1  ;;  %v8679_v44 = vld [vmem:[%s11863_s0 + $0xd64] ss:$16 sps:$4 sm:$0xff]  }
 0x28f   :  { %11960 = vst [vmem:[#allocation16_spill] sm:$0xff] %v10442_v47  ;;  %11961 = vst [vmem:[#allocation17_spill] sm:$0xff] %v10444_v30  ;;  %v1496_v26 = vpop.f32.mrb[63].mxu0  ;;  %v2907_v2 = vpop.f32.mrb[63].mxu1  ;;  %v8687_v47 = vld [vmem:[%s11863_s0 + $0x980] ss:$16 sps:$4 sm:$0xff]  }
 0x291   :  { %4047 = vmatmul.mubr.bf16.gmra.mrb[168].mxu0 %v8675_v18  ;;  %5522 = vmatmul.mubr.bf16.gmra.mrb[168].mxu1 %v8676_v11  ;;  %v8682_v18 = vld [vmem:[%s11863_s0 + $0xd60] ss:$16 sps:$4 sm:$0xff]  }
 0x292   :  { %4054 = vmatprep.mubr.bf16.mxu0 %v8677_v9  ;;  %5529 = vmatprep.mubr.bf16.mxu1 %v8679_v44  ;;  %v8683_v44 = vld [vmem:[%s11863_s0 + $0x984] ss:$16 sps:$4 sm:$0xff]  }
 0x294   :  { %v10454_v4 = vpop.f32.mrb[64].mxu0  ;;  %v10456_v51 = vpop.f32.mrb[64].mxu1 }
 0x295   :  { %11962 = vst [vmem:[#allocation18_spill] sm:$0xff] %v10454_v4  ;;  %11963 = vst [vmem:[#allocation19_spill] sm:$0xff] %v10456_v51  ;;  %v1501_v37 = vpop.f32.mrb[65].mxu0  ;;  %v2912_v58 = vpop.f32.mrb[65].mxu1 }
 0x296   :  { %v10466_v11 = vpop.f32.mrb[66].mxu0  ;;  %v10468_v9 = vpop.f32.mrb[66].mxu1  ;;  %v8685_v37 = vld [vmem:[%s11863_s0 + $0xd84] ss:$16 sps:$4 sm:$0xff]  }
 0x297   :  { %11964 = vst [vmem:[#allocation20_spill] sm:$0xff] %v10466_v11  ;;  %11965 = vst [vmem:[#allocation21_spill] sm:$0xff] %v10468_v9  ;;  %v1504_v26 = vpop.f32.mrb[67].mxu0  ;;  %v2915_v2 = vpop.f32.mrb[67].mxu1  ;;  %v8693_v11 = vld [vmem:[%s11863_s0 + $0x9a0] ss:$16 sps:$4 sm:$0xff]  }
 0x299   :  { %4055 = vmatmul.mubr.bf16.gmra.mrb[172].mxu0 %v8681_v53  ;;  %5530 = vmatmul.mubr.bf16.gmra.mrb[172].mxu1 %v8682_v18  ;;  %v8688_v53 = vld [vmem:[%s11863_s0 + $0xd80] ss:$16 sps:$4 sm:$0xff]  }
 0x29a   :  { %4062 = vmatprep.mubr.bf16.mxu0 %v8683_v44  ;;  %5537 = vmatprep.mubr.bf16.mxu1 %v8685_v37  ;;  %v8689_v37 = vld [vmem:[%s11863_s0 + $0x9a4] ss:$16 sps:$4 sm:$0xff]  }
 0x29c   :  { %v10478_v39 = vpop.f32.mrb[68].mxu0  ;;  %v10480_v23 = vpop.f32.mrb[68].mxu1 }
 0x29d   :  { %11966 = vst [vmem:[#allocation22_spill] sm:$0xff] %v10478_v39  ;;  %11967 = vst [vmem:[#allocation23_spill] sm:$0xff] %v10480_v23  ;;  %v1509_v4 = vpop.f32.mrb[69].mxu0  ;;  %v2920_v30 = vpop.f32.mrb[69].mxu1 }
 0x29e   :  { %v10490_v18 = vpop.f32.mrb[70].mxu0  ;;  %v10492_v44 = vpop.f32.mrb[70].mxu1  ;;  %v8691_v4 = vld [vmem:[%s11863_s0 + $0xda4] ss:$16 sps:$4 sm:$0xff]  }
 0x29f   :  { %11968 = vst [vmem:[#allocation24_spill] sm:$0xff] %v10490_v18  ;;  %11969 = vst [vmem:[#allocation25_spill] sm:$0xff] %v10492_v44  ;;  %v1512_v26 = vpop.f32.mrb[71].mxu0  ;;  %v2923_v2 = vpop.f32.mrb[71].mxu1  ;;  %v8699_v18 = vld [vmem:[%s11863_s0 + $0x9c0] ss:$16 sps:$4 sm:$0xff]  }
 0x2a1   :  { %4063 = vmatmul.mubr.bf16.gmra.mrb[176].mxu0 %v8687_v47  ;;  %5538 = vmatmul.mubr.bf16.gmra.mrb[176].mxu1 %v8688_v53  ;;  %v8694_v47 = vld [vmem:[%s11863_s0 + $0xda0] ss:$16 sps:$4 sm:$0xff]  }
 0x2a2   :  { %4070 = vmatprep.mubr.bf16.mxu0 %v8689_v37  ;;  %5545 = vmatprep.mubr.bf16.mxu1 %v8691_v4  ;;  %v8695_v4 = vld [vmem:[%s11863_s0 + $0x9c4] ss:$16 sps:$4 sm:$0xff]  }
 0x2a4   :  { %v10502_v51 = vpop.f32.mrb[72].mxu0  ;;  %v10504_v58 = vpop.f32.mrb[72].mxu1 }
 0x2a5   :  { %11970 = vst [vmem:[#allocation26_spill] sm:$0xff] %v10502_v51  ;;  %11971 = vst [vmem:[#allocation27_spill] sm:$0xff] %v10504_v58  ;;  %v1517_v39 = vpop.f32.mrb[73].mxu0  ;;  %v2928_v9 = vpop.f32.mrb[73].mxu1 }
 0x2a6   :  { %v10514_v53 = vpop.f32.mrb[74].mxu0  ;;  %v10516_v37 = vpop.f32.mrb[74].mxu1  ;;  %v8697_v39 = vld [vmem:[%s11863_s0 + $0xdc4] ss:$16 sps:$4 sm:$0xff]  }
 0x2a7   :  { %11972 = vst [vmem:[#allocation28_spill] sm:$0xff] %v10514_v53  ;;  %11973 = vst [vmem:[#allocation29_spill] sm:$0xff] %v10516_v37  ;;  %v1520_v26 = vpop.f32.mrb[75].mxu0  ;;  %v2931_v2 = vpop.f32.mrb[75].mxu1  ;;  %v8705_v53 = vld [vmem:[%s11863_s0 + $0x9e0] ss:$16 sps:$4 sm:$0xff]  }
 0x2a9   :  { %4071 = vmatmul.mubr.bf16.gmra.mrb[180].mxu0 %v8693_v11  ;;  %5546 = vmatmul.mubr.bf16.gmra.mrb[180].mxu1 %v8694_v47  ;;  %v8700_v11 = vld [vmem:[%s11863_s0 + $0xdc0] ss:$16 sps:$4 sm:$0xff]  }
 0x2aa   :  { %4078 = vmatprep.mubr.bf16.mxu0 %v8695_v4  ;;  %5553 = vmatprep.mubr.bf16.mxu1 %v8697_v39  ;;  %v8701_v39 = vld [vmem:[%s11863_s0 + $0x9e4] ss:$16 sps:$4 sm:$0xff]  }
 0x2ac   :  { %v10526_v23 = vpop.f32.mrb[76].mxu0  ;;  %v10528_v30 = vpop.f32.mrb[76].mxu1 }
 0x2ad   :  { %11974 = vst [vmem:[#allocation30_spill] sm:$0xff] %v10526_v23  ;;  %11975 = vst [vmem:[#allocation31_spill] sm:$0xff] %v10528_v30  ;;  %v1525_v51 = vpop.f32.mrb[77].mxu0  ;;  %v2936_v44 = vpop.f32.mrb[77].mxu1 }
 0x2ae   :  { %v10538_v47 = vpop.f32.mrb[78].mxu0  ;;  %v10540_v4 = vpop.f32.mrb[78].mxu1  ;;  %v8703_v51 = vld [vmem:[%s11863_s0 + $0xde4] ss:$16 sps:$4 sm:$0xff]  }
 0x2af   :  { %11976 = vst [vmem:[#allocation32_spill] sm:$0xff] %v10538_v47  ;;  %11977 = vst [vmem:[#allocation33_spill] sm:$0xff] %v10540_v4  ;;  %v1528_v26 = vpop.f32.mrb[79].mxu0  ;;  %v2939_v2 = vpop.f32.mrb[79].mxu1  ;;  %v8711_v47 = vld [vmem:[%s11863_s0 + $0xa00] ss:$16 sps:$4 sm:$0xff]  }
 0x2b1   :  { %4079 = vmatmul.mubr.bf16.gmra.mrb[184].mxu0 %v8699_v18  ;;  %5554 = vmatmul.mubr.bf16.gmra.mrb[184].mxu1 %v8700_v11  ;;  %v8706_v18 = vld [vmem:[%s11863_s0 + $0xde0] ss:$16 sps:$4 sm:$0xff]  }
 0x2b2   :  { %4086 = vmatprep.mubr.bf16.mxu0 %v8701_v39  ;;  %5561 = vmatprep.mubr.bf16.mxu1 %v8703_v51  ;;  %v8707_v51 = vld [vmem:[%s11863_s0 + $0xa04] ss:$16 sps:$4 sm:$0xff]  }
 0x2b4   :  { %v10550_v58 = vpop.f32.mrb[80].mxu0  ;;  %v10552_v9 = vpop.f32.mrb[80].mxu1 }
 0x2b5   :  { %11978 = vst [vmem:[#allocation34_spill] sm:$0xff] %v10550_v58  ;;  %11979 = vst [vmem:[#allocation35_spill] sm:$0xff] %v10552_v9  ;;  %v1533_v23 = vpop.f32.mrb[81].mxu0  ;;  %v2944_v37 = vpop.f32.mrb[81].mxu1 }
 0x2b6   :  { %v10562_v11 = vpop.f32.mrb[82].mxu0  ;;  %v10564_v39 = vpop.f32.mrb[82].mxu1  ;;  %v8709_v23 = vld [vmem:[%s11863_s0 + $0xe04] ss:$16 sps:$4 sm:$0xff]  }
 0x2b7   :  { %11980 = vst [vmem:[#allocation36_spill] sm:$0xff] %v10562_v11  ;;  %11981 = vst [vmem:[#allocation37_spill] sm:$0xff] %v10564_v39  ;;  %v1536_v26 = vpop.f32.mrb[83].mxu0  ;;  %v2947_v2 = vpop.f32.mrb[83].mxu1  ;;  %v8717_v11 = vld [vmem:[%s11863_s0 + $0xa20] ss:$16 sps:$4 sm:$0xff]  }
 0x2b9   :  { %4087 = vmatmul.mubr.bf16.gmra.mrb[188].mxu0 %v8705_v53  ;;  %5562 = vmatmul.mubr.bf16.gmra.mrb[188].mxu1 %v8706_v18  ;;  %v8712_v53 = vld [vmem:[%s11863_s0 + $0xe00] ss:$16 sps:$4 sm:$0xff]  }
 0x2ba   :  { %4094 = vmatprep.mubr.bf16.mxu0 %v8707_v51  ;;  %5569 = vmatprep.mubr.bf16.mxu1 %v8709_v23  ;;  %v8713_v23 = vld [vmem:[%s11863_s0 + $0xa24] ss:$16 sps:$4 sm:$0xff]  }
 0x2bc   :  { %v10574_v30 = vpop.f32.mrb[84].mxu0  ;;  %v10576_v44 = vpop.f32.mrb[84].mxu1 }
 0x2bd   :  { %11982 = vst [vmem:[#allocation38_spill] sm:$0xff] %v10574_v30  ;;  %11983 = vst [vmem:[#allocation39_spill] sm:$0xff] %v10576_v44  ;;  %v1541_v58 = vpop.f32.mrb[85].mxu0  ;;  %v2952_v4 = vpop.f32.mrb[85].mxu1 }
 0x2be   :  { %v10586_v18 = vpop.f32.mrb[86].mxu0  ;;  %v10588_v51 = vpop.f32.mrb[86].mxu1  ;;  %v8715_v58 = vld [vmem:[%s11863_s0 + $0xe24] ss:$16 sps:$4 sm:$0xff]  }
 0x2bf   :  { %11984 = vst [vmem:[#allocation40_spill] sm:$0xff] %v10586_v18  ;;  %11985 = vst [vmem:[#allocation41_spill] sm:$0xff] %v10588_v51  ;;  %v1544_v26 = vpop.f32.mrb[87].mxu0  ;;  %v2955_v2 = vpop.f32.mrb[87].mxu1  ;;  %v8723_v18 = vld [vmem:[%s11863_s0 + $0xa40] ss:$16 sps:$4 sm:$0xff]  }
 0x2c1   :  { %4095 = vmatmul.mubr.bf16.gmra.mrb[192].mxu0 %v8711_v47  ;;  %5570 = vmatmul.mubr.bf16.gmra.mrb[192].mxu1 %v8712_v53  ;;  %v8718_v47 = vld [vmem:[%s11863_s0 + $0xe20] ss:$16 sps:$4 sm:$0xff]  }
 0x2c2   :  { %4102 = vmatprep.mubr.bf16.mxu0 %v8713_v23  ;;  %5577 = vmatprep.mubr.bf16.mxu1 %v8715_v58  ;;  %v8719_v58 = vld [vmem:[%s11863_s0 + $0xa44] ss:$16 sps:$4 sm:$0xff]  }
 0x2c4   :  { %v10598_v9 = vpop.f32.mrb[88].mxu0  ;;  %v10600_v37 = vpop.f32.mrb[88].mxu1 }
 0x2c5   :  { %11986 = vst [vmem:[#allocation42_spill] sm:$0xff] %v10598_v9  ;;  %11987 = vst [vmem:[#allocation43_spill] sm:$0xff] %v10600_v37  ;;  %v1549_v30 = vpop.f32.mrb[89].mxu0  ;;  %v2960_v39 = vpop.f32.mrb[89].mxu1 }
 0x2c6   :  { %v10610_v53 = vpop.f32.mrb[90].mxu0  ;;  %v10612_v23 = vpop.f32.mrb[90].mxu1  ;;  %v8721_v30 = vld [vmem:[%s11863_s0 + $0xe44] ss:$16 sps:$4 sm:$0xff]  }
 0x2c7   :  { %11988 = vst [vmem:[#allocation44_spill] sm:$0xff] %v10610_v53  ;;  %11989 = vst [vmem:[#allocation45_spill] sm:$0xff] %v10612_v23  ;;  %v1552_v26 = vpop.f32.mrb[91].mxu0  ;;  %v2963_v2 = vpop.f32.mrb[91].mxu1  ;;  %v8729_v53 = vld [vmem:[%s11863_s0 + $0xa60] ss:$16 sps:$4 sm:$0xff]  }
 0x2c9   :  { %4103 = vmatmul.mubr.bf16.gmra.mrb[196].mxu0 %v8717_v11  ;;  %5578 = vmatmul.mubr.bf16.gmra.mrb[196].mxu1 %v8718_v47  ;;  %v8724_v11 = vld [vmem:[%s11863_s0 + $0xe40] ss:$16 sps:$4 sm:$0xff]  }
 0x2ca   :  { %4110 = vmatprep.mubr.bf16.mxu0 %v8719_v58  ;;  %5585 = vmatprep.mubr.bf16.mxu1 %v8721_v30  ;;  %v8725_v30 = vld [vmem:[%s11863_s0 + $0xa64] ss:$16 sps:$4 sm:$0xff]  }
 0x2cc   :  { %v10622_v44 = vpop.f32.mrb[92].mxu0  ;;  %v10624_v4 = vpop.f32.mrb[92].mxu1 }
 0x2cd   :  { %11990 = vst [vmem:[#allocation46_spill] sm:$0xff] %v10622_v44  ;;  %11991 = vst [vmem:[#allocation47_spill] sm:$0xff] %v10624_v4  ;;  %v1557_v9 = vpop.f32.mrb[93].mxu0  ;;  %v2968_v51 = vpop.f32.mrb[93].mxu1 }
 0x2ce   :  { %v10634_v47 = vpop.f32.mrb[94].mxu0  ;;  %v10636_v58 = vpop.f32.mrb[94].mxu1  ;;  %v8727_v9 = vld [vmem:[%s11863_s0 + $0xe64] ss:$16 sps:$4 sm:$0xff]  }
 0x2cf   :  { %11992 = vst [vmem:[#allocation48_spill] sm:$0xff] %v10634_v47  ;;  %11993 = vst [vmem:[#allocation49_spill] sm:$0xff] %v10636_v58  ;;  %v1560_v26 = vpop.f32.mrb[95].mxu0  ;;  %v2971_v2 = vpop.f32.mrb[95].mxu1  ;;  %v8735_v47 = vld [vmem:[%s11863_s0 + $0xa80] ss:$16 sps:$4 sm:$0xff]  }
 0x2d1   :  { %4111 = vmatmul.mubr.bf16.gmra.mrb[200].mxu0 %v8723_v18  ;;  %5586 = vmatmul.mubr.bf16.gmra.mrb[200].mxu1 %v8724_v11  ;;  %v8730_v18 = vld [vmem:[%s11863_s0 + $0xe60] ss:$16 sps:$4 sm:$0xff]  }
 0x2d2   :  { %4118 = vmatprep.mubr.bf16.mxu0 %v8725_v30  ;;  %5593 = vmatprep.mubr.bf16.mxu1 %v8727_v9  ;;  %v8731_v9 = vld [vmem:[%s11863_s0 + $0xa84] ss:$16 sps:$4 sm:$0xff]  }
 0x2d4   :  { %v10646_v37 = vpop.f32.mrb[96].mxu0  ;;  %v10648_v39 = vpop.f32.mrb[96].mxu1 }
 0x2d5   :  { %11994 = vst [vmem:[#allocation50_spill] sm:$0xff] %v10646_v37  ;;  %11995 = vst [vmem:[#allocation51_spill] sm:$0xff] %v10648_v39  ;;  %v1565_v44 = vpop.f32.mrb[97].mxu0  ;;  %v2976_v23 = vpop.f32.mrb[97].mxu1 }
 0x2d6   :  { %v10658_v11 = vpop.f32.mrb[98].mxu0  ;;  %v10660_v30 = vpop.f32.mrb[98].mxu1  ;;  %v8733_v44 = vld [vmem:[%s11863_s0 + $0xe84] ss:$16 sps:$4 sm:$0xff]  }
 0x2d7   :  { %11996 = vst [vmem:[#allocation52_spill] sm:$0xff] %v10658_v11  ;;  %11997 = vst [vmem:[#allocation53_spill] sm:$0xff] %v10660_v30  ;;  %v1568_v26 = vpop.f32.mrb[99].mxu0  ;;  %v2979_v2 = vpop.f32.mrb[99].mxu1  ;;  %v8741_v11 = vld [vmem:[%s11863_s0 + $0xaa0] ss:$16 sps:$4 sm:$0xff]  }
 0x2d9   :  { %4119 = vmatmul.mubr.bf16.gmra.mrb[204].mxu0 %v8729_v53  ;;  %5594 = vmatmul.mubr.bf16.gmra.mrb[204].mxu1 %v8730_v18  ;;  %v8736_v53 = vld [vmem:[%s11863_s0 + $0xe80] ss:$16 sps:$4 sm:$0xff]  }
 0x2da   :  { %4126 = vmatprep.mubr.bf16.mxu0 %v8731_v9  ;;  %5601 = vmatprep.mubr.bf16.mxu1 %v8733_v44  ;;  %v8737_v44 = vld [vmem:[%s11863_s0 + $0xaa4] ss:$16 sps:$4 sm:$0xff]  }
 0x2dc   :  { %v10670_v4 = vpop.f32.mrb[100].mxu0  ;;  %v10672_v51 = vpop.f32.mrb[100].mxu1 }
 0x2dd   :  { %11998 = vst [vmem:[#allocation54_spill] sm:$0xff] %v10670_v4  ;;  %11999 = vst [vmem:[#allocation55_spill] sm:$0xff] %v10672_v51  ;;  %v1573_v37 = vpop.f32.mrb[101].mxu0  ;;  %v2984_v58 = vpop.f32.mrb[101].mxu1 }
 0x2de   :  { %v10682_v18 = vpop.f32.mrb[102].mxu0  ;;  %v10684_v9 = vpop.f32.mrb[102].mxu1  ;;  %v8739_v37 = vld [vmem:[%s11863_s0 + $0xea4] ss:$16 sps:$4 sm:$0xff]  }
 0x2df   :  { %12000 = vst [vmem:[#allocation56_spill] sm:$0xff] %v10682_v18  ;;  %12001 = vst [vmem:[#allocation57_spill] sm:$0xff] %v10684_v9  ;;  %v1576_v26 = vpop.f32.mrb[103].mxu0  ;;  %v2987_v2 = vpop.f32.mrb[103].mxu1  ;;  %v8747_v18 = vld [vmem:[%s11863_s0 + $0xac0] ss:$16 sps:$4 sm:$0xff]  }
 0x2e1   :  { %4127 = vmatmul.mubr.bf16.gmra.mrb[208].mxu0 %v8735_v47  ;;  %5602 = vmatmul.mubr.bf16.gmra.mrb[208].mxu1 %v8736_v53  ;;  %v8742_v47 = vld [vmem:[%s11863_s0 + $0xea0] ss:$16 sps:$4 sm:$0xff]  }
 0x2e2   :  { %4134 = vmatprep.mubr.bf16.mxu0 %v8737_v44  ;;  %5609 = vmatprep.mubr.bf16.mxu1 %v8739_v37  ;;  %v8743_v37 = vld [vmem:[%s11863_s0 + $0xac4] ss:$16 sps:$4 sm:$0xff]  }
 0x2e4   :  { %v10694_v39 = vpop.f32.mrb[104].mxu0  ;;  %v10696_v23 = vpop.f32.mrb[104].mxu1 }
 0x2e5   :  { %12002 = vst [vmem:[#allocation58_spill] sm:$0xff] %v10694_v39  ;;  %12003 = vst [vmem:[#allocation59_spill] sm:$0xff] %v10696_v23  ;;  %v1581_v4 = vpop.f32.mrb[105].mxu0  ;;  %v2992_v30 = vpop.f32.mrb[105].mxu1 }
 0x2e6   :  { %v10706_v53 = vpop.f32.mrb[106].mxu0  ;;  %v10708_v44 = vpop.f32.mrb[106].mxu1  ;;  %v8745_v4 = vld [vmem:[%s11863_s0 + $0xec4] ss:$16 sps:$4 sm:$0xff]  }
 0x2e7   :  { %12004 = vst [vmem:[#allocation60_spill] sm:$0xff] %v10706_v53  ;;  %12005 = vst [vmem:[#allocation61_spill] sm:$0xff] %v10708_v44  ;;  %v1584_v26 = vpop.f32.mrb[107].mxu0  ;;  %v2995_v2 = vpop.f32.mrb[107].mxu1  ;;  %v8753_v53 = vld [vmem:[%s11863_s0 + $0xae0] ss:$16 sps:$4 sm:$0xff]  }
 0x2e9   :  { %4135 = vmatmul.mubr.bf16.gmra.mrb[212].mxu0 %v8741_v11  ;;  %5610 = vmatmul.mubr.bf16.gmra.mrb[212].mxu1 %v8742_v47  ;;  %v8748_v11 = vld [vmem:[%s11863_s0 + $0xec0] ss:$16 sps:$4 sm:$0xff]  }
 0x2ea   :  { %4142 = vmatprep.mubr.bf16.mxu0 %v8743_v37  ;;  %5617 = vmatprep.mubr.bf16.mxu1 %v8745_v4  ;;  %v8749_v4 = vld [vmem:[%s11863_s0 + $0xae4] ss:$16 sps:$4 sm:$0xff]  }
 0x2ec   :  { %v10718_v51 = vpop.f32.mrb[108].mxu0  ;;  %v10720_v58 = vpop.f32.mrb[108].mxu1 }
 0x2ed   :  { %12006 = vst [vmem:[#allocation62_spill] sm:$0xff] %v10718_v51  ;;  %12007 = vst [vmem:[#allocation63_spill] sm:$0xff] %v10720_v58  ;;  %v1589_v39 = vpop.f32.mrb[109].mxu0  ;;  %v3000_v9 = vpop.f32.mrb[109].mxu1 }
 0x2ee   :  { %v10730_v47 = vpop.f32.mrb[110].mxu0  ;;  %v10732_v37 = vpop.f32.mrb[110].mxu1  ;;  %v8751_v39 = vld [vmem:[%s11863_s0 + $0xee4] ss:$16 sps:$4 sm:$0xff]  }
 0x2ef   :  { %12008 = vst [vmem:[#allocation64_spill] sm:$0xff] %v10730_v47  ;;  %12009 = vst [vmem:[#allocation65_spill] sm:$0xff] %v10732_v37  ;;  %v1592_v26 = vpop.f32.mrb[111].mxu0  ;;  %v3003_v2 = vpop.f32.mrb[111].mxu1  ;;  %v8759_v47 = vld [vmem:[%s11863_s0 + $0xb00] ss:$16 sps:$4 sm:$0xff]  }
 0x2f1   :  { %4143 = vmatmul.mubr.bf16.gmra.mrb[216].mxu0 %v8747_v18  ;;  %5618 = vmatmul.mubr.bf16.gmra.mrb[216].mxu1 %v8748_v11  ;;  %v8754_v18 = vld [vmem:[%s11863_s0 + $0xee0] ss:$16 sps:$4 sm:$0xff]  }
 0x2f2   :  { %4150 = vmatprep.mubr.bf16.mxu0 %v8749_v4  ;;  %5625 = vmatprep.mubr.bf16.mxu1 %v8751_v39  ;;  %v8755_v39 = vld [vmem:[%s11863_s0 + $0xb04] ss:$16 sps:$4 sm:$0xff]  }
 0x2f4   :  { %v10742_v23 = vpop.f32.mrb[112].mxu0  ;;  %v10744_v30 = vpop.f32.mrb[112].mxu1 }
 0x2f5   :  { %12010 = vst [vmem:[#allocation66_spill] sm:$0xff] %v10742_v23  ;;  %12011 = vst [vmem:[#allocation67_spill] sm:$0xff] %v10744_v30  ;;  %v1597_v51 = vpop.f32.mrb[113].mxu0  ;;  %v3008_v44 = vpop.f32.mrb[113].mxu1 }
 0x2f6   :  { %v10754_v11 = vpop.f32.mrb[114].mxu0  ;;  %v10756_v4 = vpop.f32.mrb[114].mxu1  ;;  %v8757_v51 = vld [vmem:[%s11863_s0 + $0xf04] ss:$16 sps:$4 sm:$0xff]  }
 0x2f7   :  { %12012 = vst [vmem:[#allocation68_spill] sm:$0xff] %v10754_v11  ;;  %12013 = vst [vmem:[#allocation69_spill] sm:$0xff] %v10756_v4  ;;  %v1600_v26 = vpop.f32.mrb[115].mxu0  ;;  %v3011_v2 = vpop.f32.mrb[115].mxu1  ;;  %v8765_v11 = vld [vmem:[%s11863_s0 + $0xb20] ss:$16 sps:$4 sm:$0xff]  }
 0x2f9   :  { %4151 = vmatmul.mubr.bf16.gmra.mrb[220].mxu0 %v8753_v53  ;;  %5626 = vmatmul.mubr.bf16.gmra.mrb[220].mxu1 %v8754_v18  ;;  %v8760_v53 = vld [vmem:[%s11863_s0 + $0xf00] ss:$16 sps:$4 sm:$0xff]  }
 0x2fa   :  { %4158 = vmatprep.mubr.bf16.mxu0 %v8755_v39  ;;  %5633 = vmatprep.mubr.bf16.mxu1 %v8757_v51  ;;  %v8761_v51 = vld [vmem:[%s11863_s0 + $0xb24] ss:$16 sps:$4 sm:$0xff]  }
 0x2fc   :  { %v10766_v58 = vpop.f32.mrb[116].mxu0  ;;  %v10768_v9 = vpop.f32.mrb[116].mxu1 }
 0x2fd   :  { %12014 = vst [vmem:[#allocation70_spill] sm:$0xff] %v10766_v58  ;;  %12015 = vst [vmem:[#allocation71_spill] sm:$0xff] %v10768_v9  ;;  %v1605_v23 = vpop.f32.mrb[117].mxu0  ;;  %v3016_v37 = vpop.f32.mrb[117].mxu1 }
 0x2fe   :  { %v10778_v18 = vpop.f32.mrb[118].mxu0  ;;  %v10780_v39 = vpop.f32.mrb[118].mxu1  ;;  %v8763_v23 = vld [vmem:[%s11863_s0 + $0xf24] ss:$16 sps:$4 sm:$0xff]  }
 0x2ff   :  { %12016 = vst [vmem:[#allocation72_spill] sm:$0xff] %v10778_v18  ;;  %12017 = vst [vmem:[#allocation73_spill] sm:$0xff] %v10780_v39  ;;  %v1608_v26 = vpop.f32.mrb[119].mxu0  ;;  %v3019_v2 = vpop.f32.mrb[119].mxu1  ;;  %v8771_v18 = vld [vmem:[%s11863_s0 + $0xb40] ss:$16 sps:$4 sm:$0xff]  }
 0x301   :  { %4159 = vmatmul.mubr.bf16.gmra.mrb[224].mxu0 %v8759_v47  ;;  %5634 = vmatmul.mubr.bf16.gmra.mrb[224].mxu1 %v8760_v53  ;;  %v8766_v47 = vld [vmem:[%s11863_s0 + $0xf20] ss:$16 sps:$4 sm:$0xff]  }
 0x302   :  { %4166 = vmatprep.mubr.bf16.mxu0 %v8761_v51  ;;  %5641 = vmatprep.mubr.bf16.mxu1 %v8763_v23  ;;  %v8767_v23 = vld [vmem:[%s11863_s0 + $0xb44] ss:$16 sps:$4 sm:$0xff]  }
 0x304   :  { %v10790_v30 = vpop.f32.mrb[120].mxu0  ;;  %v10792_v44 = vpop.f32.mrb[120].mxu1 }
 0x305   :  { %12018 = vst [vmem:[#allocation74_spill] sm:$0xff] %v10790_v30  ;;  %12019 = vst [vmem:[#allocation75_spill] sm:$0xff] %v10792_v44  ;;  %v1613_v58 = vpop.f32.mrb[121].mxu0  ;;  %v3024_v4 = vpop.f32.mrb[121].mxu1  ;;  %v8777_v44 = vld [vmem:[%s11863_s0 + $0xb60] ss:$16 sps:$4 sm:$0xff]  }
 0x306   :  { %v10802_v53 = vpop.f32.mrb[122].mxu0  ;;  %v10804_v51 = vpop.f32.mrb[122].mxu1  ;;  %v8769_v58 = vld [vmem:[%s11863_s0 + $0xf44] ss:$16 sps:$4 sm:$0xff]   ;;  %v8778_v4 = vld [vmem:[%s11863_s0 + $0xf60] ss:$16 sps:$4 sm:$0xff]  }
 0x307   :  { %12020 = vst [vmem:[#allocation76_spill] sm:$0xff] %v10802_v53  ;;  %12021 = vst [vmem:[#allocation77_spill] sm:$0xff] %v10804_v51  ;;  %v1616_v26 = vpop.f32.mrb[123].mxu0  ;;  %v3027_v2 = vpop.f32.mrb[123].mxu1 }
 0x309   :  { %4167 = vmatmul.mubr.bf16.gmra.mrb[228].mxu0 %v8765_v11  ;;  %5642 = vmatmul.mubr.bf16.gmra.mrb[228].mxu1 %v8766_v47  ;;  %v8772_v11 = vld [vmem:[%s11863_s0 + $0xf40] ss:$16 sps:$4 sm:$0xff]  }
 0x30a   :  { %4174 = vmatprep.mubr.bf16.mxu0 %v8767_v23  ;;  %5649 = vmatprep.mubr.bf16.mxu1 %v8769_v58  ;;  %v8773_v58 = vld [vmem:[%s11863_s0 + $0xb64] ss:$16 sps:$4 sm:$0xff]  }
 0x30c   :  { %v10814_v9 = vpop.f32.mrb[124].mxu0  ;;  %v10816_v37 = vpop.f32.mrb[124].mxu1 }
 0x30d   :  { %12022 = vst [vmem:[#allocation78_spill] sm:$0xff] %v10814_v9  ;;  %12023 = vst [vmem:[#allocation79_spill] sm:$0xff] %v10816_v37  ;;  %v1621_v30 = vpop.f32.mrb[125].mxu0  ;;  %v3032_v39 = vpop.f32.mrb[125].mxu1  ;;  %v8779_v37 = vld [vmem:[%s11863_s0 + $0xb84] ss:$16 sps:$4 sm:$0xff]  }
 0x30e   :  { %v10826_v47 = vpop.f32.mrb[126].mxu0  ;;  %v10828_v23 = vpop.f32.mrb[126].mxu1  ;;  %v8775_v30 = vld [vmem:[%s11863_s0 + $0xf64] ss:$16 sps:$4 sm:$0xff]  }
 0x30f   :  { %12024 = vst [vmem:[#allocation80_spill] sm:$0xff] %v10826_v47  ;;  %12025 = vst [vmem:[#allocation81_spill] sm:$0xff] %v10828_v23  ;;  %v1624_v26 = vpop.f32.mrb[127].mxu0  ;;  %v3035_v2 = vpop.f32.mrb[127].mxu1  ;;  %v8971_v47 = vld [vmem:[%s11863_s0 + $0xb8c] ss:$16 sps:$4 sm:$0xff]  }
 0x310   :  { %v8781_v26 = vld [vmem:[%s11863_s0 + $0xf84] ss:$16 sps:$4 sm:$0xff]  }
 0x311   :  { %4175 = vmatmul.mubr.bf16.gmra.mrb[232].mxu0 %v8771_v18  ;;  %5650 = vmatmul.mubr.bf16.gmra.mrb[232].mxu1 %v8772_v11  ;;  %v8783_v18 = vld [vmem:[%s11863_s0 + $0xb80] ss:$16 sps:$4 sm:$0xff]   ;;  %v8793_v2 = vld [vmem:[%s11863_s0 + $0xfc4] ss:$16 sps:$4 sm:$0xff]  }
 0x312   :  { %4182 = vmatprep.mubr.bf16.mxu0 %v8773_v58  ;;  %5657 = vmatprep.mubr.bf16.mxu1 %v8775_v30  ;;  %v8784_v11 = vld [vmem:[%s11863_s0 + $0xf80] ss:$16 sps:$4 sm:$0xff]   ;;  %v8785_v58 = vld [vmem:[%s11863_s0 + $0xba4] ss:$16 sps:$4 sm:$0xff]  }
 0x313   :  { %v8787_v30 = vld [vmem:[%s11863_s0 + $0xfa4] ss:$16 sps:$4 sm:$0xff]  }
 0x319   :  { %4183 = vmatmul.mubr.bf16.gmra.mrb[236].mxu0 %v8777_v44  ;;  %5658 = vmatmul.mubr.bf16.gmra.mrb[236].mxu1 %v8778_v4  ;;  %v8789_v44 = vld [vmem:[%s11863_s0 + $0xba0] ss:$16 sps:$4 sm:$0xff]   ;;  %v8791_v4 = vld [vmem:[%s11863_s0 + $0xbc4] ss:$16 sps:$4 sm:$0xff]  }
 0x31a   :  { %4190 = vmatprep.mubr.bf16.mxu0 %v8779_v37  ;;  %5665 = vmatprep.mubr.bf16.mxu1 %v8781_v26  ;;  %v8790_v37 = vld [vmem:[%s11863_s0 + $0xfa0] ss:$16 sps:$4 sm:$0xff]  }
 0x31b   :  { %v8795_v26 = vld [vmem:[%s11863_s0 + $0xbc0] ss:$16 sps:$4 sm:$0xff]  }
 0x321   :  { %4191 = vmatmul.mubr.bf16.gmra.mrb[240].mxu0 %v8783_v18  ;;  %5666 = vmatmul.mubr.bf16.gmra.mrb[240].mxu1 %v8784_v11  ;;  %v8796_v18 = vld [vmem:[%s11863_s0 + $0xfc0] ss:$16 sps:$4 sm:$0xff]   ;;  %v8797_v11 = vld [vmem:[%s11863_s0 + $0xbe4] ss:$16 sps:$4 sm:$0xff]  }
 0x322   :  { %4198 = vmatprep.mubr.bf16.mxu0 %v8785_v58  ;;  %5673 = vmatprep.mubr.bf16.mxu1 %v8787_v30  ;;  %v8799_v58 = vld [vmem:[%s11863_s0 + $0xfe4] ss:$16 sps:$4 sm:$0xff]   ;;  %v8801_v30 = vld [vmem:[%s11863_s0 + $0xbe0] ss:$16 sps:$4 sm:$0xff]  }
 0x329   :  { %4199 = vmatmul.mubr.bf16.gmra.mrb[244].mxu0 %v8789_v44  ;;  %5674 = vmatmul.mubr.bf16.gmra.mrb[244].mxu1 %v8790_v37  ;;  %v8802_v44 = vld [vmem:[%s11863_s0 + $0xfe0] ss:$16 sps:$4 sm:$0xff]   ;;  %v8805_v37 = vld [vmem:[%s11863_s0 + $0x80c] ss:$16 sps:$4 sm:$0xff]  }
 0x32a   :  { %4206 = vmatprep.mubr.bf16.mxu0 %v8791_v4  ;;  %5681 = vmatprep.mubr.bf16.mxu1 %v8793_v2  ;;  %v8808_v4 = vld [vmem:[%s11863_s0 + $0xc0c] ss:$16 sps:$4 sm:$0xff]   ;;  %v8803_v2 = vld [vmem:[%s11863_s0 + $0x808] ss:$16 sps:$4 sm:$0xff]  }
 0x331   :  { %4207 = vmatmul.mubr.bf16.gmra.mrb[248].mxu0 %v8795_v26  ;;  %5682 = vmatmul.mubr.bf16.gmra.mrb[248].mxu1 %v8796_v18  ;;  %v8806_v26 = vld [vmem:[%s11863_s0 + $0xc08] ss:$16 sps:$4 sm:$0xff]   ;;  %v8809_v18 = vld [vmem:[%s11863_s0 + $0x82c] ss:$16 sps:$4 sm:$0xff]  }
 0x332   :  { %4214 = vmatprep.mubr.bf16.mxu0 %v8797_v11  ;;  %5689 = vmatprep.mubr.bf16.mxu1 %v8799_v58  ;;  %v8811_v11 = vld [vmem:[%s11863_s0 + $0xc2c] ss:$16 sps:$4 sm:$0xff]   ;;  %v8813_v58 = vld [vmem:[%s11863_s0 + $0x828] ss:$16 sps:$4 sm:$0xff]  }
 0x339   :  { %4215 = vmatmul.mubr.bf16.gmra.mrb[252].mxu0 %v8801_v30  ;;  %5690 = vmatmul.mubr.bf16.gmra.mrb[252].mxu1 %v8802_v44  ;;  %v8814_v30 = vld [vmem:[%s11863_s0 + $0xc28] ss:$16 sps:$4 sm:$0xff]   ;;  %v8815_v44 = vld [vmem:[%s11863_s0 + $0x84c] ss:$16 sps:$4 sm:$0xff]  }
 0x33a   :  { %7240 = vmatprep.mubr.msk.bf16.mxu0 %vm951_vm0, %v8805_v37  ;;  %7528 = vmatprep.mubr.msk.bf16.mxu1 %vm951_vm0, %v8808_v4  ;;  %v8817_v37 = vld [vmem:[%s11863_s0 + $0xc4c] ss:$16 sps:$4 sm:$0xff]   ;;  %v8819_v4 = vld [vmem:[%s11863_s0 + $0x848] ss:$16 sps:$4 sm:$0xff]  }
 0x341   :  { %4256 = vmatmul.mubr.bf16.vlgmr.msra.gmra.mrb[128].mxu0 %v8803_v2  ;;  %5731 = vmatmul.mubr.bf16.vlgmr.msra.gmra.mrb[128].mxu1 %v8806_v26  ;;  %v8820_v2 = vld [vmem:[%s11863_s0 + $0xc48] ss:$16 sps:$4 sm:$0xff]   ;;  %v8821_v26 = vld [vmem:[%s11863_s0 + $0x86c] ss:$16 sps:$4 sm:$0xff]  }
 0x342   :  { %7241 = vmatprep.mubr.msk.bf16.mxu0 %vm951_vm0, %v8809_v18  ;;  %7529 = vmatprep.mubr.msk.bf16.mxu1 %vm951_vm0, %v8811_v11  ;;  %v8823_v18 = vld [vmem:[%s11863_s0 + $0xc6c] ss:$16 sps:$4 sm:$0xff]   ;;  %v8825_v11 = vld [vmem:[%s11863_s0 + $0x868] ss:$16 sps:$4 sm:$0xff]  }
 0x349   :  { %4264 = vmatmul.mubr.bf16.gmra.mrb[132].mxu0 %v8813_v58  ;;  %5739 = vmatmul.mubr.bf16.gmra.mrb[132].mxu1 %v8814_v30  ;;  %v8826_v58 = vld [vmem:[%s11863_s0 + $0xc68] ss:$16 sps:$4 sm:$0xff]   ;;  %v8827_v30 = vld [vmem:[%s11863_s0 + $0x88c] ss:$16 sps:$4 sm:$0xff]  }
 0x34a   :  { %7242 = vmatprep.mubr.msk.bf16.mxu0 %vm951_vm0, %v8815_v44  ;;  %7530 = vmatprep.mubr.msk.bf16.mxu1 %vm951_vm0, %v8817_v37  ;;  %v8829_v44 = vld [vmem:[%s11863_s0 + $0xc8c] ss:$16 sps:$4 sm:$0xff]   ;;  %v8831_v37 = vld [vmem:[%s11863_s0 + $0x888] ss:$16 sps:$4 sm:$0xff]  }
 0x351   :  { %4272 = vmatmul.mubr.bf16.gmra.mrb[136].mxu0 %v8819_v4  ;;  %5747 = vmatmul.mubr.bf16.gmra.mrb[136].mxu1 %v8820_v2  ;;  %v8832_v4 = vld [vmem:[%s11863_s0 + $0xc88] ss:$16 sps:$4 sm:$0xff]   ;;  %v8833_v2 = vld [vmem:[%s11863_s0 + $0x8ac] ss:$16 sps:$4 sm:$0xff]  }
 0x352   :  { %7243 = vmatprep.mubr.msk.bf16.mxu0 %vm951_vm0, %v8821_v26  ;;  %7531 = vmatprep.mubr.msk.bf16.mxu1 %vm951_vm0, %v8823_v18  ;;  %v8835_v26 = vld [vmem:[%s11863_s0 + $0xcac] ss:$16 sps:$4 sm:$0xff]   ;;  %v8837_v18 = vld [vmem:[%s11863_s0 + $0x8a8] ss:$16 sps:$4 sm:$0xff]  }
 0x359   :  { %4280 = vmatmul.mubr.bf16.gmra.mrb[140].mxu0 %v8825_v11  ;;  %5755 = vmatmul.mubr.bf16.gmra.mrb[140].mxu1 %v8826_v58  ;;  %v8838_v11 = vld [vmem:[%s11863_s0 + $0xca8] ss:$16 sps:$4 sm:$0xff]   ;;  %v8839_v58 = vld [vmem:[%s11863_s0 + $0x8cc] ss:$16 sps:$4 sm:$0xff]  }
 0x35a   :  { %7244 = vmatprep.mubr.msk.bf16.mxu0 %vm951_vm0, %v8827_v30  ;;  %7532 = vmatprep.mubr.msk.bf16.mxu1 %vm951_vm0, %v8829_v44  ;;  %v8841_v30 = vld [vmem:[%s11863_s0 + $0xccc] ss:$16 sps:$4 sm:$0xff]   ;;  %v8843_v44 = vld [vmem:[%s11863_s0 + $0x8c8] ss:$16 sps:$4 sm:$0xff]  }
 0x361   :  { %4288 = vmatmul.mubr.bf16.gmra.mrb[144].mxu0 %v8831_v37  ;;  %5763 = vmatmul.mubr.bf16.gmra.mrb[144].mxu1 %v8832_v4  ;;  %v8844_v37 = vld [vmem:[%s11863_s0 + $0xcc8] ss:$16 sps:$4 sm:$0xff]   ;;  %v8845_v4 = vld [vmem:[%s11863_s0 + $0x8ec] ss:$16 sps:$4 sm:$0xff]  }
 0x362   :  { %7245 = vmatprep.mubr.msk.bf16.mxu0 %vm951_vm0, %v8833_v2  ;;  %7533 = vmatprep.mubr.msk.bf16.mxu1 %vm951_vm0, %v8835_v26  ;;  %v8847_v2 = vld [vmem:[%s11863_s0 + $0xcec] ss:$16 sps:$4 sm:$0xff]   ;;  %v8849_v26 = vld [vmem:[%s11863_s0 + $0x8e8] ss:$16 sps:$4 sm:$0xff]  }
 0x369   :  { %4296 = vmatmul.mubr.bf16.gmra.mrb[148].mxu0 %v8837_v18  ;;  %5771 = vmatmul.mubr.bf16.gmra.mrb[148].mxu1 %v8838_v11  ;;  %v8850_v18 = vld [vmem:[%s11863_s0 + $0xce8] ss:$16 sps:$4 sm:$0xff]   ;;  %v8851_v11 = vld [vmem:[%s11863_s0 + $0x90c] ss:$16 sps:$4 sm:$0xff]  }
 0x36a   :  { %7246 = vmatprep.mubr.msk.bf16.mxu0 %vm951_vm0, %v8839_v58  ;;  %7534 = vmatprep.mubr.msk.bf16.mxu1 %vm951_vm0, %v8841_v30  ;;  %v8853_v58 = vld [vmem:[%s11863_s0 + $0xd0c] ss:$16 sps:$4 sm:$0xff]   ;;  %v8855_v30 = vld [vmem:[%s11863_s0 + $0x908] ss:$16 sps:$4 sm:$0xff]  }
 0x371   :  { %4304 = vmatmul.mubr.bf16.gmra.mrb[152].mxu0 %v8843_v44  ;;  %5779 = vmatmul.mubr.bf16.gmra.mrb[152].mxu1 %v8844_v37  ;;  %v8856_v44 = vld [vmem:[%s11863_s0 + $0xd08] ss:$16 sps:$4 sm:$0xff]   ;;  %v8857_v37 = vld [vmem:[%s11863_s0 + $0x92c] ss:$16 sps:$4 sm:$0xff]  }
 0x372   :  { %7247 = vmatprep.mubr.msk.bf16.mxu0 %vm951_vm0, %v8845_v4  ;;  %7535 = vmatprep.mubr.msk.bf16.mxu1 %vm951_vm0, %v8847_v2  ;;  %v8859_v4 = vld [vmem:[%s11863_s0 + $0xd2c] ss:$16 sps:$4 sm:$0xff]   ;;  %v8861_v2 = vld [vmem:[%s11863_s0 + $0x928] ss:$16 sps:$4 sm:$0xff]  }
 0x379   :  { %4312 = vmatmul.mubr.bf16.gmra.mrb[156].mxu0 %v8849_v26  ;;  %5787 = vmatmul.mubr.bf16.gmra.mrb[156].mxu1 %v8850_v18  ;;  %v8862_v26 = vld [vmem:[%s11863_s0 + $0xd28] ss:$16 sps:$4 sm:$0xff]   ;;  %v8863_v18 = vld [vmem:[%s11863_s0 + $0x94c] ss:$16 sps:$4 sm:$0xff]  }
 0x37a   :  { %7248 = vmatprep.mubr.msk.bf16.mxu0 %vm951_vm0, %v8851_v11  ;;  %7536 = vmatprep.mubr.msk.bf16.mxu1 %vm951_vm0, %v8853_v58  ;;  %v8865_v11 = vld [vmem:[%s11863_s0 + $0xd4c] ss:$16 sps:$4 sm:$0xff]   ;;  %v8867_v58 = vld [vmem:[%s11863_s0 + $0x948] ss:$16 sps:$4 sm:$0xff]  }
 0x381   :  { %4320 = vmatmul.mubr.bf16.gmra.mrb[160].mxu0 %v8855_v30  ;;  %5795 = vmatmul.mubr.bf16.gmra.mrb[160].mxu1 %v8856_v44  ;;  %v8868_v30 = vld [vmem:[%s11863_s0 + $0xd48] ss:$16 sps:$4 sm:$0xff]   ;;  %v8869_v44 = vld [vmem:[%s11863_s0 + $0x96c] ss:$16 sps:$4 sm:$0xff]  }
 0x382   :  { %7249 = vmatprep.mubr.msk.bf16.mxu0 %vm951_vm0, %v8857_v37  ;;  %7537 = vmatprep.mubr.msk.bf16.mxu1 %vm951_vm0, %v8859_v4  ;;  %v8871_v37 = vld [vmem:[%s11863_s0 + $0xd6c] ss:$16 sps:$4 sm:$0xff]   ;;  %v8873_v4 = vld [vmem:[%s11863_s0 + $0x968] ss:$16 sps:$4 sm:$0xff]  }
 0x389   :  { %4328 = vmatmul.mubr.bf16.gmra.mrb[164].mxu0 %v8861_v2  ;;  %5803 = vmatmul.mubr.bf16.gmra.mrb[164].mxu1 %v8862_v26  ;;  %v8874_v2 = vld [vmem:[%s11863_s0 + $0xd68] ss:$16 sps:$4 sm:$0xff]   ;;  %v8875_v26 = vld [vmem:[%s11863_s0 + $0x98c] ss:$16 sps:$4 sm:$0xff]  }
 0x38a   :  { %7250 = vmatprep.mubr.msk.bf16.mxu0 %vm951_vm0, %v8863_v18  ;;  %7538 = vmatprep.mubr.msk.bf16.mxu1 %vm951_vm0, %v8865_v11  ;;  %v8877_v18 = vld [vmem:[%s11863_s0 + $0xd8c] ss:$16 sps:$4 sm:$0xff]   ;;  %v8879_v11 = vld [vmem:[%s11863_s0 + $0x988] ss:$16 sps:$4 sm:$0xff]  }
 0x391   :  { %4336 = vmatmul.mubr.bf16.gmra.mrb[168].mxu0 %v8867_v58  ;;  %5811 = vmatmul.mubr.bf16.gmra.mrb[168].mxu1 %v8868_v30  ;;  %v8880_v58 = vld [vmem:[%s11863_s0 + $0xd88] ss:$16 sps:$4 sm:$0xff]   ;;  %v8881_v30 = vld [vmem:[%s11863_s0 + $0x9ac] ss:$16 sps:$4 sm:$0xff]  }
 0x392   :  { %7251 = vmatprep.mubr.msk.bf16.mxu0 %vm951_vm0, %v8869_v44  ;;  %7539 = vmatprep.mubr.msk.bf16.mxu1 %vm951_vm0, %v8871_v37  ;;  %v8883_v44 = vld [vmem:[%s11863_s0 + $0xdac] ss:$16 sps:$4 sm:$0xff]   ;;  %v8885_v37 = vld [vmem:[%s11863_s0 + $0x9a8] ss:$16 sps:$4 sm:$0xff]  }
 0x399   :  { %4344 = vmatmul.mubr.bf16.gmra.mrb[172].mxu0 %v8873_v4  ;;  %5819 = vmatmul.mubr.bf16.gmra.mrb[172].mxu1 %v8874_v2  ;;  %v8886_v4 = vld [vmem:[%s11863_s0 + $0xda8] ss:$16 sps:$4 sm:$0xff]   ;;  %v8887_v2 = vld [vmem:[%s11863_s0 + $0x9cc] ss:$16 sps:$4 sm:$0xff]  }
 0x39a   :  { %7252 = vmatprep.mubr.msk.bf16.mxu0 %vm951_vm0, %v8875_v26  ;;  %7540 = vmatprep.mubr.msk.bf16.mxu1 %vm951_vm0, %v8877_v18  ;;  %v8889_v26 = vld [vmem:[%s11863_s0 + $0xdcc] ss:$16 sps:$4 sm:$0xff]   ;;  %v8891_v18 = vld [vmem:[%s11863_s0 + $0x9c8] ss:$16 sps:$4 sm:$0xff]  }
 0x3a1   :  { %4352 = vmatmul.mubr.bf16.gmra.mrb[176].mxu0 %v8879_v11  ;;  %5827 = vmatmul.mubr.bf16.gmra.mrb[176].mxu1 %v8880_v58  ;;  %v8892_v11 = vld [vmem:[%s11863_s0 + $0xdc8] ss:$16 sps:$4 sm:$0xff]   ;;  %v8893_v58 = vld [vmem:[%s11863_s0 + $0x9ec] ss:$16 sps:$4 sm:$0xff]  }
 0x3a2   :  { %7253 = vmatprep.mubr.msk.bf16.mxu0 %vm951_vm0, %v8881_v30  ;;  %7541 = vmatprep.mubr.msk.bf16.mxu1 %vm951_vm0, %v8883_v44  ;;  %v8895_v30 = vld [vmem:[%s11863_s0 + $0xdec] ss:$16 sps:$4 sm:$0xff]   ;;  %v8897_v44 = vld [vmem:[%s11863_s0 + $0x9e8] ss:$16 sps:$4 sm:$0xff]  }
 0x3a9   :  { %4360 = vmatmul.mubr.bf16.gmra.mrb[180].mxu0 %v8885_v37  ;;  %5835 = vmatmul.mubr.bf16.gmra.mrb[180].mxu1 %v8886_v4  ;;  %v8898_v37 = vld [vmem:[%s11863_s0 + $0xde8] ss:$16 sps:$4 sm:$0xff]   ;;  %v8899_v4 = vld [vmem:[%s11863_s0 + $0xa0c] ss:$16 sps:$4 sm:$0xff]  }
 0x3aa   :  { %7254 = vmatprep.mubr.msk.bf16.mxu0 %vm951_vm0, %v8887_v2  ;;  %7542 = vmatprep.mubr.msk.bf16.mxu1 %vm951_vm0, %v8889_v26  ;;  %v8901_v2 = vld [vmem:[%s11863_s0 + $0xe0c] ss:$16 sps:$4 sm:$0xff]   ;;  %v8903_v26 = vld [vmem:[%s11863_s0 + $0xa08] ss:$16 sps:$4 sm:$0xff]  }
 0x3b1   :  { %4368 = vmatmul.mubr.bf16.gmra.mrb[184].mxu0 %v8891_v18  ;;  %5843 = vmatmul.mubr.bf16.gmra.mrb[184].mxu1 %v8892_v11  ;;  %v8904_v18 = vld [vmem:[%s11863_s0 + $0xe08] ss:$16 sps:$4 sm:$0xff]   ;;  %v8905_v11 = vld [vmem:[%s11863_s0 + $0xa2c] ss:$16 sps:$4 sm:$0xff]  }
 0x3b2   :  { %7255 = vmatprep.mubr.msk.bf16.mxu0 %vm951_vm0, %v8893_v58  ;;  %7543 = vmatprep.mubr.msk.bf16.mxu1 %vm951_vm0, %v8895_v30  ;;  %v8907_v58 = vld [vmem:[%s11863_s0 + $0xe2c] ss:$16 sps:$4 sm:$0xff]   ;;  %v8909_v30 = vld [vmem:[%s11863_s0 + $0xa28] ss:$16 sps:$4 sm:$0xff]  }
 0x3b9   :  { %4376 = vmatmul.mubr.bf16.gmra.mrb[188].mxu0 %v8897_v44  ;;  %5851 = vmatmul.mubr.bf16.gmra.mrb[188].mxu1 %v8898_v37  ;;  %v8910_v44 = vld [vmem:[%s11863_s0 + $0xe28] ss:$16 sps:$4 sm:$0xff]   ;;  %v8911_v37 = vld [vmem:[%s11863_s0 + $0xa4c] ss:$16 sps:$4 sm:$0xff]  }
 0x3ba   :  { %7256 = vmatprep.mubr.msk.bf16.mxu0 %vm951_vm0, %v8899_v4  ;;  %7544 = vmatprep.mubr.msk.bf16.mxu1 %vm951_vm0, %v8901_v2  ;;  %v8913_v4 = vld [vmem:[%s11863_s0 + $0xe4c] ss:$16 sps:$4 sm:$0xff]   ;;  %v8915_v2 = vld [vmem:[%s11863_s0 + $0xa48] ss:$16 sps:$4 sm:$0xff]  }
 0x3c1   :  { %4384 = vmatmul.mubr.bf16.gmra.mrb[192].mxu0 %v8903_v26  ;;  %5859 = vmatmul.mubr.bf16.gmra.mrb[192].mxu1 %v8904_v18  ;;  %v8916_v26 = vld [vmem:[%s11863_s0 + $0xe48] ss:$16 sps:$4 sm:$0xff]   ;;  %v8917_v18 = vld [vmem:[%s11863_s0 + $0xa6c] ss:$16 sps:$4 sm:$0xff]  }
 0x3c2   :  { %7257 = vmatprep.mubr.msk.bf16.mxu0 %vm951_vm0, %v8905_v11  ;;  %7545 = vmatprep.mubr.msk.bf16.mxu1 %vm951_vm0, %v8907_v58  ;;  %v8919_v11 = vld [vmem:[%s11863_s0 + $0xe6c] ss:$16 sps:$4 sm:$0xff]   ;;  %v8921_v58 = vld [vmem:[%s11863_s0 + $0xa68] ss:$16 sps:$4 sm:$0xff]  }
 0x3c9   :  { %4392 = vmatmul.mubr.bf16.gmra.mrb[196].mxu0 %v8909_v30  ;;  %5867 = vmatmul.mubr.bf16.gmra.mrb[196].mxu1 %v8910_v44  ;;  %v8922_v30 = vld [vmem:[%s11863_s0 + $0xe68] ss:$16 sps:$4 sm:$0xff]   ;;  %v8923_v44 = vld [vmem:[%s11863_s0 + $0xa8c] ss:$16 sps:$4 sm:$0xff]  }
 0x3ca   :  { %7258 = vmatprep.mubr.msk.bf16.mxu0 %vm951_vm0, %v8911_v37  ;;  %7546 = vmatprep.mubr.msk.bf16.mxu1 %vm951_vm0, %v8913_v4  ;;  %v8925_v37 = vld [vmem:[%s11863_s0 + $0xe8c] ss:$16 sps:$4 sm:$0xff]   ;;  %v8927_v4 = vld [vmem:[%s11863_s0 + $0xa88] ss:$16 sps:$4 sm:$0xff]  }
 0x3d1   :  { %4400 = vmatmul.mubr.bf16.gmra.mrb[200].mxu0 %v8915_v2  ;;  %5875 = vmatmul.mubr.bf16.gmra.mrb[200].mxu1 %v8916_v26  ;;  %v8928_v2 = vld [vmem:[%s11863_s0 + $0xe88] ss:$16 sps:$4 sm:$0xff]   ;;  %v8929_v26 = vld [vmem:[%s11863_s0 + $0xaac] ss:$16 sps:$4 sm:$0xff]  }
 0x3d2   :  { %7259 = vmatprep.mubr.msk.bf16.mxu0 %vm951_vm0, %v8917_v18  ;;  %7547 = vmatprep.mubr.msk.bf16.mxu1 %vm951_vm0, %v8919_v11  ;;  %v8931_v18 = vld [vmem:[%s11863_s0 + $0xeac] ss:$16 sps:$4 sm:$0xff]   ;;  %v8933_v11 = vld [vmem:[%s11863_s0 + $0xaa8] ss:$16 sps:$4 sm:$0xff]  }
 0x3d9   :  { %4408 = vmatmul.mubr.bf16.gmra.mrb[204].mxu0 %v8921_v58  ;;  %5883 = vmatmul.mubr.bf16.gmra.mrb[204].mxu1 %v8922_v30  ;;  %v8934_v58 = vld [vmem:[%s11863_s0 + $0xea8] ss:$16 sps:$4 sm:$0xff]   ;;  %v8935_v30 = vld [vmem:[%s11863_s0 + $0xacc] ss:$16 sps:$4 sm:$0xff]  }
 0x3da   :  { %7260 = vmatprep.mubr.msk.bf16.mxu0 %vm951_vm0, %v8923_v44  ;;  %7548 = vmatprep.mubr.msk.bf16.mxu1 %vm951_vm0, %v8925_v37  ;;  %v8937_v44 = vld [vmem:[%s11863_s0 + $0xecc] ss:$16 sps:$4 sm:$0xff]   ;;  %v8939_v37 = vld [vmem:[%s11863_s0 + $0xac8] ss:$16 sps:$4 sm:$0xff]  }
 0x3e1   :  { %4416 = vmatmul.mubr.bf16.gmra.mrb[208].mxu0 %v8927_v4  ;;  %5891 = vmatmul.mubr.bf16.gmra.mrb[208].mxu1 %v8928_v2  ;;  %v8940_v4 = vld [vmem:[%s11863_s0 + $0xec8] ss:$16 sps:$4 sm:$0xff]   ;;  %v8941_v2 = vld [vmem:[%s11863_s0 + $0xaec] ss:$16 sps:$4 sm:$0xff]  }
 0x3e2   :  { %7261 = vmatprep.mubr.msk.bf16.mxu0 %vm951_vm0, %v8929_v26  ;;  %7549 = vmatprep.mubr.msk.bf16.mxu1 %vm951_vm0, %v8931_v18  ;;  %v8943_v26 = vld [vmem:[%s11863_s0 + $0xeec] ss:$16 sps:$4 sm:$0xff]   ;;  %v8945_v18 = vld [vmem:[%s11863_s0 + $0xae8] ss:$16 sps:$4 sm:$0xff]  }
 0x3e9   :  { %4424 = vmatmul.mubr.bf16.gmra.mrb[212].mxu0 %v8933_v11  ;;  %5899 = vmatmul.mubr.bf16.gmra.mrb[212].mxu1 %v8934_v58  ;;  %v8946_v11 = vld [vmem:[%s11863_s0 + $0xee8] ss:$16 sps:$4 sm:$0xff]   ;;  %v8947_v58 = vld [vmem:[%s11863_s0 + $0xb0c] ss:$16 sps:$4 sm:$0xff]  }
 0x3ea   :  { %7262 = vmatprep.mubr.msk.bf16.mxu0 %vm951_vm0, %v8935_v30  ;;  %7550 = vmatprep.mubr.msk.bf16.mxu1 %vm951_vm0, %v8937_v44  ;;  %v8949_v30 = vld [vmem:[%s11863_s0 + $0xf0c] ss:$16 sps:$4 sm:$0xff]   ;;  %v8951_v44 = vld [vmem:[%s11863_s0 + $0xb08] ss:$16 sps:$4 sm:$0xff]  }
 0x3f1   :  { %4432 = vmatmul.mubr.bf16.gmra.mrb[216].mxu0 %v8939_v37  ;;  %5907 = vmatmul.mubr.bf16.gmra.mrb[216].mxu1 %v8940_v4  ;;  %v8952_v37 = vld [vmem:[%s11863_s0 + $0xf08] ss:$16 sps:$4 sm:$0xff]   ;;  %v8953_v4 = vld [vmem:[%s11863_s0 + $0xb2c] ss:$16 sps:$4 sm:$0xff]  }
 0x3f2   :  { %7263 = vmatprep.mubr.msk.bf16.mxu0 %vm951_vm0, %v8941_v2  ;;  %7551 = vmatprep.mubr.msk.bf16.mxu1 %vm951_vm0, %v8943_v26  ;;  %v8955_v2 = vld [vmem:[%s11863_s0 + $0xf2c] ss:$16 sps:$4 sm:$0xff]   ;;  %v8957_v26 = vld [vmem:[%s11863_s0 + $0xb28] ss:$16 sps:$4 sm:$0xff]  }
 0x3f9   :  { %4440 = vmatmul.mubr.bf16.gmra.mrb[220].mxu0 %v8945_v18  ;;  %5915 = vmatmul.mubr.bf16.gmra.mrb[220].mxu1 %v8946_v11  ;;  %v8958_v18 = vld [vmem:[%s11863_s0 + $0xf28] ss:$16 sps:$4 sm:$0xff]   ;;  %v8959_v11 = vld [vmem:[%s11863_s0 + $0xb4c] ss:$16 sps:$4 sm:$0xff]  }
 0x3fa   :  { %7264 = vmatprep.mubr.msk.bf16.mxu0 %vm951_vm0, %v8947_v58  ;;  %7552 = vmatprep.mubr.msk.bf16.mxu1 %vm951_vm0, %v8949_v30  ;;  %v8961_v58 = vld [vmem:[%s11863_s0 + $0xf4c] ss:$16 sps:$4 sm:$0xff]   ;;  %v8963_v30 = vld [vmem:[%s11863_s0 + $0xb48] ss:$16 sps:$4 sm:$0xff]  }
 0x401   :  { %4448 = vmatmul.mubr.bf16.gmra.mrb[224].mxu0 %v8951_v44  ;;  %5923 = vmatmul.mubr.bf16.gmra.mrb[224].mxu1 %v8952_v37  ;;  %v8964_v44 = vld [vmem:[%s11863_s0 + $0xf48] ss:$16 sps:$4 sm:$0xff]   ;;  %v8965_v37 = vld [vmem:[%s11863_s0 + $0xb6c] ss:$16 sps:$4 sm:$0xff]  }
 0x402   :  { %7265 = vmatprep.mubr.msk.bf16.mxu0 %vm951_vm0, %v8953_v4  ;;  %7553 = vmatprep.mubr.msk.bf16.mxu1 %vm951_vm0, %v8955_v2  ;;  %v8967_v4 = vld [vmem:[%s11863_s0 + $0xf6c] ss:$16 sps:$4 sm:$0xff]  }
 0x409   :  { %4456 = vmatmul.mubr.bf16.gmra.mrb[228].mxu0 %v8957_v26  ;;  %5931 = vmatmul.mubr.bf16.gmra.mrb[228].mxu1 %v8958_v18  ;;  %v11281_v18 = vld [vmem:[%s11864_s2] ss:$0 sm:$0xff] }
 0x40a   :  { %7266 = vmatprep.mubr.msk.bf16.mxu0 %vm951_vm0, %v8959_v11  ;;  %7554 = vmatprep.mubr.msk.bf16.mxu1 %vm951_vm0, %v8961_v58  ;;  %v12026_v11 = vmax.f32 %v10019_v28, %v10021_v29  ;;  %v8973_v28 = vld [vmem:[%s11863_s0 + $0xf8c] ss:$16 sps:$4 sm:$0xff]  }
 0x411   :  { %4464 = vmatmul.mubr.bf16.gmra.mrb[232].mxu0 %v8963_v30  ;;  %5939 = vmatmul.mubr.bf16.gmra.mrb[232].mxu1 %v8964_v44  ;;  %v8969_v30 = vld [vmem:[%s11863_s0 + $0xb68] ss:$16 sps:$4 sm:$0xff]  }
 0x412   :  { %7267 = vmatprep.mubr.msk.bf16.mxu0 %vm951_vm0, %v8965_v37  ;;  %7555 = vmatprep.mubr.msk.bf16.mxu1 %vm951_vm0, %v8967_v4  ;;  %v8970_v44 = vld [vmem:[%s11863_s0 + $0xf68] ss:$16 sps:$4 sm:$0xff]  }
 0x414   :  { %v4257_v2 = vpop.f32.mrb[128].mxu0  ;;  %v5732_v26 = vpop.f32.mrb[128].mxu1 }
 0x415   :  { %v4512_v58 = vmax.f32 %v12026_v11, %v4257_v2  ;;  %v4259_v39 = vpop.f32.mrb[129].mxu0  ;;  %v5734_v23 = vpop.f32.mrb[129].mxu1 }
 0x416   :  { %v4260_v37 = vpop.f32.mrb[130].mxu0  ;;  %v5735_v4 = vpop.f32.mrb[130].mxu1  ;;  %v12027_v23 = vmax.f32 %v10031_v35, %v10033_v36  ;;  %v8975_v35 = vld [vmem:[%s11863_s0 + $0xb88] ss:$16 sps:$4 sm:$0xff]  }
 0x417   :  { %v5987_v29 = vmax.f32 %v4512_v58, %v5732_v26  ;;  %v4262_v2 = vpop.f32.mrb[131].mxu0  ;;  %v5737_v11 = vpop.f32.mrb[131].mxu1 }
 0x418   :  { %v4513_v39 = vmax.f32 %v12027_v23, %v4260_v37 }
 0x419   :  { %v6058_v9 = vadd.f32 %v11281_v18, %v5987_v29  ;;  %4472 = vmatmul.mubr.bf16.gmra.mrb[236].mxu0 %v8969_v30  ;;  %5947 = vmatmul.mubr.bf16.gmra.mrb[236].mxu1 %v8970_v44  ;;  %v12028_v30 = vmax.f32 %v10045_v42, %v10047_v43  ;;  %v8977_v29 = vld [vmem:[%s11863_s0 + $0xbac] ss:$16 sps:$4 sm:$0xff]  }
 0x41a   :  { %v5988_v51 = vmax.f32 %v4513_v39, %v5735_v4  ;;  %7268 = vmatprep.mubr.msk.bf16.mxu0 %vm951_vm0, %v8971_v47  ;;  %7556 = vmatprep.mubr.msk.bf16.mxu1 %vm951_vm0, %v8973_v28 }
 0x41b   :  { %v6122_v53 = vmax.f32 %v6058_v9, 0.0  ;;  %v8976_v9 = vld [vmem:[%s11863_s0 + $0xf88] ss:$16 sps:$4 sm:$0xff]  }
 0x41c   :  { %v6059_v46 = vadd.f32 %v11281_v18, %v5988_v51  ;;  %v4265_v26 = vpop.f32.mrb[132].mxu0  ;;  %v5740_v58 = vpop.f32.mrb[132].mxu1 }
 0x41d   :  { %v7625_v36 = vpack.c.bf16 %v6122_v53, %v6122_v53  ;;  %v4514_v44 = vmax.f32 %v12028_v30, %v4265_v26  ;;  %v4267_v4 = vpop.f32.mrb[133].mxu0  ;;  %v5742_v47 = vpop.f32.mrb[133].mxu1  ;;  %v12029_v53 = vmax.f32 %v10057_v49, %v10059_v50 }
 0x41e   :  { %v6123_v37 = vmax.f32 %v6059_v46, 0.0  ;;  %v4268_v51 = vpop.f32.mrb[134].mxu0  ;;  %v5743_v28 = vpop.f32.mrb[134].mxu1  ;;  %v8979_v46 = vld [vmem:[%s11863_s0 + $0xfac] ss:$16 sps:$4 sm:$0xff]   ;;  %v12030_v4 = vmax.f32 %v10071_v56, %v10073_v57 }
 0x41f   :  { %6443 = vst.msk [vmem:[%s11865_s3] sm:$0xf] %vm6442_vm1, %v7625_v36  ;;  %v5989_v43 = vmax.f32 %v4514_v44, %v5740_v58  ;;  %v4515_v23 = vmax.f32 %v12029_v53, %v4268_v51  ;;  %v4270_v39 = vpop.f32.mrb[135].mxu0  ;;  %v5745_v2 = vpop.f32.mrb[135].mxu1  ;;  %v8982_v51 = vld [vmem:[%s11863_s0 + $0xfa8] ss:$16 sps:$4 sm:$0xff]  }
 0x420   :  { %v7626_v42 = vpack.c.bf16 %v6123_v37, %v6123_v37  ;;  %v8981_v37 = vld [vmem:[%s11863_s0 + $0xba8] ss:$16 sps:$4 sm:$0xff]  }
 0x421   :  { %v6060_v11 = vadd.f32 %v11281_v18, %v5989_v43  ;;  %v5990_v26 = vmax.f32 %v4515_v23, %v5743_v28  ;;  %4480 = vmatmul.mubr.bf16.gmra.mrb[240].mxu0 %v8975_v35  ;;  %5955 = vmatmul.mubr.bf16.gmra.mrb[240].mxu1 %v8976_v9  ;;  %v12031_v43 = vmax.f32 %v10083_v63, %v10085_v1 }
 0x422   :  { %6444 = vst.msk [vmem:[%s11865_s3 + $0x4] sm:$0xf] %vm6442_vm1, %v7626_v42  ;;  %7269 = vmatprep.mubr.msk.bf16.mxu0 %vm951_vm0, %v8977_v29  ;;  %7557 = vmatprep.mubr.msk.bf16.mxu1 %vm951_vm0, %v8979_v46  ;;  %v8983_v46 = vld [vmem:[%s11863_s0 + $0xbcc] ss:$16 sps:$4 sm:$0xff]  }
 0x423   :  { %v6124_v58 = vmax.f32 %v6060_v11, 0.0  ;;  %v6061_v49 = vadd.f32 %v11281_v18, %v5990_v26  ;;  %v8985_v42 = vld [vmem:[%s11863_s0 + $0xfcc] ss:$16 sps:$4 sm:$0xff]  }
 0x424   :  { %v4273_v50 = vpop.f32.mrb[136].mxu0  ;;  %v5748_v36 = vpop.f32.mrb[136].mxu1 }
 0x425   :  { %v7627_v30 = vpack.c.bf16 %v6124_v58, %v6124_v58  ;;  %v6125_v44 = vmax.f32 %v6061_v49, 0.0  ;;  %v4516_v35 = vmax.f32 %v12030_v4, %v4273_v50  ;;  %v4275_v47 = vpop.f32.mrb[137].mxu0  ;;  %v5750_v9 = vpop.f32.mrb[137].mxu1  ;;  %v8987_v49 = vld [vmem:[%s11863_s0 + $0xbc8] ss:$16 sps:$4 sm:$0xff]  }
 0x426   :  { %v4276_v28 = vpop.f32.mrb[138].mxu0  ;;  %v5751_v29 = vpop.f32.mrb[138].mxu1 }
 0x427   :  { %6445 = vst.msk [vmem:[%s11865_s3 + $0x8] sm:$0xf] %vm6442_vm1, %v7627_v30  ;;  %v7628_v56 = vpack.c.bf16 %v6125_v44, %v6125_v44  ;;  %v5991_v57 = vmax.f32 %v4516_v35, %v5748_v36  ;;  %v4517_v53 = vmax.f32 %v12031_v43, %v4276_v28  ;;  %v4278_v23 = vpop.f32.mrb[139].mxu0  ;;  %v5753_v39 = vpop.f32.mrb[139].mxu1  ;;  %v12032_v30 = vmax.f32 %v10097_v7, %v10099_v8  ;;  %v8988_v35 = vld [vmem:[%s11863_s0 + $0xfc8] ss:$16 sps:$4 sm:$0xff]  }
 0x428   :  { %v8991_v28 = vld [vmem:[%s11863_s0 + $0xfec] ss:$16 sps:$4 sm:$0xff]   ;;  %v8993_v39 = vld [vmem:[%s11863_s0 + $0xbe8] ss:$16 sps:$4 sm:$0xff]  }
 0x429   :  { %6446 = vst.msk [vmem:[%s11865_s3 + $0xc] sm:$0xf] %vm6442_vm1, %v7628_v56  ;;  %v6062_v2 = vadd.f32 %v11281_v18, %v5991_v57  ;;  %v5992_v11 = vmax.f32 %v4517_v53, %v5751_v29  ;;  %4488 = vmatmul.mubr.bf16.gmra.mrb[244].mxu0 %v8981_v37  ;;  %5963 = vmatmul.mubr.bf16.gmra.mrb[244].mxu1 %v8982_v51  ;;  %v8989_v51 = vld [vmem:[%s11863_s0 + $0xbec] ss:$16 sps:$4 sm:$0xff]  }
 0x42a   :  { %7270 = vmatprep.mubr.msk.bf16.mxu0 %vm951_vm0, %v8983_v46  ;;  %7558 = vmatprep.mubr.msk.bf16.mxu1 %vm951_vm0, %v8985_v42  ;;  %v12033_v29 = vmax.f32 %v10109_v14, %v10111_v15 }
 0x42b   :  { %v6126_v26 = vmax.f32 %v6062_v2, 0.0  ;;  %v6063_v63 = vadd.f32 %v11281_v18, %v5992_v11 }
 0x42c   :  { %v4281_v1 = vpop.f32.mrb[140].mxu0  ;;  %v5756_v58 = vpop.f32.mrb[140].mxu1 }
 0x42d   :  { %v7629_v50 = vpack.c.bf16 %v6126_v26, %v6126_v26  ;;  %v6127_v36 = vmax.f32 %v6063_v63, 0.0  ;;  %v4518_v37 = vmax.f32 %v12032_v30, %v4281_v1  ;;  %v4283_v44 = vpop.f32.mrb[141].mxu0  ;;  %v5758_v4 = vpop.f32.mrb[141].mxu1  ;;  %v12034_v26 = vmax.f32 %v10123_v21, %v10125_v22 }
 0x42e   :  { %v4284_v47 = vpop.f32.mrb[142].mxu0  ;;  %v5759_v9 = vpop.f32.mrb[142].mxu1  ;;  %v12035_v44 = vmax.f32 %v10135_v31, %v10137_v32  ;;  %v12036_v32 = vmax.f32 %v10147_v41, %v10149_v45 }
 0x42f   :  { %6447 = vst.msk [vmem:[%s11865_s3 + $0x10] sm:$0xf] %vm6442_vm1, %v7629_v50  ;;  %v7630_v7 = vpack.c.bf16 %v6127_v36, %v6127_v36  ;;  %v5993_v8 = vmax.f32 %v4518_v37, %v5756_v58  ;;  %v4519_v46 = vmax.f32 %v12033_v29, %v4284_v47  ;;  %v4286_v42 = vpop.f32.mrb[143].mxu0  ;;  %v5761_v56 = vpop.f32.mrb[143].mxu1 }
 0x431   :  { %6448 = vst.msk [vmem:[%s11865_s3 + $0x14] sm:$0xf] %vm6442_vm1, %v7630_v7  ;;  %v6064_v57 = vadd.f32 %v11281_v18, %v5993_v8  ;;  %v5994_v43 = vmax.f32 %v4519_v46, %v5759_v9  ;;  %4496 = vmatmul.mubr.bf16.gmra.mrb[248].mxu0 %v8987_v49  ;;  %5971 = vmatmul.mubr.bf16.gmra.mrb[248].mxu1 %v8988_v35  ;;  %v8994_v49 = vld [vmem:[%s11863_s0 + $0xfe8] ss:$16 sps:$4 sm:$0xff]  }
 0x432   :  { %7271 = vmatprep.mubr.msk.bf16.mxu0 %vm951_vm0, %v8989_v51  ;;  %7559 = vmatprep.mubr.msk.bf16.mxu1 %vm951_vm0, %v8991_v28 }
 0x433   :  { %v6128_v53 = vmax.f32 %v6064_v57, 0.0  ;;  %v6065_v14 = vadd.f32 %v11281_v18, %v5994_v43 }
 0x434   :  { %v4289_v15 = vpop.f32.mrb[144].mxu0  ;;  %v5764_v23 = vpop.f32.mrb[144].mxu1 }
 0x435   :  { %v7631_v2 = vpack.c.bf16 %v6128_v53, %v6128_v53  ;;  %v6129_v11 = vmax.f32 %v6065_v14, 0.0  ;;  %v4520_v63 = vmax.f32 %v12034_v26, %v4289_v15  ;;  %v4291_v1 = vpop.f32.mrb[145].mxu0  ;;  %v5766_v58 = vpop.f32.mrb[145].mxu1  ;;  %v12037_v14 = vmax.f32 %v10159_v54, %v10161_v55 }
 0x436   :  { %v4292_v50 = vpop.f32.mrb[146].mxu0  ;;  %v5767_v36 = vpop.f32.mrb[146].mxu1  ;;  %v12038_v54 = vmax.f32 %v10174_v5, %v10176_v6 }
 0x437   :  { %6449 = vst.msk [vmem:[%s11865_s3 + $0x18] sm:$0xf] %vm6442_vm1, %v7631_v2  ;;  %v7632_v30 = vpack.c.bf16 %v6129_v11, %v6129_v11  ;;  %v5995_v37 = vmax.f32 %v4520_v63, %v5764_v23  ;;  %v4521_v21 = vmax.f32 %v12035_v44, %v4292_v50  ;;  %v4294_v22 = vpop.f32.mrb[147].mxu0  ;;  %v5769_v4 = vpop.f32.mrb[147].mxu1 }
 0x439   :  { %6450 = vst.msk [vmem:[%s11865_s3 + $0x1c] sm:$0xf] %vm6442_vm1, %v7632_v30  ;;  %v6066_v35 = vadd.f32 %v11281_v18, %v5995_v37  ;;  %v5996_v47 = vmax.f32 %v4521_v21, %v5767_v36  ;;  %4504 = vmatmul.mubr.bf16.gmra.mrb[252].mxu0 %v8993_v39  ;;  %5979 = vmatmul.mubr.bf16.gmra.mrb[252].mxu1 %v8994_v49 }
 0x43a   :  { %v12039_v21 = vmax.f32 %v10188_v17, %v10190_v19  ;;  %v12040_v17 = vmax.f32 %v10208_v38, %v10210_v40 }
 0x43b   :  { %v6130_v9 = vmax.f32 %v6066_v35, 0.0  ;;  %v6067_v51 = vadd.f32 %v11281_v18, %v5996_v47 }
 0x43c   :  { %v4297_v28 = vpop.f32.mrb[148].mxu0  ;;  %v5772_v7 = vpop.f32.mrb[148].mxu1 }
 0x43d   :  { %v7633_v8 = vpack.c.bf16 %v6130_v9, %v6130_v9  ;;  %v6131_v31 = vmax.f32 %v6067_v51, 0.0  ;;  %v4522_v29 = vmax.f32 %v12036_v32, %v4297_v28  ;;  %v4299_v46 = vpop.f32.mrb[149].mxu0  ;;  %v5774_v42 = vpop.f32.mrb[149].mxu1 }
 0x43e   :  { %v4300_v56 = vpop.f32.mrb[150].mxu0  ;;  %v5775_v57 = vpop.f32.mrb[150].mxu1 }
 0x43f   :  { %6451 = vst.msk [vmem:[%s11865_s3 + $0x20] sm:$0xf] %vm6442_vm1, %v7633_v8  ;;  %v7634_v43 = vpack.c.bf16 %v6131_v31, %v6131_v31  ;;  %v5997_v53 = vmax.f32 %v4522_v29, %v5772_v7  ;;  %v4523_v15 = vmax.f32 %v12037_v14, %v4300_v56  ;;  %v4302_v23 = vpop.f32.mrb[151].mxu0  ;;  %v5777_v39 = vpop.f32.mrb[151].mxu1 }
 0x441   :  { %6452 = vst.msk [vmem:[%s11865_s3 + $0x24] sm:$0xf] %vm6442_vm1, %v7634_v43  ;;  %v6068_v41 = vadd.f32 %v11281_v18, %v5997_v53  ;;  %v5998_v45 = vmax.f32 %v4523_v15, %v5775_v57  ;;  %v12041_v57 = vmax.f32 %v10222_v61, %v10224_v62  ;;  %v12042_v61 = vmax.f32 %v10242_v24, %v10244_v25 }
 0x443   :  { %v6132_v2 = vmax.f32 %v6068_v41, 0.0  ;;  %v6069_v11 = vadd.f32 %v11281_v18, %v5998_v45 }
 0x444   :  { %v4305_v26 = vpop.f32.mrb[152].mxu0  ;;  %v5780_v63 = vpop.f32.mrb[152].mxu1 }
 0x445   :  { %v7635_v1 = vpack.c.bf16 %v6132_v2, %v6132_v2  ;;  %v6133_v58 = vmax.f32 %v6069_v11, 0.0  ;;  %v4524_v55 = vmax.f32 %v12038_v54, %v4305_v26  ;;  %v4307_v49 = vpop.f32.mrb[153].mxu0  ;;  %v5782_v50 = vpop.f32.mrb[153].mxu1 }
 0x446   :  { %v4308_v36 = vpop.f32.mrb[154].mxu0  ;;  %v5783_v30 = vpop.f32.mrb[154].mxu1 }
 0x447   :  { %6453 = vst.msk [vmem:[%s11865_s3 + $0x28] sm:$0xf] %vm6442_vm1, %v7635_v1  ;;  %v7636_v37 = vpack.c.bf16 %v6133_v58, %v6133_v58  ;;  %v5999_v44 = vmax.f32 %v4524_v55, %v5780_v63  ;;  %v4525_v22 = vmax.f32 %v12039_v21, %v4308_v36  ;;  %v4310_v4 = vpop.f32.mrb[155].mxu0  ;;  %v5785_v35 = vpop.f32.mrb[155].mxu1  ;;  %v12043_v55 = vmax.f32 %v10256_v52, %v10258_v60 }
 0x448   :  { %v12044_v52 = vmax.f32 %v10276_v34, %v10278_v13 }
 0x449   :  { %6454 = vst.msk [vmem:[%s11865_s3 + $0x2c] sm:$0xf] %vm6442_vm1, %v7636_v37  ;;  %v6070_v5 = vadd.f32 %v11281_v18, %v5999_v44  ;;  %v6000_v6 = vmax.f32 %v4525_v22, %v5783_v30 }
 0x44b   :  { %v6134_v47 = vmax.f32 %v6070_v5, 0.0  ;;  %v6071_v9 = vadd.f32 %v11281_v18, %v6000_v6 }
 0x44c   :  { %v4313_v51 = vpop.f32.mrb[156].mxu0  ;;  %v5788_v28 = vpop.f32.mrb[156].mxu1 }
 0x44d   :  { %v7637_v7 = vpack.c.bf16 %v6134_v47, %v6134_v47  ;;  %v6135_v8 = vmax.f32 %v6071_v9, 0.0  ;;  %v4526_v19 = vmax.f32 %v12040_v17, %v4313_v51  ;;  %v4315_v31 = vpop.f32.mrb[157].mxu0  ;;  %v5790_v32 = vpop.f32.mrb[157].mxu1 }
 0x44e   :  { %v4316_v29 = vpop.f32.mrb[158].mxu0  ;;  %v5791_v46 = vpop.f32.mrb[158].mxu1 }
 0x44f   :  { %6455 = vst.msk [vmem:[%s11865_s3 + $0x30] sm:$0xf] %vm6442_vm1, %v7637_v7  ;;  %v7638_v42 = vpack.c.bf16 %v6135_v8, %v6135_v8  ;;  %v6001_v56 = vmax.f32 %v4526_v19, %v5788_v28  ;;  %v4527_v43 = vmax.f32 %v12041_v57, %v4316_v29  ;;  %v4318_v53 = vpop.f32.mrb[159].mxu0  ;;  %v5793_v14 = vpop.f32.mrb[159].mxu1  ;;  %v12045_v28 = vmax.f32 %v10290_v20, %v10292_v33 }
 0x450   :  { %v12046_v20 = vmax.f32 %v10310_v27, %v10312_v48 }
 0x451   :  { %6456 = vst.msk [vmem:[%s11865_s3 + $0x34] sm:$0xf] %vm6442_vm1, %v7638_v42  ;;  %v6072_v38 = vadd.f32 %v11281_v18, %v6001_v56  ;;  %v6002_v40 = vmax.f32 %v4527_v43, %v5791_v46 }
 0x453   :  { %v6136_v15 = vmax.f32 %v6072_v38, 0.0  ;;  %v6073_v23 = vadd.f32 %v11281_v18, %v6002_v40  ;;  %v12047_v40 = vmax.f32 %v10322_v3, %v10324_v16  ;;  %v12048_v3 = vmax.f32 %v10334_v10, %v10336_v59 }
 0x454   :  { %v4321_v39 = vpop.f32.mrb[160].mxu0  ;;  %v5796_v41 = vpop.f32.mrb[160].mxu1 }
 0x455   :  { %v7639_v45 = vpack.c.bf16 %v6136_v15, %v6136_v15  ;;  %v6137_v2 = vmax.f32 %v6073_v23, 0.0  ;;  %v4528_v62 = vmax.f32 %v12042_v61, %v4321_v39  ;;  %v4323_v11 = vpop.f32.mrb[161].mxu0  ;;  %v5798_v26 = vpop.f32.mrb[161].mxu1 }
 0x456   :  { %v4324_v63 = vpop.f32.mrb[162].mxu0  ;;  %v5799_v1 = vpop.f32.mrb[162].mxu1 }
 0x457   :  { %6457 = vst.msk [vmem:[%s11865_s3 + $0x38] sm:$0xf] %vm6442_vm1, %v7639_v45  ;;  %v7640_v58 = vpack.c.bf16 %v6137_v2, %v6137_v2  ;;  %v6003_v54 = vmax.f32 %v4528_v62, %v5796_v41  ;;  %v4529_v49 = vmax.f32 %v12043_v55, %v4324_v63  ;;  %v4326_v50 = vpop.f32.mrb[163].mxu0  ;;  %v5801_v36 = vpop.f32.mrb[163].mxu1 }
 0x459   :  { %6458 = vst.msk [vmem:[%s11865_s3 + $0x3c] sm:$0xf] %vm6442_vm1, %v7640_v58  ;;  %v6074_v24 = vadd.f32 %v11281_v18, %v6003_v54  ;;  %v6004_v25 = vmax.f32 %v4529_v49, %v5799_v1  ;;  %v12049_v49 = vmax.f32 %v10346_v0, %v10348_v12  ;;  %v12051_v0 = vld [vmem:[#allocation3_spill] sm:$0xff] }
 0x45b   :  { %v6138_v30 = vmax.f32 %v6074_v24, 0.0  ;;  %v6075_v37 = vadd.f32 %v11281_v18, %v6004_v25 }
 0x45c   :  { %v4329_v44 = vpop.f32.mrb[164].mxu0  ;;  %v5804_v21 = vpop.f32.mrb[164].mxu1 }
 0x45d   :  { %v7641_v22 = vpack.c.bf16 %v6138_v30, %v6138_v30  ;;  %v6139_v4 = vmax.f32 %v6075_v37, 0.0  ;;  %v4530_v60 = vmax.f32 %v12044_v52, %v4329_v44  ;;  %v4331_v35 = vpop.f32.mrb[165].mxu0  ;;  %v5806_v5 = vpop.f32.mrb[165].mxu1 }
 0x45e   :  { %v4332_v6 = vpop.f32.mrb[166].mxu0  ;;  %v5807_v47 = vpop.f32.mrb[166].mxu1 }
 0x45f   :  { %6459 = vst.msk [vmem:[%s11865_s3 + $0x40] sm:$0xf] %vm6442_vm1, %v7641_v22  ;;  %v7642_v9 = vpack.c.bf16 %v6139_v4, %v6139_v4  ;;  %v6005_v51 = vmax.f32 %v4530_v60, %v5804_v21  ;;  %v4531_v7 = vmax.f32 %v12045_v28, %v4332_v6  ;;  %v4334_v8 = vpop.f32.mrb[167].mxu0  ;;  %v5809_v17 = vpop.f32.mrb[167].mxu1  ;;  %v12050_v4 = vld [vmem:[#allocation2_spill] sm:$0xff]  ;;  %v12054_v28 = vld [vmem:[#allocation5_spill] sm:$0xff] }
 0x460   :  { %v12052_v12 = vmax.f32 %v12050_v4, %v12051_v0 }
 0x461   :  { %6460 = vst.msk [vmem:[%s11865_s3 + $0x44] sm:$0xf] %vm6442_vm1, %v7642_v9  ;;  %v6076_v34 = vadd.f32 %v11281_v18, %v6005_v51  ;;  %v6006_v13 = vmax.f32 %v4531_v7, %v5807_v47  ;;  %v12053_v51 = vld [vmem:[#allocation4_spill] sm:$0xff] }
 0x462   :  { %v12055_v7 = vmax.f32 %v12053_v51, %v12054_v28  ;;  %v12069_v51 = vld [vmem:[#allocation15_spill] sm:$0xff] }
 0x463   :  { %v6140_v19 = vmax.f32 %v6076_v34, 0.0  ;;  %v6077_v31 = vadd.f32 %v11281_v18, %v6006_v13 }
 0x464   :  { %v4337_v32 = vpop.f32.mrb[168].mxu0  ;;  %v5812_v29 = vpop.f32.mrb[168].mxu1 }
 0x465   :  { %v7643_v46 = vpack.c.bf16 %v6140_v19, %v6140_v19  ;;  %v6141_v42 = vmax.f32 %v6077_v31, 0.0  ;;  %v4532_v33 = vmax.f32 %v12046_v20, %v4337_v32  ;;  %v4339_v56 = vpop.f32.mrb[169].mxu0  ;;  %v5814_v57 = vpop.f32.mrb[169].mxu1 }
 0x466   :  { %v4340_v43 = vpop.f32.mrb[170].mxu0  ;;  %v5815_v53 = vpop.f32.mrb[170].mxu1  ;;  %v12057_v56 = vld [vmem:[#allocation7_spill] sm:$0xff] }
 0x467   :  { %6461 = vst.msk [vmem:[%s11865_s3 + $0x48] sm:$0xf] %vm6442_vm1, %v7643_v46  ;;  %v7644_v14 = vpack.c.bf16 %v6141_v42, %v6141_v42  ;;  %v6007_v38 = vmax.f32 %v4532_v33, %v5812_v29  ;;  %v4533_v15 = vmax.f32 %v12047_v40, %v4340_v43  ;;  %v4342_v23 = vpop.f32.mrb[171].mxu0  ;;  %v5817_v39 = vpop.f32.mrb[171].mxu1  ;;  %v12056_v33 = vld [vmem:[#allocation6_spill] sm:$0xff] }
 0x468   :  { %v12058_v57 = vmax.f32 %v12056_v33, %v12057_v56  ;;  %v12059_v39 = vld [vmem:[#allocation8_spill] sm:$0xff] }
 0x469   :  { %6462 = vst.msk [vmem:[%s11865_s3 + $0x4c] sm:$0xf] %vm6442_vm1, %v7644_v14  ;;  %v6078_v27 = vadd.f32 %v11281_v18, %v6007_v38  ;;  %v6008_v48 = vmax.f32 %v4533_v15, %v5815_v53 }
 0x46b   :  { %v6142_v41 = vmax.f32 %v6078_v27, 0.0  ;;  %v6079_v45 = vadd.f32 %v11281_v18, %v6008_v48  ;;  %v12060_v27 = vld [vmem:[#allocation9_spill] sm:$0xff] }
 0x46c   :  { %v4345_v2 = vpop.f32.mrb[172].mxu0  ;;  %v5820_v61 = vpop.f32.mrb[172].mxu1  ;;  %v12061_v48 = vmax.f32 %v12059_v39, %v12060_v27  ;;  %v12075_v39 = vld [vmem:[#allocation19_spill] sm:$0xff] }
 0x46d   :  { %v7645_v62 = vpack.c.bf16 %v6142_v41, %v6142_v41  ;;  %v6143_v11 = vmax.f32 %v6079_v45, 0.0  ;;  %v4534_v16 = vmax.f32 %v12048_v3, %v4345_v2  ;;  %v4347_v26 = vpop.f32.mrb[173].mxu0  ;;  %v5822_v63 = vpop.f32.mrb[173].mxu1 }
 0x46e   :  { %v4348_v1 = vpop.f32.mrb[174].mxu0  ;;  %v5823_v58 = vpop.f32.mrb[174].mxu1 }
 0x46f   :  { %6463 = vst.msk [vmem:[%s11865_s3 + $0x50] sm:$0xf] %vm6442_vm1, %v7645_v62  ;;  %v7646_v54 = vpack.c.bf16 %v6143_v11, %v6143_v11  ;;  %v6009_v55 = vmax.f32 %v4534_v16, %v5820_v61  ;;  %v4535_v50 = vmax.f32 %v12049_v49, %v4348_v1  ;;  %v4350_v36 = vpop.f32.mrb[175].mxu0  ;;  %v5825_v24 = vpop.f32.mrb[175].mxu1 }
 0x471   :  { %6464 = vst.msk [vmem:[%s11865_s3 + $0x54] sm:$0xf] %vm6442_vm1, %v7646_v54  ;;  %v6080_v59 = vadd.f32 %v11281_v18, %v6009_v55  ;;  %v6010_v10 = vmax.f32 %v4535_v50, %v5823_v58  ;;  %v12062_v58 = vld [vmem:[#allocation10_spill] sm:$0xff]  ;;  %v12063_v54 = vld [vmem:[#allocation11_spill] sm:$0xff] }
 0x472   :  { %v12064_v55 = vmax.f32 %v12062_v58, %v12063_v54 }
 0x473   :  { %v6144_v25 = vmax.f32 %v6080_v59, 0.0  ;;  %v6081_v30 = vadd.f32 %v11281_v18, %v6010_v10 }
 0x474   :  { %v4353_v37 = vpop.f32.mrb[176].mxu0  ;;  %v5828_v44 = vpop.f32.mrb[176].mxu1 }
 0x475   :  { %v7647_v21 = vpack.c.bf16 %v6144_v25, %v6144_v25  ;;  %v6145_v22 = vmax.f32 %v6081_v30, 0.0  ;;  %v4536_v52 = vmax.f32 %v12052_v12, %v4353_v37  ;;  %v4355_v60 = vpop.f32.mrb[177].mxu0  ;;  %v5830_v35 = vpop.f32.mrb[177].mxu1  ;;  %v12065_v30 = vld [vmem:[#allocation12_spill] sm:$0xff]  ;;  %v12066_v37 = vld [vmem:[#allocation13_spill] sm:$0xff] }
 0x476   :  { %v4356_v5 = vpop.f32.mrb[178].mxu0  ;;  %v5831_v6 = vpop.f32.mrb[178].mxu1 }
 0x477   :  { %6465 = vst.msk [vmem:[%s11865_s3 + $0x58] sm:$0xf] %vm6442_vm1, %v7647_v21  ;;  %v7648_v47 = vpack.c.bf16 %v6145_v22, %v6145_v22  ;;  %v6011_v9 = vmax.f32 %v4536_v52, %v5828_v44  ;;  %v4537_v8 = vmax.f32 %v12055_v7, %v4356_v5  ;;  %v4358_v17 = vpop.f32.mrb[179].mxu0  ;;  %v5833_v34 = vpop.f32.mrb[179].mxu1  ;;  %v12067_v44 = vmax.f32 %v12065_v30, %v12066_v37  ;;  %v12081_v30 = vld [vmem:[#allocation23_spill] sm:$0xff] }
 0x479   :  { %6466 = vst.msk [vmem:[%s11865_s3 + $0x5c] sm:$0xf] %vm6442_vm1, %v7648_v47  ;;  %v6082_v13 = vadd.f32 %v11281_v18, %v6011_v9  ;;  %v6012_v19 = vmax.f32 %v4537_v8, %v5831_v6  ;;  %v12068_v9 = vld [vmem:[#allocation14_spill] sm:$0xff] }
 0x47a   :  { %v12070_v28 = vmax.f32 %v12068_v9, %v12069_v51 }
 0x47b   :  { %v6146_v31 = vmax.f32 %v6082_v13, 0.0  ;;  %v6083_v32 = vadd.f32 %v11281_v18, %v6012_v19 }
 0x47c   :  { %v4361_v29 = vpop.f32.mrb[180].mxu0  ;;  %v5836_v46 = vpop.f32.mrb[180].mxu1 }
 0x47d   :  { %v7649_v42 = vpack.c.bf16 %v6146_v31, %v6146_v31  ;;  %v6147_v20 = vmax.f32 %v6083_v32, 0.0  ;;  %v4538_v43 = vmax.f32 %v12058_v57, %v4361_v29  ;;  %v4363_v53 = vpop.f32.mrb[181].mxu0  ;;  %v5838_v14 = vpop.f32.mrb[181].mxu1  ;;  %v12071_v32 = vld [vmem:[#allocation16_spill] sm:$0xff]  ;;  %v12072_v29 = vld [vmem:[#allocation17_spill] sm:$0xff] }
 0x47e   :  { %v4364_v38 = vpop.f32.mrb[182].mxu0  ;;  %v5839_v40 = vpop.f32.mrb[182].mxu1 }
 0x47f   :  { %6467 = vst.msk [vmem:[%s11865_s3 + $0x60] sm:$0xf] %vm6442_vm1, %v7649_v42  ;;  %v7650_v15 = vpack.c.bf16 %v6147_v20, %v6147_v20  ;;  %v6013_v23 = vmax.f32 %v4538_v43, %v5836_v46  ;;  %v4539_v41 = vmax.f32 %v12061_v48, %v4364_v38  ;;  %v4366_v45 = vpop.f32.mrb[183].mxu0  ;;  %v5841_v2 = vpop.f32.mrb[183].mxu1  ;;  %v12073_v46 = vmax.f32 %v12071_v32, %v12072_v29  ;;  %v12087_v32 = vld [vmem:[#allocation27_spill] sm:$0xff] }
 0x481   :  { %6468 = vst.msk [vmem:[%s11865_s3 + $0x64] sm:$0xf] %vm6442_vm1, %v7650_v15  ;;  %v6084_v61 = vadd.f32 %v11281_v18, %v6013_v23  ;;  %v6014_v62 = vmax.f32 %v4539_v41, %v5839_v40  ;;  %v12074_v23 = vld [vmem:[#allocation18_spill] sm:$0xff] }
 0x482   :  { %v12076_v27 = vmax.f32 %v12074_v23, %v12075_v39 }
 0x483   :  { %v6148_v11 = vmax.f32 %v6084_v61, 0.0  ;;  %v6085_v3 = vadd.f32 %v11281_v18, %v6014_v62 }
 0x484   :  { %v4369_v16 = vpop.f32.mrb[184].mxu0  ;;  %v5844_v26 = vpop.f32.mrb[184].mxu1 }
 0x485   :  { %v7651_v63 = vpack.c.bf16 %v6148_v11, %v6148_v11  ;;  %v6149_v1 = vmax.f32 %v6085_v3, 0.0  ;;  %v4540_v49 = vmax.f32 %v12064_v55, %v4369_v16  ;;  %v4371_v50 = vpop.f32.mrb[185].mxu0  ;;  %v5846_v36 = vpop.f32.mrb[185].mxu1  ;;  %v12077_v3 = vld [vmem:[#allocation20_spill] sm:$0xff]  ;;  %v12078_v16 = vld [vmem:[#allocation21_spill] sm:$0xff] }
 0x486   :  { %v4372_v24 = vpop.f32.mrb[186].mxu0  ;;  %v5847_v59 = vpop.f32.mrb[186].mxu1 }
 0x487   :  { %6469 = vst.msk [vmem:[%s11865_s3 + $0x68] sm:$0xf] %vm6442_vm1, %v7651_v63  ;;  %v7652_v10 = vpack.c.bf16 %v6149_v1, %v6149_v1  ;;  %v6015_v25 = vmax.f32 %v4540_v49, %v5844_v26  ;;  %v4541_v21 = vmax.f32 %v12067_v44, %v4372_v24  ;;  %v4374_v22 = vpop.f32.mrb[187].mxu0  ;;  %v5849_v4 = vpop.f32.mrb[187].mxu1  ;;  %v12079_v26 = vmax.f32 %v12077_v3, %v12078_v16  ;;  %v12093_v3 = vld [vmem:[#allocation31_spill] sm:$0xff] }
 0x489   :  { %6470 = vst.msk [vmem:[%s11865_s3 + $0x6c] sm:$0xf] %vm6442_vm1, %v7652_v10  ;;  %v6086_v0 = vadd.f32 %v11281_v18, %v6015_v25  ;;  %v6016_v12 = vmax.f32 %v4541_v21, %v5847_v59  ;;  %v12080_v25 = vld [vmem:[#allocation22_spill] sm:$0xff] }
 0x48a   :  { %v12082_v37 = vmax.f32 %v12080_v25, %v12081_v30 }
 0x48b   :  { %v6150_v52 = vmax.f32 %v6086_v0, 0.0  ;;  %v6087_v60 = vadd.f32 %v11281_v18, %v6016_v12 }
 0x48c   :  { %v4377_v35 = vpop.f32.mrb[188].mxu0  ;;  %v5852_v5 = vpop.f32.mrb[188].mxu1 }
 0x48d   :  { %v7653_v6 = vpack.c.bf16 %v6150_v52, %v6150_v52  ;;  %v6151_v47 = vmax.f32 %v6087_v60, 0.0  ;;  %v4542_v7 = vmax.f32 %v12070_v28, %v4377_v35  ;;  %v4379_v8 = vpop.f32.mrb[189].mxu0  ;;  %v5854_v17 = vpop.f32.mrb[189].mxu1  ;;  %v12083_v60 = vld [vmem:[#allocation24_spill] sm:$0xff]  ;;  %v12084_v35 = vld [vmem:[#allocation25_spill] sm:$0xff] }
 0x48e   :  { %v4380_v34 = vpop.f32.mrb[190].mxu0  ;;  %v5855_v13 = vpop.f32.mrb[190].mxu1 }
 0x48f   :  { %6471 = vst.msk [vmem:[%s11865_s3 + $0x70] sm:$0xf] %vm6442_vm1, %v7653_v6  ;;  %v7654_v19 = vpack.c.bf16 %v6151_v47, %v6151_v47  ;;  %v6017_v31 = vmax.f32 %v4542_v7, %v5852_v5  ;;  %v4543_v42 = vmax.f32 %v12073_v46, %v4380_v34  ;;  %v4382_v20 = vpop.f32.mrb[191].mxu0  ;;  %v5857_v33 = vpop.f32.mrb[191].mxu1  ;;  %v12085_v5 = vmax.f32 %v12083_v60, %v12084_v35  ;;  %v12099_v60 = vld [vmem:[#allocation35_spill] sm:$0xff] }
 0x491   :  { %6472 = vst.msk [vmem:[%s11865_s3 + $0x74] sm:$0xf] %vm6442_vm1, %v7654_v19  ;;  %v6088_v56 = vadd.f32 %v11281_v18, %v6017_v31  ;;  %v6018_v57 = vmax.f32 %v4543_v42, %v5855_v13  ;;  %v12086_v31 = vld [vmem:[#allocation26_spill] sm:$0xff] }
 0x492   :  { %v12088_v29 = vmax.f32 %v12086_v31, %v12087_v32 }
 0x493   :  { %v6152_v43 = vmax.f32 %v6088_v56, 0.0  ;;  %v6089_v53 = vadd.f32 %v11281_v18, %v6018_v57 }
 0x494   :  { %v4385_v14 = vpop.f32.mrb[192].mxu0  ;;  %v5860_v38 = vpop.f32.mrb[192].mxu1 }
 0x495   :  { %v7655_v40 = vpack.c.bf16 %v6152_v43, %v6152_v43  ;;  %v6153_v15 = vmax.f32 %v6089_v53, 0.0  ;;  %v4544_v48 = vmax.f32 %v12076_v27, %v4385_v14  ;;  %v4387_v41 = vpop.f32.mrb[193].mxu0  ;;  %v5862_v45 = vpop.f32.mrb[193].mxu1  ;;  %v12089_v53 = vld [vmem:[#allocation28_spill] sm:$0xff]  ;;  %v12090_v14 = vld [vmem:[#allocation29_spill] sm:$0xff] }
 0x496   :  { %v4388_v2 = vpop.f32.mrb[194].mxu0  ;;  %v5863_v61 = vpop.f32.mrb[194].mxu1 }
 0x497   :  { %6473 = vst.msk [vmem:[%s11865_s3 + $0x78] sm:$0xf] %vm6442_vm1, %v7655_v40  ;;  %v7656_v62 = vpack.c.bf16 %v6153_v15, %v6153_v15  ;;  %v6019_v11 = vmax.f32 %v4544_v48, %v5860_v38  ;;  %v4545_v63 = vmax.f32 %v12079_v26, %v4388_v2  ;;  %v4390_v1 = vpop.f32.mrb[195].mxu0  ;;  %v5865_v58 = vpop.f32.mrb[195].mxu1  ;;  %v12091_v38 = vmax.f32 %v12089_v53, %v12090_v14  ;;  %v12105_v53 = vld [vmem:[#allocation39_spill] sm:$0xff] }
 0x499   :  { %6474 = vst.msk [vmem:[%s11865_s3 + $0x7c] sm:$0xf] %vm6442_vm1, %v7656_v62  ;;  %v6090_v54 = vadd.f32 %v11281_v18, %v6019_v11  ;;  %v6020_v55 = vmax.f32 %v4545_v63, %v5863_v61  ;;  %v12092_v11 = vld [vmem:[#allocation30_spill] sm:$0xff] }
 0x49a   :  { %v12094_v16 = vmax.f32 %v12092_v11, %v12093_v3 }
 0x49b   :  { %v6154_v49 = vmax.f32 %v6090_v54, 0.0  ;;  %v6091_v50 = vadd.f32 %v11281_v18, %v6020_v55 }
 0x49c   :  { %v4393_v36 = vpop.f32.mrb[196].mxu0  ;;  %v5868_v24 = vpop.f32.mrb[196].mxu1 }
 0x49d   :  { %v7657_v59 = vpack.c.bf16 %v6154_v49, %v6154_v49  ;;  %v6155_v10 = vmax.f32 %v6091_v50, 0.0  ;;  %v4546_v44 = vmax.f32 %v12082_v37, %v4393_v36  ;;  %v4395_v21 = vpop.f32.mrb[197].mxu0  ;;  %v5870_v22 = vpop.f32.mrb[197].mxu1  ;;  %v12095_v50 = vld [vmem:[#allocation32_spill] sm:$0xff]  ;;  %v12096_v36 = vld [vmem:[#allocation33_spill] sm:$0xff] }
 0x49e   :  { %v4396_v4 = vpop.f32.mrb[198].mxu0  ;;  %v5871_v0 = vpop.f32.mrb[198].mxu1 }
 0x49f   :  { %6475 = vst.msk [vmem:[%s11865_s3 + $0x80] sm:$0xf] %vm6442_vm1, %v7657_v59  ;;  %v7658_v12 = vpack.c.bf16 %v6155_v10, %v6155_v10  ;;  %v6021_v52 = vmax.f32 %v4546_v44, %v5868_v24  ;;  %v4547_v6 = vmax.f32 %v12085_v5, %v4396_v4  ;;  %v4398_v47 = vpop.f32.mrb[199].mxu0  ;;  %v5873_v9 = vpop.f32.mrb[199].mxu1  ;;  %v12097_v24 = vmax.f32 %v12095_v50, %v12096_v36  ;;  %v12111_v50 = vld [vmem:[#allocation43_spill] sm:$0xff] }
 0x4a1   :  { %6476 = vst.msk [vmem:[%s11865_s3 + $0x84] sm:$0xf] %vm6442_vm1, %v7658_v12  ;;  %v6092_v51 = vadd.f32 %v11281_v18, %v6021_v52  ;;  %v6022_v28 = vmax.f32 %v4547_v6, %v5871_v0  ;;  %v12098_v52 = vld [vmem:[#allocation34_spill] sm:$0xff] }
 0x4a2   :  { %v12100_v35 = vmax.f32 %v12098_v52, %v12099_v60 }
 0x4a3   :  { %v6156_v7 = vmax.f32 %v6092_v51, 0.0  ;;  %v6093_v8 = vadd.f32 %v11281_v18, %v6022_v28 }
 0x4a4   :  { %v4401_v17 = vpop.f32.mrb[200].mxu0  ;;  %v5876_v34 = vpop.f32.mrb[200].mxu1 }
 0x4a5   :  { %v7659_v13 = vpack.c.bf16 %v6156_v7, %v6156_v7  ;;  %v6157_v19 = vmax.f32 %v6093_v8, 0.0  ;;  %v4548_v46 = vmax.f32 %v12088_v29, %v4401_v17  ;;  %v4403_v42 = vpop.f32.mrb[201].mxu0  ;;  %v5878_v20 = vpop.f32.mrb[201].mxu1  ;;  %v12101_v8 = vld [vmem:[#allocation36_spill] sm:$0xff]  ;;  %v12102_v17 = vld [vmem:[#allocation37_spill] sm:$0xff] }
 0x4a6   :  { %v4404_v33 = vpop.f32.mrb[202].mxu0  ;;  %v5879_v56 = vpop.f32.mrb[202].mxu1 }
 0x4a7   :  { %6477 = vst.msk [vmem:[%s11865_s3 + $0x88] sm:$0xf] %vm6442_vm1, %v7659_v13  ;;  %v7660_v57 = vpack.c.bf16 %v6157_v19, %v6157_v19  ;;  %v6023_v43 = vmax.f32 %v4548_v46, %v5876_v34  ;;  %v4549_v40 = vmax.f32 %v12091_v38, %v4404_v33  ;;  %v4406_v15 = vpop.f32.mrb[203].mxu0  ;;  %v5881_v23 = vpop.f32.mrb[203].mxu1  ;;  %v12103_v34 = vmax.f32 %v12101_v8, %v12102_v17  ;;  %v12117_v8 = vld [vmem:[#allocation47_spill] sm:$0xff] }
 0x4a9   :  { %6478 = vst.msk [vmem:[%s11865_s3 + $0x8c] sm:$0xf] %vm6442_vm1, %v7660_v57  ;;  %v6094_v39 = vadd.f32 %v11281_v18, %v6023_v43  ;;  %v6024_v27 = vmax.f32 %v4549_v40, %v5879_v56  ;;  %v12104_v43 = vld [vmem:[#allocation38_spill] sm:$0xff] }
 0x4aa   :  { %v12106_v14 = vmax.f32 %v12104_v43, %v12105_v53 }
 0x4ab   :  { %v6158_v48 = vmax.f32 %v6094_v39, 0.0  ;;  %v6095_v41 = vadd.f32 %v11281_v18, %v6024_v27 }
 0x4ac   :  { %v4409_v45 = vpop.f32.mrb[204].mxu0  ;;  %v5884_v2 = vpop.f32.mrb[204].mxu1 }
 0x4ad   :  { %v7661_v61 = vpack.c.bf16 %v6158_v48, %v6158_v48  ;;  %v6159_v62 = vmax.f32 %v6095_v41, 0.0  ;;  %v4550_v26 = vmax.f32 %v12094_v16, %v4409_v45  ;;  %v4411_v63 = vpop.f32.mrb[205].mxu0  ;;  %v5886_v1 = vpop.f32.mrb[205].mxu1  ;;  %v12107_v41 = vld [vmem:[#allocation40_spill] sm:$0xff]  ;;  %v12108_v45 = vld [vmem:[#allocation41_spill] sm:$0xff] }
 0x4ae   :  { %v4412_v58 = vpop.f32.mrb[206].mxu0  ;;  %v5887_v54 = vpop.f32.mrb[206].mxu1 }
 0x4af   :  { %6479 = vst.msk [vmem:[%s11865_s3 + $0x90] sm:$0xf] %vm6442_vm1, %v7661_v61  ;;  %v7662_v55 = vpack.c.bf16 %v6159_v62, %v6159_v62  ;;  %v6025_v49 = vmax.f32 %v4550_v26, %v5884_v2  ;;  %v4551_v59 = vmax.f32 %v12097_v24, %v4412_v58  ;;  %v4414_v10 = vpop.f32.mrb[207].mxu0  ;;  %v5889_v25 = vpop.f32.mrb[207].mxu1  ;;  %v12109_v2 = vmax.f32 %v12107_v41, %v12108_v45  ;;  %v12123_v41 = vld [vmem:[#allocation51_spill] sm:$0xff] }
 0x4b1   :  { %6480 = vst.msk [vmem:[%s11865_s3 + $0x94] sm:$0xf] %vm6442_vm1, %v7662_v55  ;;  %v6096_v30 = vadd.f32 %v11281_v18, %v6025_v49  ;;  %v6026_v37 = vmax.f32 %v4551_v59, %v5887_v54  ;;  %v12110_v49 = vld [vmem:[#allocation42_spill] sm:$0xff] }
 0x4b2   :  { %v12112_v36 = vmax.f32 %v12110_v49, %v12111_v50  ;;  %v11738_v49 = vld [vmem:[%s11864_s2] ss:$0 sm:$0xff] }
 0x4b3   :  { %v6160_v44 = vmax.f32 %v6096_v30, 0.0  ;;  %v6097_v21 = vadd.f32 %v11281_v18, %v6026_v37 }
 0x4b4   :  { %v4417_v22 = vpop.f32.mrb[208].mxu0  ;;  %v5892_v4 = vpop.f32.mrb[208].mxu1 }
 0x4b5   :  { %v7663_v0 = vpack.c.bf16 %v6160_v44, %v6160_v44  ;;  %v6161_v12 = vmax.f32 %v6097_v21, 0.0  ;;  %v4552_v5 = vmax.f32 %v12100_v35, %v4417_v22  ;;  %v4419_v6 = vpop.f32.mrb[209].mxu0  ;;  %v5894_v47 = vpop.f32.mrb[209].mxu1  ;;  %v12113_v21 = vld [vmem:[#allocation44_spill] sm:$0xff]  ;;  %v12114_v22 = vld [vmem:[#allocation45_spill] sm:$0xff] }
 0x4b6   :  { %v4420_v9 = vpop.f32.mrb[210].mxu0  ;;  %v5895_v51 = vpop.f32.mrb[210].mxu1 }
 0x4b7   :  { %6481 = vst.msk [vmem:[%s11865_s3 + $0x98] sm:$0xf] %vm6442_vm1, %v7663_v0  ;;  %v7664_v28 = vpack.c.bf16 %v6161_v12, %v6161_v12  ;;  %v6027_v7 = vmax.f32 %v4552_v5, %v5892_v4  ;;  %v4553_v13 = vmax.f32 %v12103_v34, %v4420_v9  ;;  %v4422_v19 = vpop.f32.mrb[211].mxu0  ;;  %v5897_v31 = vpop.f32.mrb[211].mxu1  ;;  %v12115_v4 = vmax.f32 %v12113_v21, %v12114_v22  ;;  %v12129_v21 = vld [vmem:[#allocation55_spill] sm:$0xff] }
 0x4b9   :  { %6482 = vst.msk [vmem:[%s11865_s3 + $0x9c] sm:$0xf] %vm6442_vm1, %v7664_v28  ;;  %v6098_v32 = vadd.f32 %v11281_v18, %v6027_v7  ;;  %v6028_v29 = vmax.f32 %v4553_v13, %v5895_v51  ;;  %v12116_v7 = vld [vmem:[#allocation46_spill] sm:$0xff] }
 0x4ba   :  { %v12118_v17 = vmax.f32 %v12116_v7, %v12117_v8 }
 0x4bb   :  { %v6162_v46 = vmax.f32 %v6098_v32, 0.0  ;;  %v6099_v42 = vadd.f32 %v11281_v18, %v6028_v29 }
 0x4bc   :  { %v4425_v20 = vpop.f32.mrb[212].mxu0  ;;  %v5900_v33 = vpop.f32.mrb[212].mxu1 }
 0x4bd   :  { %v7665_v56 = vpack.c.bf16 %v6162_v46, %v6162_v46  ;;  %v6163_v57 = vmax.f32 %v6099_v42, 0.0  ;;  %v4554_v38 = vmax.f32 %v12106_v14, %v4425_v20  ;;  %v4427_v40 = vpop.f32.mrb[213].mxu0  ;;  %v5902_v15 = vpop.f32.mrb[213].mxu1  ;;  %v12119_v42 = vld [vmem:[#allocation48_spill] sm:$0xff]  ;;  %v12120_v20 = vld [vmem:[#allocation49_spill] sm:$0xff] }
 0x4be   :  { %v4428_v23 = vpop.f32.mrb[214].mxu0  ;;  %v5903_v39 = vpop.f32.mrb[214].mxu1 }
 0x4bf   :  { %6483 = vst.msk [vmem:[%s11865_s3 + $0xa0] sm:$0xf] %vm6442_vm1, %v7665_v56  ;;  %v7666_v27 = vpack.c.bf16 %v6163_v57, %v6163_v57  ;;  %v6029_v48 = vmax.f32 %v4554_v38, %v5900_v33  ;;  %v4555_v61 = vmax.f32 %v12109_v2, %v4428_v23  ;;  %v4430_v62 = vpop.f32.mrb[215].mxu0  ;;  %v5905_v11 = vpop.f32.mrb[215].mxu1  ;;  %v12121_v33 = vmax.f32 %v12119_v42, %v12120_v20  ;;  %v12135_v42 = vld [vmem:[#allocation59_spill] sm:$0xff] }
 0x4c1   :  { %6484 = vst.msk [vmem:[%s11865_s3 + $0xa4] sm:$0xf] %vm6442_vm1, %v7666_v27  ;;  %v6100_v3 = vadd.f32 %v11281_v18, %v6029_v48  ;;  %v6030_v16 = vmax.f32 %v4555_v61, %v5903_v39  ;;  %v12122_v48 = vld [vmem:[#allocation50_spill] sm:$0xff] }
 0x4c2   :  { %v12124_v45 = vmax.f32 %v12122_v48, %v12123_v41 }
 0x4c3   :  { %v6164_v26 = vmax.f32 %v6100_v3, 0.0  ;;  %v6101_v63 = vadd.f32 %v11281_v18, %v6030_v16 }
 0x4c4   :  { %v4433_v1 = vpop.f32.mrb[216].mxu0  ;;  %v5908_v58 = vpop.f32.mrb[216].mxu1 }
 0x4c5   :  { %v7667_v54 = vpack.c.bf16 %v6164_v26, %v6164_v26  ;;  %v6165_v55 = vmax.f32 %v6101_v63, 0.0  ;;  %v4556_v24 = vmax.f32 %v12112_v36, %v4433_v1  ;;  %v4435_v59 = vpop.f32.mrb[217].mxu0  ;;  %v5910_v10 = vpop.f32.mrb[217].mxu1  ;;  %v12126_v63 = vld [vmem:[#allocation53_spill] sm:$0xff] }
 0x4c6   :  { %v4436_v25 = vpop.f32.mrb[218].mxu0  ;;  %v5911_v30 = vpop.f32.mrb[218].mxu1 }
 0x4c7   :  { %6485 = vst.msk [vmem:[%s11865_s3 + $0xa8] sm:$0xf] %vm6442_vm1, %v7667_v54  ;;  %v7668_v37 = vpack.c.bf16 %v6165_v55, %v6165_v55  ;;  %v6031_v44 = vmax.f32 %v4556_v24, %v5908_v58  ;;  %v4557_v0 = vmax.f32 %v12115_v4, %v4436_v25  ;;  %v4438_v12 = vpop.f32.mrb[219].mxu0  ;;  %v5913_v52 = vpop.f32.mrb[219].mxu1 }
 0x4c9   :  { %6486 = vst.msk [vmem:[%s11865_s3 + $0xac] sm:$0xf] %vm6442_vm1, %v7668_v37  ;;  %v6102_v60 = vadd.f32 %v11281_v18, %v6031_v44  ;;  %v6032_v35 = vmax.f32 %v4557_v0, %v5911_v30  ;;  %v12128_v44 = vld [vmem:[#allocation54_spill] sm:$0xff] }
 0x4ca   :  { %v12130_v22 = vmax.f32 %v12128_v44, %v12129_v21 }
 0x4cb   :  { %v6166_v5 = vmax.f32 %v6102_v60, 0.0  ;;  %v6103_v6 = vadd.f32 %v11281_v18, %v6032_v35 }
 0x4cc   :  { %v4441_v47 = vpop.f32.mrb[220].mxu0  ;;  %v5916_v9 = vpop.f32.mrb[220].mxu1 }
 0x4cd   :  { %v7669_v51 = vpack.c.bf16 %v6166_v5, %v6166_v5  ;;  %v6167_v28 = vmax.f32 %v6103_v6, 0.0  ;;  %v4558_v34 = vmax.f32 %v12118_v17, %v4441_v47  ;;  %v4443_v13 = vpop.f32.mrb[221].mxu0  ;;  %v5918_v19 = vpop.f32.mrb[221].mxu1  ;;  %v12131_v6 = vld [vmem:[#allocation56_spill] sm:$0xff]  ;;  %v12132_v47 = vld [vmem:[#allocation57_spill] sm:$0xff] }
 0x4ce   :  { %v4444_v31 = vpop.f32.mrb[222].mxu0  ;;  %v5919_v32 = vpop.f32.mrb[222].mxu1 }
 0x4cf   :  { %6487 = vst.msk [vmem:[%s11865_s3 + $0xb0] sm:$0xf] %vm6442_vm1, %v7669_v51  ;;  %v7670_v29 = vpack.c.bf16 %v6167_v28, %v6167_v28  ;;  %v6033_v46 = vmax.f32 %v4558_v34, %v5916_v9  ;;  %v4559_v56 = vmax.f32 %v12121_v33, %v4444_v31  ;;  %v4446_v57 = vpop.f32.mrb[223].mxu0  ;;  %v5921_v43 = vpop.f32.mrb[223].mxu1  ;;  %v12133_v9 = vmax.f32 %v12131_v6, %v12132_v47  ;;  %v12147_v6 = vld [vmem:[#allocation67_spill] sm:$0xff] }
 0x4d1   :  { %6488 = vst.msk [vmem:[%s11865_s3 + $0xb4] sm:$0xf] %vm6442_vm1, %v7670_v29  ;;  %v6104_v53 = vadd.f32 %v11281_v18, %v6033_v46  ;;  %v6034_v14 = vmax.f32 %v4559_v56, %v5919_v32  ;;  %v12134_v46 = vld [vmem:[#allocation58_spill] sm:$0xff] }
 0x4d2   :  { %v12136_v20 = vmax.f32 %v12134_v46, %v12135_v42 }
 0x4d3   :  { %v6168_v38 = vmax.f32 %v6104_v53, 0.0  ;;  %v6105_v40 = vadd.f32 %v11281_v18, %v6034_v14  ;;  %v12125_v18 = vld [vmem:[#allocation52_spill] sm:$0xff] }
 0x4d4   :  { %v4449_v15 = vpop.f32.mrb[224].mxu0  ;;  %v5924_v23 = vpop.f32.mrb[224].mxu1  ;;  %v12127_v1 = vmax.f32 %v12125_v18, %v12126_v63  ;;  %v12141_v18 = vld [vmem:[#allocation63_spill] sm:$0xff] }
 0x4d5   :  { %v7671_v39 = vpack.c.bf16 %v6168_v38, %v6168_v38  ;;  %v6169_v27 = vmax.f32 %v6105_v40, 0.0  ;;  %v4560_v2 = vmax.f32 %v12124_v45, %v4449_v15  ;;  %v4451_v61 = vpop.f32.mrb[225].mxu0  ;;  %v5926_v62 = vpop.f32.mrb[225].mxu1  ;;  %v12137_v40 = vld [vmem:[#allocation60_spill] sm:$0xff]  ;;  %v12138_v15 = vld [vmem:[#allocation61_spill] sm:$0xff] }
 0x4d6   :  { %v4452_v11 = vpop.f32.mrb[226].mxu0  ;;  %v5927_v3 = vpop.f32.mrb[226].mxu1 }
 0x4d7   :  { %6489 = vst.msk [vmem:[%s11865_s3 + $0xb8] sm:$0xf] %vm6442_vm1, %v7671_v39  ;;  %v7672_v16 = vpack.c.bf16 %v6169_v27, %v6169_v27  ;;  %v6035_v26 = vmax.f32 %v4560_v2, %v5924_v23  ;;  %v4561_v58 = vmax.f32 %v12127_v1, %v4452_v11  ;;  %v4454_v54 = vpop.f32.mrb[227].mxu0  ;;  %v5929_v55 = vpop.f32.mrb[227].mxu1  ;;  %v12139_v23 = vmax.f32 %v12137_v40, %v12138_v15  ;;  %v12153_v40 = vld [vmem:[#allocation71_spill] sm:$0xff] }
 0x4d9   :  { %6490 = vst.msk [vmem:[%s11865_s3 + $0xbc] sm:$0xf] %vm6442_vm1, %v7672_v16  ;;  %v6106_v50 = vadd.f32 %v11738_v49, %v6035_v26  ;;  %v6036_v36 = vmax.f32 %v4561_v58, %v5927_v3  ;;  %v12140_v26 = vld [vmem:[#allocation62_spill] sm:$0xff] }
 0x4da   :  { %v12142_v63 = vmax.f32 %v12140_v26, %v12141_v18 }
 0x4db   :  { %v6170_v24 = vmax.f32 %v6106_v50, 0.0  ;;  %v6107_v59 = vadd.f32 %v11738_v49, %v6036_v36 }
 0x4dc   :  { %v4457_v10 = vpop.f32.mrb[228].mxu0  ;;  %v5932_v25 = vpop.f32.mrb[228].mxu1 }
 0x4dd   :  { %v7673_v30 = vpack.c.bf16 %v6170_v24, %v6170_v24  ;;  %v6171_v37 = vmax.f32 %v6107_v59, 0.0  ;;  %v4562_v4 = vmax.f32 %v12130_v22, %v4457_v10  ;;  %v4459_v0 = vpop.f32.mrb[229].mxu0  ;;  %v5934_v12 = vpop.f32.mrb[229].mxu1  ;;  %v12143_v59 = vld [vmem:[#allocation64_spill] sm:$0xff]  ;;  %v12144_v10 = vld [vmem:[#allocation65_spill] sm:$0xff] }
 0x4de   :  { %v4460_v52 = vpop.f32.mrb[230].mxu0  ;;  %v5935_v60 = vpop.f32.mrb[230].mxu1 }
 0x4df   :  { %6491 = vst.msk [vmem:[%s11865_s3 + $0xc0] sm:$0xf] %vm6442_vm1, %v7673_v30  ;;  %v7674_v35 = vpack.c.bf16 %v6171_v37, %v6171_v37  ;;  %v6037_v5 = vmax.f32 %v4562_v4, %v5932_v25  ;;  %v4563_v51 = vmax.f32 %v12133_v9, %v4460_v52  ;;  %v4462_v28 = vpop.f32.mrb[231].mxu0  ;;  %v5937_v7 = vpop.f32.mrb[231].mxu1  ;;  %v12145_v25 = vmax.f32 %v12143_v59, %v12144_v10  ;;  %v12159_v59 = vld [vmem:[#allocation75_spill] sm:$0xff] }
 0x4e1   :  { %6492 = vst.msk [vmem:[%s11865_s3 + $0xc4] sm:$0xf] %vm6442_vm1, %v7674_v35  ;;  %v6108_v8 = vadd.f32 %v11738_v49, %v6037_v5  ;;  %v6038_v17 = vmax.f32 %v4563_v51, %v5935_v60  ;;  %v12146_v5 = vld [vmem:[#allocation66_spill] sm:$0xff] }
 0x4e2   :  { %v12148_v47 = vmax.f32 %v12146_v5, %v12147_v6 }
 0x4e3   :  { %v6172_v34 = vmax.f32 %v6108_v8, 0.0  ;;  %v6109_v13 = vadd.f32 %v11738_v49, %v6038_v17 }
 0x4e4   :  { %v4465_v19 = vpop.f32.mrb[232].mxu0  ;;  %v5940_v31 = vpop.f32.mrb[232].mxu1 }
 0x4e5   :  { %v7675_v32 = vpack.c.bf16 %v6172_v34, %v6172_v34  ;;  %v6173_v29 = vmax.f32 %v6109_v13, 0.0  ;;  %v4564_v33 = vmax.f32 %v12136_v20, %v4465_v19  ;;  %v4467_v56 = vpop.f32.mrb[233].mxu0  ;;  %v5942_v57 = vpop.f32.mrb[233].mxu1  ;;  %v12149_v13 = vld [vmem:[#allocation68_spill] sm:$0xff]  ;;  %v12150_v19 = vld [vmem:[#allocation69_spill] sm:$0xff] }
 0x4e6   :  { %v4468_v43 = vpop.f32.mrb[234].mxu0  ;;  %v5943_v53 = vpop.f32.mrb[234].mxu1 }
 0x4e7   :  { %6493 = vst.msk [vmem:[%s11865_s3 + $0xc8] sm:$0xf] %vm6442_vm1, %v7675_v32  ;;  %v7676_v14 = vpack.c.bf16 %v6173_v29, %v6173_v29  ;;  %v6039_v38 = vmax.f32 %v4564_v33, %v5940_v31  ;;  %v4565_v39 = vmax.f32 %v12139_v23, %v4468_v43  ;;  %v4470_v27 = vpop.f32.mrb[235].mxu0  ;;  %v5945_v48 = vpop.f32.mrb[235].mxu1  ;;  %v12151_v31 = vmax.f32 %v12149_v13, %v12150_v19  ;;  %v12165_v13 = vld [vmem:[#allocation79_spill] sm:$0xff] }
 0x4e9   :  { %6494 = vst.msk [vmem:[%s11865_s3 + $0xcc] sm:$0xf] %vm6442_vm1, %v7676_v14  ;;  %v6110_v41 = vadd.f32 %v11738_v49, %v6039_v38  ;;  %v6040_v45 = vmax.f32 %v4565_v39, %v5943_v53  ;;  %v12152_v38 = vld [vmem:[#allocation70_spill] sm:$0xff] }
 0x4ea   :  { %v12154_v15 = vmax.f32 %v12152_v38, %v12153_v40 }
 0x4eb   :  { %v6174_v2 = vmax.f32 %v6110_v41, 0.0  ;;  %v6111_v61 = vadd.f32 %v11738_v49, %v6040_v45 }
 0x4ec   :  { %v4473_v62 = vpop.f32.mrb[236].mxu0  ;;  %v5948_v11 = vpop.f32.mrb[236].mxu1 }
 0x4ed   :  { %v7677_v3 = vpack.c.bf16 %v6174_v2, %v6174_v2  ;;  %v6175_v16 = vmax.f32 %v6111_v61, 0.0  ;;  %v4566_v1 = vmax.f32 %v12142_v63, %v4473_v62  ;;  %v4475_v58 = vpop.f32.mrb[237].mxu0  ;;  %v5950_v54 = vpop.f32.mrb[237].mxu1  ;;  %v12155_v61 = vld [vmem:[#allocation72_spill] sm:$0xff]  ;;  %v12156_v62 = vld [vmem:[#allocation73_spill] sm:$0xff] }
 0x4ee   :  { %v4476_v55 = vpop.f32.mrb[238].mxu0  ;;  %v5951_v50 = vpop.f32.mrb[238].mxu1 }
 0x4ef   :  { %6495 = vst.msk [vmem:[%s11865_s3 + $0xd0] sm:$0xf] %vm6442_vm1, %v7677_v3  ;;  %v7678_v36 = vpack.c.bf16 %v6175_v16, %v6175_v16  ;;  %v6041_v24 = vmax.f32 %v4566_v1, %v5948_v11  ;;  %v4567_v30 = vmax.f32 %v12145_v25, %v4476_v55  ;;  %v4478_v37 = vpop.f32.mrb[239].mxu0  ;;  %v5953_v44 = vpop.f32.mrb[239].mxu1  ;;  %v12157_v11 = vmax.f32 %v12155_v61, %v12156_v62 }
 0x4f1   :  { %6496 = vst.msk [vmem:[%s11865_s3 + $0xd4] sm:$0xf] %vm6442_vm1, %v7678_v36  ;;  %v6112_v21 = vadd.f32 %v11738_v49, %v6041_v24  ;;  %v6042_v22 = vmax.f32 %v4567_v30, %v5951_v50  ;;  %v12158_v24 = vld [vmem:[#allocation74_spill] sm:$0xff] }
 0x4f2   :  { %v12160_v10 = vmax.f32 %v12158_v24, %v12159_v59 }
 0x4f3   :  { %v6176_v4 = vmax.f32 %v6112_v21, 0.0  ;;  %v6113_v0 = vadd.f32 %v11738_v49, %v6042_v22 }
 0x4f4   :  { %v4481_v12 = vpop.f32.mrb[240].mxu0  ;;  %v5956_v52 = vpop.f32.mrb[240].mxu1 }
 0x4f5   :  { %v7679_v60 = vpack.c.bf16 %v6176_v4, %v6176_v4  ;;  %v6177_v35 = vmax.f32 %v6113_v0, 0.0  ;;  %v4568_v9 = vmax.f32 %v12148_v47, %v4481_v12  ;;  %v4483_v51 = vpop.f32.mrb[241].mxu0  ;;  %v5958_v28 = vpop.f32.mrb[241].mxu1  ;;  %v12161_v0 = vld [vmem:[#allocation76_spill] sm:$0xff]  ;;  %v12162_v12 = vld [vmem:[#allocation77_spill] sm:$0xff] }
 0x4f6   :  { %v4484_v7 = vpop.f32.mrb[242].mxu0  ;;  %v5959_v8 = vpop.f32.mrb[242].mxu1 }
 0x4f7   :  { %6497 = vst.msk [vmem:[%s11865_s3 + $0xd8] sm:$0xf] %vm6442_vm1, %v7679_v60  ;;  %v7680_v17 = vpack.c.bf16 %v6177_v35, %v6177_v35  ;;  %v6043_v34 = vmax.f32 %v4568_v9, %v5956_v52  ;;  %v4569_v32 = vmax.f32 %v12151_v31, %v4484_v7  ;;  %v4486_v29 = vpop.f32.mrb[243].mxu0  ;;  %v5961_v46 = vpop.f32.mrb[243].mxu1  ;;  %v12163_v52 = vmax.f32 %v12161_v0, %v12162_v12 }
 0x4f9   :  { %6498 = vst.msk [vmem:[%s11865_s3 + $0xdc] sm:$0xf] %vm6442_vm1, %v7680_v17  ;;  %v6114_v42 = vadd.f32 %v11738_v49, %v6043_v34  ;;  %v6044_v20 = vmax.f32 %v4569_v32, %v5959_v8  ;;  %v12164_v34 = vld [vmem:[#allocation78_spill] sm:$0xff] }
 0x4fa   :  { %v12166_v19 = vmax.f32 %v12164_v34, %v12165_v13 }
 0x4fb   :  { %v6178_v33 = vmax.f32 %v6114_v42, 0.0  ;;  %v6115_v56 = vadd.f32 %v11738_v49, %v6044_v20 }
 0x4fc   :  { %v4489_v57 = vpop.f32.mrb[244].mxu0  ;;  %v5964_v43 = vpop.f32.mrb[244].mxu1 }
 0x4fd   :  { %v7681_v53 = vpack.c.bf16 %v6178_v33, %v6178_v33  ;;  %v6179_v14 = vmax.f32 %v6115_v56, 0.0  ;;  %v4570_v23 = vmax.f32 %v12154_v15, %v4489_v57  ;;  %v4491_v39 = vpop.f32.mrb[245].mxu0  ;;  %v5966_v27 = vpop.f32.mrb[245].mxu1  ;;  %v12167_v56 = vld [vmem:[#allocation80_spill] sm:$0xff]  ;;  %v12168_v57 = vld [vmem:[#allocation81_spill] sm:$0xff] }
 0x4fe   :  { %v4492_v48 = vpop.f32.mrb[246].mxu0  ;;  %v5967_v41 = vpop.f32.mrb[246].mxu1 }
 0x4ff   :  { %6499 = vst.msk [vmem:[%s11865_s3 + $0xe0] sm:$0xf] %vm6442_vm1, %v7681_v53  ;;  %v7682_v45 = vpack.c.bf16 %v6179_v14, %v6179_v14  ;;  %v6045_v2 = vmax.f32 %v4570_v23, %v5964_v43  ;;  %v4571_v3 = vmax.f32 %v12157_v11, %v4492_v48  ;;  %v4494_v16 = vpop.f32.mrb[247].mxu0  ;;  %v5969_v26 = vpop.f32.mrb[247].mxu1  ;;  %v12169_v43 = vmax.f32 %v12167_v56, %v12168_v57 }
 0x501   :  { %6500 = vst.msk [vmem:[%s11865_s3 + $0xe4] sm:$0xf] %vm6442_vm1, %v7682_v45  ;;  %v6116_v18 = vadd.f32 %v11738_v49, %v6045_v2  ;;  %v6046_v63 = vmax.f32 %v4571_v3, %v5967_v41 }
 0x503   :  { %v6180_v1 = vmax.f32 %v6116_v18, 0.0  ;;  %v6117_v58 = vadd.f32 %v11738_v49, %v6046_v63 }
 0x504   :  { %v4497_v54 = vpop.f32.mrb[248].mxu0  ;;  %v5972_v55 = vpop.f32.mrb[248].mxu1 }
 0x505   :  { %v7683_v50 = vpack.c.bf16 %v6180_v1, %v6180_v1  ;;  %v6181_v36 = vmax.f32 %v6117_v58, 0.0  ;;  %v4572_v25 = vmax.f32 %v12160_v10, %v4497_v54  ;;  %v4499_v30 = vpop.f32.mrb[249].mxu0  ;;  %v5974_v37 = vpop.f32.mrb[249].mxu1 }
 0x506   :  { %v4500_v44 = vpop.f32.mrb[250].mxu0  ;;  %v5975_v21 = vpop.f32.mrb[250].mxu1 }
 0x507   :  { %6501 = vst.msk [vmem:[%s11865_s3 + $0xe8] sm:$0xf] %vm6442_vm1, %v7683_v50  ;;  %v7684_v22 = vpack.c.bf16 %v6181_v36, %v6181_v36  ;;  %v6047_v4 = vmax.f32 %v4572_v25, %v5972_v55  ;;  %v4573_v60 = vmax.f32 %v12163_v52, %v4500_v44  ;;  %v4502_v35 = vpop.f32.mrb[251].mxu0  ;;  %v5977_v5 = vpop.f32.mrb[251].mxu1 }
 0x509   :  { %6502 = vst.msk [vmem:[%s11865_s3 + $0xec] sm:$0xf] %vm6442_vm1, %v7684_v22  ;;  %v6118_v6 = vadd.f32 %v11738_v49, %v6047_v4  ;;  %v6048_v47 = vmax.f32 %v4573_v60, %v5975_v21 }
 0x50b   :  { %v6182_v9 = vmax.f32 %v6118_v6, 0.0  ;;  %v6119_v51 = vadd.f32 %v11738_v49, %v6048_v47 }
 0x50c   :  { %v4505_v28 = vpop.f32.mrb[252].mxu0  ;;  %v5980_v7 = vpop.f32.mrb[252].mxu1 }
 0x50d   :  { %v7685_v8 = vpack.c.bf16 %v6182_v9, %v6182_v9  ;;  %v6183_v17 = vmax.f32 %v6119_v51, 0.0  ;;  %v4574_v31 = vmax.f32 %v12166_v19, %v4505_v28  ;;  %v4507_v32 = vpop.f32.mrb[253].mxu0  ;;  %v5982_v29 = vpop.f32.mrb[253].mxu1 }
 0x50e   :  { %v4508_v46 = vpop.f32.mrb[254].mxu0  ;;  %v5983_v42 = vpop.f32.mrb[254].mxu1 }
 0x50f   :  { %6503 = vst.msk [vmem:[%s11865_s3 + $0xf0] sm:$0xf] %vm6442_vm1, %v7685_v8  ;;  %v7686_v20 = vpack.c.bf16 %v6183_v17, %v6183_v17  ;;  %v6049_v33 = vmax.f32 %v4574_v31, %v5980_v7  ;;  %v4575_v53 = vmax.f32 %v12169_v43, %v4508_v46  ;;  %v4510_v14 = vpop.f32.mrb[255].mxu0  ;;  %v5985_v38 = vpop.f32.mrb[255].mxu1 }
 0x511   :  { %6504 = vst.msk [vmem:[%s11865_s3 + $0xf4] sm:$0xf] %vm6442_vm1, %v7686_v20  ;;  %v6120_v40 = vadd.f32 %v11738_v49, %v6049_v33  ;;  %v6050_v15 = vmax.f32 %v4575_v53, %v5983_v42 }
 0x513   :  { %v6184_v23 = vmax.f32 %v6120_v40, 0.0  ;;  %v6121_v39 = vadd.f32 %v11738_v49, %v6050_v15 }
 0x515   :  { %v7687_v27 = vpack.c.bf16 %v6184_v23, %v6184_v23  ;;  %v6185_v48 = vmax.f32 %v6121_v39, 0.0 }
 0x517   :  { %6505 = vst.msk [vmem:[%s11865_s3 + $0xf8] sm:$0xf] %vm6442_vm1, %v7687_v27  ;;  %v7688_v41 = vpack.c.bf16 %v6185_v48, %v6185_v48 }
 0x519   :  { %6506 = vst.msk [vmem:[%s11865_s3 + $0xfc] sm:$0xf] %vm6442_vm1, %v7688_v41 }

// kernel: net_forward.8
= control target key start
LH: loop header
LB: loop body
LE: loop exit
PB: predicated region body
PF: predicated region fallthrough
CT: control target
= control target key end

     0   :  { %vm311_vm0 = vcmask 261120   ;;  %vm1794_vm1 = vcmask 519168   ;;  %s3497_s1 = inlined_call_operand.vmem [shape: bf16[288,64], index: 1, kind: input, shape index: {}]   ;;  %s3498_s0 = inlined_call_operand.vmem [shape: bf16[4,128,288], index: 0, kind: input, shape index: {}]   ;;  %s3499_s2 = inlined_call_operand.vmem [shape: f32[1,64], index: 2, kind: input, shape index: {}]   ;;  %s3500_s3 = inlined_call_operand.vmem [shape: bf16[128,64], index: 3, kind: output, shape index: {}]  }
   0x1   :  { %v2651_v0 = vld [vmem:[%s3497_s1 + $0x40] sm:$0xff]   ;;  %v2668_v3 = vld [vmem:[%s3497_s1 + $0x48] sm:$0xff]   ;;  %v2690_v7 = vld [vmem:[%s3497_s1 + $0x50] sm:$0xff]  }
   0x2   :  { %v2656_v1 = vld [vmem:[%s3497_s1 + $0x80] sm:$0xff]   ;;  %2090 = vmatprep.subr.bf16.mxu0 %v2651_v0  ;;  %v2675_v4 = vld [vmem:[%s3497_s1 + $0x88] sm:$0xff]   ;;  %v2702_v9 = vld [vmem:[%s3497_s1 + $0x10] sm:$0xff]  }
   0x3   :  { %v2662_v2 = vld [vmem:[%s3497_s1] sm:$0xff]   ;;  %2386 = vmatprep.subr.bf16.mxu1 %v2656_v1  ;;  %v2681_v5 = vld [vmem:[%s3497_s1 + $0x8] sm:$0xff]   ;;  %v2708_v10 = vld [vmem:[%s3497_s1 + $0x58] sm:$0xff]  }
   0x4   :  { %2091 = vmatpush3.bf16.msra.mxu0 %v2662_v2  ;;  %2387 = vmatpush3.bf16.msra.mxu1 %v2656_v1  ;;  %v2488_v6 = vld [vmem:[%s3498_s0 + $0x8] ss:$12 sps:$4 sm:$0xff]   ;;  %v2490_v8 = vld [vmem:[%s3498_s0 + $0x20] ss:$12 sps:$4 sm:$0xff]   ;;  %v2714_v11 = vld [vmem:[%s3497_s1 + $0x18] sm:$0xff]  }
   0x5   :  { %2092 = vmatprep.subr.bf16.mxu0 %v2668_v3  ;;  %2388 = vmatprep.subr.bf16.mxu1 %v2675_v4  ;;  %v2494_v12 = vld [vmem:[%s3498_s0 + $0x38] ss:$12 sps:$4 sm:$0xff]   ;;  %v2496_v14 = vld [vmem:[%s3498_s0 + $0x50] ss:$12 sps:$4 sm:$0xff]   ;;  %v2744_v16 = vld [vmem:[%s3497_s1 + $0x68] sm:$0xff]  }
   0x6   :  { %2390 = vmatprep.mubr.msk.bf16.mxu1 %vm311_vm0, %v2488_v6  ;;  %v2726_v13 = vld [vmem:[%s3497_s1 + $0x60] sm:$0xff]   ;;  %v2500_v17 = vld [vmem:[%s3498_s0 + $0x68] ss:$12 sps:$4 sm:$0xff]   ;;  %v2778_v22 = vld [vmem:[%s3497_s1 + $0x78] sm:$0xff]  }
   0x7   :  { %v2737_v15 = vld [vmem:[%s3497_s1 + $0x20] sm:$0xff]   ;;  %v2755_v18 = vld [vmem:[%s3497_s1 + $0x28] sm:$0xff]   ;;  %v2762_v19 = vld [vmem:[%s3497_s1 + $0x70] sm:$0xff]  }
   0x8   :  { %2093 = vmatpush3.bf16.msra.mxu0 %v2681_v5  ;;  %2389 = vmatpush3.bf16.msra.mxu1 %v2675_v4  ;;  %v2502_v20 = vld [vmem:[%s3498_s0 + $0x80] ss:$12 sps:$4 sm:$0xff]   ;;  %v2771_v21 = vld [vmem:[%s3497_s1 + $0x30] sm:$0xff]   ;;  %v2509_v24 = vld [vmem:[%s3498_s0 + $0x98] ss:$12 sps:$4 sm:$0xff]  }
   0x9   :  { %2094 = vmatprep.subr.bf16.mxu0 %v2690_v7  ;;  %2164 = vmatprep.subr.bf16.mxu1 %v2651_v0  ;;  %v2508_v23 = vld [vmem:[%s3498_s0 + $0x4] ss:$12 sps:$4 sm:$0xff]   ;;  %v2794_v25 = vld [vmem:[%s3497_s1 + $0x38] sm:$0xff]   ;;  %v2506_v26 = vld [vmem:[%s3498_s0] ss:$12 sps:$4 sm:$0xff]  }
   0xa   :  { %368 = vmatprep.mubr.bf16.mxu0 %v2508_v23  ;;  %v2510_v27 = vld [vmem:[%s3498_s0 + $0xb0] ss:$12 sps:$4 sm:$0xff]   ;;  %v2513_v30 = vld [vmem:[%s3498_s0 + $0xc0] ss:$12 sps:$4 sm:$0xff]   ;;  %v2516_v31 = vld [vmem:[%s3498_s0 + $0x18] ss:$12 sps:$4 sm:$0xff]  }
   0xb   :  { %2391 = vmatmul.mubr.msk.bf16.vlgmr.msra.gmra.mrb[0].mxu1 %vm311_vm0, %v2490_v8  ;;  %v2511_v28 = vld [vmem:[%s3498_s0 + $0x1c] ss:$12 sps:$4 sm:$0xff]   ;;  %v2515_v29 = vld [vmem:[%s3498_s0 + $0xc4] ss:$12 sps:$4 sm:$0xff]   ;;  %v2517_v32 = vld [vmem:[%s3498_s0 + $0x34] ss:$12 sps:$4 sm:$0xff]  }
   0xc   :  { %2095 = vmatpush3.bf16.msra.mxu0 %v2702_v9  ;;  %2165 = vmatpush3.bf16.msra.mxu1 %v2662_v2  ;;  %v2519_v33 = vld [vmem:[%s3498_s0 + $0xdc] ss:$12 sps:$4 sm:$0xff]   ;;  %v2522_v35 = vld [vmem:[%s3498_s0 + $0xd8] ss:$12 sps:$4 sm:$0xff]   ;;  %v2525_v37 = vld [vmem:[%s3498_s0 + $0xf4] ss:$12 sps:$4 sm:$0xff]  }
   0xd   :  { %2096 = vmatprep.subr.bf16.mxu0 %v2708_v10  ;;  %2166 = vmatprep.subr.bf16.mxu1 %v2668_v3  ;;  %v2521_v34 = vld [vmem:[%s3498_s0 + $0x30] ss:$12 sps:$4 sm:$0xff]   ;;  %v2523_v36 = vld [vmem:[%s3498_s0 + $0x4c] ss:$12 sps:$4 sm:$0xff]   ;;  %v2527_v38 = vld [vmem:[%s3498_s0 + $0x48] ss:$12 sps:$4 sm:$0xff]  }
   0xe   :  { %2394 = vmatprep.mubr.msk.bf16.mxu1 %vm311_vm0, %v2494_v12  ;;  %v2528_v39 = vld [vmem:[%s3498_s0 + $0xf0] ss:$12 sps:$4 sm:$0xff]   ;;  %v2531_v41 = vld [vmem:[%s3498_s0 + $0x10c] ss:$12 sps:$4 sm:$0xff]   ;;  %v2534_v43 = vld [vmem:[%s3498_s0 + $0x108] ss:$12 sps:$4 sm:$0xff]  }
   0xf   :  { %v2529_v40 = vld [vmem:[%s3498_s0 + $0x64] ss:$12 sps:$4 sm:$0xff]   ;;  %v2533_v42 = vld [vmem:[%s3498_s0 + $0x60] ss:$12 sps:$4 sm:$0xff]   ;;  %v2535_v44 = vld [vmem:[%s3498_s0 + $0x7c] ss:$12 sps:$4 sm:$0xff]  }
  0x10   :  { %2097 = vmatpush3.bf16.msra.mxu0 %v2714_v11  ;;  %2167 = vmatpush3.bf16.msra.mxu1 %v2681_v5  ;;  %v2537_v45 = vld [vmem:[%s3498_s0 + $0x124] ss:$12 sps:$4 sm:$0xff]   ;;  %v2540_v47 = vld [vmem:[%s3498_s0 + $0x120] ss:$12 sps:$4 sm:$0xff]   ;;  %v2543_v49 = vld [vmem:[%s3498_s0 + $0x13c] ss:$12 sps:$4 sm:$0xff]  }
  0x11   :  { %2098 = vmatprep.subr.bf16.mxu0 %v2726_v13  ;;  %2168 = vmatprep.subr.bf16.mxu1 %v2690_v7  ;;  %v2539_v46 = vld [vmem:[%s3498_s0 + $0x78] ss:$12 sps:$4 sm:$0xff]   ;;  %v2541_v48 = vld [vmem:[%s3498_s0 + $0x94] ss:$12 sps:$4 sm:$0xff]   ;;  %v2545_v50 = vld [vmem:[%s3498_s0 + $0x90] ss:$12 sps:$4 sm:$0xff]  }
  0x12   :  { %v2546_v51 = vld [vmem:[%s3498_s0 + $0x138] ss:$12 sps:$4 sm:$0xff]   ;;  %v2549_v53 = vld [vmem:[%s3498_s0 + $0x154] ss:$12 sps:$4 sm:$0xff]   ;;  %v2552_v55 = vld [vmem:[%s3498_s0 + $0x150] ss:$12 sps:$4 sm:$0xff]  }
  0x13   :  { %2395 = vmatmul.mubr.msk.bf16.gmra.mrb[4].mxu1 %vm311_vm0, %v2496_v14  ;;  %v2547_v52 = vld [vmem:[%s3498_s0 + $0xac] ss:$12 sps:$4 sm:$0xff]   ;;  %v2551_v54 = vld [vmem:[%s3498_s0 + $0xa8] ss:$12 sps:$4 sm:$0xff]   ;;  %v2561_v61 = vld [vmem:[%s3498_s0 + $0x184] ss:$12 sps:$4 sm:$0xff]  }
  0x14   :  { %2099 = vmatpush3.bf16.msra.mxu0 %v2737_v15  ;;  %2169 = vmatpush3.bf16.msra.mxu1 %v2702_v9  ;;  %v2553_v56 = vld [vmem:[%s3498_s0 + $0x16c] ss:$12 sps:$4 sm:$0xff]   ;;  %v2555_v57 = vld [vmem:[%s3498_s0 + $0xc8] ss:$12 sps:$4 sm:$0xff]   ;;  %v2562_v63 = vld [vmem:[%s3498_s0 + $0x110] ss:$12 sps:$4 sm:$0xff]  }
  0x15   :  { %2100 = vmatprep.subr.bf16.mxu0 %v2744_v16  ;;  %2170 = vmatprep.subr.bf16.mxu1 %v2708_v10  ;;  %v2556_v58 = vld [vmem:[%s3498_s0 + $0x168] ss:$12 sps:$4 sm:$0xff]   ;;  %v2557_v59 = vld [vmem:[%s3498_s0 + $0xe0] ss:$12 sps:$4 sm:$0xff]   ;;  %v2558_v60 = vld [vmem:[%s3498_s0 + $0xf8] ss:$12 sps:$4 sm:$0xff]  }
  0x16   :  { %2398 = vmatprep.mubr.msk.bf16.mxu1 %vm311_vm0, %v2500_v17  ;;  %v2559_v62 = vld [vmem:[%s3498_s0 + $0x180] ss:$12 sps:$4 sm:$0xff]   ;;  %v2563_v6 = vld [vmem:[%s3498_s0 + $0x128] ss:$12 sps:$4 sm:$0xff]   ;;  %v2567_v14 = vld [vmem:[%s3498_s0 + $0x198] ss:$12 sps:$4 sm:$0xff]  }
  0x17   :  { %v2564_v8 = vld [vmem:[%s3498_s0 + $0x19c] ss:$12 sps:$4 sm:$0xff]   ;;  %v2566_v12 = vld [vmem:[%s3498_s0 + $0x140] ss:$12 sps:$4 sm:$0xff]  }
  0x18   :  { %2101 = vmatpush3.bf16.msra.mxu0 %v2755_v18  ;;  %2171 = vmatpush3.bf16.msra.mxu1 %v2714_v11  ;;  %v2569_v17 = vld [vmem:[%s3498_s0 + $0x1b4] ss:$12 sps:$4 sm:$0xff]   ;;  %v2572_v23 = vld [vmem:[%s3498_s0 + $0x1b0] ss:$12 sps:$4 sm:$0xff]  }
  0x19   :  { %2102 = vmatprep.subr.bf16.mxu0 %v2762_v19  ;;  %2172 = vmatprep.subr.bf16.mxu1 %v2726_v13 }
  0x1b   :  { %2399 = vmatmul.mubr.msk.bf16.gmra.mrb[8].mxu1 %vm311_vm0, %v2502_v20  ;;  %v2571_v20 = vld [vmem:[%s3498_s0 + $0x170] ss:$12 sps:$4 sm:$0xff]  }
  0x1c   :  { %2103 = vmatpush3.bf16.msra.mxu0 %v2771_v21  ;;  %2173 = vmatpush3.bf16.msra.mxu1 %v2737_v15 }
  0x1d   :  { %2104 = vmatprep.subr.bf16.mxu0 %v2778_v22  ;;  %2174 = vmatprep.subr.bf16.mxu1 %v2744_v16 }
  0x1e   :  { %2402 = vmatprep.mubr.msk.bf16.mxu1 %vm311_vm0, %v2509_v24  ;;  %v2573_v24 = vld [vmem:[%s3498_s0 + $0x1cc] ss:$12 sps:$4 sm:$0xff]  }
  0x20   :  { %2105 = vmatpush3.bf16.msra.mxu0 %v2794_v25  ;;  %2175 = vmatpush3.bf16.msra.mxu1 %v2755_v18 }
  0x21   :  { %2176 = vmatprep.subr.bf16.mxu1 %v2762_v19  ;;  %2406 = vmatprep.subr.bf16.mxu0 %v2656_v1 }
  0x23   :  { %369 = vmatmul.mubr.bf16.vlgmr.msra.gmra.mrb[0].mxu0 %v2506_v26  ;;  %2403 = vmatmul.mubr.msk.bf16.gmra.mrb[12].mxu1 %vm311_vm0, %v2510_v27  ;;  %v2575_v26 = vld [vmem:[%s3498_s0 + $0x188] ss:$12 sps:$4 sm:$0xff]  }
  0x24   :  { %2177 = vmatpush3.bf16.msra.mxu1 %v2771_v21  ;;  %2407 = vmatpush3.bf16.msra.mxu0 %v2656_v1  ;;  %v2576_v27 = vld [vmem:[%s3498_s0 + $0x1c8] ss:$12 sps:$4 sm:$0xff]  }
  0x25   :  { %2178 = vmatprep.subr.bf16.mxu1 %v2778_v22  ;;  %376 = vmatprep.mubr.bf16.mxu0 %v2511_v28  ;;  %v2577_v28 = vld [vmem:[%s3498_s0 + $0x1a0] ss:$12 sps:$4 sm:$0xff]  }
  0x26   :  { %739 = vmatprep.mubr.bf16.mxu1 %v2515_v29  ;;  %2408 = vmatprep.subr.bf16.mxu0 %v2675_v4  ;;  %v2578_v29 = vld [vmem:[%s3498_s0 + $0x1e4] ss:$12 sps:$4 sm:$0xff]  }
  0x28   :  { %2179 = vmatpush3.bf16.msra.mxu1 %v2794_v25  ;;  %2409 = vmatpush3.bf16.msra.mxu0 %v2675_v4 }
  0x29   :  { %2238 = vmatprep.subr.bf16.mxu1 %v2651_v0  ;;  %2426 = vmatprep.subr.bf16.mxu0 %v2656_v1 }
  0x2b   :  { %377 = vmatmul.mubr.bf16.gmra.mrb[4].mxu0 %v2516_v31  ;;  %740 = vmatmul.mubr.bf16.vlgmr.msra.gmra.mrb[16].mxu1 %v2513_v30  ;;  %v2580_v30 = vld [vmem:[%s3498_s0 + $0x1b8] ss:$12 sps:$4 sm:$0xff]   ;;  %v2581_v31 = vld [vmem:[%s3498_s0 + $0x1e0] ss:$12 sps:$4 sm:$0xff]  }
  0x2c   :  { %384 = vmatprep.mubr.bf16.mxu0 %v2517_v32  ;;  %747 = vmatprep.mubr.bf16.mxu1 %v2519_v33  ;;  %v2582_v32 = vld [vmem:[%s3498_s0 + $0x1d0] ss:$12 sps:$4 sm:$0xff]   ;;  %v2593_v33 = vld [vmem:[%s3498_s0 + $0x22c] ss:$12 sps:$4 sm:$0xff]  }
  0x2d   :  { %2239 = vmatpush3.bf16.msra.mxu1 %v2662_v2 }
  0x2e   :  { %2240 = vmatprep.subr.bf16.mxu1 %v2668_v3 }
  0x31   :  { %2241 = vmatpush3.bf16.msra.mxu1 %v2681_v5 }
  0x32   :  { %2242 = vmatprep.subr.bf16.mxu1 %v2690_v7 }
  0x33   :  { %385 = vmatmul.mubr.bf16.gmra.mrb[8].mxu0 %v2521_v34  ;;  %748 = vmatmul.mubr.bf16.gmra.mrb[20].mxu1 %v2522_v35  ;;  %v2605_v34 = vld [vmem:[%s3498_s0 + $0x274] ss:$12 sps:$4 sm:$0xff]  }
  0x34   :  { %392 = vmatprep.mubr.bf16.mxu0 %v2523_v36  ;;  %755 = vmatprep.mubr.bf16.mxu1 %v2525_v37  ;;  %v2607_v35 = vld [vmem:[%s3498_s0 + $0x248] ss:$12 sps:$4 sm:$0xff]   ;;  %v2608_v36 = vld [vmem:[%s3498_s0 + $0x270] ss:$12 sps:$4 sm:$0xff]   ;;  %v2609_v37 = vld [vmem:[%s3498_s0 + $0x260] ss:$12 sps:$4 sm:$0xff]  }
  0x35   :  { %2243 = vmatpush3.bf16.msra.mxu1 %v2702_v9 }
  0x36   :  { %2244 = vmatprep.subr.bf16.mxu1 %v2708_v10 }
  0x39   :  { %2245 = vmatpush3.bf16.msra.mxu1 %v2714_v11 }
  0x3a   :  { %2246 = vmatprep.subr.bf16.mxu1 %v2726_v13 }
  0x3b   :  { %393 = vmatmul.mubr.bf16.gmra.mrb[12].mxu0 %v2527_v38  ;;  %756 = vmatmul.mubr.bf16.gmra.mrb[24].mxu1 %v2528_v39  ;;  %v2610_v38 = vld [vmem:[%s3498_s0 + $0x28c] ss:$12 sps:$4 sm:$0xff]   ;;  %v2613_v39 = vld [vmem:[%s3498_s0 + $0x288] ss:$12 sps:$4 sm:$0xff]  }
  0x3c   :  { %400 = vmatprep.mubr.bf16.mxu0 %v2529_v40  ;;  %763 = vmatprep.mubr.bf16.mxu1 %v2531_v41  ;;  %v2615_v40 = vld [vmem:[%s3498_s0 + $0x2a4] ss:$12 sps:$4 sm:$0xff]   ;;  %v2617_v41 = vld [vmem:[%s3498_s0 + $0x2a8] ss:$12 sps:$4 sm:$0xff]  }
  0x3d   :  { %2247 = vmatpush3.bf16.msra.mxu1 %v2737_v15 }
  0x3e   :  { %2248 = vmatprep.subr.bf16.mxu1 %v2744_v16 }
  0x41   :  { %2249 = vmatpush3.bf16.msra.mxu1 %v2755_v18 }
  0x42   :  { %2250 = vmatprep.subr.bf16.mxu1 %v2762_v19 }
  0x43   :  { %401 = vmatmul.mubr.bf16.gmra.mrb[16].mxu0 %v2533_v42  ;;  %764 = vmatmul.mubr.bf16.gmra.mrb[28].mxu1 %v2534_v43  ;;  %v2618_v42 = vld [vmem:[%s3498_s0 + $0x2a0] ss:$12 sps:$4 sm:$0xff]  }
  0x44   :  { %408 = vmatprep.mubr.bf16.mxu0 %v2535_v44  ;;  %771 = vmatprep.mubr.bf16.mxu1 %v2537_v45  ;;  %v2619_v43 = vld [vmem:[%s3498_s0 + $0x2c0] ss:$12 sps:$4 sm:$0xff]   ;;  %v2620_v44 = vld [vmem:[%s3498_s0 + $0x2bc] ss:$12 sps:$4 sm:$0xff]   ;;  %v2622_v45 = vld [vmem:[%s3498_s0 + $0x2d8] ss:$12 sps:$4 sm:$0xff]  }
  0x45   :  { %2251 = vmatpush3.bf16.msra.mxu1 %v2771_v21 }
  0x46   :  { %2252 = vmatprep.subr.bf16.mxu1 %v2778_v22 }
  0x49   :  { %2253 = vmatpush3.bf16.msra.mxu1 %v2794_v25 }
  0x4a   :  { %2466 = vmatprep.subr.bf16.mxu1 %v2651_v0 }
  0x4b   :  { %409 = vmatmul.mubr.bf16.gmra.mrb[20].mxu0 %v2539_v46  ;;  %772 = vmatmul.mubr.bf16.gmra.mrb[32].mxu1 %v2540_v47  ;;  %v2623_v46 = vld [vmem:[%s3498_s0 + $0x2b8] ss:$12 sps:$4 sm:$0xff]   ;;  %v2624_v47 = vld [vmem:[%s3498_s0 + $0x2f0] ss:$12 sps:$4 sm:$0xff]  }
  0x4c   :  { %416 = vmatprep.mubr.bf16.mxu0 %v2541_v48  ;;  %779 = vmatprep.mubr.bf16.mxu1 %v2543_v49  ;;  %v2625_v48 = vld [vmem:[%s3498_s0 + $0x2d4] ss:$12 sps:$4 sm:$0xff]   ;;  %v2627_v49 = vld [vmem:[%s3498_s0 + $0x2d0] ss:$12 sps:$4 sm:$0xff]  }
  0x53   :  { %417 = vmatmul.mubr.bf16.gmra.mrb[24].mxu0 %v2545_v50  ;;  %780 = vmatmul.mubr.bf16.gmra.mrb[36].mxu1 %v2546_v51 }
  0x54   :  { %424 = vmatprep.mubr.bf16.mxu0 %v2547_v52  ;;  %787 = vmatprep.mubr.bf16.mxu1 %v2549_v53 }
  0x5b   :  { %425 = vmatmul.mubr.bf16.gmra.mrb[28].mxu0 %v2551_v54  ;;  %788 = vmatmul.mubr.bf16.gmra.mrb[40].mxu1 %v2552_v55 }
  0x5c   :  { %795 = vmatprep.mubr.bf16.mxu1 %v2553_v56  ;;  %2410 = vmatprep.mubr.msk.bf16.mxu0 %vm311_vm0, %v2555_v57 }
  0x63   :  { %796 = vmatmul.mubr.bf16.gmra.mrb[44].mxu1 %v2556_v58  ;;  %2411 = vmatmul.mubr.msk.bf16.vlgmr.msra.gmra.mrb[32].mxu0 %vm311_vm0, %v2557_v59 }
  0x64   :  { %2427 = vmatpush3.bf16.msra.mxu0 %v2656_v1  ;;  %2414 = vmatprep.mubr.msk.bf16.mxu0 %vm311_vm0, %v2558_v60 }
  0x65   :  { %1126 = vmatprep.mubr.bf16.mxu1 %v2561_v61  ;;  %2428 = vmatprep.subr.bf16.mxu0 %v2675_v4 }
  0x68   :  { %2429 = vmatpush3.bf16.msra.mxu0 %v2675_v4 }
  0x69   :  { %2312 = vmatprep.subr.bf16.mxu0 %v2651_v0  ;;  %v2568_v0 = vld [vmem:[%s3498_s0 + $0x158] ss:$12 sps:$4 sm:$0xff]  }
  0x6b   :  { %2415 = vmatmul.mubr.msk.bf16.gmra.mrb[36].mxu0 %vm311_vm0, %v2562_v63  ;;  %1127 = vmatmul.mubr.bf16.vlgmr.msra.gmra.mrb[48].mxu1 %v2559_v62 }
  0x6c   :  { %2418 = vmatprep.mubr.msk.bf16.mxu0 %vm311_vm0, %v2563_v6  ;;  %1134 = vmatprep.mubr.bf16.mxu1 %v2564_v8 }
  0x6d   :  { %2474 = vmatpush3.bf16.msra.mxu1 %v2662_v2 }
  0x6e   :  { %2467 = vmatprep.subr.bf16.mxu1 %v2668_v3 }
  0x71   :  { %2475 = vmatpush3.bf16.msra.mxu1 %v2681_v5 }
  0x72   :  { %2468 = vmatprep.subr.bf16.mxu1 %v2690_v7 }
  0x73   :  { %2419 = vmatmul.mubr.msk.bf16.gmra.mrb[40].mxu0 %vm311_vm0, %v2566_v12  ;;  %1135 = vmatmul.mubr.bf16.gmra.mrb[52].mxu1 %v2567_v14 }
  0x74   :  { %2422 = vmatprep.mubr.msk.bf16.mxu0 %vm311_vm0, %v2568_v0  ;;  %1142 = vmatprep.mubr.bf16.mxu1 %v2569_v17 }
  0x75   :  { %2476 = vmatpush3.bf16.msra.mxu1 %v2702_v9 }
  0x76   :  { %2469 = vmatprep.subr.bf16.mxu1 %v2708_v10 }
  0x79   :  { %2477 = vmatpush3.bf16.msra.mxu1 %v2714_v11 }
  0x7a   :  { %2470 = vmatprep.subr.bf16.mxu1 %v2726_v13 }
  0x7b   :  { %2423 = vmatmul.mubr.msk.bf16.gmra.mrb[44].mxu0 %vm311_vm0, %v2571_v20  ;;  %1143 = vmatmul.mubr.bf16.gmra.mrb[56].mxu1 %v2572_v23 }
  0x7c   :  { %1150 = vmatprep.mubr.bf16.mxu1 %v2573_v24  ;;  %2430 = vmatprep.mubr.msk.bf16.mxu0 %vm311_vm0, %v2575_v26 }
  0x7d   :  { %2478 = vmatpush3.bf16.msra.mxu1 %v2737_v15 }
  0x7e   :  { %2471 = vmatprep.subr.bf16.mxu1 %v2744_v16 }
  0x81   :  { %2479 = vmatpush3.bf16.msra.mxu1 %v2755_v18 }
  0x82   :  { %2472 = vmatprep.subr.bf16.mxu1 %v2762_v19 }
  0x83   :  { %1151 = vmatmul.mubr.bf16.gmra.mrb[60].mxu1 %v2576_v27  ;;  %2431 = vmatmul.mubr.msk.bf16.vlgmr.msra.gmra.mrb[48].mxu0 %vm311_vm0, %v2577_v28 }
  0x84   :  { %2313 = vmatpush3.bf16.msra.mxu0 %v2662_v2  ;;  %1158 = vmatprep.mubr.bf16.mxu1 %v2578_v29  ;;  %v2583_v2 = vld [vmem:[%s3498_s0 + $0x1fc] ss:$12 sps:$4 sm:$0xff]  }
  0x85   :  { %2314 = vmatprep.subr.bf16.mxu0 %v2668_v3  ;;  %2434 = vmatprep.mubr.msk.bf16.mxu0 %vm311_vm0, %v2580_v30  ;;  %v2585_v3 = vld [vmem:[%s3498_s0 + $0x1e8] ss:$12 sps:$4 sm:$0xff]  }
  0x86   :  { %2480 = vmatpush3.bf16.msra.mxu1 %v2771_v21 }
  0x87   :  { %2473 = vmatprep.subr.bf16.mxu1 %v2778_v22 }
  0x88   :  { %2315 = vmatpush3.bf16.msra.mxu0 %v2681_v5  ;;  %v2586_v5 = vld [vmem:[%s3498_s0 + $0x1f8] ss:$12 sps:$4 sm:$0xff]  }
  0x89   :  { %2316 = vmatprep.subr.bf16.mxu0 %v2690_v7  ;;  %v2587_v7 = vld [vmem:[%s3498_s0 + $0x200] ss:$12 sps:$4 sm:$0xff]  }
  0x8a   :  { %2481 = vmatpush3.bf16.msra.mxu1 %v2794_v25 }
  0x8b   :  { %1159 = vmatmul.mubr.bf16.gmra.mrb[64].mxu1 %v2581_v31  ;;  %2435 = vmatmul.mubr.msk.bf16.gmra.mrb[52].mxu0 %vm311_vm0, %v2582_v32 }
  0x8c   :  { %2317 = vmatpush3.bf16.msra.mxu0 %v2702_v9  ;;  %1166 = vmatprep.mubr.bf16.mxu1 %v2583_v2  ;;  %v2588_v9 = vld [vmem:[%s3498_s0 + $0x214] ss:$12 sps:$4 sm:$0xff]  }
  0x8d   :  { %2318 = vmatprep.subr.bf16.mxu0 %v2708_v10  ;;  %2438 = vmatprep.mubr.msk.bf16.mxu0 %vm311_vm0, %v2585_v3  ;;  %v2590_v10 = vld [vmem:[%s3498_s0 + $0x218] ss:$12 sps:$4 sm:$0xff]  }
  0x8e   :  { %2446 = vmatprep.subr.bf16.mxu1 %v2656_v1 }
  0x90   :  { %2319 = vmatpush3.bf16.msra.mxu0 %v2714_v11  ;;  %v2591_v11 = vld [vmem:[%s3498_s0 + $0x210] ss:$12 sps:$4 sm:$0xff]  }
  0x91   :  { %2320 = vmatprep.subr.bf16.mxu0 %v2726_v13  ;;  %v2592_v13 = vld [vmem:[%s3498_s0 + $0x230] ss:$12 sps:$4 sm:$0xff]  }
  0x93   :  { %1167 = vmatmul.mubr.bf16.gmra.mrb[68].mxu1 %v2586_v5  ;;  %2439 = vmatmul.mubr.msk.bf16.gmra.mrb[56].mxu0 %vm311_vm0, %v2587_v7 }
  0x94   :  { %2321 = vmatpush3.bf16.msra.mxu0 %v2737_v15  ;;  %1174 = vmatprep.mubr.bf16.mxu1 %v2588_v9  ;;  %v2597_v15 = vld [vmem:[%s3498_s0 + $0x244] ss:$12 sps:$4 sm:$0xff]  }
  0x95   :  { %2322 = vmatprep.subr.bf16.mxu0 %v2744_v16  ;;  %2442 = vmatprep.mubr.msk.bf16.mxu0 %vm311_vm0, %v2590_v10  ;;  %v2595_v16 = vld [vmem:[%s3498_s0 + $0x240] ss:$12 sps:$4 sm:$0xff]  }
  0x98   :  { %2323 = vmatpush3.bf16.msra.mxu0 %v2755_v18  ;;  %v2598_v18 = vld [vmem:[%s3498_s0 + $0x228] ss:$12 sps:$4 sm:$0xff]  }
  0x99   :  { %2324 = vmatprep.subr.bf16.mxu0 %v2762_v19  ;;  %v2599_v19 = vld [vmem:[%s3498_s0 + $0x25c] ss:$12 sps:$4 sm:$0xff]  }
  0x9b   :  { %1175 = vmatmul.mubr.bf16.gmra.mrb[72].mxu1 %v2591_v11  ;;  %2443 = vmatmul.mubr.msk.bf16.gmra.mrb[60].mxu0 %vm311_vm0, %v2592_v13 }
  0x9c   :  { %2325 = vmatpush3.bf16.msra.mxu0 %v2771_v21  ;;  %1182 = vmatprep.mubr.bf16.mxu1 %v2593_v33  ;;  %v2603_v21 = vld [vmem:[%s3498_s0 + $0x2ec] ss:$12 sps:$4 sm:$0xff]  }
  0x9d   :  { %2326 = vmatprep.subr.bf16.mxu0 %v2778_v22  ;;  %1513 = vmatprep.mubr.bf16.mxu0 %v2597_v15  ;;  %v2601_v22 = vld [vmem:[%s3498_s0 + $0x2e8] ss:$12 sps:$4 sm:$0xff]  }
  0xa0   :  { %2327 = vmatpush3.bf16.msra.mxu0 %v2794_v25  ;;  %v2604_v25 = vld [vmem:[%s3498_s0 + $0x258] ss:$12 sps:$4 sm:$0xff]  }
  0xa3   :  { %1183 = vmatmul.mubr.bf16.gmra.mrb[76].mxu1 %v2598_v18  ;;  %1514 = vmatmul.mubr.bf16.vlgmr.msra.gmra.mrb[64].mxu0 %v2595_v16 }
  0xa4   :  { %1521 = vmatprep.mubr.bf16.mxu0 %v2599_v19  ;;  %1569 = vmatprep.mubr.bf16.mxu1 %v2603_v21 }
  0xab   :  { %1522 = vmatmul.mubr.bf16.gmra.mrb[68].mxu0 %v2604_v25  ;;  %1570 = vmatmul.mubr.bf16.vlgmr.msra.gmra.mrb[80].mxu1 %v2601_v22 }
  0xac   :  { %2447 = vmatpush3.bf16.msra.mxu1 %v2656_v1  ;;  %1529 = vmatprep.mubr.bf16.mxu0 %v2605_v34  ;;  %v2612_v1 = vld [vmem:[%s3498_s0 + $0x278] ss:$12 sps:$4 sm:$0xff]  }
  0xad   :  { %2448 = vmatprep.subr.bf16.mxu1 %v2675_v4  ;;  %2450 = vmatprep.mubr.msk.bf16.mxu1 %vm311_vm0, %v2607_v35 }
  0xb0   :  { %2449 = vmatpush3.bf16.msra.mxu1 %v2675_v4  ;;  %v2614_v4 = vld [vmem:[%s3498_s0 + $0x290] ss:$12 sps:$4 sm:$0xff]  }
  0xb3   :  { %1530 = vmatmul.mubr.bf16.gmra.mrb[72].mxu0 %v2608_v36  ;;  %2451 = vmatmul.mubr.msk.bf16.vlgmr.msra.gmra.mrb[84].mxu1 %vm311_vm0, %v2609_v37 }
  0xb4   :  { %1537 = vmatprep.mubr.bf16.mxu0 %v2610_v38  ;;  %2454 = vmatprep.mubr.msk.bf16.mxu1 %vm311_vm0, %v2612_v1 }
  0xbb   :  { %1538 = vmatmul.mubr.bf16.gmra.mrb[76].mxu0 %v2613_v39  ;;  %2455 = vmatmul.mubr.msk.bf16.gmra.mrb[88].mxu1 %vm311_vm0, %v2614_v4 }
  0xbc   :  { %1545 = vmatprep.mubr.bf16.mxu0 %v2615_v40  ;;  %2458 = vmatprep.mubr.msk.bf16.mxu1 %vm311_vm0, %v2617_v41 }
  0xc3   :  { %1546 = vmatmul.mubr.bf16.gmra.mrb[80].mxu0 %v2618_v42  ;;  %2459 = vmatmul.mubr.msk.bf16.gmra.mrb[92].mxu1 %vm311_vm0, %v2619_v43 }
  0xc4   :  { %1553 = vmatprep.mubr.bf16.mxu0 %v2620_v44  ;;  %2462 = vmatprep.mubr.msk.bf16.mxu1 %vm311_vm0, %v2622_v45 }
  0xcb   :  { %1554 = vmatmul.mubr.bf16.gmra.mrb[84].mxu0 %v2623_v46  ;;  %2463 = vmatmul.mubr.msk.bf16.gmra.mrb[96].mxu1 %vm311_vm0, %v2624_v47 }
  0xcc   :  { %1561 = vmatprep.mubr.bf16.mxu0 %v2625_v48 }
  0xd3   :  { %1562 = vmatmul.mubr.bf16.gmra.mrb[88].mxu0 %v2627_v49 }
  0xde   :  { %v2392_v50 = vpop.f32.mrb[0].mxu1 }
  0xdf   :  { %v467_v51 = vpop.f32.mrb[1].mxu1 }
  0xe0   :  { %v2393_v52 = vpop.f32.mrb[2].mxu1 }
  0xe1   :  { %v470_v53 = vpop.f32.mrb[3].mxu1 }
  0xe6   :  { %v2396_v54 = vpop.f32.mrb[4].mxu1 }
  0xe7   :  { %v483_v55 = vpop.f32.mrb[5].mxu1 }
  0xe8   :  { %v2397_v56 = vpop.f32.mrb[6].mxu1 }
  0xe9   :  { %v486_v57 = vpop.f32.mrb[7].mxu1 }
  0xee   :  { %v3154_v58 = vpop.f32.mrb[8].mxu1 }
  0xef   :  { %v3156_v59 = vpop.f32.mrb[9].mxu1 }
  0xf0   :  { %v3158_v60 = vpop.f32.mrb[10].mxu1 }
  0xf1   :  { %v3160_v61 = vpop.f32.mrb[11].mxu1 }
  0xf6   :  { %v2106_v62 = vpop.f32.mrb[0].mxu0  ;;  %v3162_v63 = vpop.f32.mrb[12].mxu1 }
  0xf7   :  { %v2107_v6 = vpop.f32.mrb[1].mxu0  ;;  %v3164_v8 = vpop.f32.mrb[13].mxu1 }
  0xf8   :  { %v2108_v12 = vadd.f32 %v2107_v6, %v2106_v62  ;;  %v2109_v14 = vpop.f32.mrb[2].mxu0  ;;  %v3166_v0 = vpop.f32.mrb[14].mxu1 }
  0xf9   :  { %v2110_v17 = vpop.f32.mrb[3].mxu0  ;;  %v3168_v20 = vpop.f32.mrb[15].mxu1 }
  0xfa   :  { %v3170_v23 = vadd.f32 %v2108_v12, %v467_v51  ;;  %v2111_v24 = vadd.f32 %v2110_v17, %v2109_v14 }
  0xfc   :  { %v3172_v26 = vadd.f32 %v2111_v24, %v470_v53 }
  0xfe   :  { %v2112_v27 = vpop.f32.mrb[4].mxu0  ;;  %v2180_v28 = vpop.f32.mrb[16].mxu1 }
  0xff   :  { %v2113_v29 = vpop.f32.mrb[5].mxu0  ;;  %v2181_v30 = vpop.f32.mrb[17].mxu1 }
 0x100   :  { %v2114_v31 = vadd.f32 %v2113_v29, %v2112_v27  ;;  %v2115_v32 = vpop.f32.mrb[6].mxu0  ;;  %v3174_v2 = vadd.f32 %v2181_v30, %v2180_v28  ;;  %v2183_v3 = vpop.f32.mrb[18].mxu1 }
 0x101   :  { %v2116_v5 = vpop.f32.mrb[7].mxu0  ;;  %v2184_v7 = vpop.f32.mrb[19].mxu1 }
 0x102   :  { %v3176_v9 = vadd.f32 %v2392_v50, %v2114_v31  ;;  %v2117_v10 = vadd.f32 %v2116_v5, %v2115_v32  ;;  %v3178_v11 = vadd.f32 %v2184_v7, %v2183_v3 }
 0x104   :  { %v3180_v13 = vadd.f32 %v2393_v52, %v2117_v10 }
 0x106   :  { %v2118_v33 = vpop.f32.mrb[8].mxu0  ;;  %v2186_v15 = vpop.f32.mrb[20].mxu1 }
 0x107   :  { %v2119_v16 = vpop.f32.mrb[9].mxu0  ;;  %v2187_v18 = vpop.f32.mrb[21].mxu1 }
 0x108   :  { %v2120_v19 = vadd.f32 %v2119_v16, %v2118_v33  ;;  %v2121_v21 = vpop.f32.mrb[10].mxu0  ;;  %v3182_v22 = vadd.f32 %v2187_v18, %v2186_v15  ;;  %v2189_v25 = vpop.f32.mrb[22].mxu1 }
 0x109   :  { %v2122_v34 = vpop.f32.mrb[11].mxu0  ;;  %v2190_v35 = vpop.f32.mrb[23].mxu1 }
 0x10a   :  { %v3184_v36 = vadd.f32 %v2120_v19, %v483_v55  ;;  %v2123_v37 = vadd.f32 %v2122_v34, %v2121_v21  ;;  %v3186_v38 = vadd.f32 %v2190_v35, %v2189_v25 }
 0x10c   :  { %v3188_v1 = vadd.f32 %v2123_v37, %v486_v57 }
 0x10e   :  { %v2124_v39 = vpop.f32.mrb[12].mxu0  ;;  %v2192_v4 = vpop.f32.mrb[24].mxu1 }
 0x10f   :  { %v2125_v40 = vpop.f32.mrb[13].mxu0  ;;  %v2193_v41 = vpop.f32.mrb[25].mxu1 }
 0x110   :  { %v2126_v42 = vadd.f32 %v2125_v40, %v2124_v39  ;;  %v2127_v43 = vpop.f32.mrb[14].mxu0  ;;  %v3190_v44 = vadd.f32 %v2193_v41, %v2192_v4  ;;  %v2195_v45 = vpop.f32.mrb[26].mxu1 }
 0x111   :  { %v2128_v46 = vpop.f32.mrb[15].mxu0  ;;  %v2196_v47 = vpop.f32.mrb[27].mxu1 }
 0x112   :  { %v3192_v48 = vadd.f32 %v2396_v54, %v2126_v42  ;;  %v2129_v49 = vadd.f32 %v2128_v46, %v2127_v43  ;;  %v3194_v50 = vadd.f32 %v2196_v47, %v2195_v45 }
 0x114   :  { %v3196_v51 = vadd.f32 %v2397_v56, %v2129_v49 }
 0x116   :  { %v2130_v52 = vpop.f32.mrb[16].mxu0  ;;  %v2198_v53 = vpop.f32.mrb[28].mxu1 }
 0x117   :  { %v2131_v55 = vpop.f32.mrb[17].mxu0  ;;  %v2199_v57 = vpop.f32.mrb[29].mxu1 }
 0x118   :  { %v2132_v62 = vadd.f32 %v2131_v55, %v2130_v52  ;;  %v2133_v6 = vpop.f32.mrb[18].mxu0  ;;  %v3198_v12 = vadd.f32 %v2199_v57, %v2198_v53  ;;  %v2201_v14 = vpop.f32.mrb[30].mxu1 }
 0x119   :  { %v2134_v17 = vpop.f32.mrb[19].mxu0  ;;  %v2202_v24 = vpop.f32.mrb[31].mxu1 }
 0x11a   :  { %v3201_v27 = vadd.f32 %v2132_v62, %v3156_v59  ;;  %v2135_v54 = vadd.f32 %v2134_v17, %v2133_v6  ;;  %v3203_v28 = vadd.f32 %v2202_v24, %v2201_v14 }
 0x11c   :  { %v3206_v56 = vadd.f32 %v2135_v54, %v3160_v61 }
 0x11e   :  { %v2136_v29 = vpop.f32.mrb[20].mxu0  ;;  %v2204_v30 = vpop.f32.mrb[32].mxu1 }
 0x11f   :  { %v2137_v31 = vpop.f32.mrb[21].mxu0  ;;  %v2205_v32 = vpop.f32.mrb[33].mxu1 }
 0x120   :  { %v2138_v3 = vadd.f32 %v2137_v31, %v2136_v29  ;;  %v2139_v5 = vpop.f32.mrb[22].mxu0  ;;  %v3208_v7 = vadd.f32 %v2205_v32, %v2204_v30  ;;  %v2207_v10 = vpop.f32.mrb[34].mxu1 }
 0x121   :  { %v2140_v33 = vpop.f32.mrb[23].mxu0  ;;  %v2208_v15 = vpop.f32.mrb[35].mxu1 }
 0x122   :  { %v3211_v59 = vadd.f32 %v3154_v58, %v2138_v3  ;;  %v2141_v16 = vadd.f32 %v2140_v33, %v2139_v5  ;;  %v3213_v18 = vadd.f32 %v2208_v15, %v2207_v10 }
 0x124   :  { %v3216_v61 = vadd.f32 %v3158_v60, %v2141_v16 }
 0x126   :  { %v2142_v19 = vpop.f32.mrb[24].mxu0  ;;  %v2210_v21 = vpop.f32.mrb[36].mxu1 }
 0x127   :  { %v2143_v25 = vpop.f32.mrb[25].mxu0  ;;  %v2211_v34 = vpop.f32.mrb[37].mxu1 }
 0x128   :  { %v2144_v35 = vadd.f32 %v2143_v25, %v2142_v19  ;;  %v2145_v37 = vpop.f32.mrb[26].mxu0  ;;  %v2212_v39 = vadd.f32 %v2211_v34, %v2210_v21  ;;  %v2213_v4 = vpop.f32.mrb[38].mxu1 }
 0x129   :  { %v2146_v40 = vpop.f32.mrb[27].mxu0  ;;  %v2214_v41 = vpop.f32.mrb[39].mxu1 }
 0x12a   :  { %v3219_v42 = vadd.f32 %v2144_v35, %v3164_v8  ;;  %v2147_v58 = vadd.f32 %v2146_v40, %v2145_v37  ;;  %v2215_v43 = vadd.f32 %v2214_v41, %v2213_v4 }
 0x12c   :  { %v3222_v45 = vadd.f32 %v2147_v58, %v3168_v20 }
 0x12e   :  { %v2148_v60 = vpop.f32.mrb[28].mxu0  ;;  %v2216_v46 = vpop.f32.mrb[40].mxu1 }
 0x12f   :  { %v2149_v47 = vpop.f32.mrb[29].mxu0  ;;  %v2217_v49 = vpop.f32.mrb[41].mxu1 }
 0x130   :  { %v2150_v52 = vadd.f32 %v2149_v47, %v2148_v60  ;;  %v2151_v53 = vpop.f32.mrb[30].mxu0  ;;  %v3224_v55 = vadd.f32 %v2217_v49, %v2216_v46  ;;  %v2219_v57 = vpop.f32.mrb[42].mxu1 }
 0x131   :  { %v2152_v62 = vpop.f32.mrb[31].mxu0  ;;  %v2220_v6 = vpop.f32.mrb[43].mxu1 }
 0x132   :  { %v3227_v14 = vadd.f32 %v3162_v63, %v2150_v52  ;;  %v2153_v8 = vadd.f32 %v2152_v62, %v2151_v53  ;;  %v3229_v17 = vadd.f32 %v2220_v6, %v2219_v57 }
 0x134   :  { %v3232_v20 = vadd.f32 %v3166_v0, %v2153_v8 }
 0x136   :  { %v2412_v24 = vpop.f32.mrb[32].mxu0  ;;  %v2222_v54 = vpop.f32.mrb[44].mxu1 }
 0x137   :  { %v3235_v29 = vadd.f32 %v2412_v24, %v3182_v22  ;;  %v838_v30 = vpop.f32.mrb[33].mxu0  ;;  %v2223_v31 = vpop.f32.mrb[45].mxu1 }
 0x138   :  { %v3238_v32 = vadd.f32 %v3174_v2, %v838_v30  ;;  %v2413_v3 = vpop.f32.mrb[34].mxu0  ;;  %v2224_v5 = vadd.f32 %v2223_v31, %v2222_v54  ;;  %v2225_v63 = vpop.f32.mrb[46].mxu1 }
 0x139   :  { %v903_v10 = vmax.f32 %v3176_v9, %v3235_v29  ;;  %v3243_v33 = vadd.f32 %v2413_v3, %v3186_v38  ;;  %v841_v0 = vpop.f32.mrb[35].mxu0  ;;  %v2226_v15 = vpop.f32.mrb[47].mxu1 }
 0x13a   :  { %v901_v22 = vmax.f32 %v3170_v23, %v3238_v32  ;;  %v3248_v16 = vadd.f32 %v3178_v11, %v841_v0  ;;  %v2227_v19 = vadd.f32 %v2226_v15, %v2225_v63 }
 0x13b   :  { %v904_v2 = vmax.f32 %v3180_v13, %v3243_v33 }
 0x13c   :  { %v902_v21 = vmax.f32 %v3172_v26, %v3248_v16 }
 0x13e   :  { %v2416_v25 = vpop.f32.mrb[36].mxu0  ;;  %v2254_v34 = vpop.f32.mrb[48].mxu1 }
 0x13f   :  { %v3255_v38 = vadd.f32 %v2416_v25, %v3198_v12  ;;  %v854_v35 = vpop.f32.mrb[37].mxu0  ;;  %v2255_v37 = vpop.f32.mrb[49].mxu1 }
 0x140   :  { %v3258_v4 = vadd.f32 %v3190_v44, %v854_v35  ;;  %v2417_v40 = vpop.f32.mrb[38].mxu0  ;;  %v2256_v11 = vadd.f32 %v2255_v37, %v2254_v34  ;;  %v2257_v41 = vpop.f32.mrb[50].mxu1 }
 0x141   :  { %v907_v58 = vmax.f32 %v3192_v48, %v3255_v38  ;;  %v3263_v60 = vadd.f32 %v2417_v40, %v3203_v28  ;;  %v857_v46 = vpop.f32.mrb[39].mxu0  ;;  %v2258_v47 = vpop.f32.mrb[51].mxu1 }
 0x142   :  { %v905_v12 = vmax.f32 %v3184_v36, %v3258_v4  ;;  %v3268_v49 = vadd.f32 %v3194_v50, %v857_v46  ;;  %v2259_v52 = vadd.f32 %v2258_v47, %v2257_v41 }
 0x143   :  { %v908_v44 = vmax.f32 %v3196_v51, %v3263_v60 }
 0x144   :  { %v906_v53 = vmax.f32 %v3188_v1, %v3268_v49 }
 0x146   :  { %v2420_v57 = vpop.f32.mrb[40].mxu0  ;;  %v2260_v62 = vpop.f32.mrb[52].mxu1 }
 0x147   :  { %v3274_v6 = vadd.f32 %v2420_v57, %v2212_v39  ;;  %v870_v28 = vpop.f32.mrb[41].mxu0  ;;  %v2261_v8 = vpop.f32.mrb[53].mxu1 }
 0x148   :  { %v3277_v24 = vadd.f32 %v3208_v7, %v870_v28  ;;  %v2421_v54 = vpop.f32.mrb[42].mxu0  ;;  %v2262_v30 = vadd.f32 %v2261_v8, %v2260_v62  ;;  %v2263_v50 = vpop.f32.mrb[54].mxu1 }
 0x149   :  { %v911_v31 = vmax.f32 %v3211_v59, %v3274_v6  ;;  %v3281_v3 = vadd.f32 %v2421_v54, %v2215_v43  ;;  %v873_v63 = vpop.f32.mrb[43].mxu0  ;;  %v2264_v0 = vpop.f32.mrb[55].mxu1 }
 0x14a   :  { %v909_v15 = vmax.f32 %v3201_v27, %v3277_v24  ;;  %v3286_v39 = vadd.f32 %v3213_v18, %v873_v63  ;;  %v2265_v25 = vadd.f32 %v2264_v0, %v2263_v50 }
 0x14e   :  { %v2424_v35 = vpop.f32.mrb[44].mxu0  ;;  %v2266_v37 = vpop.f32.mrb[56].mxu1 }
 0x14f   :  { %v3292_v40 = vadd.f32 %v2424_v35, %v2224_v5  ;;  %v886_v43 = vpop.f32.mrb[45].mxu0  ;;  %v2267_v41 = vpop.f32.mrb[57].mxu1 }
 0x150   :  { %v3295_v46 = vadd.f32 %v3224_v55, %v886_v43  ;;  %v2425_v47 = vpop.f32.mrb[46].mxu0  ;;  %v2268_v57 = vadd.f32 %v2267_v41, %v2266_v37  ;;  %v2269_v18 = vpop.f32.mrb[58].mxu1 }
 0x151   :  { %v3299_v28 = vadd.f32 %v2425_v47, %v2227_v19  ;;  %v889_v8 = vpop.f32.mrb[47].mxu0  ;;  %v2270_v54 = vpop.f32.mrb[59].mxu1 }
 0x152   :  { %v913_v50 = vmax.f32 %v3219_v42, %v3295_v46  ;;  %v3304_v5 = vadd.f32 %v3229_v17, %v889_v8  ;;  %v2271_v63 = vadd.f32 %v2270_v54, %v2269_v18 }
 0x154   :  { %v914_v0 = vmax.f32 %v3222_v45, %v3304_v5 }
 0x156   :  { %v2432_v35 = vpop.f32.mrb[48].mxu0  ;;  %v2272_v37 = vpop.f32.mrb[60].mxu1 }
 0x157   :  { %v1234_v43 = vadd.f32 %v2432_v35, %v2262_v30  ;;  %v1225_v19 = vpop.f32.mrb[49].mxu0  ;;  %v2273_v41 = vpop.f32.mrb[61].mxu1 }
 0x158   :  { %v1226_v47 = vadd.f32 %v2256_v11, %v1225_v19  ;;  %v2433_v62 = vpop.f32.mrb[50].mxu0  ;;  %v2274_v7 = vadd.f32 %v2273_v41, %v2272_v37  ;;  %v2275_v34 = vpop.f32.mrb[62].mxu1 }
 0x159   :  { %v3313_v17 = vmax.f32 %v903_v10, %v1234_v43  ;;  %v1237_v18 = vadd.f32 %v2433_v62, %v2265_v25  ;;  %v1228_v8 = vpop.f32.mrb[51].mxu0  ;;  %v2276_v54 = vpop.f32.mrb[63].mxu1 }
 0x15a   :  { %v3318_v55 = vmax.f32 %v901_v22, %v1226_v47  ;;  %v1229_v30 = vadd.f32 %v2259_v52, %v1228_v8  ;;  %v2277_v35 = vadd.f32 %v2276_v54, %v2275_v34  ;;  %v3502_v8 = vmax.f32 %v3216_v61, %v3281_v3 }
 0x15b   :  { %v3323_v11 = vmax.f32 %v904_v2, %v1237_v18 }
 0x15c   :  { %v3328_v9 = vmax.f32 %v902_v21, %v1229_v30 }
 0x15e   :  { %v2436_v29 = vpop.f32.mrb[52].mxu0  ;;  %v2278_v10 = vpop.f32.mrb[64].mxu1 }
 0x15f   :  { %v1250_v25 = vadd.f32 %v2436_v29, %v2274_v7  ;;  %v1241_v62 = vpop.f32.mrb[53].mxu0  ;;  %v2279_v37 = vpop.f32.mrb[65].mxu1 }
 0x160   :  { %v1242_v23 = vadd.f32 %v2268_v57, %v1241_v62  ;;  %v2437_v32 = vpop.f32.mrb[54].mxu0  ;;  %v2280_v22 = vadd.f32 %v2279_v37, %v2278_v10  ;;  %v2281_v52 = vpop.f32.mrb[66].mxu1 }
 0x161   :  { %v3333_v13 = vmax.f32 %v907_v58, %v1250_v25  ;;  %v1253_v33 = vadd.f32 %v2437_v32, %v2277_v35  ;;  %v1244_v2 = vpop.f32.mrb[55].mxu0  ;;  %v2282_v34 = vpop.f32.mrb[67].mxu1 }
 0x162   :  { %v3338_v26 = vmax.f32 %v905_v12, %v1242_v23  ;;  %v1245_v16 = vadd.f32 %v2271_v63, %v1244_v2  ;;  %v2283_v21 = vadd.f32 %v2282_v34, %v2281_v52 }
 0x163   :  { %v3343_v7 = vmax.f32 %v908_v44, %v1253_v33 }
 0x164   :  { %v3348_v48 = vmax.f32 %v906_v53, %v1245_v16  ;;  %v3501_v53 = vmax.f32 %v3206_v56, %v3286_v39 }
 0x166   :  { %v2284_v38 = vpop.f32.mrb[68].mxu1  ;;  %v2440_v58 = vpop.f32.mrb[56].mxu0 }
 0x167   :  { %v2285_v57 = vpop.f32.mrb[69].mxu1  ;;  %v1257_v43 = vpop.f32.mrb[57].mxu0 }
 0x168   :  { %v2286_v19 = vadd.f32 %v2285_v57, %v2284_v38  ;;  %v1258_v36 = vadd.f32 %v2280_v22, %v1257_v43  ;;  %v2287_v4 = vpop.f32.mrb[70].mxu1  ;;  %v2441_v12 = vpop.f32.mrb[58].mxu0  ;;  %v3504_v38 = vmax.f32 %v3232_v20, %v3299_v28  ;;  %v3397_v20 = vld [vmem:[%s3499_s2] ss:$0 sm:$0xff] }
 0x169   :  { %v2288_v63 = vpop.f32.mrb[71].mxu1  ;;  %v1260_v41 = vpop.f32.mrb[59].mxu0 }
 0x16a   :  { %v1266_v47 = vadd.f32 %v2440_v58, %v2286_v19  ;;  %v3353_v51 = vmax.f32 %v909_v15, %v1258_v36  ;;  %v2289_v60 = vadd.f32 %v2288_v63, %v2287_v4  ;;  %v1261_v1 = vadd.f32 %v2283_v21, %v1260_v41 }
 0x16b   :  { %v3503_v21 = vmax.f32 %v3227_v14, %v3292_v40 }
 0x16c   :  { %v3358_v49 = vmax.f32 %v911_v31, %v1266_v47  ;;  %v1269_v44 = vadd.f32 %v2441_v12, %v2289_v60  ;;  %v3363_v18 = vmax.f32 %v3501_v53, %v1261_v1 }
 0x16e   :  { %v3368_v54 = vmax.f32 %v3502_v8, %v1269_v44  ;;  %v2290_v27 = vpop.f32.mrb[72].mxu1  ;;  %v2444_v24 = vpop.f32.mrb[60].mxu0 }
 0x16f   :  { %v2291_v15 = vpop.f32.mrb[73].mxu1  ;;  %v1273_v30 = vpop.f32.mrb[61].mxu0 }
 0x170   :  { %v2292_v35 = vadd.f32 %v2291_v15, %v2290_v27  ;;  %v2293_v29 = vpop.f32.mrb[74].mxu1  ;;  %v2445_v59 = vpop.f32.mrb[62].mxu0 }
 0x171   :  { %v2294_v6 = vpop.f32.mrb[75].mxu1  ;;  %v1276_v31 = vpop.f32.mrb[63].mxu0 }
 0x172   :  { %v1274_v10 = vadd.f32 %v2292_v35, %v1273_v30  ;;  %v2295_v25 = vadd.f32 %v2294_v6, %v2293_v29 }
 0x174   :  { %v3373_v56 = vmax.f32 %v913_v50, %v1274_v10  ;;  %v1277_v39 = vadd.f32 %v2295_v25, %v1276_v31 }
 0x176   :  { %v3378_v61 = vmax.f32 %v914_v0, %v1277_v39  ;;  %v2296_v3 = vpop.f32.mrb[76].mxu1  ;;  %v2328_v62 = vpop.f32.mrb[64].mxu0 }
 0x177   :  { %v2297_v37 = vpop.f32.mrb[77].mxu1  ;;  %v2329_v23 = vpop.f32.mrb[65].mxu0 }
 0x178   :  { %v2298_v32 = vadd.f32 %v2297_v37, %v2296_v3  ;;  %v2330_v22 = vadd.f32 %v2329_v23, %v2328_v62  ;;  %v2299_v52 = vpop.f32.mrb[78].mxu1  ;;  %v2331_v33 = vpop.f32.mrb[66].mxu0 }
 0x179   :  { %v2300_v2 = vpop.f32.mrb[79].mxu1  ;;  %v2332_v34 = vpop.f32.mrb[67].mxu0 }
 0x17a   :  { %v1282_v16 = vadd.f32 %v2444_v24, %v2298_v32  ;;  %v2301_v42 = vadd.f32 %v2300_v2, %v2299_v52  ;;  %v2333_v46 = vadd.f32 %v2332_v34, %v2331_v33 }
 0x17c   :  { %v1285_v50 = vadd.f32 %v2445_v59, %v2301_v42  ;;  %v3383_v45 = vmax.f32 %v3503_v21, %v1282_v16 }
 0x17e   :  { %v2334_v5 = vpop.f32.mrb[68].mxu0  ;;  %v2370_v0 = vpop.f32.mrb[80].mxu1  ;;  %v3388_v58 = vmax.f32 %v3504_v38, %v1285_v50 }
 0x17f   :  { %v2335_v57 = vpop.f32.mrb[69].mxu0  ;;  %v2371_v43 = vpop.f32.mrb[81].mxu1 }
 0x180   :  { %v2336_v19 = vadd.f32 %v2335_v57, %v2334_v5  ;;  %v2337_v36 = vpop.f32.mrb[70].mxu0  ;;  %v3390_v4 = vadd.f32 %v2371_v43, %v2370_v0  ;;  %v2373_v12 = vpop.f32.mrb[82].mxu1 }
 0x181   :  { %v2338_v63 = vpop.f32.mrb[71].mxu0  ;;  %v2374_v41 = vpop.f32.mrb[83].mxu1 }
 0x182   :  { %v2339_v47 = vadd.f32 %v2338_v63, %v2337_v36  ;;  %v3392_v14 = vadd.f32 %v2374_v41, %v2373_v12 }
 0x186   :  { %v2340_v40 = vpop.f32.mrb[72].mxu0  ;;  %v2452_v60 = vpop.f32.mrb[84].mxu1 }
 0x187   :  { %v1621_v1 = vadd.f32 %v2452_v60, %v2336_v19  ;;  %v2341_v44 = vpop.f32.mrb[73].mxu0  ;;  %v1612_v53 = vpop.f32.mrb[85].mxu1 }
 0x188   :  { %v2342_v28 = vadd.f32 %v2341_v44, %v2340_v40  ;;  %v1613_v8 = vadd.f32 %v2330_v22, %v1612_v53  ;;  %v2343_v27 = vpop.f32.mrb[74].mxu0  ;;  %v2453_v24 = vpop.f32.mrb[86].mxu1 }
 0x189   :  { %v1677_v15 = vmax.f32 %v3313_v17, %v1621_v1  ;;  %v1624_v30 = vadd.f32 %v2453_v24, %v2339_v47  ;;  %v2344_v35 = vpop.f32.mrb[75].mxu0  ;;  %v1615_v29 = vpop.f32.mrb[87].mxu1 }
 0x18a   :  { %v1675_v59 = vmax.f32 %v3318_v55, %v1613_v8  ;;  %v2345_v6 = vadd.f32 %v2344_v35, %v2343_v27  ;;  %v1616_v31 = vadd.f32 %v2333_v46, %v1615_v29 }
 0x18b   :  { %v1700_v10 = vadd.f32 %v3397_v20, %v1677_v15  ;;  %v1678_v25 = vmax.f32 %v3323_v11, %v1624_v30 }
 0x18c   :  { %v1698_v39 = vadd.f32 %v3397_v20, %v1675_v59  ;;  %v1676_v3 = vmax.f32 %v3328_v9, %v1616_v31 }
 0x18d   :  { %v1716_v62 = vmax.f32 %v1700_v10, 0.0  ;;  %v1701_v37 = vadd.f32 %v3397_v20, %v1678_v25 }
 0x18e   :  { %v1714_v17 = vmax.f32 %v1698_v39, 0.0  ;;  %v1699_v23 = vadd.f32 %v3397_v20, %v1676_v3  ;;  %v2346_v32 = vpop.f32.mrb[76].mxu0  ;;  %v2456_v22 = vpop.f32.mrb[88].mxu1 }
 0x18f   :  { %v2076_v55 = vpack.c.bf16 %v1716_v62, %v1716_v62  ;;  %v1717_v52 = vmax.f32 %v1701_v37, 0.0  ;;  %v2347_v33 = vpop.f32.mrb[77].mxu0  ;;  %v1628_v2 = vpop.f32.mrb[89].mxu1 }
 0x190   :  { %v2074_v34 = vpack.c.bf16 %v1714_v17, %v1714_v17  ;;  %v1715_v16 = vmax.f32 %v1699_v23, 0.0  ;;  %v2348_v11 = vadd.f32 %v2347_v33, %v2346_v32  ;;  %v1629_v42 = vadd.f32 %v2342_v28, %v1628_v2  ;;  %v2349_v46 = vpop.f32.mrb[78].mxu0  ;;  %v2457_v50 = vpop.f32.mrb[90].mxu1 }
 0x191   :  { %1797 = vst.msk [vmem:[%s3500_s3 + $0x8] sm:$0xf] %vm1794_vm1, %v2076_v55  ;;  %v2077_v9 = vpack.c.bf16 %v1717_v52, %v1717_v52  ;;  %v2350_v21 = vpop.f32.mrb[79].mxu0  ;;  %v1631_v5 = vpop.f32.mrb[91].mxu1 }
 0x192   :  { %1795 = vst.msk [vmem:[%s3500_s3] sm:$0xf] %vm1794_vm1, %v2074_v34  ;;  %v2075_v0 = vpack.c.bf16 %v1715_v16, %v1715_v16  ;;  %v1637_v38 = vadd.f32 %v2456_v22, %v2348_v11  ;;  %v1679_v57 = vmax.f32 %v3338_v26, %v1629_v42  ;;  %v2351_v43 = vadd.f32 %v2350_v21, %v2349_v46 }
 0x193   :  { %1798 = vst.msk [vmem:[%s3500_s3 + $0xc] sm:$0xf] %vm1794_vm1, %v2077_v9  ;;  %v1632_v19 = vadd.f32 %v2345_v6, %v1631_v5 }
 0x194   :  { %1796 = vst.msk [vmem:[%s3500_s3 + $0x4] sm:$0xf] %vm1794_vm1, %v2075_v0  ;;  %v1681_v36 = vmax.f32 %v3333_v13, %v1637_v38  ;;  %v1702_v12 = vadd.f32 %v3397_v20, %v1679_v57  ;;  %v1640_v63 = vadd.f32 %v2457_v50, %v2351_v43 }
 0x195   :  { %v1680_v41 = vmax.f32 %v3348_v48, %v1632_v19 }
 0x196   :  { %v1704_v26 = vadd.f32 %v3397_v20, %v1681_v36  ;;  %v1718_v47 = vmax.f32 %v1702_v12, 0.0  ;;  %v1682_v40 = vmax.f32 %v3343_v7, %v1640_v63  ;;  %v2352_v60 = vpop.f32.mrb[80].mxu0  ;;  %v2460_v1 = vpop.f32.mrb[92].mxu1 }
 0x197   :  { %v1703_v44 = vadd.f32 %v3397_v20, %v1680_v41  ;;  %v2353_v53 = vpop.f32.mrb[81].mxu0  ;;  %v1644_v28 = vpop.f32.mrb[93].mxu1 }
 0x198   :  { %v1720_v8 = vmax.f32 %v1704_v26, 0.0  ;;  %v2078_v27 = vpack.c.bf16 %v1718_v47, %v1718_v47  ;;  %v1705_v13 = vadd.f32 %v3397_v20, %v1682_v40  ;;  %v2354_v24 = vadd.f32 %v2353_v53, %v2352_v60  ;;  %v2355_v15 = vpop.f32.mrb[82].mxu0  ;;  %v2461_v30 = vpop.f32.mrb[94].mxu1 }
 0x199   :  { %v1719_v35 = vmax.f32 %v1703_v44, 0.0  ;;  %v2356_v48 = vpop.f32.mrb[83].mxu0  ;;  %v1647_v29 = vpop.f32.mrb[95].mxu1 }
 0x19a   :  { %v2080_v59 = vpack.c.bf16 %v1720_v8, %v1720_v8  ;;  %1799 = vst.msk [vmem:[%s3500_s3 + $0x10] sm:$0xf] %vm1794_vm1, %v2078_v27  ;;  %v1721_v7 = vmax.f32 %v1705_v13, 0.0  ;;  %v2357_v6 = vadd.f32 %v2356_v48, %v2355_v15  ;;  %v1645_v31 = vadd.f32 %v2354_v24, %v1644_v28 }
 0x19b   :  { %v2079_v10 = vpack.c.bf16 %v1719_v35, %v1719_v35 }
 0x19c   :  { %1801 = vst.msk [vmem:[%s3500_s3 + $0x18] sm:$0xf] %vm1794_vm1, %v2080_v59  ;;  %v2081_v25 = vpack.c.bf16 %v1721_v7, %v1721_v7  ;;  %v1683_v39 = vmax.f32 %v3353_v51, %v1645_v31  ;;  %v1648_v3 = vadd.f32 %v2357_v6, %v1647_v29 }
 0x19d   :  { %1800 = vst.msk [vmem:[%s3500_s3 + $0x14] sm:$0xf] %vm1794_vm1, %v2079_v10 }
 0x19e   :  { %1802 = vst.msk [vmem:[%s3500_s3 + $0x1c] sm:$0xf] %vm1794_vm1, %v2081_v25  ;;  %v1706_v62 = vadd.f32 %v3397_v20, %v1683_v39  ;;  %v1684_v37 = vmax.f32 %v3363_v18, %v1648_v3  ;;  %v2358_v17 = vpop.f32.mrb[84].mxu0  ;;  %v2464_v23 = vpop.f32.mrb[96].mxu1 }
 0x19f   :  { %v1669_v32 = vadd.f32 %v2464_v23, %v3390_v4  ;;  %v2359_v51 = vpop.f32.mrb[85].mxu0  ;;  %v1660_v22 = vpop.f32.mrb[97].mxu1 }
 0x1a0   :  { %v1722_v55 = vmax.f32 %v1706_v62, 0.0  ;;  %v1707_v52 = vadd.f32 %v3397_v20, %v1684_v37  ;;  %v2360_v33 = vadd.f32 %v2359_v51, %v2358_v17  ;;  %v2361_v2 = vpop.f32.mrb[86].mxu0  ;;  %v2465_v34 = vpop.f32.mrb[98].mxu1 }
 0x1a1   :  { %v1689_v16 = vmax.f32 %v3383_v45, %v1669_v32  ;;  %v1672_v11 = vadd.f32 %v2465_v34, %v3392_v14  ;;  %v2362_v42 = vpop.f32.mrb[87].mxu0  ;;  %v1663_v46 = vpop.f32.mrb[99].mxu1 }
 0x1a2   :  { %v2082_v50 = vpack.c.bf16 %v1722_v55, %v1722_v55  ;;  %v1723_v18 = vmax.f32 %v1707_v52, 0.0  ;;  %v1653_v9 = vadd.f32 %v2460_v1, %v2360_v33  ;;  %v2363_v21 = vadd.f32 %v2362_v42, %v2361_v2 }
 0x1a3   :  { %v1712_v4 = vadd.f32 %v3397_v20, %v1689_v16  ;;  %v1690_v5 = vmax.f32 %v3388_v58, %v1672_v11 }
 0x1a4   :  { %1803 = vst.msk [vmem:[%s3500_s3 + $0x20] sm:$0xf] %vm1794_vm1, %v2082_v50  ;;  %v2083_v0 = vpack.c.bf16 %v1723_v18, %v1723_v18  ;;  %v1685_v45 = vmax.f32 %v3358_v49, %v1653_v9  ;;  %v1656_v38 = vadd.f32 %v2461_v30, %v2363_v21 }
 0x1a5   :  { %v1728_v14 = vmax.f32 %v1712_v4, 0.0  ;;  %v1713_v57 = vadd.f32 %v3397_v20, %v1690_v5 }
 0x1a6   :  { %1804 = vst.msk [vmem:[%s3500_s3 + $0x24] sm:$0xf] %vm1794_vm1, %v2083_v0  ;;  %v1708_v43 = vadd.f32 %v3397_v20, %v1685_v45  ;;  %v1686_v58 = vmax.f32 %v3368_v54, %v1656_v38  ;;  %v2364_v19 = vpop.f32.mrb[88].mxu0 }
 0x1a7   :  { %v2088_v36 = vpack.c.bf16 %v1728_v14, %v1728_v14  ;;  %v1729_v12 = vmax.f32 %v1713_v57, 0.0  ;;  %v2365_v63 = vpop.f32.mrb[89].mxu0 }
 0x1a8   :  { %v1724_v41 = vmax.f32 %v1708_v43, 0.0  ;;  %v1709_v49 = vadd.f32 %v3397_v20, %v1686_v58  ;;  %v2366_v26 = vadd.f32 %v2365_v63, %v2364_v19  ;;  %v2367_v47 = vpop.f32.mrb[90].mxu0 }
 0x1a9   :  { %1809 = vst.msk [vmem:[%s3500_s3 + $0x38] sm:$0xf] %vm1794_vm1, %v2088_v36  ;;  %v2089_v40 = vpack.c.bf16 %v1729_v12, %v1729_v12  ;;  %v2368_v60 = vpop.f32.mrb[91].mxu0 }
 0x1aa   :  { %v2084_v1 = vpack.c.bf16 %v1724_v41, %v1724_v41  ;;  %v1725_v44 = vmax.f32 %v1709_v49, 0.0  ;;  %v1661_v53 = vadd.f32 %v2366_v26, %v1660_v22  ;;  %v2369_v54 = vadd.f32 %v2368_v60, %v2367_v47 }
 0x1ab   :  { %1810 = vst.msk [vmem:[%s3500_s3 + $0x3c] sm:$0xf] %vm1794_vm1, %v2089_v40 }
 0x1ac   :  { %1805 = vst.msk [vmem:[%s3500_s3 + $0x28] sm:$0xf] %vm1794_vm1, %v2084_v1  ;;  %v2085_v28 = vpack.c.bf16 %v1725_v44, %v1725_v44  ;;  %v1687_v8 = vmax.f32 %v3373_v56, %v1661_v53  ;;  %v1664_v27 = vadd.f32 %v2369_v54, %v1663_v46 }
 0x1ae   :  { %1806 = vst.msk [vmem:[%s3500_s3 + $0x2c] sm:$0xf] %vm1794_vm1, %v2085_v28  ;;  %v1710_v13 = vadd.f32 %v3397_v20, %v1687_v8  ;;  %v1688_v24 = vmax.f32 %v3378_v61, %v1664_v27 }
 0x1b0   :  { %v1726_v15 = vmax.f32 %v1710_v13, 0.0  ;;  %v1711_v30 = vadd.f32 %v3397_v20, %v1688_v24 }
 0x1b2   :  { %v2086_v35 = vpack.c.bf16 %v1726_v15, %v1726_v15  ;;  %v1727_v48 = vmax.f32 %v1711_v30, 0.0 }
 0x1b4   :  { %1807 = vst.msk [vmem:[%s3500_s3 + $0x30] sm:$0xf] %vm1794_vm1, %v2086_v35  ;;  %v2087_v56 = vpack.c.bf16 %v1727_v48, %v1727_v48 }
 0x1b6   :  { %1808 = vst.msk [vmem:[%s3500_s3 + $0x34] sm:$0xf] %vm1794_vm1, %v2087_v56 }

// kernel: net_forward.9
= control target key start
LH: loop header
LB: loop body
LE: loop exit
PB: predicated region body
PF: predicated region fallthrough
CT: control target
= control target key end

     0   :  { %vm365_vm0 = vcmask 523264   ;;  %s2255_s1 = inlined_call_operand.vmem [shape: bf16[576,128], index: 1, kind: input, shape index: {}]   ;;  %s2256_s0 = inlined_call_operand.vmem [shape: bf16[4,32,576], index: 0, kind: input, shape index: {}]   ;;  %s2257_s2 = inlined_call_operand.vmem [shape: f32[1,128], index: 2, kind: input, shape index: {}]   ;;  %s2258_s3 = inlined_call_operand.vmem [shape: bf16[32,128], index: 3, kind: output, shape index: {}]  }
   0x1   :  { %v1769_v0 = vld [vmem:[%s2255_s1 + $0x40] sm:$0xff]   ;;  %v1792_v4 = vld [vmem:[%s2255_s1 + $0x48] sm:$0xff]   ;;  %v1816_v8 = vld [vmem:[%s2255_s1 + $0x50] sm:$0xff]  }
   0x2   :  { %v1774_v1 = vld [vmem:[%s2255_s1 + $0xc0] sm:$0xff]   ;;  %1358 = vmatprep.subr.bf16.mxu0 %v1769_v0  ;;  %v1798_v5 = vld [vmem:[%s2255_s1 + $0xc8] sm:$0xff]   ;;  %v1822_v9 = vld [vmem:[%s2255_s1 + $0xd0] sm:$0xff]  }
   0x3   :  { %v1780_v2 = vld [vmem:[%s2255_s1] sm:$0xff]   ;;  %1386 = vmatprep.subr.bf16.mxu1 %v1774_v1  ;;  %v1804_v6 = vld [vmem:[%s2255_s1 + $0x8] sm:$0xff]   ;;  %v1828_v10 = vld [vmem:[%s2255_s1 + $0x10] sm:$0xff]  }
   0x4   :  { %v1786_v3 = vld [vmem:[%s2255_s1 + $0x80] sm:$0xff]   ;;  %1359 = vmatpush3.bf16.msra.mxu0 %v1780_v2  ;;  %v1810_v7 = vld [vmem:[%s2255_s1 + $0x88] sm:$0xff]   ;;  %v1834_v11 = vld [vmem:[%s2255_s1 + $0x90] sm:$0xff]  }
   0x5   :  { %1387 = vmatpush3.bf16.msra.mxu1 %v1786_v3  ;;  %1360 = vmatprep.subr.bf16.mxu0 %v1792_v4  ;;  %v1840_v12 = vld [vmem:[%s2255_s1 + $0x58] sm:$0xff]   ;;  %v1864_v16 = vld [vmem:[%s2255_s1 + $0x60] sm:$0xff]   ;;  %v1888_v20 = vld [vmem:[%s2255_s1 + $0x68] sm:$0xff]  }
   0x6   :  { %1388 = vmatprep.subr.bf16.mxu1 %v1798_v5  ;;  %v1846_v13 = vld [vmem:[%s2255_s1 + $0xd8] sm:$0xff]   ;;  %v1870_v17 = vld [vmem:[%s2255_s1 + $0xe0] sm:$0xff]   ;;  %v1894_v21 = vld [vmem:[%s2255_s1 + $0xe8] sm:$0xff]  }
   0x7   :  { %v1852_v14 = vld [vmem:[%s2255_s1 + $0x18] sm:$0xff]   ;;  %v1876_v18 = vld [vmem:[%s2255_s1 + $0x20] sm:$0xff]   ;;  %v1900_v22 = vld [vmem:[%s2255_s1 + $0x28] sm:$0xff]  }
   0x8   :  { %1361 = vmatpush3.bf16.msra.mxu0 %v1804_v6  ;;  %v1858_v15 = vld [vmem:[%s2255_s1 + $0x98] sm:$0xff]   ;;  %v1882_v19 = vld [vmem:[%s2255_s1 + $0xa0] sm:$0xff]   ;;  %v1906_v23 = vld [vmem:[%s2255_s1 + $0xa8] sm:$0xff]  }
   0x9   :  { %1389 = vmatpush3.bf16.msra.mxu1 %v1810_v7  ;;  %1362 = vmatprep.subr.bf16.mxu0 %v1816_v8  ;;  %v1912_v24 = vld [vmem:[%s2255_s1 + $0x70] sm:$0xff]   ;;  %v1936_v28 = vld [vmem:[%s2255_s1 + $0x78] sm:$0xff]   ;;  %v1691_v35 = vld [vmem:[%s2256_s0 + $0xc] ss:$20 sps:$4 sm:$0xff]  }
   0xa   :  { %1390 = vmatprep.subr.bf16.mxu1 %v1822_v9  ;;  %v1918_v25 = vld [vmem:[%s2255_s1 + $0xf0] sm:$0xff]   ;;  %v1942_v29 = vld [vmem:[%s2255_s1 + $0xf8] sm:$0xff]   ;;  %v1974_v36 = vld [vmem:[%s2255_s1 + $0x100] sm:$0xff]   ;;  %453 = vmatprep.mubr.bf16.mxu1 %v1691_v35 }
   0xb   :  { %v1924_v26 = vld [vmem:[%s2255_s1 + $0x30] sm:$0xff]   ;;  %v1948_v30 = vld [vmem:[%s2255_s1 + $0x38] sm:$0xff]   ;;  %v1979_v37 = vld [vmem:[%s2255_s1 + $0x108] sm:$0xff]  }
   0xc   :  { %1363 = vmatpush3.bf16.msra.mxu0 %v1828_v10  ;;  %v1930_v27 = vld [vmem:[%s2255_s1 + $0xb0] sm:$0xff]   ;;  %v1954_v31 = vld [vmem:[%s2255_s1 + $0xb8] sm:$0xff]   ;;  %v1694_v38 = vld [vmem:[%s2256_s0 + $0x2c] ss:$20 sps:$4 sm:$0xff]  }
   0xd   :  { %1391 = vmatpush3.bf16.msra.mxu1 %v1834_v11  ;;  %1364 = vmatprep.subr.bf16.mxu0 %v1840_v12  ;;  %v1686_v32 = vld [vmem:[%s2256_s0] ss:$20 sps:$4 sm:$0xff]   ;;  %v1688_v33 = vld [vmem:[%s2256_s0 + $0x4] ss:$20 sps:$4 sm:$0xff]   ;;  %v1689_v34 = vld [vmem:[%s2256_s0 + $0x8] ss:$20 sps:$4 sm:$0xff]  }
   0xe   :  { %1392 = vmatprep.subr.bf16.mxu1 %v1846_v13  ;;  %404 = vmatprep.mubr.bf16.mxu0 %v1688_v33  ;;  %v1696_v39 = vld [vmem:[%s2256_s0 + $0x34] ss:$20 sps:$4 sm:$0xff]   ;;  %v1699_v42 = vld [vmem:[%s2256_s0 + $0x30] ss:$20 sps:$4 sm:$0xff]   ;;  %v2013_v44 = vld [vmem:[%s2255_s1 + $0x118] sm:$0xff]  }
   0xf   :  { %v1698_v40 = vld [vmem:[%s2256_s0 + $0x28] ss:$20 sps:$4 sm:$0xff]   ;;  %v1998_v41 = vld [vmem:[%s2255_s1 + $0x110] sm:$0xff]   ;;  %v1703_v46 = vld [vmem:[%s2256_s0 + $0x38] ss:$20 sps:$4 sm:$0xff]  }
  0x10   :  { %1365 = vmatpush3.bf16.msra.mxu0 %v1852_v14  ;;  %v1702_v43 = vld [vmem:[%s2256_s0 + $0x10] ss:$20 sps:$4 sm:$0xff]   ;;  %v1706_v45 = vld [vmem:[%s2256_s0 + $0x54] ss:$20 sps:$4 sm:$0xff]   ;;  %v1709_v50 = vld [vmem:[%s2256_s0 + $0x78] ss:$20 sps:$4 sm:$0xff]  }
  0x11   :  { %1393 = vmatpush3.bf16.msra.mxu1 %v1858_v15  ;;  %1366 = vmatprep.subr.bf16.mxu0 %v1864_v16  ;;  %v1712_v47 = vld [vmem:[%s2256_s0 + $0x5c] ss:$20 sps:$4 sm:$0xff]   ;;  %v1713_v51 = vld [vmem:[%s2256_s0 + $0x60] ss:$20 sps:$4 sm:$0xff]   ;;  %v1710_v52 = vld [vmem:[%s2256_s0 + $0x58] ss:$20 sps:$4 sm:$0xff]  }
  0x12   :  { %1394 = vmatprep.subr.bf16.mxu1 %v1870_v17  ;;  %v1704_v48 = vld [vmem:[%s2256_s0 + $0x50] ss:$20 sps:$4 sm:$0xff]   ;;  %v1714_v53 = vld [vmem:[%s2256_s0 + $0x88] ss:$20 sps:$4 sm:$0xff]   ;;  %v1723_v55 = vld [vmem:[%s2256_s0 + $0xac] ss:$20 sps:$4 sm:$0xff]  }
  0x13   :  { %v1707_v49 = vld [vmem:[%s2256_s0 + $0x7c] ss:$20 sps:$4 sm:$0xff]   ;;  %v1715_v54 = vld [vmem:[%s2256_s0 + $0x84] ss:$20 sps:$4 sm:$0xff]   ;;  %v1717_v56 = vld [vmem:[%s2256_s0 + $0x80] ss:$20 sps:$4 sm:$0xff]  }
  0x14   :  { %1367 = vmatpush3.bf16.msra.mxu0 %v1876_v18  ;;  %v1720_v57 = vld [vmem:[%s2256_s0 + $0xa4] ss:$20 sps:$4 sm:$0xff]   ;;  %v1718_v58 = vld [vmem:[%s2256_s0 + $0xa0] ss:$20 sps:$4 sm:$0xff]   ;;  %v1721_v59 = vld [vmem:[%s2256_s0 + $0xa8] ss:$20 sps:$4 sm:$0xff]  }
  0x15   :  { %1395 = vmatpush3.bf16.msra.mxu1 %v1882_v19  ;;  %1368 = vmatprep.subr.bf16.mxu0 %v1888_v20  ;;  %v1724_v60 = vld [vmem:[%s2256_s0 + $0xcc] ss:$20 sps:$4 sm:$0xff]   ;;  %v1726_v61 = vld [vmem:[%s2256_s0 + $0xd4] ss:$20 sps:$4 sm:$0xff]   ;;  %v1729_v63 = vld [vmem:[%s2256_s0 + $0xd0] ss:$20 sps:$4 sm:$0xff]  }
  0x16   :  { %1396 = vmatprep.subr.bf16.mxu1 %v1894_v21  ;;  %v1728_v62 = vld [vmem:[%s2256_s0 + $0xc8] ss:$20 sps:$4 sm:$0xff]  }
  0x18   :  { %1369 = vmatpush3.bf16.msra.mxu0 %v1900_v22 }
  0x19   :  { %1397 = vmatpush3.bf16.msra.mxu1 %v1906_v23  ;;  %1370 = vmatprep.subr.bf16.mxu0 %v1912_v24 }
  0x1a   :  { %1398 = vmatprep.subr.bf16.mxu1 %v1918_v25 }
  0x1c   :  { %1371 = vmatpush3.bf16.msra.mxu0 %v1924_v26 }
  0x1d   :  { %1399 = vmatpush3.bf16.msra.mxu1 %v1930_v27  ;;  %1372 = vmatprep.subr.bf16.mxu0 %v1936_v28 }
  0x1e   :  { %1400 = vmatprep.subr.bf16.mxu1 %v1942_v29 }
  0x20   :  { %1373 = vmatpush3.bf16.msra.mxu0 %v1948_v30 }
  0x21   :  { %1401 = vmatpush3.bf16.msra.mxu1 %v1954_v31  ;;  %1606 = vmatprep.subr.bf16.mxu0 %v1974_v36 }
  0x22   :  { %1420 = vmatprep.subr.bf16.mxu1 %v1769_v0 }
  0x23   :  { %405 = vmatmul.mubr.bf16.vlgmr.msra.gmra.mrb[0].mxu0 %v1686_v32 }
  0x24   :  { %454 = vmatmul.mubr.bf16.vlgmr.msra.gmra.mrb[0].mxu1 %v1689_v34  ;;  %1607 = vmatpush3.bf16.msra.mxu0 %v1974_v36 }
  0x25   :  { %1421 = vmatpush3.bf16.msra.mxu1 %v1780_v2  ;;  %1608 = vmatprep.subr.bf16.mxu0 %v1979_v37 }
  0x26   :  { %1422 = vmatprep.subr.bf16.mxu1 %v1792_v4  ;;  %412 = vmatprep.mubr.bf16.mxu0 %v1694_v38 }
  0x27   :  { %461 = vmatprep.mubr.bf16.mxu1 %v1696_v39 }
  0x28   :  { %1609 = vmatpush3.bf16.msra.mxu0 %v1979_v37 }
  0x29   :  { %1423 = vmatpush3.bf16.msra.mxu1 %v1804_v6  ;;  %1610 = vmatprep.subr.bf16.mxu0 %v1998_v41 }
  0x2a   :  { %1424 = vmatprep.subr.bf16.mxu1 %v1816_v8 }
  0x2b   :  { %413 = vmatmul.mubr.bf16.gmra.mrb[4].mxu0 %v1698_v40 }
  0x2c   :  { %462 = vmatmul.mubr.bf16.gmra.mrb[4].mxu1 %v1699_v42  ;;  %1614 = vmatprep.mubr.msk.bf16.mxu0 %vm365_vm0, %v1702_v43 }
  0x2d   :  { %1611 = vmatpush3.bf16.msra.mxu0 %v1998_v41  ;;  %1425 = vmatpush3.bf16.msra.mxu1 %v1828_v10 }
  0x2e   :  { %1612 = vmatprep.subr.bf16.mxu0 %v2013_v44  ;;  %1426 = vmatprep.subr.bf16.mxu1 %v1840_v12 }
  0x2f   :  { %620 = vmatprep.mubr.bf16.mxu1 %v1706_v45 }
  0x31   :  { %1613 = vmatpush3.bf16.msra.mxu0 %v2013_v44  ;;  %1427 = vmatpush3.bf16.msra.mxu1 %v1852_v14 }
  0x32   :  { %1428 = vmatprep.subr.bf16.mxu1 %v1864_v16  ;;  %1448 = vmatprep.subr.bf16.mxu0 %v1774_v1 }
  0x34   :  { %1615 = vmatmul.mubr.msk.bf16.vlgmr.msra.gmra.mrb[8].mxu0 %vm365_vm0, %v1703_v46 }
  0x35   :  { %1429 = vmatpush3.bf16.msra.mxu1 %v1876_v18  ;;  %1449 = vmatpush3.bf16.msra.mxu0 %v1786_v3 }
  0x36   :  { %1430 = vmatprep.subr.bf16.mxu1 %v1888_v20  ;;  %1450 = vmatprep.subr.bf16.mxu0 %v1798_v5 }
  0x37   :  { %669 = vmatprep.mubr.bf16.mxu0 %v1712_v47 }
  0x39   :  { %1431 = vmatpush3.bf16.msra.mxu1 %v1900_v22  ;;  %1451 = vmatpush3.bf16.msra.mxu0 %v1810_v7 }
  0x3a   :  { %1432 = vmatprep.subr.bf16.mxu1 %v1912_v24  ;;  %1452 = vmatprep.subr.bf16.mxu0 %v1822_v9 }
  0x3d   :  { %1433 = vmatpush3.bf16.msra.mxu1 %v1924_v26  ;;  %1453 = vmatpush3.bf16.msra.mxu0 %v1834_v11 }
  0x3e   :  { %1434 = vmatprep.subr.bf16.mxu1 %v1936_v28  ;;  %1454 = vmatprep.subr.bf16.mxu0 %v1846_v13 }
  0x41   :  { %1435 = vmatpush3.bf16.msra.mxu1 %v1948_v30  ;;  %1455 = vmatpush3.bf16.msra.mxu0 %v1858_v15 }
  0x42   :  { %1456 = vmatprep.subr.bf16.mxu0 %v1870_v17  ;;  %1618 = vmatprep.subr.bf16.mxu1 %v1974_v36 }
  0x44   :  { %621 = vmatmul.mubr.bf16.vlgmr.msra.gmra.mrb[8].mxu1 %v1704_v48 }
  0x45   :  { %1457 = vmatpush3.bf16.msra.mxu0 %v1882_v19  ;;  %1619 = vmatpush3.bf16.msra.mxu1 %v1974_v36 }
  0x46   :  { %1458 = vmatprep.subr.bf16.mxu0 %v1894_v21  ;;  %1620 = vmatprep.subr.bf16.mxu1 %v1979_v37 }
  0x47   :  { %628 = vmatprep.mubr.bf16.mxu1 %v1707_v49 }
  0x49   :  { %1459 = vmatpush3.bf16.msra.mxu0 %v1906_v23  ;;  %1621 = vmatpush3.bf16.msra.mxu1 %v1979_v37 }
  0x4a   :  { %1460 = vmatprep.subr.bf16.mxu0 %v1918_v25  ;;  %1622 = vmatprep.subr.bf16.mxu1 %v1998_v41 }
  0x4c   :  { %629 = vmatmul.mubr.bf16.gmra.mrb[12].mxu1 %v1709_v50 }
  0x4d   :  { %1461 = vmatpush3.bf16.msra.mxu0 %v1930_v27  ;;  %1623 = vmatpush3.bf16.msra.mxu1 %v1998_v41 }
  0x4e   :  { %1462 = vmatprep.subr.bf16.mxu0 %v1942_v29  ;;  %1624 = vmatprep.subr.bf16.mxu1 %v2013_v44 }
  0x4f   :  { %1626 = vmatprep.mubr.msk.bf16.mxu1 %vm365_vm0, %v1713_v51 }
  0x51   :  { %1463 = vmatpush3.bf16.msra.mxu0 %v1954_v31  ;;  %1625 = vmatpush3.bf16.msra.mxu1 %v2013_v44 }
  0x52   :  { %1482 = vmatprep.subr.bf16.mxu0 %v1769_v0  ;;  %1510 = vmatprep.subr.bf16.mxu1 %v1774_v1 }
  0x54   :  { %670 = vmatmul.mubr.bf16.vlgmr.msra.gmra.mrb[12].mxu0 %v1710_v52  ;;  %1627 = vmatmul.mubr.msk.bf16.vlgmr.msra.gmra.mrb[16].mxu1 %vm365_vm0, %v1714_v53 }
  0x55   :  { %1483 = vmatpush3.bf16.msra.mxu0 %v1780_v2  ;;  %1511 = vmatpush3.bf16.msra.mxu1 %v1786_v3 }
  0x56   :  { %1484 = vmatprep.subr.bf16.mxu0 %v1792_v4  ;;  %1512 = vmatprep.subr.bf16.mxu1 %v1798_v5 }
  0x57   :  { %677 = vmatprep.mubr.bf16.mxu0 %v1715_v54  ;;  %889 = vmatprep.mubr.bf16.mxu1 %v1723_v55 }
  0x59   :  { %1485 = vmatpush3.bf16.msra.mxu0 %v1804_v6  ;;  %1513 = vmatpush3.bf16.msra.mxu1 %v1810_v7 }
  0x5a   :  { %1486 = vmatprep.subr.bf16.mxu0 %v1816_v8  ;;  %1514 = vmatprep.subr.bf16.mxu1 %v1822_v9 }
  0x5c   :  { %678 = vmatmul.mubr.bf16.gmra.mrb[16].mxu0 %v1717_v56 }
  0x5d   :  { %1487 = vmatpush3.bf16.msra.mxu0 %v1828_v10  ;;  %1515 = vmatpush3.bf16.msra.mxu1 %v1834_v11 }
  0x5e   :  { %1488 = vmatprep.subr.bf16.mxu0 %v1840_v12  ;;  %1516 = vmatprep.subr.bf16.mxu1 %v1846_v13 }
  0x5f   :  { %840 = vmatprep.mubr.bf16.mxu0 %v1720_v57 }
  0x61   :  { %1489 = vmatpush3.bf16.msra.mxu0 %v1852_v14  ;;  %1517 = vmatpush3.bf16.msra.mxu1 %v1858_v15 }
  0x62   :  { %1490 = vmatprep.subr.bf16.mxu0 %v1864_v16  ;;  %1518 = vmatprep.subr.bf16.mxu1 %v1870_v17 }
  0x65   :  { %1491 = vmatpush3.bf16.msra.mxu0 %v1876_v18  ;;  %1519 = vmatpush3.bf16.msra.mxu1 %v1882_v19 }
  0x66   :  { %1492 = vmatprep.subr.bf16.mxu0 %v1888_v20  ;;  %1520 = vmatprep.subr.bf16.mxu1 %v1894_v21 }
  0x69   :  { %1493 = vmatpush3.bf16.msra.mxu0 %v1900_v22  ;;  %1521 = vmatpush3.bf16.msra.mxu1 %v1906_v23 }
  0x6a   :  { %1494 = vmatprep.subr.bf16.mxu0 %v1912_v24  ;;  %1522 = vmatprep.subr.bf16.mxu1 %v1918_v25 }
  0x6d   :  { %1495 = vmatpush3.bf16.msra.mxu0 %v1924_v26  ;;  %1523 = vmatpush3.bf16.msra.mxu1 %v1930_v27 }
  0x6e   :  { %1496 = vmatprep.subr.bf16.mxu0 %v1936_v28  ;;  %1524 = vmatprep.subr.bf16.mxu1 %v1942_v29 }
  0x71   :  { %1497 = vmatpush3.bf16.msra.mxu0 %v1948_v30  ;;  %1525 = vmatpush3.bf16.msra.mxu1 %v1954_v31 }
  0x72   :  { %1630 = vmatprep.subr.bf16.mxu0 %v1974_v36  ;;  %1544 = vmatprep.subr.bf16.mxu1 %v1769_v0  ;;  %v1730_v0 = vld [vmem:[%s2256_s0 + $0xb0] ss:$20 sps:$4 sm:$0xff]  }
  0x74   :  { %841 = vmatmul.mubr.bf16.vlgmr.msra.gmra.mrb[20].mxu0 %v1718_v58  ;;  %890 = vmatmul.mubr.bf16.vlgmr.msra.gmra.mrb[20].mxu1 %v1721_v59 }
  0x75   :  { %1631 = vmatpush3.bf16.msra.mxu0 %v1974_v36  ;;  %1545 = vmatpush3.bf16.msra.mxu1 %v1780_v2  ;;  %v1734_v2 = vld [vmem:[%s2256_s0 + $0xf4] ss:$20 sps:$4 sm:$0xff]  }
  0x76   :  { %1632 = vmatprep.subr.bf16.mxu0 %v1979_v37  ;;  %848 = vmatprep.mubr.bf16.mxu0 %v1724_v60 }
  0x77   :  { %897 = vmatprep.mubr.bf16.mxu1 %v1726_v61  ;;  %1546 = vmatprep.subr.bf16.mxu1 %v1792_v4  ;;  %v1731_v4 = vld [vmem:[%s2256_s0 + $0xd8] ss:$20 sps:$4 sm:$0xff]  }
  0x79   :  { %1633 = vmatpush3.bf16.msra.mxu0 %v1979_v37  ;;  %1547 = vmatpush3.bf16.msra.mxu1 %v1804_v6  ;;  %v1740_v6 = vld [vmem:[%s2256_s0 + $0xfc] ss:$20 sps:$4 sm:$0xff]  }
  0x7a   :  { %1634 = vmatprep.subr.bf16.mxu0 %v1998_v41  ;;  %1548 = vmatprep.subr.bf16.mxu1 %v1816_v8  ;;  %v1738_v8 = vld [vmem:[%s2256_s0 + $0xf8] ss:$20 sps:$4 sm:$0xff]  }
  0x7c   :  { %849 = vmatmul.mubr.bf16.gmra.mrb[24].mxu0 %v1728_v62  ;;  %898 = vmatmul.mubr.bf16.gmra.mrb[24].mxu1 %v1729_v63 }
  0x7d   :  { %1635 = vmatpush3.bf16.msra.mxu0 %v1998_v41  ;;  %1549 = vmatpush3.bf16.msra.mxu1 %v1828_v10  ;;  %v1743_v10 = vld [vmem:[%s2256_s0 + $0x124] ss:$20 sps:$4 sm:$0xff]  }
  0x7e   :  { %1636 = vmatprep.subr.bf16.mxu0 %v2013_v44  ;;  %1638 = vmatprep.mubr.msk.bf16.mxu0 %vm365_vm0, %v1730_v0 }
  0x7f   :  { %1550 = vmatprep.subr.bf16.mxu1 %v1840_v12  ;;  %1060 = vmatprep.mubr.bf16.mxu1 %v1734_v2 }
  0x81   :  { %1637 = vmatpush3.bf16.msra.mxu0 %v2013_v44  ;;  %1551 = vmatpush3.bf16.msra.mxu1 %v1852_v14 }
  0x82   :  { %1572 = vmatprep.subr.bf16.mxu0 %v1774_v1  ;;  %1552 = vmatprep.subr.bf16.mxu1 %v1864_v16  ;;  %v1732_v1 = vld [vmem:[%s2256_s0 + $0xf0] ss:$20 sps:$4 sm:$0xff]  }
  0x84   :  { %1639 = vmatmul.mubr.msk.bf16.vlgmr.msra.gmra.mrb[28].mxu0 %vm365_vm0, %v1731_v4 }
  0x85   :  { %1573 = vmatpush3.bf16.msra.mxu0 %v1786_v3  ;;  %1553 = vmatpush3.bf16.msra.mxu1 %v1876_v18  ;;  %v1735_v3 = vld [vmem:[%s2256_s0 + $0x11c] ss:$20 sps:$4 sm:$0xff]  }
  0x86   :  { %1574 = vmatprep.subr.bf16.mxu0 %v1798_v5  ;;  %1554 = vmatprep.subr.bf16.mxu1 %v1888_v20  ;;  %v1737_v5 = vld [vmem:[%s2256_s0 + $0x118] ss:$20 sps:$4 sm:$0xff]  }
  0x87   :  { %1109 = vmatprep.mubr.bf16.mxu0 %v1740_v6 }
  0x89   :  { %1575 = vmatpush3.bf16.msra.mxu0 %v1810_v7  ;;  %1555 = vmatpush3.bf16.msra.mxu1 %v1900_v22  ;;  %v1741_v7 = vld [vmem:[%s2256_s0 + $0x100] ss:$20 sps:$4 sm:$0xff]  }
  0x8a   :  { %1576 = vmatprep.subr.bf16.mxu0 %v1822_v9  ;;  %1556 = vmatprep.subr.bf16.mxu1 %v1912_v24  ;;  %v1742_v9 = vld [vmem:[%s2256_s0 + $0x128] ss:$20 sps:$4 sm:$0xff]  }
  0x8d   :  { %1577 = vmatpush3.bf16.msra.mxu0 %v1834_v11  ;;  %1557 = vmatpush3.bf16.msra.mxu1 %v1924_v26  ;;  %v1745_v11 = vld [vmem:[%s2256_s0 + $0x120] ss:$20 sps:$4 sm:$0xff]  }
  0x8e   :  { %1578 = vmatprep.subr.bf16.mxu0 %v1846_v13  ;;  %1558 = vmatprep.subr.bf16.mxu1 %v1936_v28 }
  0x91   :  { %1579 = vmatpush3.bf16.msra.mxu0 %v1858_v15  ;;  %1559 = vmatpush3.bf16.msra.mxu1 %v1948_v30 }
  0x92   :  { %1580 = vmatprep.subr.bf16.mxu0 %v1870_v17  ;;  %1642 = vmatprep.subr.bf16.mxu1 %v1974_v36 }
  0x94   :  { %1061 = vmatmul.mubr.bf16.vlgmr.msra.gmra.mrb[28].mxu1 %v1732_v1 }
  0x95   :  { %1581 = vmatpush3.bf16.msra.mxu0 %v1882_v19  ;;  %1643 = vmatpush3.bf16.msra.mxu1 %v1974_v36 }
  0x96   :  { %1582 = vmatprep.subr.bf16.mxu0 %v1894_v21  ;;  %1644 = vmatprep.subr.bf16.mxu1 %v1979_v37 }
  0x97   :  { %1068 = vmatprep.mubr.bf16.mxu1 %v1735_v3 }
  0x99   :  { %1583 = vmatpush3.bf16.msra.mxu0 %v1906_v23  ;;  %1645 = vmatpush3.bf16.msra.mxu1 %v1979_v37 }
  0x9a   :  { %1584 = vmatprep.subr.bf16.mxu0 %v1918_v25  ;;  %1646 = vmatprep.subr.bf16.mxu1 %v1998_v41 }
  0x9c   :  { %1069 = vmatmul.mubr.bf16.gmra.mrb[32].mxu1 %v1737_v5 }
  0x9d   :  { %1585 = vmatpush3.bf16.msra.mxu0 %v1930_v27  ;;  %1647 = vmatpush3.bf16.msra.mxu1 %v1998_v41 }
  0x9e   :  { %1586 = vmatprep.subr.bf16.mxu0 %v1942_v29  ;;  %1648 = vmatprep.subr.bf16.mxu1 %v2013_v44 }
  0x9f   :  { %1650 = vmatprep.mubr.msk.bf16.mxu1 %vm365_vm0, %v1741_v7 }
  0xa1   :  { %1587 = vmatpush3.bf16.msra.mxu0 %v1954_v31  ;;  %1649 = vmatpush3.bf16.msra.mxu1 %v2013_v44 }
  0xa4   :  { %1110 = vmatmul.mubr.bf16.vlgmr.msra.gmra.mrb[32].mxu0 %v1738_v8  ;;  %1651 = vmatmul.mubr.msk.bf16.vlgmr.msra.gmra.mrb[36].mxu1 %vm365_vm0, %v1742_v9 }
  0xa5   :  { %1117 = vmatprep.mubr.bf16.mxu0 %v1743_v10 }
  0xac   :  { %1118 = vmatmul.mubr.bf16.gmra.mrb[36].mxu0 %v1745_v11 }
  0xf6   :  { %v1374_v12 = vpop.f32.mrb[0].mxu0 }
  0xf7   :  { %v1402_v13 = vpop.f32.mrb[0].mxu1  ;;  %v1375_v14 = vpop.f32.mrb[1].mxu0 }
  0xf8   :  { %v1376_v15 = vadd.f32 %v1375_v14, %v1374_v12  ;;  %v1403_v16 = vpop.f32.mrb[1].mxu1  ;;  %v1377_v17 = vpop.f32.mrb[2].mxu0 }
  0xf9   :  { %v1404_v18 = vadd.f32 %v1403_v16, %v1402_v13  ;;  %v1405_v19 = vpop.f32.mrb[2].mxu1  ;;  %v1378_v20 = vpop.f32.mrb[3].mxu0 }
  0xfa   :  { %v1379_v21 = vadd.f32 %v1378_v20, %v1377_v17  ;;  %v1406_v22 = vpop.f32.mrb[3].mxu1 }
  0xfb   :  { %v1407_v23 = vadd.f32 %v1406_v22, %v1405_v19  ;;  %v456_v24 = vadd.f32 %v1404_v18, %v1376_v15 }
  0xfd   :  { %v459_v25 = vadd.f32 %v1407_v23, %v1379_v21 }
  0xfe   :  { %v1380_v26 = vpop.f32.mrb[4].mxu0 }
  0xff   :  { %v1408_v27 = vpop.f32.mrb[4].mxu1  ;;  %v1381_v28 = vpop.f32.mrb[5].mxu0 }
 0x100   :  { %v1382_v29 = vadd.f32 %v1381_v28, %v1380_v26  ;;  %v1409_v30 = vpop.f32.mrb[5].mxu1  ;;  %v1383_v31 = vpop.f32.mrb[6].mxu0 }
 0x101   :  { %v1410_v32 = vadd.f32 %v1409_v30, %v1408_v27  ;;  %v1411_v33 = vpop.f32.mrb[6].mxu1  ;;  %v1384_v34 = vpop.f32.mrb[7].mxu0 }
 0x102   :  { %v1385_v35 = vadd.f32 %v1384_v34, %v1383_v31  ;;  %v1412_v36 = vpop.f32.mrb[7].mxu1 }
 0x103   :  { %v1413_v37 = vadd.f32 %v1412_v36, %v1411_v33  ;;  %v464_v38 = vadd.f32 %v1410_v32, %v1382_v29 }
 0x105   :  { %v467_v39 = vadd.f32 %v1413_v37, %v1385_v35 }
 0x107   :  { %v1616_v40 = vpop.f32.mrb[8].mxu0 }
 0x108   :  { %v2234_v41 = vadd.f32 %v1616_v40, %v464_v38  ;;  %v504_v42 = vpop.f32.mrb[9].mxu0 }
 0x109   :  { %v2236_v43 = vadd.f32 %v504_v42, %v456_v24  ;;  %v1617_v44 = vpop.f32.mrb[10].mxu0 }
 0x10a   :  { %v2238_v45 = vadd.f32 %v1617_v44, %v467_v39  ;;  %v507_v46 = vpop.f32.mrb[11].mxu0 }
 0x10b   :  { %v2240_v47 = vadd.f32 %v507_v46, %v459_v25 }
 0x117   :  { %v1436_v48 = vpop.f32.mrb[8].mxu1 }
 0x118   :  { %v1437_v49 = vpop.f32.mrb[9].mxu1 }
 0x119   :  { %v1438_v50 = vadd.f32 %v1437_v49, %v1436_v48  ;;  %v1439_v51 = vpop.f32.mrb[10].mxu1 }
 0x11a   :  { %v1440_v52 = vpop.f32.mrb[11].mxu1 }
 0x11b   :  { %v1441_v53 = vadd.f32 %v1440_v52, %v1439_v51 }
 0x11f   :  { %v1442_v54 = vpop.f32.mrb[12].mxu1 }
 0x120   :  { %v1443_v55 = vpop.f32.mrb[13].mxu1 }
 0x121   :  { %v1444_v56 = vadd.f32 %v1443_v55, %v1442_v54  ;;  %v1445_v57 = vpop.f32.mrb[14].mxu1 }
 0x122   :  { %v1446_v58 = vpop.f32.mrb[15].mxu1 }
 0x123   :  { %v1447_v59 = vadd.f32 %v1446_v58, %v1445_v57 }
 0x127   :  { %v1464_v60 = vpop.f32.mrb[12].mxu0  ;;  %v1628_v61 = vpop.f32.mrb[16].mxu1 }
 0x128   :  { %v1465_v62 = vpop.f32.mrb[13].mxu0  ;;  %v720_v63 = vpop.f32.mrb[17].mxu1 }
 0x129   :  { %v1466_v0 = vadd.f32 %v1465_v62, %v1464_v60  ;;  %v1467_v2 = vpop.f32.mrb[14].mxu0  ;;  %v1629_v4 = vpop.f32.mrb[18].mxu1 }
 0x12a   :  { %v1468_v6 = vpop.f32.mrb[15].mxu0  ;;  %v723_v1 = vpop.f32.mrb[19].mxu1 }
 0x12b   :  { %v1469_v3 = vadd.f32 %v1468_v6, %v1467_v2  ;;  %v672_v5 = vadd.f32 %v1466_v0, %v1438_v50 }
 0x12d   :  { %v721_v7 = vadd.f32 %v720_v63, %v672_v5  ;;  %v675_v8 = vadd.f32 %v1469_v3, %v1441_v53 }
 0x12f   :  { %v735_v9 = vmax.f32 %v2236_v43, %v721_v7  ;;  %v724_v10 = vadd.f32 %v723_v1, %v675_v8  ;;  %v1470_v11 = vpop.f32.mrb[16].mxu0 }
 0x130   :  { %v1471_v12 = vpop.f32.mrb[17].mxu0 }
 0x131   :  { %v736_v13 = vmax.f32 %v2240_v47, %v724_v10  ;;  %v1472_v14 = vadd.f32 %v1471_v12, %v1470_v11  ;;  %v1473_v15 = vpop.f32.mrb[18].mxu0 }
 0x132   :  { %v1474_v16 = vpop.f32.mrb[19].mxu0 }
 0x133   :  { %v680_v17 = vadd.f32 %v1472_v14, %v1444_v56  ;;  %v1475_v18 = vadd.f32 %v1474_v16, %v1473_v15 }
 0x135   :  { %v729_v19 = vadd.f32 %v1628_v61, %v680_v17  ;;  %v683_v20 = vadd.f32 %v1475_v18, %v1447_v59 }
 0x137   :  { %v732_v21 = vadd.f32 %v1629_v4, %v683_v20  ;;  %v737_v22 = vmax.f32 %v2234_v41, %v729_v19 }
 0x139   :  { %v738_v23 = vmax.f32 %v2238_v45, %v732_v21 }
 0x147   :  { %v1498_v24 = vpop.f32.mrb[20].mxu0  ;;  %v1526_v25 = vpop.f32.mrb[20].mxu1 }
 0x148   :  { %v1499_v26 = vpop.f32.mrb[21].mxu0  ;;  %v1527_v27 = vpop.f32.mrb[21].mxu1 }
 0x149   :  { %v1500_v28 = vadd.f32 %v1499_v26, %v1498_v24  ;;  %v1528_v29 = vadd.f32 %v1527_v27, %v1526_v25  ;;  %v1501_v30 = vpop.f32.mrb[22].mxu0  ;;  %v1529_v31 = vpop.f32.mrb[22].mxu1  ;;  %v1338_v25 = vld [vmem:[%s2257_s2] ss:$0 sm:$0xff] }
 0x14a   :  { %v1502_v32 = vpop.f32.mrb[23].mxu0  ;;  %v1530_v33 = vpop.f32.mrb[23].mxu1 }
 0x14b   :  { %v1503_v34 = vadd.f32 %v1502_v32, %v1501_v30  ;;  %v1531_v35 = vadd.f32 %v1530_v33, %v1529_v31  ;;  %v892_v36 = vadd.f32 %v1528_v29, %v1500_v28 }
 0x14d   :  { %v895_v37 = vadd.f32 %v1531_v35, %v1503_v34 }
 0x14f   :  { %v1504_v38 = vpop.f32.mrb[24].mxu0  ;;  %v1532_v39 = vpop.f32.mrb[24].mxu1 }
 0x150   :  { %v1505_v40 = vpop.f32.mrb[25].mxu0  ;;  %v1533_v41 = vpop.f32.mrb[25].mxu1 }
 0x151   :  { %v1506_v42 = vadd.f32 %v1505_v40, %v1504_v38  ;;  %v1534_v43 = vadd.f32 %v1533_v41, %v1532_v39  ;;  %v1507_v44 = vpop.f32.mrb[26].mxu0  ;;  %v1535_v45 = vpop.f32.mrb[26].mxu1 }
 0x152   :  { %v1508_v46 = vpop.f32.mrb[27].mxu0  ;;  %v1536_v47 = vpop.f32.mrb[27].mxu1 }
 0x153   :  { %v1509_v48 = vadd.f32 %v1508_v46, %v1507_v44  ;;  %v1537_v49 = vadd.f32 %v1536_v47, %v1535_v45  ;;  %v900_v50 = vadd.f32 %v1534_v43, %v1506_v42 }
 0x155   :  { %v903_v51 = vadd.f32 %v1537_v49, %v1509_v48 }
 0x157   :  { %v1640_v52 = vpop.f32.mrb[28].mxu0 }
 0x158   :  { %v949_v53 = vadd.f32 %v1640_v52, %v900_v50  ;;  %v940_v54 = vpop.f32.mrb[29].mxu0 }
 0x159   :  { %v941_v55 = vadd.f32 %v940_v54, %v892_v36  ;;  %v1641_v56 = vpop.f32.mrb[30].mxu0 }
 0x15a   :  { %v957_v57 = vmax.f32 %v737_v22, %v949_v53  ;;  %v952_v58 = vadd.f32 %v1641_v56, %v903_v51  ;;  %v943_v59 = vpop.f32.mrb[31].mxu0 }
 0x15b   :  { %v955_v60 = vmax.f32 %v735_v9, %v941_v55  ;;  %v944_v61 = vadd.f32 %v943_v59, %v895_v37 }
 0x15c   :  { %v958_v62 = vmax.f32 %v738_v23, %v952_v58 }
 0x15d   :  { %v956_v63 = vmax.f32 %v736_v13, %v944_v61 }
 0x167   :  { %v1560_v0 = vpop.f32.mrb[28].mxu1 }
 0x168   :  { %v1561_v2 = vpop.f32.mrb[29].mxu1 }
 0x169   :  { %v1562_v4 = vadd.f32 %v1561_v2, %v1560_v0  ;;  %v1563_v6 = vpop.f32.mrb[30].mxu1 }
 0x16a   :  { %v1564_v1 = vpop.f32.mrb[31].mxu1 }
 0x16b   :  { %v1565_v3 = vadd.f32 %v1564_v1, %v1563_v6 }
 0x16f   :  { %v1566_v5 = vpop.f32.mrb[32].mxu1 }
 0x170   :  { %v1567_v7 = vpop.f32.mrb[33].mxu1 }
 0x171   :  { %v1568_v8 = vadd.f32 %v1567_v7, %v1566_v5  ;;  %v1569_v10 = vpop.f32.mrb[34].mxu1 }
 0x172   :  { %v1570_v11 = vpop.f32.mrb[35].mxu1 }
 0x173   :  { %v1571_v12 = vadd.f32 %v1570_v11, %v1569_v10 }
 0x177   :  { %v1588_v14 = vpop.f32.mrb[32].mxu0  ;;  %v1652_v15 = vpop.f32.mrb[36].mxu1 }
 0x178   :  { %v1589_v16 = vpop.f32.mrb[33].mxu0  ;;  %v1160_v17 = vpop.f32.mrb[37].mxu1 }
 0x179   :  { %v1590_v9 = vadd.f32 %v1589_v16, %v1588_v14  ;;  %v1591_v18 = vpop.f32.mrb[34].mxu0  ;;  %v1653_v19 = vpop.f32.mrb[38].mxu1 }
 0x17a   :  { %v1592_v13 = vpop.f32.mrb[35].mxu0  ;;  %v1163_v20 = vpop.f32.mrb[39].mxu1 }
 0x17b   :  { %v1593_v21 = vadd.f32 %v1592_v13, %v1591_v18  ;;  %v1112_v22 = vadd.f32 %v1590_v9, %v1562_v4 }
 0x17d   :  { %v1161_v23 = vadd.f32 %v1160_v17, %v1112_v22  ;;  %v1115_v24 = vadd.f32 %v1593_v21, %v1565_v3 }
 0x17f   :  { %v1175_v26 = vmax.f32 %v955_v60, %v1161_v23  ;;  %v1164_v27 = vadd.f32 %v1163_v20, %v1115_v24  ;;  %v1594_v28 = vpop.f32.mrb[36].mxu0 }
 0x180   :  { %v1595_v29 = vpop.f32.mrb[37].mxu0 }
 0x181   :  { %v1186_v30 = vadd.f32 %v1338_v25, %v1175_v26  ;;  %v1176_v31 = vmax.f32 %v956_v63, %v1164_v27  ;;  %v1596_v32 = vadd.f32 %v1595_v29, %v1594_v28  ;;  %v1597_v33 = vpop.f32.mrb[38].mxu0 }
 0x182   :  { %v1598_v34 = vpop.f32.mrb[39].mxu0 }
 0x183   :  { %v1187_v35 = vadd.f32 %v1338_v25, %v1176_v31  ;;  %v1120_v36 = vadd.f32 %v1596_v32, %v1568_v8  ;;  %v1599_v37 = vadd.f32 %v1598_v34, %v1597_v33  ;;  %v1190_v38 = vmax.f32 %v1186_v30, 0.0 }
 0x185   :  { %v1191_v39 = vmax.f32 %v1187_v35, 0.0  ;;  %v1169_v40 = vadd.f32 %v1652_v15, %v1120_v36  ;;  %v1123_v41 = vadd.f32 %v1599_v37, %v1571_v12 }
 0x187   :  { %v1350_v42 = vpack.c.bf16 %v1191_v39, %v1190_v38  ;;  %v1177_v43 = vmax.f32 %v957_v57, %v1169_v40  ;;  %v1172_v44 = vadd.f32 %v1653_v19, %v1123_v41 }
 0x189   :  { %1351 = vst [vmem:[%s2258_s3] sm:$0xff] %v1350_v42   ;;  %v1188_v45 = vadd.f32 %v1338_v25, %v1177_v43  ;;  %v1178_v46 = vmax.f32 %v958_v62, %v1172_v44 }
 0x18b   :  { %v1189_v47 = vadd.f32 %v1338_v25, %v1178_v46  ;;  %v1192_v48 = vmax.f32 %v1188_v45, 0.0 }
 0x18d   :  { %v1193_v49 = vmax.f32 %v1189_v47, 0.0 }
 0x18f   :  { %v1355_v50 = vpack.c.bf16 %v1193_v49, %v1192_v48 }
 0x191   :  { %1357 = vst [vmem:[%s2258_s3 + $0x8] sm:$0xff] %v1355_v50  }

// kernel: net_forward.10
= control target key start
LH: loop header
LB: loop body
LE: loop exit
PB: predicated region body
PF: predicated region fallthrough
CT: control target
= control target key end

     0   :  { %s1718_s1 = inlined_call_operand.vmem [shape: bf16[512,256], index: 1, kind: input, shape index: {}]   ;;  %s1719_s0 = inlined_call_operand.vmem [shape: bf16[4,8,512], index: 0, kind: input, shape index: {}]   ;;  %s1720_s2 = inlined_call_operand.vmem [shape: f32[1,256], index: 2, kind: input, shape index: {}]   ;;  %s1721_s3 = inlined_call_operand.vmem [shape: bf16[8,256], index: 3, kind: output, shape index: {}]  }
   0x1   :  { %v1067_v0 = vld [vmem:[%s1718_s1 + $0x4] ss:$8 sps:$4 sm:$0xff]   ;;  %v1072_v1 = vld [vmem:[%s1718_s1] ss:$8 sps:$4 sm:$0xff]   ;;  %v1079_v2 = vld [vmem:[%s1718_s1 + $0x14] ss:$8 sps:$4 sm:$0xff]  }
   0x2   :  { %414 = vmatprep.subr.bf16.mxu0 %v1067_v0  ;;  %513 = vmatprep.subr.bf16.mxu1 %v1067_v0  ;;  %v1086_v3 = vld [vmem:[%s1718_s1 + $0x10] ss:$8 sps:$4 sm:$0xff]   ;;  %v1093_v4 = vld [vmem:[%s1718_s1 + $0x24] ss:$8 sps:$4 sm:$0xff]   ;;  %v1100_v5 = vld [vmem:[%s1718_s1 + $0x20] ss:$8 sps:$4 sm:$0xff]  }
   0x3   :  { %415 = vmatpush1.bf16.msra.mxu0 %v1072_v1  ;;  %514 = vmatpush1.bf16.msra.mxu1 %v1072_v1  ;;  %v1107_v6 = vld [vmem:[%s1718_s1 + $0x34] ss:$8 sps:$4 sm:$0xff]   ;;  %v1114_v7 = vld [vmem:[%s1718_s1 + $0x30] ss:$8 sps:$4 sm:$0xff]   ;;  %v1121_v8 = vld [vmem:[%s1718_s1 + $0x44] ss:$8 sps:$4 sm:$0xff]  }
   0x4   :  { %416 = vmatprep.subr.bf16.mxu0 %v1079_v2  ;;  %515 = vmatprep.subr.bf16.mxu1 %v1079_v2  ;;  %v1128_v9 = vld [vmem:[%s1718_s1 + $0x40] ss:$8 sps:$4 sm:$0xff]   ;;  %v1135_v10 = vld [vmem:[%s1718_s1 + $0x54] ss:$8 sps:$4 sm:$0xff]   ;;  %v1142_v11 = vld [vmem:[%s1718_s1 + $0x50] ss:$8 sps:$4 sm:$0xff]  }
   0x5   :  { %v1149_v12 = vld [vmem:[%s1718_s1 + $0x64] ss:$8 sps:$4 sm:$0xff]   ;;  %v1161_v15 = vld [vmem:[%s1719_s0 + $0x10] sm:$0xff]  ;;  %v1168_v16 = vld [vmem:[%s1718_s1 + $0x60] ss:$8 sps:$4 sm:$0xff]  }
   0x6   :  { %v1154_v13 = vld [vmem:[%s1719_s0] sm:$0xff]  ;;  %v899_v17 = vcombine.high %v1161_v15, %v1161_v15  ;;  %v1177_v18 = vld [vmem:[%s1718_s1 + $0x74] ss:$8 sps:$4 sm:$0xff]   ;;  %v1184_v19 = vld [vmem:[%s1718_s1 + $0x70] ss:$8 sps:$4 sm:$0xff]   ;;  %v898_v38 = vcombine.low %v1161_v15, %v1161_v15 }
   0x7   :  { %417 = vmatpush1.bf16.msra.mxu0 %v1086_v3  ;;  %516 = vmatpush1.bf16.msra.mxu1 %v1086_v3  ;;  %v829_v14 = vcombine.high %v1154_v13, %v1154_v13  ;;  %v1191_v20 = vld [vmem:[%s1718_s1 + $0x84] ss:$8 sps:$4 sm:$0xff]   ;;  %v1198_v21 = vld [vmem:[%s1718_s1 + $0x80] ss:$8 sps:$4 sm:$0xff]   ;;  %v1205_v22 = vld [vmem:[%s1718_s1 + $0x94] ss:$8 sps:$4 sm:$0xff]   ;;  %v828_v37 = vcombine.low %v1154_v13, %v1154_v13 }
   0x8   :  { %418 = vmatprep.subr.bf16.mxu0 %v1093_v4  ;;  %517 = vmatprep.subr.bf16.mxu1 %v1093_v4  ;;  %v1212_v23 = vld [vmem:[%s1718_s1 + $0x90] ss:$8 sps:$4 sm:$0xff]   ;;  %v1219_v24 = vld [vmem:[%s1718_s1 + $0xa4] ss:$8 sps:$4 sm:$0xff]   ;;  %v1226_v25 = vld [vmem:[%s1718_s1 + $0xa0] ss:$8 sps:$4 sm:$0xff]  }
   0x9   :  { %446 = vmatprep.mubr.bf16.mxu0 %v829_v14  ;;  %545 = vmatprep.mubr.bf16.mxu1 %v899_v17  ;;  %v1233_v26 = vld [vmem:[%s1718_s1 + $0xb4] ss:$8 sps:$4 sm:$0xff]   ;;  %v1240_v27 = vld [vmem:[%s1718_s1 + $0xb0] ss:$8 sps:$4 sm:$0xff]   ;;  %v1247_v28 = vld [vmem:[%s1718_s1 + $0xc4] ss:$8 sps:$4 sm:$0xff]  }
   0xa   :  { %v1254_v29 = vld [vmem:[%s1718_s1 + $0xc0] ss:$8 sps:$4 sm:$0xff]   ;;  %v1261_v30 = vld [vmem:[%s1718_s1 + $0xd4] ss:$8 sps:$4 sm:$0xff]   ;;  %v1268_v31 = vld [vmem:[%s1718_s1 + $0xd0] ss:$8 sps:$4 sm:$0xff]  }
   0xb   :  { %419 = vmatpush1.bf16.msra.mxu0 %v1100_v5  ;;  %518 = vmatpush1.bf16.msra.mxu1 %v1100_v5  ;;  %v1275_v32 = vld [vmem:[%s1718_s1 + $0xe4] ss:$8 sps:$4 sm:$0xff]   ;;  %v1282_v33 = vld [vmem:[%s1718_s1 + $0xe0] ss:$8 sps:$4 sm:$0xff]   ;;  %v1289_v34 = vld [vmem:[%s1718_s1 + $0xf4] ss:$8 sps:$4 sm:$0xff]  }
   0xc   :  { %420 = vmatprep.subr.bf16.mxu0 %v1107_v6  ;;  %519 = vmatprep.subr.bf16.mxu1 %v1107_v6  ;;  %v1296_v35 = vld [vmem:[%s1718_s1 + $0xf0] ss:$8 sps:$4 sm:$0xff]   ;;  %v1303_v36 = vld [vmem:[%s1718_s1 + $0x104] ss:$8 sps:$4 sm:$0xff]   ;;  %v1324_v41 = vld [vmem:[%s1718_s1 + $0x100] ss:$8 sps:$4 sm:$0xff]  }
   0xd   :  { %v1312_v39 = vld [vmem:[%s1719_s0 + $0x8] sm:$0xff]  ;;  %v1317_v40 = vld [vmem:[%s1719_s0 + $0x18] sm:$0xff] }
   0xe   :  { %v1331_v42 = vld [vmem:[%s1718_s1 + $0x114] ss:$8 sps:$4 sm:$0xff]   ;;  %v831_v43 = vcombine.high %v1312_v39, %v1312_v39  ;;  %v901_v44 = vcombine.high %v1317_v40, %v1317_v40  ;;  %v1342_v45 = vld [vmem:[%s1718_s1 + $0x110] ss:$8 sps:$4 sm:$0xff]   ;;  %v1349_v46 = vld [vmem:[%s1718_s1 + $0x124] ss:$8 sps:$4 sm:$0xff]  }
   0xf   :  { %421 = vmatpush1.bf16.msra.mxu0 %v1114_v7  ;;  %520 = vmatpush1.bf16.msra.mxu1 %v1114_v7  ;;  %v1356_v47 = vld [vmem:[%s1718_s1 + $0x120] ss:$8 sps:$4 sm:$0xff]   ;;  %v1363_v48 = vld [vmem:[%s1718_s1 + $0x134] ss:$8 sps:$4 sm:$0xff]   ;;  %v1370_v49 = vld [vmem:[%s1718_s1 + $0x130] ss:$8 sps:$4 sm:$0xff]  }
  0x10   :  { %422 = vmatprep.subr.bf16.mxu0 %v1121_v8  ;;  %521 = vmatprep.subr.bf16.mxu1 %v1121_v8  ;;  %v1377_v50 = vld [vmem:[%s1718_s1 + $0x144] ss:$8 sps:$4 sm:$0xff]   ;;  %v1384_v51 = vld [vmem:[%s1718_s1 + $0x140] ss:$8 sps:$4 sm:$0xff]   ;;  %v1391_v52 = vld [vmem:[%s1718_s1 + $0x154] ss:$8 sps:$4 sm:$0xff]  }
  0x11   :  { %v1398_v53 = vld [vmem:[%s1718_s1 + $0x150] ss:$8 sps:$4 sm:$0xff]   ;;  %v1405_v54 = vld [vmem:[%s1718_s1 + $0x164] ss:$8 sps:$4 sm:$0xff]   ;;  %v1412_v55 = vld [vmem:[%s1718_s1 + $0x160] ss:$8 sps:$4 sm:$0xff]  }
  0x12   :  { %v1419_v56 = vld [vmem:[%s1718_s1 + $0x174] ss:$8 sps:$4 sm:$0xff]   ;;  %v1426_v57 = vld [vmem:[%s1718_s1 + $0x170] ss:$8 sps:$4 sm:$0xff]   ;;  %v1433_v58 = vld [vmem:[%s1718_s1 + $0x184] ss:$8 sps:$4 sm:$0xff]  }
  0x13   :  { %423 = vmatpush1.bf16.msra.mxu0 %v1128_v9  ;;  %522 = vmatpush1.bf16.msra.mxu1 %v1128_v9  ;;  %v1440_v59 = vld [vmem:[%s1718_s1 + $0x180] ss:$8 sps:$4 sm:$0xff]   ;;  %v1447_v60 = vld [vmem:[%s1718_s1 + $0x194] ss:$8 sps:$4 sm:$0xff]   ;;  %v1454_v61 = vld [vmem:[%s1718_s1 + $0x190] ss:$8 sps:$4 sm:$0xff]  }
  0x14   :  { %424 = vmatprep.subr.bf16.mxu0 %v1135_v10  ;;  %523 = vmatprep.subr.bf16.mxu1 %v1135_v10  ;;  %v1461_v62 = vld [vmem:[%s1718_s1 + $0x1a4] ss:$8 sps:$4 sm:$0xff]   ;;  %v1468_v63 = vld [vmem:[%s1718_s1 + $0x1a0] ss:$8 sps:$4 sm:$0xff]   ;;  %v1475_v13 = vld [vmem:[%s1718_s1 + $0x1b4] ss:$8 sps:$4 sm:$0xff]  }
  0x15   :  { %v1482_v14 = vld [vmem:[%s1718_s1 + $0x1b0] ss:$8 sps:$4 sm:$0xff]   ;;  %v1489_v15 = vld [vmem:[%s1718_s1 + $0x1c4] ss:$8 sps:$4 sm:$0xff]   ;;  %v1496_v17 = vld [vmem:[%s1718_s1 + $0x1c0] ss:$8 sps:$4 sm:$0xff]  }
  0x16   :  { %1734 = vst [vmem:[#allocation2_spill] sm:$0xff] %v1489_v15  ;;  %1735 = vst [vmem:[#allocation3_spill] sm:$0xff] %v1496_v17 }
  0x17   :  { %425 = vmatpush1.bf16.msra.mxu0 %v1142_v11  ;;  %524 = vmatpush1.bf16.msra.mxu1 %v1142_v11 }
  0x18   :  { %426 = vmatprep.subr.bf16.mxu0 %v1149_v12  ;;  %525 = vmatprep.subr.bf16.mxu1 %v1149_v12 }
  0x1b   :  { %427 = vmatpush1.bf16.msra.mxu0 %v1168_v16  ;;  %526 = vmatpush1.bf16.msra.mxu1 %v1168_v16 }
  0x1c   :  { %428 = vmatprep.subr.bf16.mxu0 %v1177_v18  ;;  %527 = vmatprep.subr.bf16.mxu1 %v1177_v18 }
  0x1f   :  { %429 = vmatpush1.bf16.msra.mxu0 %v1184_v19  ;;  %528 = vmatpush1.bf16.msra.mxu1 %v1184_v19 }
  0x20   :  { %430 = vmatprep.subr.bf16.mxu0 %v1191_v20  ;;  %529 = vmatprep.subr.bf16.mxu1 %v1191_v20 }
  0x23   :  { %431 = vmatpush1.bf16.msra.mxu0 %v1198_v21  ;;  %530 = vmatpush1.bf16.msra.mxu1 %v1198_v21 }
  0x24   :  { %432 = vmatprep.subr.bf16.mxu0 %v1205_v22  ;;  %531 = vmatprep.subr.bf16.mxu1 %v1205_v22 }
  0x27   :  { %433 = vmatpush1.bf16.msra.mxu0 %v1212_v23  ;;  %532 = vmatpush1.bf16.msra.mxu1 %v1212_v23 }
  0x28   :  { %434 = vmatprep.subr.bf16.mxu0 %v1219_v24  ;;  %533 = vmatprep.subr.bf16.mxu1 %v1219_v24 }
  0x2b   :  { %435 = vmatpush1.bf16.msra.mxu0 %v1226_v25  ;;  %534 = vmatpush1.bf16.msra.mxu1 %v1226_v25 }
  0x2c   :  { %436 = vmatprep.subr.bf16.mxu0 %v1233_v26  ;;  %535 = vmatprep.subr.bf16.mxu1 %v1233_v26 }
  0x2f   :  { %437 = vmatpush1.bf16.msra.mxu0 %v1240_v27  ;;  %536 = vmatpush1.bf16.msra.mxu1 %v1240_v27 }
  0x30   :  { %438 = vmatprep.subr.bf16.mxu0 %v1247_v28  ;;  %537 = vmatprep.subr.bf16.mxu1 %v1247_v28 }
  0x33   :  { %439 = vmatpush1.bf16.msra.mxu0 %v1254_v29  ;;  %538 = vmatpush1.bf16.msra.mxu1 %v1254_v29 }
  0x34   :  { %440 = vmatprep.subr.bf16.mxu0 %v1261_v30  ;;  %539 = vmatprep.subr.bf16.mxu1 %v1261_v30 }
  0x37   :  { %441 = vmatpush1.bf16.msra.mxu0 %v1268_v31  ;;  %540 = vmatpush1.bf16.msra.mxu1 %v1268_v31 }
  0x38   :  { %442 = vmatprep.subr.bf16.mxu0 %v1275_v32  ;;  %541 = vmatprep.subr.bf16.mxu1 %v1275_v32 }
  0x3b   :  { %443 = vmatpush1.bf16.msra.mxu0 %v1282_v33  ;;  %542 = vmatpush1.bf16.msra.mxu1 %v1282_v33 }
  0x3c   :  { %444 = vmatprep.subr.bf16.mxu0 %v1289_v34  ;;  %543 = vmatprep.subr.bf16.mxu1 %v1289_v34 }
  0x3f   :  { %445 = vmatpush1.bf16.msra.mxu0 %v1296_v35  ;;  %544 = vmatpush1.bf16.msra.mxu1 %v1296_v35 }
  0x40   :  { %455 = vmatprep.subr.bf16.mxu0 %v1303_v36  ;;  %554 = vmatprep.subr.bf16.mxu1 %v1303_v36 }
  0x42   :  { %447 = vmatmul.mubr.bf16.vlgmr.msra.gmra.mrb[0].mxu0 %v828_v37  ;;  %546 = vmatmul.mubr.bf16.vlgmr.msra.gmra.mrb[0].mxu1 %v898_v38  ;;  %v1503_v37 = vld [vmem:[%s1718_s1 + $0x1d4] ss:$8 sps:$4 sm:$0xff]   ;;  %v1510_v38 = vld [vmem:[%s1718_s1 + $0x1d0] ss:$8 sps:$4 sm:$0xff]  }
  0x43   :  { %456 = vmatpush1.bf16.msra.mxu0 %v1324_v41  ;;  %555 = vmatpush1.bf16.msra.mxu1 %v1324_v41  ;;  %1736 = vst [vmem:[#allocation4_spill] sm:$0xff] %v1503_v37  ;;  %1737 = vst [vmem:[#allocation5_spill] sm:$0xff] %v1510_v38 }
  0x44   :  { %457 = vmatprep.subr.bf16.mxu0 %v1331_v42  ;;  %556 = vmatprep.subr.bf16.mxu1 %v1331_v42 }
  0x45   :  { %487 = vmatprep.mubr.bf16.mxu0 %v831_v43  ;;  %586 = vmatprep.mubr.bf16.mxu1 %v901_v44  ;;  %v1517_v43 = vld [vmem:[%s1718_s1 + $0x1e4] ss:$8 sps:$4 sm:$0xff]   ;;  %v1524_v44 = vld [vmem:[%s1718_s1 + $0x1e0] ss:$8 sps:$4 sm:$0xff]  }
  0x46   :  { %1738 = vst [vmem:[#allocation6_spill] sm:$0xff] %v1517_v43  ;;  %1739 = vst [vmem:[#allocation7_spill] sm:$0xff] %v1524_v44 }
  0x47   :  { %458 = vmatpush1.bf16.msra.mxu0 %v1342_v45  ;;  %557 = vmatpush1.bf16.msra.mxu1 %v1342_v45 }
  0x48   :  { %459 = vmatprep.subr.bf16.mxu0 %v1349_v46  ;;  %558 = vmatprep.subr.bf16.mxu1 %v1349_v46 }
  0x4b   :  { %460 = vmatpush1.bf16.msra.mxu0 %v1356_v47  ;;  %559 = vmatpush1.bf16.msra.mxu1 %v1356_v47 }
  0x4c   :  { %461 = vmatprep.subr.bf16.mxu0 %v1363_v48  ;;  %560 = vmatprep.subr.bf16.mxu1 %v1363_v48 }
  0x4f   :  { %462 = vmatpush1.bf16.msra.mxu0 %v1370_v49  ;;  %561 = vmatpush1.bf16.msra.mxu1 %v1370_v49 }
  0x50   :  { %463 = vmatprep.subr.bf16.mxu0 %v1377_v50  ;;  %562 = vmatprep.subr.bf16.mxu1 %v1377_v50 }
  0x53   :  { %464 = vmatpush1.bf16.msra.mxu0 %v1384_v51  ;;  %563 = vmatpush1.bf16.msra.mxu1 %v1384_v51 }
  0x54   :  { %465 = vmatprep.subr.bf16.mxu0 %v1391_v52  ;;  %564 = vmatprep.subr.bf16.mxu1 %v1391_v52 }
  0x57   :  { %466 = vmatpush1.bf16.msra.mxu0 %v1398_v53  ;;  %565 = vmatpush1.bf16.msra.mxu1 %v1398_v53 }
  0x58   :  { %467 = vmatprep.subr.bf16.mxu0 %v1405_v54  ;;  %566 = vmatprep.subr.bf16.mxu1 %v1405_v54 }
  0x5b   :  { %468 = vmatpush1.bf16.msra.mxu0 %v1412_v55  ;;  %567 = vmatpush1.bf16.msra.mxu1 %v1412_v55 }
  0x5c   :  { %469 = vmatprep.subr.bf16.mxu0 %v1419_v56  ;;  %568 = vmatprep.subr.bf16.mxu1 %v1419_v56 }
  0x5f   :  { %470 = vmatpush1.bf16.msra.mxu0 %v1426_v57  ;;  %569 = vmatpush1.bf16.msra.mxu1 %v1426_v57 }
  0x60   :  { %471 = vmatprep.subr.bf16.mxu0 %v1433_v58  ;;  %570 = vmatprep.subr.bf16.mxu1 %v1433_v58 }
  0x63   :  { %472 = vmatpush1.bf16.msra.mxu0 %v1440_v59  ;;  %571 = vmatpush1.bf16.msra.mxu1 %v1440_v59 }
  0x64   :  { %473 = vmatprep.subr.bf16.mxu0 %v1447_v60  ;;  %572 = vmatprep.subr.bf16.mxu1 %v1447_v60 }
  0x67   :  { %474 = vmatpush1.bf16.msra.mxu0 %v1454_v61  ;;  %573 = vmatpush1.bf16.msra.mxu1 %v1454_v61 }
  0x68   :  { %475 = vmatprep.subr.bf16.mxu0 %v1461_v62  ;;  %574 = vmatprep.subr.bf16.mxu1 %v1461_v62 }
  0x6b   :  { %476 = vmatpush1.bf16.msra.mxu0 %v1468_v63  ;;  %575 = vmatpush1.bf16.msra.mxu1 %v1468_v63 }
  0x6c   :  { %477 = vmatprep.subr.bf16.mxu0 %v1475_v13  ;;  %576 = vmatprep.subr.bf16.mxu1 %v1475_v13 }
  0x6f   :  { %478 = vmatpush1.bf16.msra.mxu0 %v1482_v14  ;;  %577 = vmatpush1.bf16.msra.mxu1 %v1482_v14 }
  0x70   :  { %479 = vmatprep.subr.bf16.mxu0 %v1489_v15  ;;  %578 = vmatprep.subr.bf16.mxu1 %v1489_v15  ;;  %v1549_v15 = vld [vmem:[%s1719_s0 + $0x20] sm:$0xff] }
  0x73   :  { %480 = vmatpush1.bf16.msra.mxu0 %v1496_v17  ;;  %579 = vmatpush1.bf16.msra.mxu1 %v1496_v17  ;;  %v900_v17 = vcombine.low %v1317_v40, %v1317_v40 }
  0x74   :  { %481 = vmatprep.subr.bf16.mxu0 %v1503_v37  ;;  %580 = vmatprep.subr.bf16.mxu1 %v1503_v37  ;;  %v1531_v37 = vld [vmem:[%s1718_s1 + $0x1f4] ss:$8 sps:$4 sm:$0xff]  }
  0x77   :  { %482 = vmatpush1.bf16.msra.mxu0 %v1510_v38  ;;  %581 = vmatpush1.bf16.msra.mxu1 %v1510_v38  ;;  %v1538_v38 = vld [vmem:[%s1718_s1 + $0x1f0] ss:$8 sps:$4 sm:$0xff]  }
  0x78   :  { %483 = vmatprep.subr.bf16.mxu0 %v1517_v43  ;;  %582 = vmatprep.subr.bf16.mxu1 %v1517_v43  ;;  %v830_v43 = vcombine.low %v1312_v39, %v1312_v39  ;;  %v905_v39 = vcombine.high %v1549_v15, %v1549_v15 }
  0x7b   :  { %484 = vmatpush1.bf16.msra.mxu0 %v1524_v44  ;;  %583 = vmatpush1.bf16.msra.mxu1 %v1524_v44  ;;  %v1554_v44 = vld [vmem:[%s1719_s0 + $0x30] sm:$0xff] }
  0x7c   :  { %485 = vmatprep.subr.bf16.mxu0 %v1531_v37  ;;  %584 = vmatprep.subr.bf16.mxu1 %v1531_v37  ;;  %v911_v40 = vcombine.high %v1554_v44, %v1554_v44 }
  0x7f   :  { %486 = vmatpush1.bf16.msra.mxu0 %v1538_v38  ;;  %585 = vmatpush1.bf16.msra.mxu1 %v1538_v38 }
  0x80   :  { %614 = vmatprep.subr.bf16.mxu0 %v1067_v0  ;;  %715 = vmatprep.subr.bf16.mxu1 %v1067_v0  ;;  %v904_v0 = vcombine.low %v1549_v15, %v1549_v15 }
  0x82   :  { %488 = vmatmul.mubr.bf16.vlgmr.msra.gmra.mrb[0].mxu0 %v830_v43  ;;  %587 = vmatmul.mubr.bf16.vlgmr.msra.gmra.mrb[0].mxu1 %v900_v17 }
  0x83   :  { %615 = vmatpush1.bf16.msra.mxu0 %v1072_v1  ;;  %716 = vmatpush1.bf16.msra.mxu1 %v1072_v1  ;;  %v910_v1 = vcombine.low %v1554_v44, %v1554_v44 }
  0x84   :  { %616 = vmatprep.subr.bf16.mxu0 %v1079_v2  ;;  %717 = vmatprep.subr.bf16.mxu1 %v1079_v2  ;;  %v1631_v2 = vld [vmem:[%s1719_s0 + $0x28] sm:$0xff] }
  0x85   :  { %646 = vmatprep.mubr.bf16.mxu0 %v905_v39  ;;  %747 = vmatprep.mubr.bf16.mxu1 %v911_v40 }
  0x87   :  { %617 = vmatpush1.bf16.msra.mxu0 %v1086_v3  ;;  %718 = vmatpush1.bf16.msra.mxu1 %v1086_v3  ;;  %v1636_v3 = vld [vmem:[%s1719_s0 + $0x38] sm:$0xff] }
  0x88   :  { %618 = vmatprep.subr.bf16.mxu0 %v1093_v4  ;;  %719 = vmatprep.subr.bf16.mxu1 %v1093_v4  ;;  %v907_v4 = vcombine.high %v1631_v2, %v1631_v2 }
  0x8b   :  { %619 = vmatpush1.bf16.msra.mxu0 %v1100_v5  ;;  %720 = vmatpush1.bf16.msra.mxu1 %v1100_v5  ;;  %v913_v5 = vcombine.high %v1636_v3, %v1636_v3 }
  0x8c   :  { %620 = vmatprep.subr.bf16.mxu0 %v1107_v6  ;;  %721 = vmatprep.subr.bf16.mxu1 %v1107_v6  ;;  %v1740_v6 = vld [vmem:[#allocation2_spill] sm:$0xff] }
  0x8f   :  { %621 = vmatpush1.bf16.msra.mxu0 %v1114_v7  ;;  %722 = vmatpush1.bf16.msra.mxu1 %v1114_v7  ;;  %v1741_v7 = vld [vmem:[#allocation3_spill] sm:$0xff] }
  0x90   :  { %622 = vmatprep.subr.bf16.mxu0 %v1121_v8  ;;  %723 = vmatprep.subr.bf16.mxu1 %v1121_v8  ;;  %v1742_v8 = vld [vmem:[#allocation4_spill] sm:$0xff] }
  0x93   :  { %623 = vmatpush1.bf16.msra.mxu0 %v1128_v9  ;;  %724 = vmatpush1.bf16.msra.mxu1 %v1128_v9  ;;  %v1743_v9 = vld [vmem:[#allocation5_spill] sm:$0xff] }
  0x94   :  { %624 = vmatprep.subr.bf16.mxu0 %v1135_v10  ;;  %725 = vmatprep.subr.bf16.mxu1 %v1135_v10  ;;  %v1744_v10 = vld [vmem:[#allocation6_spill] sm:$0xff] }
  0x97   :  { %625 = vmatpush1.bf16.msra.mxu0 %v1142_v11  ;;  %726 = vmatpush1.bf16.msra.mxu1 %v1142_v11  ;;  %v1745_v11 = vld [vmem:[#allocation7_spill] sm:$0xff] }
  0x98   :  { %626 = vmatprep.subr.bf16.mxu0 %v1149_v12  ;;  %727 = vmatprep.subr.bf16.mxu1 %v1149_v12  ;;  %v906_v12 = vcombine.low %v1631_v2, %v1631_v2 }
  0x9b   :  { %627 = vmatpush1.bf16.msra.mxu0 %v1168_v16  ;;  %728 = vmatpush1.bf16.msra.mxu1 %v1168_v16  ;;  %v912_v16 = vcombine.low %v1636_v3, %v1636_v3 }
  0x9c   :  { %628 = vmatprep.subr.bf16.mxu0 %v1177_v18  ;;  %729 = vmatprep.subr.bf16.mxu1 %v1177_v18 }
  0x9f   :  { %629 = vmatpush1.bf16.msra.mxu0 %v1184_v19  ;;  %730 = vmatpush1.bf16.msra.mxu1 %v1184_v19 }
  0xa0   :  { %630 = vmatprep.subr.bf16.mxu0 %v1191_v20  ;;  %731 = vmatprep.subr.bf16.mxu1 %v1191_v20 }
  0xa3   :  { %631 = vmatpush1.bf16.msra.mxu0 %v1198_v21  ;;  %732 = vmatpush1.bf16.msra.mxu1 %v1198_v21 }
  0xa4   :  { %632 = vmatprep.subr.bf16.mxu0 %v1205_v22  ;;  %733 = vmatprep.subr.bf16.mxu1 %v1205_v22 }
  0xa7   :  { %633 = vmatpush1.bf16.msra.mxu0 %v1212_v23  ;;  %734 = vmatpush1.bf16.msra.mxu1 %v1212_v23 }
  0xa8   :  { %634 = vmatprep.subr.bf16.mxu0 %v1219_v24  ;;  %735 = vmatprep.subr.bf16.mxu1 %v1219_v24 }
  0xab   :  { %635 = vmatpush1.bf16.msra.mxu0 %v1226_v25  ;;  %736 = vmatpush1.bf16.msra.mxu1 %v1226_v25 }
  0xac   :  { %636 = vmatprep.subr.bf16.mxu0 %v1233_v26  ;;  %737 = vmatprep.subr.bf16.mxu1 %v1233_v26 }
  0xaf   :  { %637 = vmatpush1.bf16.msra.mxu0 %v1240_v27  ;;  %738 = vmatpush1.bf16.msra.mxu1 %v1240_v27 }
  0xb0   :  { %638 = vmatprep.subr.bf16.mxu0 %v1247_v28  ;;  %739 = vmatprep.subr.bf16.mxu1 %v1247_v28  ;;  %v801_v28 = vlaneseq }
  0xb3   :  { %639 = vmatpush1.bf16.msra.mxu0 %v1254_v29  ;;  %740 = vmatpush1.bf16.msra.mxu1 %v1254_v29  ;;  %v802_v29 = vshrl.u32 %v801_v28, 7 }
  0xb4   :  { %640 = vmatprep.subr.bf16.mxu0 %v1261_v30  ;;  %741 = vmatprep.subr.bf16.mxu1 %v1261_v30 }
  0xb5   :  { %v803_v30 = vsub.s32 0, %v802_v29 }
  0xb7   :  { %641 = vmatpush1.bf16.msra.mxu0 %v1268_v31  ;;  %742 = vmatpush1.bf16.msra.mxu1 %v1268_v31  ;;  %v799_v31 = vld [vmem:[%s1720_s2] sm:$0x3] }
  0xb8   :  { %642 = vmatprep.subr.bf16.mxu0 %v1275_v32  ;;  %743 = vmatprep.subr.bf16.mxu1 %v1275_v32  ;;  %v807_v32 = vsub.s32 1, %v802_v29 }
  0xbb   :  { %643 = vmatpush1.bf16.msra.mxu0 %v1282_v33  ;;  %744 = vmatpush1.bf16.msra.mxu1 %v1282_v33 }
  0xbc   :  { %644 = vmatprep.subr.bf16.mxu0 %v1289_v34  ;;  %745 = vmatprep.subr.bf16.mxu1 %v1289_v34 }
  0xbf   :  { %645 = vmatpush1.bf16.msra.mxu0 %v1296_v35  ;;  %746 = vmatpush1.bf16.msra.mxu1 %v1296_v35 }
  0xc0   :  { %655 = vmatprep.subr.bf16.mxu0 %v1303_v36  ;;  %756 = vmatprep.subr.bf16.mxu1 %v1303_v36  ;;  %v804_v36 = vrot.slane %v799_v31, %v803_v30 }
  0xc2   :  { %647 = vmatmul.mubr.bf16.vlgmr.msra.gmra.mrb[4].mxu0 %v904_v0  ;;  %748 = vmatmul.mubr.bf16.vlgmr.msra.gmra.mrb[4].mxu1 %v910_v1 }
  0xc3   :  { %656 = vmatpush1.bf16.msra.mxu0 %v1324_v41  ;;  %757 = vmatpush1.bf16.msra.mxu1 %v1324_v41 }
  0xc4   :  { %657 = vmatprep.subr.bf16.mxu0 %v1331_v42  ;;  %758 = vmatprep.subr.bf16.mxu1 %v1331_v42 }
  0xc5   :  { %687 = vmatprep.mubr.bf16.mxu0 %v907_v4  ;;  %788 = vmatprep.mubr.bf16.mxu1 %v913_v5 }
  0xc7   :  { %658 = vmatpush1.bf16.msra.mxu0 %v1342_v45  ;;  %759 = vmatpush1.bf16.msra.mxu1 %v1342_v45 }
  0xc8   :  { %659 = vmatprep.subr.bf16.mxu0 %v1349_v46  ;;  %760 = vmatprep.subr.bf16.mxu1 %v1349_v46  ;;  %v808_v46 = vrot.slane %v799_v31, %v807_v32 }
  0xcb   :  { %660 = vmatpush1.bf16.msra.mxu0 %v1356_v47  ;;  %761 = vmatpush1.bf16.msra.mxu1 %v1356_v47 }
  0xcc   :  { %661 = vmatprep.subr.bf16.mxu0 %v1363_v48  ;;  %762 = vmatprep.subr.bf16.mxu1 %v1363_v48 }
  0xcf   :  { %662 = vmatpush1.bf16.msra.mxu0 %v1370_v49  ;;  %763 = vmatpush1.bf16.msra.mxu1 %v1370_v49 }
  0xd0   :  { %663 = vmatprep.subr.bf16.mxu0 %v1377_v50  ;;  %764 = vmatprep.subr.bf16.mxu1 %v1377_v50 }
  0xd3   :  { %664 = vmatpush1.bf16.msra.mxu0 %v1384_v51  ;;  %765 = vmatpush1.bf16.msra.mxu1 %v1384_v51 }
  0xd4   :  { %665 = vmatprep.subr.bf16.mxu0 %v1391_v52  ;;  %766 = vmatprep.subr.bf16.mxu1 %v1391_v52 }
  0xd7   :  { %666 = vmatpush1.bf16.msra.mxu0 %v1398_v53  ;;  %767 = vmatpush1.bf16.msra.mxu1 %v1398_v53 }
  0xd8   :  { %667 = vmatprep.subr.bf16.mxu0 %v1405_v54  ;;  %768 = vmatprep.subr.bf16.mxu1 %v1405_v54 }
  0xdb   :  { %668 = vmatpush1.bf16.msra.mxu0 %v1412_v55  ;;  %769 = vmatpush1.bf16.msra.mxu1 %v1412_v55 }
  0xdc   :  { %669 = vmatprep.subr.bf16.mxu0 %v1419_v56  ;;  %770 = vmatprep.subr.bf16.mxu1 %v1419_v56 }
  0xdf   :  { %670 = vmatpush1.bf16.msra.mxu0 %v1426_v57  ;;  %771 = vmatpush1.bf16.msra.mxu1 %v1426_v57 }
  0xe0   :  { %671 = vmatprep.subr.bf16.mxu0 %v1433_v58  ;;  %772 = vmatprep.subr.bf16.mxu1 %v1433_v58 }
  0xe3   :  { %672 = vmatpush1.bf16.msra.mxu0 %v1440_v59  ;;  %773 = vmatpush1.bf16.msra.mxu1 %v1440_v59 }
  0xe4   :  { %673 = vmatprep.subr.bf16.mxu0 %v1447_v60  ;;  %774 = vmatprep.subr.bf16.mxu1 %v1447_v60 }
  0xe7   :  { %674 = vmatpush1.bf16.msra.mxu0 %v1454_v61  ;;  %775 = vmatpush1.bf16.msra.mxu1 %v1454_v61 }
  0xe8   :  { %675 = vmatprep.subr.bf16.mxu0 %v1461_v62  ;;  %776 = vmatprep.subr.bf16.mxu1 %v1461_v62 }
  0xeb   :  { %676 = vmatpush1.bf16.msra.mxu0 %v1468_v63  ;;  %777 = vmatpush1.bf16.msra.mxu1 %v1468_v63 }
  0xec   :  { %677 = vmatprep.subr.bf16.mxu0 %v1475_v13  ;;  %778 = vmatprep.subr.bf16.mxu1 %v1475_v13 }
  0xef   :  { %678 = vmatpush1.bf16.msra.mxu0 %v1482_v14  ;;  %779 = vmatpush1.bf16.msra.mxu1 %v1482_v14 }
  0xf0   :  { %679 = vmatprep.subr.bf16.mxu0 %v1740_v6  ;;  %780 = vmatprep.subr.bf16.mxu1 %v1740_v6 }
  0xf3   :  { %680 = vmatpush1.bf16.msra.mxu0 %v1741_v7  ;;  %781 = vmatpush1.bf16.msra.mxu1 %v1741_v7 }
  0xf4   :  { %681 = vmatprep.subr.bf16.mxu0 %v1742_v8  ;;  %782 = vmatprep.subr.bf16.mxu1 %v1742_v8 }
  0xf7   :  { %682 = vmatpush1.bf16.msra.mxu0 %v1743_v9  ;;  %783 = vmatpush1.bf16.msra.mxu1 %v1743_v9 }
  0xf8   :  { %683 = vmatprep.subr.bf16.mxu0 %v1744_v10  ;;  %784 = vmatprep.subr.bf16.mxu1 %v1744_v10 }
  0xfb   :  { %684 = vmatpush1.bf16.msra.mxu0 %v1745_v11  ;;  %785 = vmatpush1.bf16.msra.mxu1 %v1745_v11 }
  0xfc   :  { %685 = vmatprep.subr.bf16.mxu0 %v1531_v37  ;;  %786 = vmatprep.subr.bf16.mxu1 %v1531_v37 }
  0xff   :  { %686 = vmatpush1.bf16.msra.mxu0 %v1538_v38  ;;  %787 = vmatpush1.bf16.msra.mxu1 %v1538_v38 }
 0x102   :  { %688 = vmatmul.mubr.bf16.vlgmr.msra.gmra.mrb[4].mxu0 %v906_v12  ;;  %789 = vmatmul.mubr.bf16.vlgmr.msra.gmra.mrb[4].mxu1 %v912_v16 }
 0x155   :  { %v489_v18 = vpop.f32.mrb[0].mxu0  ;;  %v588_v19 = vpop.f32.mrb[0].mxu1 }
 0x156   :  { %v595_v20 = vmax.f32 %v489_v18, %v588_v19  ;;  %v491_v21 = vpop.f32.mrb[1].mxu0  ;;  %v590_v22 = vpop.f32.mrb[1].mxu1 }
 0x157   :  { %v596_v23 = vmax.f32 %v491_v21, %v590_v22  ;;  %v493_v24 = vpop.f32.mrb[2].mxu0  ;;  %v592_v25 = vpop.f32.mrb[2].mxu1 }
 0x158   :  { %v494_v26 = vpop.f32.mrb[3].mxu0  ;;  %v593_v27 = vpop.f32.mrb[3].mxu1 }
 0x1d5   :  { %v689_v33 = vpop.f32.mrb[4].mxu0  ;;  %v790_v34 = vpop.f32.mrb[4].mxu1 }
 0x1d6   :  { %v696_v35 = vmax.f32 %v595_v20, %v689_v33  ;;  %v691_v41 = vpop.f32.mrb[5].mxu0  ;;  %v792_v42 = vpop.f32.mrb[5].mxu1 }
 0x1d7   :  { %v697_v45 = vmax.f32 %v596_v23, %v691_v41  ;;  %v693_v47 = vpop.f32.mrb[6].mxu0  ;;  %v794_v48 = vpop.f32.mrb[6].mxu1 }
 0x1d8   :  { %v797_v49 = vmax.f32 %v696_v35, %v790_v34  ;;  %v694_v50 = vpop.f32.mrb[7].mxu0  ;;  %v795_v51 = vpop.f32.mrb[7].mxu1 }
 0x1d9   :  { %v798_v52 = vmax.f32 %v697_v45, %v792_v42 }
 0x1da   :  { %v811_v53 = vadd.f32 %v804_v36, %v797_v49 }
 0x1db   :  { %v812_v54 = vadd.f32 %v808_v46, %v798_v52 }
 0x1dc   :  { %v813_v55 = vmax.f32 %v811_v53, 0.0 }
 0x1dd   :  { %v814_v56 = vmax.f32 %v812_v54, 0.0 }
 0x1df   :  { %v915_v57 = vpack.c.bf16 %v814_v56, %v813_v55 }
 0x1e1   :  { %823 = vst [vmem:[%s1721_s3] sm:$0xff] %v915_v57 }

// kernel: net_forward.11
= control target key start
LH: loop header
LB: loop body
LE: loop exit
PB: predicated region body
PF: predicated region fallthrough
CT: control target
= control target key end

     0   :  { %v162_v7 = vlaneseq  ;;  %v1806_v8 = vmov 1966171168   ;;  %s2371_s0 = inlined_call_operand.vmem [shape: bf16[2,1024], index: 0, kind: input, shape index: {}]   ;;  %s2372_s1 = inlined_call_operand.vmem [shape: bf16[1024,256], index: 1, kind: input, shape index: {}]   ;;  %s2373_s2 = inlined_call_operand.vmem [shape: f32[1,256], index: 2, kind: input, shape index: {}]   ;;  %s2374_s3 = inlined_call_operand.vmem [shape: bf16[256,128], index: 3, kind: input, shape index: {}]   ;;  %s2375_s4 = inlined_call_operand.vmem [shape: f32[1,128], index: 4, kind: input, shape index: {}]   ;;  %s2376_s5 = inlined_call_operand.vmem [shape: bf16[128,20], index: 5, kind: input, shape index: {}]   ;;  %s2377_s6 = inlined_call_operand.vmem [shape: f32[1,20], index: 6, kind: input, shape index: {}]   ;;  %s2378_s7 = inlined_call_operand.vmem [shape: f32[2,128], index: 7, kind: input, shape index: {}]   ;;  %s2379_s8 = inlined_call_operand.hbm [shape: f32[2,20], index: 8, kind: output, shape index: {}]  }
   0x1   :  { %v1565_v0 = vld [vmem:[%s2372_s1 + $0x104] ss:$8 sps:$4 sm:$0xff]   ;;  %v1567_v1 = vld [vmem:[%s2372_s1 + $0x100] ss:$8 sps:$4 sm:$0xff]   ;;  %v1568_v2 = vld [vmem:[%s2372_s1 + $0x114] ss:$8 sps:$4 sm:$0xff]   ;;  %v175_v9 = vunpack.c.l.s4 %v1806_v8 }
   0x2   :  { %911 = vmatprep.subr.bf16.mxu0 %v1565_v0  ;;  %v1570_v3 = vld [vmem:[%s2372_s1 + $0x110] ss:$8 sps:$4 sm:$0xff]   ;;  %v1571_v4 = vld [vmem:[%s2372_s1 + $0x124] ss:$8 sps:$4 sm:$0xff]   ;;  %v1573_v5 = vld [vmem:[%s2372_s1 + $0x120] ss:$8 sps:$4 sm:$0xff]  }
   0x3   :  { %912 = vmatpush1.bf16.msra.mxu0 %v1567_v1  ;;  %v1574_v6 = vld [vmem:[%s2372_s1 + $0x134] ss:$8 sps:$4 sm:$0xff]   ;;  %v1576_v10 = vld [vmem:[%s2372_s1 + $0x130] ss:$8 sps:$4 sm:$0xff]   ;;  %v1577_v11 = vld [vmem:[%s2372_s1 + $0x144] ss:$8 sps:$4 sm:$0xff]   ;;  %v176_v13 = vunpack.c.0.s8 %v175_v9 }
   0x4   :  { %913 = vmatprep.subr.bf16.mxu0 %v1568_v2  ;;  %v1882_v12 = vshrl.u32 %v162_v7, 7  ;;  %v1579_v14 = vld [vmem:[%s2372_s1 + $0x140] ss:$8 sps:$4 sm:$0xff]   ;;  %v1580_v15 = vld [vmem:[%s2372_s1 + $0x154] ss:$8 sps:$4 sm:$0xff]  }
   0x5   :  { %v1582_v17 = vld [vmem:[%s2372_s1 + $0x150] ss:$8 sps:$4 sm:$0xff]   ;;  %v1583_v18 = vld [vmem:[%s2372_s1 + $0x164] ss:$8 sps:$4 sm:$0xff]   ;;  %v1585_v22 = vld [vmem:[%s2372_s1 + $0x160] ss:$8 sps:$4 sm:$0xff]  }
   0x6   :  { %v1891_v16 = vsub.s32 %v176_v13, %v1882_v12  ;;  %v31_v19 = vld [vmem:[%s2371_s0] sm:$0xff]  ;;  %v1586_v23 = vld [vmem:[%s2372_s1 + $0x174] ss:$8 sps:$4 sm:$0xff]   ;;  %v1588_v28 = vld [vmem:[%s2372_s1 + $0x170] ss:$8 sps:$4 sm:$0xff]  }
   0x7   :  { %914 = vmatpush1.bf16.msra.mxu0 %v1570_v3  ;;  %v173_v20 = vcombine.high %v31_v19, %v31_v19  ;;  %v1589_v29 = vld [vmem:[%s2372_s1 + $0x184] ss:$8 sps:$4 sm:$0xff]   ;;  %v1591_v31 = vld [vmem:[%s2372_s1 + $0x180] ss:$8 sps:$4 sm:$0xff]   ;;  %v1592_v32 = vld [vmem:[%s2372_s1 + $0x194] ss:$8 sps:$4 sm:$0xff]  }
   0x8   :  { %915 = vmatprep.subr.bf16.mxu0 %v1571_v4  ;;  %v180_v21 = vrot.slane %v31_v19, %v1891_v16  ;;  %v1594_v33 = vld [vmem:[%s2372_s1 + $0x190] ss:$8 sps:$4 sm:$0xff]   ;;  %v1595_v34 = vld [vmem:[%s2372_s1 + $0x1a4] ss:$8 sps:$4 sm:$0xff]   ;;  %v1597_v35 = vld [vmem:[%s2372_s1 + $0x1a0] ss:$8 sps:$4 sm:$0xff]  }
   0x9   :  { %v1910_v25 = vrot.slane %v173_v20, %v1891_v16  ;;  %v1598_v36 = vld [vmem:[%s2372_s1 + $0x1b4] ss:$8 sps:$4 sm:$0xff]   ;;  %v1659_v37 = vld [vmem:[%s2372_s1 + $0x4] ss:$8 sps:$4 sm:$0xff]   ;;  %v1661_v38 = vld [vmem:[%s2372_s1] ss:$8 sps:$4 sm:$0xff]  }
   0xa   :  { %v188_v24 = vcombine.high %v180_v21, %v180_v21  ;;  %v1600_v39 = vld [vmem:[%s2372_s1 + $0x1b0] ss:$8 sps:$4 sm:$0xff]   ;;  %v1601_v40 = vld [vmem:[%s2372_s1 + $0x1c4] ss:$8 sps:$4 sm:$0xff]   ;;  %870 = vmatprep.subr.bf16.mxu1 %v1659_v37  ;;  %v1665_v41 = vld [vmem:[%s2372_s1 + $0x14] ss:$8 sps:$4 sm:$0xff]   ;;  %v1996_v55 = vrot.slane %v180_v21, %v1891_v16 }
   0xb   :  { %916 = vmatpush1.bf16.msra.mxu0 %v1573_v5  ;;  %v1915_v27 = vrot.slane %v1910_v25, %v1891_v16  ;;  %871 = vmatpush1.bf16.msra.mxu1 %v1661_v38  ;;  %v1667_v42 = vld [vmem:[%s2372_s1 + $0x10] ss:$8 sps:$4 sm:$0xff]   ;;  %v1603_v43 = vld [vmem:[%s2372_s1 + $0x1c0] ss:$8 sps:$4 sm:$0xff]   ;;  %v1671_v44 = vld [vmem:[%s2372_s1 + $0x24] ss:$8 sps:$4 sm:$0xff]   ;;  %v189_v58 = vcombine.high %v1910_v25, %v1910_v25 }
   0xc   :  { %917 = vmatprep.subr.bf16.mxu0 %v1574_v6  ;;  %v210_v26 = vrot.slane %v188_v24, %v1891_v16  ;;  %872 = vmatprep.subr.bf16.mxu1 %v1665_v41  ;;  %v1604_v45 = vld [vmem:[%s2372_s1 + $0x1d4] ss:$8 sps:$4 sm:$0xff]   ;;  %v1673_v46 = vld [vmem:[%s2372_s1 + $0x20] ss:$8 sps:$4 sm:$0xff]   ;;  %v1606_v48 = vld [vmem:[%s2372_s1 + $0x1d0] ss:$8 sps:$4 sm:$0xff]   ;;  %v218_v61 = vcombine.high %v1996_v55, %v1996_v55 }
   0xd   :  { %v1677_v47 = vld [vmem:[%s2372_s1 + $0x34] ss:$8 sps:$4 sm:$0xff]   ;;  %v1607_v49 = vld [vmem:[%s2372_s1 + $0x1e4] ss:$8 sps:$4 sm:$0xff]   ;;  %v1679_v50 = vld [vmem:[%s2372_s1 + $0x30] ss:$8 sps:$4 sm:$0xff]   ;;  %v2021_v0 = vrot.slane %v189_v58, %v1891_v16 }
   0xe   :  { %v220_v30 = vcombine.high %v210_v26, %v210_v26  ;;  %902 = vmatprep.mubr.bf16.mxu1 %v210_v26  ;;  %v1683_v51 = vld [vmem:[%s2372_s1 + $0x44] ss:$8 sps:$4 sm:$0xff]   ;;  %v1609_v52 = vld [vmem:[%s2372_s1 + $0x1e0] ss:$8 sps:$4 sm:$0xff]   ;;  %v1610_v53 = vld [vmem:[%s2372_s1 + $0x1f4] ss:$8 sps:$4 sm:$0xff]  }
   0xf   :  { %918 = vmatpush1.bf16.msra.mxu0 %v1576_v10  ;;  %873 = vmatpush1.bf16.msra.mxu1 %v1667_v42  ;;  %v1685_v54 = vld [vmem:[%s2372_s1 + $0x40] ss:$8 sps:$4 sm:$0xff]   ;;  %v1689_v56 = vld [vmem:[%s2372_s1 + $0x54] ss:$8 sps:$4 sm:$0xff]   ;;  %v1612_v57 = vld [vmem:[%s2372_s1 + $0x1f0] ss:$8 sps:$4 sm:$0xff]  }
  0x10   :  { %919 = vmatprep.subr.bf16.mxu0 %v1577_v11  ;;  %943 = vmatprep.mubr.bf16.mxu0 %v220_v30  ;;  %v1616_v59 = vld [vmem:[%s2372_s1 + $0x204] ss:$8 sps:$4 sm:$0xff]   ;;  %v1691_v60 = vld [vmem:[%s2372_s1 + $0x50] ss:$8 sps:$4 sm:$0xff]   ;;  %v1614_v63 = vld [vmem:[%s2372_s1 + $0x200] ss:$8 sps:$4 sm:$0xff]  }
  0x11   :  { %874 = vmatprep.subr.bf16.mxu1 %v1671_v44  ;;  %v1695_v62 = vld [vmem:[%s2372_s1 + $0x64] ss:$8 sps:$4 sm:$0xff]   ;;  %v1619_v1 = vld [vmem:[%s2372_s1 + $0x214] ss:$8 sps:$4 sm:$0xff]   ;;  %v1697_v2 = vld [vmem:[%s2372_s1 + $0x60] ss:$8 sps:$4 sm:$0xff]  }
  0x12   :  { %v1701_v3 = vld [vmem:[%s2372_s1 + $0x74] ss:$8 sps:$4 sm:$0xff]   ;;  %v1617_v4 = vld [vmem:[%s2372_s1 + $0x210] ss:$8 sps:$4 sm:$0xff]   ;;  %v1622_v5 = vld [vmem:[%s2372_s1 + $0x224] ss:$8 sps:$4 sm:$0xff]  }
  0x13   :  { %920 = vmatpush1.bf16.msra.mxu0 %v1579_v14  ;;  %875 = vmatpush1.bf16.msra.mxu1 %v1673_v46  ;;  %v1703_v6 = vld [vmem:[%s2372_s1 + $0x70] ss:$8 sps:$4 sm:$0xff]   ;;  %v1707_v7 = vld [vmem:[%s2372_s1 + $0x84] ss:$8 sps:$4 sm:$0xff]   ;;  %v1620_v8 = vld [vmem:[%s2372_s1 + $0x220] ss:$8 sps:$4 sm:$0xff]  }
  0x14   :  { %921 = vmatprep.subr.bf16.mxu0 %v1580_v15  ;;  %876 = vmatprep.subr.bf16.mxu1 %v1677_v47  ;;  %v1625_v9 = vld [vmem:[%s2372_s1 + $0x234] ss:$8 sps:$4 sm:$0xff]   ;;  %v1709_v10 = vld [vmem:[%s2372_s1 + $0x80] ss:$8 sps:$4 sm:$0xff]   ;;  %v1623_v13 = vld [vmem:[%s2372_s1 + $0x230] ss:$8 sps:$4 sm:$0xff]  }
  0x15   :  { %v1713_v11 = vld [vmem:[%s2372_s1 + $0x94] ss:$8 sps:$4 sm:$0xff]   ;;  %v1628_v14 = vld [vmem:[%s2372_s1 + $0x244] ss:$8 sps:$4 sm:$0xff]   ;;  %v1715_v15 = vld [vmem:[%s2372_s1 + $0x90] ss:$8 sps:$4 sm:$0xff]  }
  0x16   :  { %v1719_v16 = vld [vmem:[%s2372_s1 + $0xa4] ss:$8 sps:$4 sm:$0xff]   ;;  %v1721_v19 = vld [vmem:[%s2372_s1 + $0xa0] ss:$8 sps:$4 sm:$0xff]   ;;  %v1725_v20 = vld [vmem:[%s2372_s1 + $0xb4] ss:$8 sps:$4 sm:$0xff]  }
  0x17   :  { %922 = vmatpush1.bf16.msra.mxu0 %v1582_v17  ;;  %877 = vmatpush1.bf16.msra.mxu1 %v1679_v50  ;;  %v1626_v17 = vld [vmem:[%s2372_s1 + $0x240] ss:$8 sps:$4 sm:$0xff]   ;;  %v1629_v21 = vld [vmem:[%s2372_s1 + $0x250] ss:$8 sps:$4 sm:$0xff]   ;;  %v1731_v24 = vld [vmem:[%s2372_s1 + $0xc4] ss:$8 sps:$4 sm:$0xff]  }
  0x18   :  { %923 = vmatprep.subr.bf16.mxu0 %v1583_v18  ;;  %878 = vmatprep.subr.bf16.mxu1 %v1683_v51  ;;  %v1631_v18 = vld [vmem:[%s2372_s1 + $0x254] ss:$8 sps:$4 sm:$0xff]   ;;  %v1632_v25 = vld [vmem:[%s2372_s1 + $0x260] ss:$8 sps:$4 sm:$0xff]   ;;  %v1635_v30 = vld [vmem:[%s2372_s1 + $0x270] ss:$8 sps:$4 sm:$0xff]  }
  0x19   :  { %v1637_v26 = vld [vmem:[%s2372_s1 + $0x274] ss:$8 sps:$4 sm:$0xff]   ;;  %v1641_v38 = vld [vmem:[%s2372_s1 + $0x290] ss:$8 sps:$4 sm:$0xff]   ;;  %v1758_v41 = vld [vmem:[%s2374_s3 + $0x40] sm:$0xff]  }
  0x1a   :  { %v1749_v37 = vld [vmem:[%s2372_s1 + $0xf4] ss:$8 sps:$4 sm:$0xff]   ;;  %v1644_v42 = vld [vmem:[%s2372_s1 + $0x2a0] ss:$8 sps:$4 sm:$0xff]  }
  0x1b   :  { %924 = vmatpush1.bf16.msra.mxu0 %v1585_v22  ;;  %879 = vmatpush1.bf16.msra.mxu1 %v1685_v54  ;;  %v1634_v22 = vld [vmem:[%s2372_s1 + $0x264] ss:$8 sps:$4 sm:$0xff]  }
  0x1c   :  { %925 = vmatprep.subr.bf16.mxu0 %v1586_v23  ;;  %880 = vmatprep.subr.bf16.mxu1 %v1689_v56  ;;  %v1727_v23 = vld [vmem:[%s2372_s1 + $0xb0] ss:$8 sps:$4 sm:$0xff]   ;;  %v1759_v44 = vld [vmem:[%s2374_s3] sm:$0xff]  }
  0x1f   :  { %926 = vmatpush1.bf16.msra.mxu0 %v1588_v28  ;;  %881 = vmatpush1.bf16.msra.mxu1 %v1691_v60  ;;  %v1733_v28 = vld [vmem:[%s2372_s1 + $0xc0] ss:$8 sps:$4 sm:$0xff]  }
  0x20   :  { %927 = vmatprep.subr.bf16.mxu0 %v1589_v29  ;;  %882 = vmatprep.subr.bf16.mxu1 %v1695_v62  ;;  %v1737_v29 = vld [vmem:[%s2372_s1 + $0xd4] ss:$8 sps:$4 sm:$0xff]  }
  0x23   :  { %928 = vmatpush1.bf16.msra.mxu0 %v1591_v31  ;;  %883 = vmatpush1.bf16.msra.mxu1 %v1697_v2  ;;  %v1640_v31 = vld [vmem:[%s2372_s1 + $0x284] ss:$8 sps:$4 sm:$0xff]  }
  0x24   :  { %929 = vmatprep.subr.bf16.mxu0 %v1592_v32  ;;  %884 = vmatprep.subr.bf16.mxu1 %v1701_v3  ;;  %v1638_v32 = vld [vmem:[%s2372_s1 + $0x280] ss:$8 sps:$4 sm:$0xff]  }
  0x27   :  { %930 = vmatpush1.bf16.msra.mxu0 %v1594_v33  ;;  %885 = vmatpush1.bf16.msra.mxu1 %v1703_v6  ;;  %v1739_v33 = vld [vmem:[%s2372_s1 + $0xd0] ss:$8 sps:$4 sm:$0xff]  }
  0x28   :  { %931 = vmatprep.subr.bf16.mxu0 %v1595_v34  ;;  %886 = vmatprep.subr.bf16.mxu1 %v1707_v7  ;;  %v1743_v34 = vld [vmem:[%s2372_s1 + $0xe4] ss:$8 sps:$4 sm:$0xff]  }
  0x2b   :  { %932 = vmatpush1.bf16.msra.mxu0 %v1597_v35  ;;  %887 = vmatpush1.bf16.msra.mxu1 %v1709_v10  ;;  %v1643_v35 = vld [vmem:[%s2372_s1 + $0x294] ss:$8 sps:$4 sm:$0xff]  }
  0x2c   :  { %933 = vmatprep.subr.bf16.mxu0 %v1598_v36  ;;  %888 = vmatprep.subr.bf16.mxu1 %v1713_v11  ;;  %v1745_v36 = vld [vmem:[%s2372_s1 + $0xe0] ss:$8 sps:$4 sm:$0xff]  }
  0x2f   :  { %934 = vmatpush1.bf16.msra.mxu0 %v1600_v39  ;;  %889 = vmatpush1.bf16.msra.mxu1 %v1715_v15  ;;  %v1646_v39 = vld [vmem:[%s2372_s1 + $0x2a4] ss:$8 sps:$4 sm:$0xff]  }
  0x30   :  { %935 = vmatprep.subr.bf16.mxu0 %v1601_v40  ;;  %890 = vmatprep.subr.bf16.mxu1 %v1719_v16  ;;  %v1751_v40 = vld [vmem:[%s2372_s1 + $0xf0] ss:$8 sps:$4 sm:$0xff]  }
  0x33   :  { %936 = vmatpush1.bf16.msra.mxu0 %v1603_v43  ;;  %891 = vmatpush1.bf16.msra.mxu1 %v1721_v19  ;;  %v1649_v43 = vld [vmem:[%s2372_s1 + $0x2b4] ss:$8 sps:$4 sm:$0xff]  }
  0x34   :  { %937 = vmatprep.subr.bf16.mxu0 %v1604_v45  ;;  %892 = vmatprep.subr.bf16.mxu1 %v1725_v20 }
  0x37   :  { %938 = vmatpush1.bf16.msra.mxu0 %v1606_v48  ;;  %893 = vmatpush1.bf16.msra.mxu1 %v1727_v23 }
  0x38   :  { %939 = vmatprep.subr.bf16.mxu0 %v1607_v49  ;;  %894 = vmatprep.subr.bf16.mxu1 %v1731_v24 }
  0x3b   :  { %940 = vmatpush1.bf16.msra.mxu0 %v1609_v52  ;;  %895 = vmatpush1.bf16.msra.mxu1 %v1733_v28 }
  0x3c   :  { %941 = vmatprep.subr.bf16.mxu0 %v1610_v53  ;;  %896 = vmatprep.subr.bf16.mxu1 %v1737_v29 }
  0x3f   :  { %942 = vmatpush1.bf16.msra.mxu0 %v1612_v57  ;;  %897 = vmatpush1.bf16.msra.mxu1 %v1739_v33 }
  0x40   :  { %952 = vmatprep.subr.bf16.mxu0 %v1616_v59  ;;  %898 = vmatprep.subr.bf16.mxu1 %v1743_v34 }
  0x42   :  { %944 = vmatmul.mubr.bf16.vlgmr.msra.gmra.mrb[0].mxu0 %v218_v61 }
  0x43   :  { %953 = vmatpush1.bf16.msra.mxu0 %v1614_v63  ;;  %984 = vmatprep.mubr.bf16.mxu0 %v2021_v0 }
  0x44   :  { %954 = vmatprep.subr.bf16.mxu0 %v1619_v1  ;;  %899 = vmatpush1.bf16.msra.mxu1 %v1745_v36 }
  0x45   :  { %900 = vmatprep.subr.bf16.mxu1 %v1749_v37 }
  0x47   :  { %955 = vmatpush1.bf16.msra.mxu0 %v1617_v4 }
  0x48   :  { %956 = vmatprep.subr.bf16.mxu0 %v1622_v5  ;;  %901 = vmatpush1.bf16.msra.mxu1 %v1751_v40 }
  0x4b   :  { %957 = vmatpush1.bf16.msra.mxu0 %v1620_v8 }
  0x4c   :  { %958 = vmatprep.subr.bf16.mxu0 %v1625_v9 }
  0x4f   :  { %959 = vmatpush1.bf16.msra.mxu0 %v1623_v13 }
  0x50   :  { %960 = vmatprep.subr.bf16.mxu0 %v1628_v14 }
  0x53   :  { %961 = vmatpush1.bf16.msra.mxu0 %v1626_v17 }
  0x54   :  { %962 = vmatprep.subr.bf16.mxu0 %v1631_v18 }
  0x57   :  { %963 = vmatpush1.bf16.msra.mxu0 %v1629_v21 }
  0x58   :  { %964 = vmatprep.subr.bf16.mxu0 %v1634_v22 }
  0x5b   :  { %965 = vmatpush1.bf16.msra.mxu0 %v1632_v25 }
  0x5c   :  { %966 = vmatprep.subr.bf16.mxu0 %v1637_v26 }
  0x5f   :  { %967 = vmatpush1.bf16.msra.mxu0 %v1635_v30 }
  0x60   :  { %968 = vmatprep.subr.bf16.mxu0 %v1640_v31 }
  0x63   :  { %969 = vmatpush1.bf16.msra.mxu0 %v1638_v32 }
  0x64   :  { %970 = vmatprep.subr.bf16.mxu0 %v1643_v35 }
  0x67   :  { %971 = vmatpush1.bf16.msra.mxu0 %v1641_v38 }
  0x68   :  { %972 = vmatprep.subr.bf16.mxu0 %v1646_v39 }
  0x69   :  { %13 = vsyncpa [#allocation3], 0  ;;  %1498 = vmatprep.subr.bf16.mxu1 %v1758_v41  ;;  %v1760_v45 = vld [vmem:[%s2374_s3 + $0x48] sm:$0xff]   ;;  %v1647_v46 = vld [vmem:[%s2372_s1 + $0x2b0] ss:$8 sps:$4 sm:$0xff]   ;;  %903 = vmatmul.mubr.bf16.vlgmr.msra.gmra.mrb[0].mxu1 %v1996_v55  ;;  %v221_v1 = vcombine.high %v2021_v0, %v2021_v0  ;;  %v219_v33 = vcombine.high %v1915_v27, %v1915_v27  ;;  %v1807_v39 = vmov 0.0  }
  0x6a   :  { %v1652_v47 = vld [vmem:[%s2372_s1 + $0x2c4] ss:$8 sps:$4 sm:$0xff]   ;;  %1499 = vmatpush3.bf16.msra.mxu1 %v1759_v44  ;;  %v1762_v49 = vld [vmem:[%s2374_s3 + $0x50] sm:$0xff]   ;;  %v1650_v50 = vld [vmem:[%s2372_s1 + $0x2c0] ss:$8 sps:$4 sm:$0xff]   ;;  %v164_v44 = vsub.s32 0, %v1882_v12 }
  0x6b   :  { %973 = vmatpush1.bf16.msra.mxu0 %v1644_v42  ;;  %v1761_v48 = vld [vmem:[%s2374_s3 + $0x8] sm:$0xff]   ;;  %1500 = vmatprep.subr.bf16.mxu1 %v1760_v45  ;;  %v1655_v51 = vld [vmem:[%s2372_s1 + $0x2d4] ss:$8 sps:$4 sm:$0xff]   ;;  %v1653_v54 = vld [vmem:[%s2372_s1 + $0x2d0] ss:$8 sps:$4 sm:$0xff]   ;;  %vm1808_vm0 = vmmov 0  }
  0x6c   :  { %974 = vmatprep.subr.bf16.mxu0 %v1649_v43  ;;  %v1763_v52 = vld [vmem:[%s2374_s3 + $0x10] sm:$0xff]   ;;  %v1764_v53 = vld [vmem:[%s2374_s3 + $0x58] sm:$0xff]   ;;  %v1658_v55 = vld [vmem:[%s2372_s1 + $0x2e4] ss:$8 sps:$4 sm:$0xff]   ;;  %s1809_s15 = smov [#allocation2]   ;;  %vm1328_vm1 = vcmask 156672  }
  0x6d   :  { %v1765_v56 = vld [vmem:[%s2374_s3 + $0x18] sm:$0xff]   ;;  %v1766_v57 = vld [vmem:[%s2374_s3 + $0x60] sm:$0xff]   ;;  %v1768_v34 = vld [vmem:[%s2374_s3 + $0x68] sm:$0xff]   ;;  %s1336_s16 = sshll.u32 %s1809_s15, 4  ;;  %s1337_s16 = int_to_ptr.vmem [resolvable:$true] %s1336_s16 }
  0x6e   :  { %1501 = vmatpush3.bf16.msra.mxu1 %v1761_v48  ;;  %v1656_v58 = vld [vmem:[%s2372_s1 + $0x2e0] ss:$8 sps:$4 sm:$0xff]   ;;  %v1664_v59 = vld [vmem:[%s2372_s1 + $0x2f4] ss:$8 sps:$4 sm:$0xff]   ;;  %v1662_v61 = vld [vmem:[%s2372_s1 + $0x2f0] ss:$8 sps:$4 sm:$0xff]   ;;  %p1787_p1 = scmp.lt.s32.totalorder %s1337_s16, %s1337_s16 }
  0x6f   :  { %975 = vmatpush1.bf16.msra.mxu0 %v1647_v46  ;;  %1502 = vmatprep.subr.bf16.mxu1 %v1762_v49  ;;  %v1767_v60 = vld [vmem:[%s2374_s3 + $0x20] sm:$0xff]   ;;  %v1676_v2 = vld [vmem:[%s2372_s1 + $0x314] ss:$8 sps:$4 sm:$0xff]   ;;  %v1674_v3 = vld [vmem:[%s2372_s1 + $0x310] ss:$8 sps:$4 sm:$0xff]   ;;  %v168_v46 = vsub.s32 1, %v1882_v12 }
  0x70   :  { %976 = vmatprep.subr.bf16.mxu0 %v1652_v47  ;;  %v1670_v62 = vld [vmem:[%s2372_s1 + $0x304] ss:$8 sps:$4 sm:$0xff]   ;;  %v1668_v63 = vld [vmem:[%s2372_s1 + $0x300] ss:$8 sps:$4 sm:$0xff]   ;;  %v1688_v5 = vld [vmem:[%s2372_s1 + $0x334] ss:$8 sps:$4 sm:$0xff]  }
  0x71   :  { %v1682_v4 = vld [vmem:[%s2372_s1 + $0x324] ss:$8 sps:$4 sm:$0xff]   ;;  %v1680_v0 = vld [vmem:[%s2372_s1 + $0x320] ss:$8 sps:$4 sm:$0xff]   ;;  %v1686_v6 = vld [vmem:[%s2372_s1 + $0x330] ss:$8 sps:$4 sm:$0xff]  }
  0x72   :  { %1503 = vmatpush3.bf16.msra.mxu1 %v1763_v52  ;;  %v1694_v7 = vld [vmem:[%s2372_s1 + $0x344] ss:$8 sps:$4 sm:$0xff]   ;;  %v1692_v8 = vld [vmem:[%s2372_s1 + $0x340] ss:$8 sps:$4 sm:$0xff]   ;;  %v1700_v9 = vld [vmem:[%s2372_s1 + $0x354] ss:$8 sps:$4 sm:$0xff]  }
  0x73   :  { %977 = vmatpush1.bf16.msra.mxu0 %v1650_v50  ;;  %1504 = vmatprep.subr.bf16.mxu1 %v1764_v53  ;;  %v1698_v10 = vld [vmem:[%s2372_s1 + $0x350] ss:$8 sps:$4 sm:$0xff]   ;;  %v1706_v11 = vld [vmem:[%s2372_s1 + $0x364] ss:$8 sps:$4 sm:$0xff]   ;;  %v1704_v13 = vld [vmem:[%s2372_s1 + $0x360] ss:$8 sps:$4 sm:$0xff]  }
  0x74   :  { %978 = vmatprep.subr.bf16.mxu0 %v1655_v51  ;;  %v1712_v14 = vld [vmem:[%s2372_s1 + $0x374] ss:$8 sps:$4 sm:$0xff]   ;;  %v1710_v15 = vld [vmem:[%s2372_s1 + $0x370] ss:$8 sps:$4 sm:$0xff]   ;;  %v1718_v16 = vld [vmem:[%s2372_s1 + $0x384] ss:$8 sps:$4 sm:$0xff]  }
  0x75   :  { %v1716_v17 = vld [vmem:[%s2372_s1 + $0x380] ss:$8 sps:$4 sm:$0xff]   ;;  %v1724_v18 = vld [vmem:[%s2372_s1 + $0x394] ss:$8 sps:$4 sm:$0xff]   ;;  %v1722_v19 = vld [vmem:[%s2372_s1 + $0x390] ss:$8 sps:$4 sm:$0xff]  }
  0x76   :  { %1505 = vmatpush3.bf16.msra.mxu1 %v1765_v56  ;;  %v1730_v20 = vld [vmem:[%s2372_s1 + $0x3a4] ss:$8 sps:$4 sm:$0xff]   ;;  %v1728_v21 = vld [vmem:[%s2372_s1 + $0x3a0] ss:$8 sps:$4 sm:$0xff]   ;;  %v1736_v22 = vld [vmem:[%s2372_s1 + $0x3b4] ss:$8 sps:$4 sm:$0xff]  }
  0x77   :  { %979 = vmatpush1.bf16.msra.mxu0 %v1653_v54  ;;  %1506 = vmatprep.subr.bf16.mxu1 %v1766_v57  ;;  %v1734_v23 = vld [vmem:[%s2372_s1 + $0x3b0] ss:$8 sps:$4 sm:$0xff]   ;;  %v1742_v24 = vld [vmem:[%s2372_s1 + $0x3c4] ss:$8 sps:$4 sm:$0xff]   ;;  %v1740_v25 = vld [vmem:[%s2372_s1 + $0x3c0] ss:$8 sps:$4 sm:$0xff]  }
  0x78   :  { %980 = vmatprep.subr.bf16.mxu0 %v1658_v55  ;;  %v1748_v26 = vld [vmem:[%s2372_s1 + $0x3d4] ss:$8 sps:$4 sm:$0xff]   ;;  %v1746_v28 = vld [vmem:[%s2372_s1 + $0x3d0] ss:$8 sps:$4 sm:$0xff]   ;;  %v1754_v29 = vld [vmem:[%s2372_s1 + $0x3e4] ss:$8 sps:$4 sm:$0xff]  }
  0x79   :  { %v1752_v30 = vld [vmem:[%s2372_s1 + $0x3e0] ss:$8 sps:$4 sm:$0xff]   ;;  %v1757_v31 = vld [vmem:[%s2372_s1 + $0x3f4] ss:$8 sps:$4 sm:$0xff]   ;;  %v1755_v32 = vld [vmem:[%s2372_s1 + $0x3f0] ss:$8 sps:$4 sm:$0xff]  }
  0x7a   :  { %1507 = vmatpush3.bf16.msra.mxu1 %v1767_v60  ;;  %v1769_v35 = vld [vmem:[%s2374_s3 + $0x28] sm:$0xff]   ;;  %v1770_v36 = vld [vmem:[%s2374_s3 + $0x70] sm:$0xff]   ;;  %v1772_v37 = vld [vmem:[%s2374_s3 + $0x78] sm:$0xff]  }
  0x7b   :  { %981 = vmatpush1.bf16.msra.mxu0 %v1656_v58  ;;  %1508 = vmatprep.subr.bf16.mxu1 %v1768_v34  ;;  %v1773_v38 = vld [vmem:[%s2374_s3 + $0x38] sm:$0xff]   ;;  %v160_v45 = vld [vmem:[%s2373_s2] sm:$0x3]  ;;  %v1775_v12 = vld [vmem:[%s2376_s5 + $0x8] sm:$0xff]  }
  0x7c   :  { %982 = vmatprep.subr.bf16.mxu0 %v1664_v59  ;;  %v165_v47 = vrot.slane %v160_v45, %v164_v44  ;;  %v169_v48 = vrot.slane %v160_v45, %v168_v46  ;;  %v1774_v60 = vld [vmem:[%s2376_s5] sm:$0xff]  }
  0x7e   :  { %1509 = vmatpush3.bf16.msra.mxu1 %v1769_v35 }
  0x7f   :  { %983 = vmatpush1.bf16.msra.mxu0 %v1662_v61  ;;  %1510 = vmatprep.subr.bf16.mxu1 %v1770_v36 }
  0x80   :  { %993 = vmatprep.subr.bf16.mxu0 %v1670_v62  ;;  %v1776_v62 = vld [vmem:[%s2376_s5 + $0x10] sm:$0xff]  }
  0x82   :  { %985 = vmatmul.mubr.bf16.vlgmr.msra.gmra.mrb[0].mxu0 %v1915_v27  ;;  %v1771_v27 = vld [vmem:[%s2374_s3 + $0x30] sm:$0xff]  }
  0x83   :  { %994 = vmatpush1.bf16.msra.mxu0 %v1668_v63  ;;  %1025 = vmatprep.mubr.bf16.mxu0 %v221_v1  ;;  %v1777_v63 = vld [vmem:[%s2376_s5 + $0x18] sm:$0xff]   ;;  %v1778_v1 = vld [vmem:[%s2376_s5 + $0x20] sm:$0xff]  }
  0x84   :  { %995 = vmatprep.subr.bf16.mxu0 %v1676_v2  ;;  %1511 = vmatpush3.bf16.msra.mxu1 %v1771_v27  ;;  %v1779_v2 = vld [vmem:[%s2376_s5 + $0x28] sm:$0xff]  }
  0x85   :  { %1512 = vmatprep.subr.bf16.mxu1 %v1772_v37 }
  0x87   :  { %996 = vmatpush1.bf16.msra.mxu0 %v1674_v3  ;;  %v1780_v3 = vld [vmem:[%s2376_s5 + $0x30] sm:$0xff]  }
  0x88   :  { %997 = vmatprep.subr.bf16.mxu0 %v1682_v4  ;;  %1513 = vmatpush3.bf16.msra.mxu1 %v1773_v38  ;;  %v1781_v4 = vld [vmem:[%s2376_s5 + $0x38] sm:$0xff]  }
  0x89   :  { %1529 = vmatprep.subr.bf16.mxu1 %v1807_v39 }
  0x8b   :  { %998 = vmatpush1.bf16.msra.mxu0 %v1680_v0 }
  0x8c   :  { %999 = vmatprep.subr.bf16.mxu0 %v1688_v5  ;;  %v1472_v5 = vld [vmem:[%s2375_s4] ss:$0 sm:$0xff]  ;;  %s1782_s4 = scalar_lea.vmem %s1337_s16, 32 }
  0x8d   :  { %p1783_p0 = scmp.ne.s32.totalorder %s1337_s16, %s1782_s4  ;;  %p1788_p2 = scmp.lt.s32.totalorder %s1782_s4, %s1782_s4 }
  0x8f   :  { %1000 = vmatpush1.bf16.msra.mxu0 %v1686_v6  ;;  %p1789_p3 = por %p1788_p2, %p1787_p1 }
  0x90   :  { %1001 = vmatprep.subr.bf16.mxu0 %v1694_v7 }
  0x91   :  { %p1790_p4 = pnand %p1789_p3, %p1783_p0 }
  0x93   :  { %1002 = vmatpush1.bf16.msra.mxu0 %v1692_v8 }
  0x94   :  { %1003 = vmatprep.subr.bf16.mxu0 %v1700_v9 }
  0x97   :  { %1004 = vmatpush1.bf16.msra.mxu0 %v1698_v10 }
  0x98   :  { %1005 = vmatprep.subr.bf16.mxu0 %v1706_v11  ;;  %v1214_v11 = vld [vmem:[%s2378_s7] sm:$0x3] }
  0x9b   :  { %1006 = vmatpush1.bf16.msra.mxu0 %v1704_v13 }
  0x9c   :  { %1007 = vmatprep.subr.bf16.mxu0 %v1712_v14 }
  0x9f   :  { %1008 = vmatpush1.bf16.msra.mxu0 %v1710_v15 }
  0xa0   :  { %1009 = vmatprep.subr.bf16.mxu0 %v1718_v16  ;;  %v1489_v16 = vld [vmem:[%s2377_s6] ss:$0 sm:$0xff] }
  0xa3   :  { %1010 = vmatpush1.bf16.msra.mxu0 %v1716_v17 }
  0xa4   :  { %1011 = vmatprep.subr.bf16.mxu0 %v1724_v18 }
  0xa7   :  { %1012 = vmatpush1.bf16.msra.mxu0 %v1722_v19 }
  0xa8   :  { %1013 = vmatprep.subr.bf16.mxu0 %v1730_v20 }
  0xab   :  { %1014 = vmatpush1.bf16.msra.mxu0 %v1728_v21 }
  0xac   :  { %1015 = vmatprep.subr.bf16.mxu0 %v1736_v22 }
  0xaf   :  { %1016 = vmatpush1.bf16.msra.mxu0 %v1734_v23 }
  0xb0   :  { %1017 = vmatprep.subr.bf16.mxu0 %v1742_v24 }
  0xb3   :  { %1018 = vmatpush1.bf16.msra.mxu0 %v1740_v25 }
  0xb4   :  { %1019 = vmatprep.subr.bf16.mxu0 %v1748_v26 }
  0xb7   :  { %1020 = vmatpush1.bf16.msra.mxu0 %v1746_v28 }
  0xb8   :  { %1021 = vmatprep.subr.bf16.mxu0 %v1754_v29 }
  0xbb   :  { %1022 = vmatpush1.bf16.msra.mxu0 %v1752_v30 }
  0xbc   :  { %1023 = vmatprep.subr.bf16.mxu0 %v1757_v31 }
  0xbf   :  { %1024 = vmatpush1.bf16.msra.mxu0 %v1755_v32 }
  0xc2   :  { %1026 = vmatmul.mubr.bf16.vlgmr.msra.gmra.mrb[0].mxu0 %v219_v33 }
 0x13c   :  { %v904_v40 = vpop.f32.mrb[0].mxu1 }
 0x13d   :  { %v906_v41 = vpop.f32.mrb[1].mxu1  ;;  %v905_v49 = vadd.f32 %v904_v40, %v165_v47 }
 0x13e   :  { %v908_v42 = vpop.f32.mrb[2].mxu1  ;;  %v907_v50 = vadd.f32 %v906_v41, %v169_v48 }
 0x13f   :  { %v909_v43 = vpop.f32.mrb[3].mxu1 }
 0x195   :  { %v1027_v51 = vpop.f32.mrb[0].mxu0 }
 0x196   :  { %v1550_v52 = vadd.f32 %v1027_v51, %v905_v49  ;;  %v1029_v53 = vpop.f32.mrb[1].mxu0 }
 0x197   :  { %v1552_v54 = vadd.f32 %v1029_v53, %v907_v50  ;;  %v1031_v55 = vpop.f32.mrb[2].mxu0 }
 0x198   :  { %v1034_v56 = vmax.f32 %v1550_v52, 0.0  ;;  %v1032_v57 = vpop.f32.mrb[3].mxu0 }
 0x199   :  { %v1035_v58 = vmax.f32 %v1552_v54, 0.0 }
 0x19a   :  { %v1036_v61 = vpack.c.bf16 %v1034_v56, %v1034_v56 }
 0x19b   :  { %v1037_v59 = vpack.c.bf16 %v1035_v58, %v1035_v58 }
 0x19d   :  { %1205 = vmatprep.mubr.bf16.mxu1 %v1037_v59 }
 0x19e   :  { %1206 = vmatmul.mubr.bf16.vlgmr.msra.gmra.mrb[4].mxu1 %v1036_v61 }
 0x19f   :  { %1530 = vmatpush3.bf16.msra.mxu1 %v1774_v60  ;;  %1545 = vmatprep.mubr.msk.bf16.mxu1 %vm1808_vm0, %v1807_v39 }
 0x1a0   :  { %1531 = vmatprep.subr.bf16.mxu1 %v1807_v39 }
 0x1a3   :  { %1532 = vmatpush3.bf16.msra.mxu1 %v1775_v12 }
 0x1a4   :  { %1533 = vmatprep.subr.bf16.mxu1 %v1807_v39 }
 0x1a7   :  { %1534 = vmatpush3.bf16.msra.mxu1 %v1776_v62 }
 0x1a8   :  { %1535 = vmatprep.subr.bf16.mxu1 %v1807_v39 }
 0x1ab   :  { %1536 = vmatpush3.bf16.msra.mxu1 %v1777_v63 }
 0x1ac   :  { %1537 = vmatprep.subr.bf16.mxu1 %v1807_v39 }
 0x1af   :  { %1538 = vmatpush3.bf16.msra.mxu1 %v1778_v1 }
 0x1b0   :  { %1539 = vmatprep.subr.bf16.mxu1 %v1807_v39 }
 0x1b3   :  { %1540 = vmatpush3.bf16.msra.mxu1 %v1779_v2 }
 0x1b4   :  { %1541 = vmatprep.subr.bf16.mxu1 %v1807_v39 }
 0x1b7   :  { %1542 = vmatpush3.bf16.msra.mxu1 %v1780_v3 }
 0x1b8   :  { %1543 = vmatprep.subr.bf16.mxu1 %v1807_v39 }
 0x1bb   :  { %1544 = vmatpush3.bf16.msra.mxu1 %v1781_v4 }
 0x271   :  { %v1514_v0 = vpop.f32.mrb[4].mxu1 }
 0x272   :  { %v1515_v6 = vpop.f32.mrb[5].mxu1 }
 0x273   :  { %v1516_v7 = vadd.f32 %v1515_v6, %v1514_v0  ;;  %v1517_v8 = vpop.f32.mrb[6].mxu1 }
 0x274   :  { %v1518_v9 = vpop.f32.mrb[7].mxu1 }
 0x275   :  { %v1208_v10 = vadd.f32 %v1516_v7, %v1472_v5 }
 0x277   :  { %v1213_v13 = vmax.f32 %v1208_v10, 0.0 }
 0x279   :  { %v1215_v14 = vmul.f32 %v1214_v11, %v1213_v13 }
 0x27b   :  { %v1216_v15 = vpack.c.bf16 %v1215_v14, %v1215_v14 }
 0x27d   :  { %1546 = vmatmul.mubr.bf16.vlgmr.msra.gmra.mrb[8].mxu1 %v1216_v15 }
 0x350   :  { %v1322_v17 = vpop.f32.mrb[8].mxu1 }
 0x351   :  { %v1323_v18 = vadd.f32 %v1489_v16, %v1322_v17  ;;  %v1547_v19 = vpop.f32.mrb[9].mxu1 }
 0x352   :  { %v1325_v20 = vpop.f32.mrb[10].mxu1 }
 0x353   :  { %v1548_v21 = vpop.f32.mrb[11].mxu1  ;;  %1329 = vst.msk [vmem:[#allocation2] sm:$0x3] %vm1328_vm1, %v1323_v18 }
 0x354   :  { %1793 = shalt.err (!%p1790_p4)
}
 0x355   :  { %s1794_s6 = scalar_lea.hbm %s2379_s8, 32 }
 0x356   :  { %p1795_p5 = scmp.ne.s32.totalorder %s2379_s8, %s1794_s6  ;;  %p1798_p6 = scmp.lt.u32.totalorder %s1794_s6, %s2379_s8 }
 0x358   :  { %p1800_p7 = pnand %p1798_p6, %p1795_p5 }
 0x35a   :  { %1803 = shalt.err (!%p1800_p7)
}
 0x35b   :  { %1339 = dma.vmem_to_hbm [thread:$0]  %s1337_s16, 32, %s2379_s8, [#allocation3]  }
 0x35c   :  { %1804 = dma.done.wait [#allocation3], 32  }
 0x35d   :  { %1805 = vsyncadd [#allocation3], 4294967264 }
 0x35e   :  { %1343 = vsyncpa [#allocation3], 1 }

</bundles_post_ra>
